<compile_context>
chip_gen: v5e
topology: v5e:2x2
jax: 0.10.0
libtpu: 0.0.40
codegen_flags: <defaults>
</compile_context>

<pallas_src>
import functools

import jax
import jax.numpy as jnp
from jax import lax
from jax.experimental import pallas as pl
from jax.experimental.pallas import tpu as pltpu

EPS = 1e-6   # LayerNorm eps (matches LayerNorm(channels), eps=1e-6)
PADL = 8     # left zero-pad of the scratch W axis -> sublane-aligned body store


def _layernorm(v, g, b):
    """Channel-wise LayerNorm (ConvNeXt-style) in f32. v: (N, C), g/b: (1, C)."""
    m = jnp.mean(v, axis=-1, keepdims=True)
    m2 = jnp.mean(v * v, axis=-1, keepdims=True)          # independent reduction
    var = jnp.maximum(m2 - m * m, 0.0)
    return (v - m) * lax.rsqrt(var + EPS) * g + b


def _gelu(v):
    """Exact GELU (nn.GELU default): 0.5 * x * (1 + erf(x / sqrt(2)))."""
    return 0.5 * v * (1.0 + lax.erf(v * 0.7071067811865476))


def _resbottleneck_kernel(x_ref, xtop_ref, xbot_ref,
                          w1_ref, w2_ref, w3_ref,
                          g1_ref, b1_ref, g2_ref, b2_ref, g3_ref, b3_ref,
                          o_ref, hpad_ref, *, TH, W):
    """One (batch, row-tile) per grid step.

    x_ref   : (TH, W, Cin)          body rows (input dtype, f32 residual source)
    xtop_ref: (W, Cin)              image row just above the tile (clamped fetch)
    xbot_ref: (W, Cin)              image row just below the tile (clamped fetch)
    w1_ref  : (Cin, Cb)             conv1 weight (in, out)           compute dtype
    w2_ref  : (9, Cb, Cb)           conv2 weight, k = ky*3+kx        compute dtype
    w3_ref  : (Cb, Cout)            conv3 weight (in, out)           compute dtype
    g*/b*   : (1, C)                LayerNorm affine params (f32)
    o_ref   : (TH, W, Cout)         output tile
    hpad_ref: (TH+2, W+16, Cb)      scratch; body at cols [8, 8+W), zero pad
                                    columns at 7 and 8+W, halo rows 0 / TH+1
    """
    Cin = x_ref.shape[-1]
    Cb = w1_ref.shape[-1]
    Cout = w3_ref.shape[-1]
    cdt = hpad_ref.dtype
    Wp = hpad_ref.shape[1]                                  # W + 16
    t = pl.program_id(1)
    nt = pl.num_programs(1)

    def conv1_ln_gelu(x2d):
        h = jnp.dot(x2d.astype(cdt), w1_ref[...],
                    preferred_element_type=jnp.float32)
        return _gelu(_layernorm(h, g1_ref[...], b1_ref[...]))

    # Zero-pad columns read by the dx=0 / dx=2 taps. Nothing else ever writes
    # them, but the scratch starts with undefined contents, so clear each step
    # (2 narrow columns only -- tiny vs. the old full-scratch clear).
    col0 = jnp.zeros((TH + 2, 1, Cb), cdt)
    hpad_ref[:, PADL - 1:PADL, :] = col0
    hpad_ref[:, PADL + W:PADL + W + 1, :] = col0

    # ---- conv1 (1x1) + norm1 + act1 on the body rows --------------------------
    x3d = x_ref[...]                                        # (TH, W, Cin)
    hb = conv1_ln_gelu(x3d.reshape(TH * W, Cin))            # (TH*W, Cb) f32
    # Sublane-aligned store (column offset 8).
    hpad_ref[1:TH + 1, PADL:PADL + W, :] = hb.reshape(TH, W, Cb).astype(cdt)

    # ---- halo rows: zero at image boundaries, conv1 of the neighbour row else --
    @pl.when(t == 0)
    def _():
        hpad_ref[0:1, :, :] = jnp.zeros((1, Wp, Cb), cdt)

    @pl.when(t > 0)
    def _():
        ht = conv1_ln_gelu(xtop_ref[...])                   # (W, Cb)
        hpad_ref[0:1, PADL:PADL + W, :] = ht[None].astype(cdt)

    @pl.when(t == nt - 1)
    def _():
        hpad_ref[TH + 1:TH + 2, :, :] = jnp.zeros((1, Wp, Cb), cdt)

    @pl.when(t < nt - 1)
    def _():
        hbot = conv1_ln_gelu(xbot_ref[...])                 # (W, Cb)
        hpad_ref[TH + 1:TH + 2, PADL:PADL + W, :] = hbot[None].astype(cdt)

    # ---- conv2 (3x3, pad=1): 9 accumulated MXU dots, f32 accumulator ----------
    acc2 = None
    for k in range(9):
        dy, dx = divmod(k, 3)
        tap = hpad_ref[dy:dy + TH, PADL - 1 + dx:PADL - 1 + dx + W, :]
        d = jnp.dot(tap.reshape(TH * W, Cb), w2_ref[k],
                    preferred_element_type=jnp.float32)
        acc2 = d if acc2 is None else acc2 + d
    h2 = _gelu(_layernorm(acc2, g2_ref[...], b2_ref[...]))  # (TH*W, Cb) f32

    # ---- conv3 (1x1) + norm3 + residual (residual in f32) ---------------------
    out = jnp.dot(h2.astype(cdt), w3_ref[...],
                  preferred_element_type=jnp.float32)       # (TH*W, Cout)
    out = _layernorm(out, g3_ref[...], b3_ref[...])
    res = x3d.astype(jnp.float32) + out.reshape(TH, W, Cout)
    o_ref[...] = res.astype(o_ref.dtype)


def _pick_tile_h(H, W, Cin, Cb, Cout, in_size, cdt_size, out_size, budget_bytes):
    """Largest divisor of H (capped at 128 rows) whose per-step footprint fits."""
    def footprint(th):
        xb = th * W * Cin * in_size * 2                      # body input, 2 bufs
        halo = 2 * W * Cin * in_size * 2                     # halo rows
        ob = th * W * Cout * out_size * 2                    # output, 2 bufs
        wts = (Cin * Cb + 9 * Cb * Cb + Cb * Cout) * cdt_size * 2
        lnp = (4 * Cb + 2 * Cout) * 4 * 2
        scr = (th + 2) * (W + 16) * Cb * cdt_size            # hpad scratch
        live = th * W * (3 * Cb + Cout) * 4                  # f32 intermediates
        return xb + halo + ob + wts + lnp + scr + live
    best = 1
    for th in range(1, min(H, 128) + 1):
        if H % th == 0 and footprint(th) <= budget_bytes:
            best = th
    return best


def res_bottleneck_block_nhwc(x_nhwc, params, *, tile_h=None,
                              compute_dtype=jnp.float32, out_dtype=None,
                              vmem_limit_bytes=48 * 1024 * 1024):
    """x_nhwc: (B, H, W, Cin) -> (B, H, W, Cout)."""
    w1t, w2_9, w3t, g1, b1, g2, b2, g3, b3 = params
    B, H, W, Cin = x_nhwc.shape
    Cb = w1t.shape[1]
    Cout = w3t.shape[1]
    assert Cin == Cout, "residual add requires in_channels == out_channels"

    cdt = jnp.dtype(compute_dtype)
    odt = jnp.dtype(out_dtype) if out_dtype is not None else x_nhwc.dtype
    w1c, w2c, w3c = (w.astype(cdt) for w in (w1t, w2_9, w3t))

    if tile_h is None:
        tile_h = _pick_tile_h(H, W, Cin, Cb, Cout,
                              x_nhwc.dtype.itemsize, cdt.itemsize, odt.itemsize,
                              budget_bytes=int(0.70 * vmem_limit_bytes))
    assert H % tile_h == 0, "tile_h must divide H"
    TH = tile_h
    NT = H // TH

    kernel = functools.partial(_resbottleneck_kernel, TH=TH, W=W)

    def full(shape):
        return pl.BlockSpec(shape, lambda b, t: tuple(0 for _ in shape))

    out = pl.pallas_call(
        kernel,
        out_shape=jax.ShapeDtypeStruct((B, H, W, Cout), odt),
        grid_spec=pltpu.PrefetchScalarGridSpec(
            num_scalar_prefetch=0,
            grid=(B, NT),
            in_specs=[
                # body rows of this tile
                pl.BlockSpec((None, TH, W, Cin), lambda b, t: (b, t, 0, 0)),
                # row just above the tile (clamped; ignored at t == 0)
                pl.BlockSpec((None, None, W, Cin),
                             lambda b, t: (b, jnp.maximum(t * TH - 1, 0), 0, 0)),
                # row just below the tile (clamped; ignored at t == NT-1)
                pl.BlockSpec((None, None, W, Cin),
                             lambda b, t: (b, jnp.minimum(t * TH + TH, H - 1), 0, 0)),
                # weights & LayerNorm params (constant block index)
                full(w1c.shape), full(w2c.shape), full(w3c.shape),
                full(g1.shape), full(b1.shape),
                full(g2.shape), full(b2.shape),
                full(g3.shape), full(b3.shape),
            ],
            out_specs=pl.BlockSpec((None, TH, W, Cout), lambda b, t: (b, t, 0, 0)),
            scratch_shapes=[pltpu.VMEM((TH + 2, W + 16, Cb), cdt)],
        ),
        compiler_params=pltpu.CompilerParams(
            dimension_semantics=("parallel", "parallel"),
            vmem_limit_bytes=vmem_limit_bytes),
    )(x_nhwc, x_nhwc, x_nhwc, w1c, w2c, w3c, g1, b1, g2, b2, g3, b3)
    return out


def res_bottleneck_block(x_nchw, params, **kwargs):
    """NCHW adapter matching the PyTorch module interface."""
    x = jnp.transpose(x_nchw, (0, 2, 3, 1))
    out = res_bottleneck_block_nhwc(x, params, **kwargs)
    return jnp.transpose(out, (0, 3, 1, 2))


def _reference_forward(x_nchw, params):
    """Pure-JAX f32 reference (explicit zero padding) for correctness checking."""
    w1t, w2_9, w3t, g1, b1, g2, b2, g3, b3 = params
    x = jnp.transpose(x_nchw, (0, 2, 3, 1)).astype(jnp.float32)
    B, H, W, Cin = x.shape
    Cb = w1t.shape[1]

    def ln(v, g, b):
        u = v.mean(-1, keepdims=True)
        d = v - u
        s = (d * d).mean(-1, keepdims=True)
        return (d / jnp.sqrt(s + EPS)) * g.reshape(1, 1, 1, -1) + b.reshape(1, 1, 1, -1)

    def gelu(v):
        return 0.5 * v * (1.0 + lax.erf(v * 0.7071067811865476))

    h = gelu(ln(jnp.einsum('bhwi,io->bhwo', x, w1t), g1, b1))
    hp = jnp.pad(h, ((0, 0), (1, 1), (1, 1), (0, 0)))
    w2_4d = w2_9.reshape(3, 3, Cb, Cb)
    acc = jnp.zeros((B, H, W, Cb), jnp.float32)
    for dy in range(3):
        for dx in range(3):
            acc = acc + jnp.einsum('bhwi,io->bhwo',
                                   hp[:, dy:dy + H, dx:dx + W, :], w2_4d[dy, dx])
    h2 = gelu(ln(acc, g2, b2))
    out = ln(jnp.einsum('bhwi,io->bhwo', h2, w3t), g3, b3)
    return jnp.transpose(x + out, (0, 3, 1, 2))


def make_params(key, in_channels, out_channels, bottleneck_channels):
    """Deterministic synthetic parameters (shapes per the module's __init__).

    Note: the real module initializes norm3.weight/bias to zero (identity
    residual at init). We use nonzero deterministic values so the full compute
    path is actually exercised by the test.
    """
    ks = jax.random.split(key, 9)
    Cb = bottleneck_channels
    # PyTorch conv weights are OIHW; pre-transpose to matmul-friendly layouts.
    w1_oihw = 0.10 * jax.random.normal(ks[0], (Cb, in_channels, 1, 1), jnp.float32)
    w2_oihw = 0.05 * jax.random.normal(ks[1], (Cb, Cb, 3, 3), jnp.float32)
    w3_oihw = 0.10 * jax.random.normal(ks[2], (out_channels, Cb, 1, 1), jnp.float32)

    w1t = jnp.transpose(w1_oihw[:, :, 0, 0], (1, 0))                 # (Cin, Cb)
    w2_9 = jnp.transpose(w2_oihw, (2, 3, 1, 0)).reshape(9, Cb, Cb)   # (ky*3+kx, ci, co)
    w3t = jnp.transpose(w3_oihw[:, :, 0, 0], (1, 0))                 # (Cb, Cout)

    g1 = 1.0 + 0.1 * jax.random.normal(ks[3], (1, Cb), jnp.float32)
    b1 = 0.1 * jax.random.normal(ks[4], (1, Cb), jnp.float32)
    g2 = 1.0 + 0.1 * jax.random.normal(ks[5], (1, Cb), jnp.float32)
    b2 = 0.1 * jax.random.normal(ks[6], (1, Cb), jnp.float32)
    g3 = 0.5 + 0.1 * jax.random.normal(ks[7], (1, out_channels), jnp.float32)
    b3 = 0.1 * jax.random.normal(ks[8], (1, out_channels), jnp.float32)
    return (w1t, w2_9, w3t, g1, b1, g2, b2, g3, b3)


if __name__ == "__main__":
    B, C, H, W = 2, 32, 16, 16      # in_channels == out_channels == 32
    Cb = 16                         # bottleneck_channels

    key = jax.random.PRNGKey(0)
    kx, kp = jax.random.split(key)
    x = jax.random.normal(kx, (B, C, H, W), jnp.float32)   # NCHW like PyTorch
    params = make_params(kp, C, C, Cb)

    ref = jax.block_until_ready(_reference_forward(x, params))

    # f32 path, auto-derived tile_h (whole image per tile at this size).
    out = jax.block_until_ready(res_bottleneck_block(x, params))
    assert out.shape == (B, C, H, W)
    err = float(jnp.max(jnp.abs(out - ref)))
    assert jnp.allclose(out, ref, atol=1e-3, rtol=1e-3), f"f32 max abs err {err}"

    # Forced spatial tiling (grid (2, 2)): exercises both interior halo paths
    # and both image-boundary zero rows.
    out_t = jax.block_until_ready(res_bottleneck_block(x, params, tile_h=8))
    err_t = float(jnp.max(jnp.abs(out_t - ref)))
    assert jnp.allclose(out_t, ref, atol=1e-3, rtol=1e-3), f"tiled max abs err {err_t}"

    # bf16 MXU-operand path: matmul inputs bf16, accumulation / LN / GELU /
    # residual stay f32 (residual uses the f32 input directly).
    out_bf = jax.block_until_ready(
        res_bottleneck_block(x, params, tile_h=8, compute_dtype=jnp.bfloat16))
    err_bf = float(jnp.max(jnp.abs(out_bf - ref)))
    assert jnp.allclose(out_bf, ref, atol=0.25, rtol=0.05), f"bf16 max abs err {err_bf}"

    print("KERNEL_OK")
</pallas_src>

<mosaic_0001>
module attributes {stable_mosaic.version = 11 : i64} {
  func.func @_resbottleneck_kernel(%arg0: i32, %arg1: i32, %arg2: memref<1x16x16x32xf32, #tpu.memory_space<vmem>>, %arg3: memref<1x1x16x32xf32, #tpu.memory_space<vmem>>, %arg4: memref<1x1x16x32xf32, #tpu.memory_space<vmem>>, %arg5: memref<32x16xf32, #tpu.memory_space<vmem>>, %arg6: memref<9x16x16xf32, #tpu.memory_space<vmem>>, %arg7: memref<16x32xf32, #tpu.memory_space<vmem>>, %arg8: memref<1x16xf32, #tpu.memory_space<vmem>>, %arg9: memref<1x16xf32, #tpu.memory_space<vmem>>, %arg10: memref<1x16xf32, #tpu.memory_space<vmem>>, %arg11: memref<1x16xf32, #tpu.memory_space<vmem>>, %arg12: memref<1x32xf32, #tpu.memory_space<vmem>>, %arg13: memref<1x32xf32, #tpu.memory_space<vmem>>, %arg14: memref<1x16x16x32xf32, #tpu.memory_space<vmem>>, %arg15: memref<18x32x16xf32, #tpu.memory_space<vmem>>) attributes {dimension_semantics = [#tpu.dimension_semantics<parallel>, #tpu.dimension_semantics<parallel>], iteration_bounds = array<i64: 2, 1>, scalar_prefetch = 0 : i64, scratch_operands = 1 : i64, tpu.core_type = #tpu.core_type<tc>, window_params = [{transform_indices = @transform_0, window_bounds = array<i64: 1, 16, 16, 32>}, {transform_indices = @transform_1, window_bounds = array<i64: 1, 1, 16, 32>}, {transform_indices = @transform_2, window_bounds = array<i64: 1, 1, 16, 32>}, {pipeline_mode = #tpu.pipeline_mode<synchronous>, transform_indices = @transform_3, window_bounds = array<i64: 32, 16>}, {pipeline_mode = #tpu.pipeline_mode<synchronous>, transform_indices = @transform_4, window_bounds = array<i64: 9, 16, 16>}, {pipeline_mode = #tpu.pipeline_mode<synchronous>, transform_indices = @transform_5, window_bounds = array<i64: 16, 32>}, {pipeline_mode = #tpu.pipeline_mode<synchronous>, transform_indices = @transform_6, window_bounds = array<i64: 1, 16>}, {pipeline_mode = #tpu.pipeline_mode<synchronous>, transform_indices = @transform_7, window_bounds = array<i64: 1, 16>}, {pipeline_mode = #tpu.pipeline_mode<synchronous>, transform_indices = @transform_8, window_bounds = array<i64: 1, 16>}, {pipeline_mode = #tpu.pipeline_mode<synchronous>, transform_indices = @transform_9, window_bounds = array<i64: 1, 16>}, {pipeline_mode = #tpu.pipeline_mode<synchronous>, transform_indices = @transform_10, window_bounds = array<i64: 1, 32>}, {pipeline_mode = #tpu.pipeline_mode<synchronous>, transform_indices = @transform_11, window_bounds = array<i64: 1, 32>}, {transform_indices = @transform_12, window_bounds = array<i64: 1, 16, 16, 32>}]} {
    %cst = arith.constant 0.000000e+00 : f32
    %0 = vector.broadcast %cst : f32 to vector<18x1x16xf32>
    %c0 = arith.constant 0 : index
    %c7 = arith.constant 7 : index
    %c0_0 = arith.constant 0 : index
    %1 = vector.load %arg15[%c0, %c7, %c0_0] : memref<18x32x16xf32, #tpu.memory_space<vmem>>, vector<18x1x16xf32>
    tpu.vector_store %arg15[%c0, %c7, %c0_0], %0 {strides = array<i32>} : memref<18x32x16xf32, #tpu.memory_space<vmem>>, vector<18x1x16xf32>,
    %c0_1 = arith.constant 0 : index
    %c24 = arith.constant 24 : index
    %c0_2 = arith.constant 0 : index
    %2 = vector.load %arg15[%c0_1, %c24, %c0_2] : memref<18x32x16xf32, #tpu.memory_space<vmem>>, vector<18x1x16xf32>
    tpu.vector_store %arg15[%c0_1, %c24, %c0_2], %0 {strides = array<i32>} : memref<18x32x16xf32, #tpu.memory_space<vmem>>, vector<18x1x16xf32>,
    %c0_3 = arith.constant 0 : index
    %c0_4 = arith.constant 0 : index
    %c0_5 = arith.constant 0 : index
    %c0_6 = arith.constant 0 : index
    %3 = vector.load %arg2[%c0_3, %c0_4, %c0_5, %c0_6] : memref<1x16x16x32xf32, #tpu.memory_space<vmem>>, vector<1x16x16x32xf32>
    %4 = vector.shape_cast %3 : vector<1x16x16x32xf32> to vector<16x16x32xf32>
    %5 = vector.shape_cast %4 : vector<16x16x32xf32> to vector<256x32xf32>
    %c0_7 = arith.constant 0 : index
    %c0_8 = arith.constant 0 : index
    %6 = vector.load %arg5[%c0_7, %c0_8] : memref<32x16xf32, #tpu.memory_space<vmem>>, vector<32x16xf32>
    %cst_9 = arith.constant dense<0.000000e+00> : vector<256x16xf32>
    %7 = tpu.matmul %5, %6, %cst_9 {dimension_numbers = #tpu.dot_dimension_numbers<[1], [0], [0], [1], [0, 0, 1, 1], [], []>} : vector<256x32xf32>, vector<32x16xf32>, vector<256x16xf32> -> vector<256x16xf32>
    %c0_10 = arith.constant 0 : index
    %c0_11 = arith.constant 0 : index
    %8 = vector.load %arg8[%c0_10, %c0_11] : memref<1x16xf32, #tpu.memory_space<vmem>>, vector<1x16xf32>
    %c0_12 = arith.constant 0 : index
    %c0_13 = arith.constant 0 : index
    %9 = vector.load %arg9[%c0_12, %c0_13] : memref<1x16xf32, #tpu.memory_space<vmem>>, vector<1x16xf32>
    %cst_14 = arith.constant dense<0.000000e+00> : vector<256xf32>
    %10 = vector.multi_reduction <add>, %7, %cst_14 [1] : vector<256x16xf32> to vector<256xf32>
    %11 = vector.shape_cast %10 : vector<256xf32> to vector<256x1xf32>
    %cst_15 = arith.constant 1.600000e+01 : f32
    %12 = vector.broadcast %cst_15 : f32 to vector<256x1xf32>
    %13 = arith.divf %11, %12 : vector<256x1xf32>
    %14 = arith.mulf %7, %7 : vector<256x16xf32>
    %cst_16 = arith.constant dense<0.000000e+00> : vector<256xf32>
    %15 = vector.multi_reduction <add>, %14, %cst_16 [1] : vector<256x16xf32> to vector<256xf32>
    %16 = vector.shape_cast %15 : vector<256xf32> to vector<256x1xf32>
    %cst_17 = arith.constant 1.600000e+01 : f32
    %17 = vector.broadcast %cst_17 : f32 to vector<256x1xf32>
    %18 = arith.divf %16, %17 : vector<256x1xf32>
    %19 = arith.mulf %13, %13 : vector<256x1xf32>
    %20 = arith.subf %18, %19 : vector<256x1xf32>
    %cst_18 = arith.constant 0.000000e+00 : f32
    %21 = vector.broadcast %cst_18 : f32 to vector<256x1xf32>
    %22 = arith.maximumf %20, %21 : vector<256x1xf32>
    %23 = vector.broadcast %13 : vector<256x1xf32> to vector<256x16xf32>
    %24 = arith.subf %7, %23 : vector<256x16xf32>
    %cst_19 = arith.constant 9.99999997E-7 : f32
    %25 = vector.broadcast %cst_19 : f32 to vector<256x1xf32>
    %26 = arith.addf %22, %25 : vector<256x1xf32>
    %27 = math.rsqrt %26 : vector<256x1xf32>
    %28 = vector.broadcast %27 : vector<256x1xf32> to vector<256x16xf32>
    %29 = arith.mulf %24, %28 : vector<256x16xf32>
    %30 = vector.broadcast %8 : vector<1x16xf32> to vector<256x16xf32>
    %31 = arith.mulf %29, %30 : vector<256x16xf32>
    %32 = vector.broadcast %9 : vector<1x16xf32> to vector<256x16xf32>
    %33 = arith.addf %31, %32 : vector<256x16xf32>
    %cst_20 = arith.constant 5.000000e-01 : f32
    %34 = vector.broadcast %cst_20 : f32 to vector<256x16xf32>
    %35 = arith.mulf %34, %33 : vector<256x16xf32>
    %cst_21 = arith.constant 0.707106769 : f32
    %36 = vector.broadcast %cst_21 : f32 to vector<256x16xf32>
    %37 = arith.mulf %33, %36 : vector<256x16xf32>
    %38 = math.erf %37 : vector<256x16xf32>
    %cst_22 = arith.constant 1.000000e+00 : f32
    %39 = vector.broadcast %cst_22 : f32 to vector<256x16xf32>
    %40 = arith.addf %39, %38 : vector<256x16xf32>
    %41 = arith.mulf %35, %40 : vector<256x16xf32>
    %42 = vector.shape_cast %41 : vector<256x16xf32> to vector<16x16x16xf32>
    %c1 = arith.constant 1 : index
    %c8 = arith.constant 8 : index
    %c0_23 = arith.constant 0 : index
    %43 = vector.load %arg15[%c1, %c8, %c0_23] : memref<18x32x16xf32, #tpu.memory_space<vmem>>, vector<16x16x16xf32>
    tpu.vector_store %arg15[%c1, %c8, %c0_23], %42 {strides = array<i32>} : memref<18x32x16xf32, #tpu.memory_space<vmem>>, vector<16x16x16xf32>,
    %c0_i32 = arith.constant 0 : i32
    %44 = arith.cmpi eq, %arg1, %c0_i32 : i32
    %45 = arith.extui %44 : i1 to i32
    %c0_i32_24 = arith.constant 0 : i32
    %46 = arith.cmpi ne, %45, %c0_i32_24 : i32
    scf.if %46 {
      %cst_118 = arith.constant 0.000000e+00 : f32
      %176 = vector.broadcast %cst_118 : f32 to vector<1x32x16xf32>
      %c0_119 = arith.constant 0 : index
      %c0_120 = arith.constant 0 : index
      %c0_121 = arith.constant 0 : index
      %177 = vector.load %arg15[%c0_119, %c0_120, %c0_121] : memref<18x32x16xf32, #tpu.memory_space<vmem>>, vector<1x32x16xf32>
      tpu.vector_store %arg15[%c0_119, %c0_120, %c0_121], %176 {strides = array<i32>} : memref<18x32x16xf32, #tpu.memory_space<vmem>>, vector<1x32x16xf32>,
    } else {
    }
    %c0_i32_25 = arith.constant 0 : i32
    %47 = arith.cmpi sgt, %arg1, %c0_i32_25 : i32
    %48 = arith.extui %47 : i1 to i32
    %c0_i32_26 = arith.constant 0 : i32
    %49 = arith.cmpi ne, %48, %c0_i32_26 : i32
    scf.if %49 {
      %c0_118 = arith.constant 0 : index
      %c0_119 = arith.constant 0 : index
      %c0_120 = arith.constant 0 : index
      %c0_121 = arith.constant 0 : index
      %176 = vector.load %arg3[%c0_118, %c0_119, %c0_120, %c0_121] : memref<1x1x16x32xf32, #tpu.memory_space<vmem>>, vector<1x1x16x32xf32>
      %177 = vector.shape_cast %176 : vector<1x1x16x32xf32> to vector<16x32xf32>
      %c0_122 = arith.constant 0 : index
      %c0_123 = arith.constant 0 : index
      %178 = vector.load %arg5[%c0_122, %c0_123] : memref<32x16xf32, #tpu.memory_space<vmem>>, vector<32x16xf32>
      %cst_124 = arith.constant dense<0.000000e+00> : vector<16x16xf32>
      %179 = tpu.matmul %177, %178, %cst_124 {dimension_numbers = #tpu.dot_dimension_numbers<[1], [0], [0], [1], [0, 0, 1, 1], [], []>} : vector<16x32xf32>, vector<32x16xf32>, vector<16x16xf32> -> vector<16x16xf32>
      %c0_125 = arith.constant 0 : index
      %c0_126 = arith.constant 0 : index
      %180 = vector.load %arg8[%c0_125, %c0_126] : memref<1x16xf32, #tpu.memory_space<vmem>>, vector<1x16xf32>
      %c0_127 = arith.constant 0 : index
      %c0_128 = arith.constant 0 : index
      %181 = vector.load %arg9[%c0_127, %c0_128] : memref<1x16xf32, #tpu.memory_space<vmem>>, vector<1x16xf32>
      %cst_129 = arith.constant dense<0.000000e+00> : vector<16xf32>
      %182 = vector.multi_reduction <add>, %179, %cst_129 [1] : vector<16x16xf32> to vector<16xf32>
      %183 = vector.shape_cast %182 : vector<16xf32> to vector<16x1xf32>
      %cst_130 = arith.constant 1.600000e+01 : f32
      %184 = vector.broadcast %cst_130 : f32 to vector<16x1xf32>
      %185 = arith.divf %183, %184 : vector<16x1xf32>
      %186 = arith.mulf %179, %179 : vector<16x16xf32>
      %cst_131 = arith.constant dense<0.000000e+00> : vector<16xf32>
      %187 = vector.multi_reduction <add>, %186, %cst_131 [1] : vector<16x16xf32> to vector<16xf32>
      %188 = vector.shape_cast %187 : vector<16xf32> to vector<16x1xf32>
      %cst_132 = arith.constant 1.600000e+01 : f32
      %189 = vector.broadcast %cst_132 : f32 to vector<16x1xf32>
      %190 = arith.divf %188, %189 : vector<16x1xf32>
      %191 = arith.mulf %185, %185 : vector<16x1xf32>
      %192 = arith.subf %190, %191 : vector<16x1xf32>
      %cst_133 = arith.constant 0.000000e+00 : f32
      %193 = vector.broadcast %cst_133 : f32 to vector<16x1xf32>
      %194 = arith.maximumf %192, %193 : vector<16x1xf32>
      %195 = vector.broadcast %185 : vector<16x1xf32> to vector<16x16xf32>
      %196 = arith.subf %179, %195 : vector<16x16xf32>
      %cst_134 = arith.constant 9.99999997E-7 : f32
      %197 = vector.broadcast %cst_134 : f32 to vector<16x1xf32>
      %198 = arith.addf %194, %197 : vector<16x1xf32>
      %199 = math.rsqrt %198 : vector<16x1xf32>
      %200 = vector.broadcast %199 : vector<16x1xf32> to vector<16x16xf32>
      %201 = arith.mulf %196, %200 : vector<16x16xf32>
      %202 = vector.broadcast %180 : vector<1x16xf32> to vector<16x16xf32>
      %203 = arith.mulf %201, %202 : vector<16x16xf32>
      %204 = vector.broadcast %181 : vector<1x16xf32> to vector<16x16xf32>
      %205 = arith.addf %203, %204 : vector<16x16xf32>
      %cst_135 = arith.constant 5.000000e-01 : f32
      %206 = vector.broadcast %cst_135 : f32 to vector<16x16xf32>
      %207 = arith.mulf %206, %205 : vector<16x16xf32>
      %cst_136 = arith.constant 0.707106769 : f32
      %208 = vector.broadcast %cst_136 : f32 to vector<16x16xf32>
      %209 = arith.mulf %205, %208 : vector<16x16xf32>
      %210 = math.erf %209 : vector<16x16xf32>
      %cst_137 = arith.constant 1.000000e+00 : f32
      %211 = vector.broadcast %cst_137 : f32 to vector<16x16xf32>
      %212 = arith.addf %211, %210 : vector<16x16xf32>
      %213 = arith.mulf %207, %212 : vector<16x16xf32>
      %214 = vector.shape_cast %213 : vector<16x16xf32> to vector<1x16x16xf32>
      %c0_138 = arith.constant 0 : index
      %c8_139 = arith.constant 8 : index
      %c0_140 = arith.constant 0 : index
      %215 = vector.load %arg15[%c0_138, %c8_139, %c0_140] : memref<18x32x16xf32, #tpu.memory_space<vmem>>, vector<1x16x16xf32>
      tpu.vector_store %arg15[%c0_138, %c8_139, %c0_140], %214 {strides = array<i32>} : memref<18x32x16xf32, #tpu.memory_space<vmem>>, vector<1x16x16xf32>,
    } else {
    }
    %c0_i32_27 = arith.constant 0 : i32
    %50 = arith.cmpi eq, %arg1, %c0_i32_27 : i32
    %51 = arith.extui %50 : i1 to i32
    %c0_i32_28 = arith.constant 0 : i32
    %52 = arith.cmpi ne, %51, %c0_i32_28 : i32
    scf.if %52 {
      %cst_118 = arith.constant 0.000000e+00 : f32
      %176 = vector.broadcast %cst_118 : f32 to vector<1x32x16xf32>
      %c17 = arith.constant 17 : index
      %c0_119 = arith.constant 0 : index
      %c0_120 = arith.constant 0 : index
      %177 = vector.load %arg15[%c17, %c0_119, %c0_120] : memref<18x32x16xf32, #tpu.memory_space<vmem>>, vector<1x32x16xf32>
      tpu.vector_store %arg15[%c17, %c0_119, %c0_120], %176 {strides = array<i32>} : memref<18x32x16xf32, #tpu.memory_space<vmem>>, vector<1x32x16xf32>,
    } else {
    }
    %c0_i32_29 = arith.constant 0 : i32
    %53 = arith.cmpi slt, %arg1, %c0_i32_29 : i32
    %54 = arith.extui %53 : i1 to i32
    %c0_i32_30 = arith.constant 0 : i32
    %55 = arith.cmpi ne, %54, %c0_i32_30 : i32
    scf.if %55 {
      %c0_118 = arith.constant 0 : index
      %c0_119 = arith.constant 0 : index
      %c0_120 = arith.constant 0 : index
      %c0_121 = arith.constant 0 : index
      %176 = vector.load %arg4[%c0_118, %c0_119, %c0_120, %c0_121] : memref<1x1x16x32xf32, #tpu.memory_space<vmem>>, vector<1x1x16x32xf32>
      %177 = vector.shape_cast %176 : vector<1x1x16x32xf32> to vector<16x32xf32>
      %c0_122 = arith.constant 0 : index
      %c0_123 = arith.constant 0 : index
      %178 = vector.load %arg5[%c0_122, %c0_123] : memref<32x16xf32, #tpu.memory_space<vmem>>, vector<32x16xf32>
      %cst_124 = arith.constant dense<0.000000e+00> : vector<16x16xf32>
      %179 = tpu.matmul %177, %178, %cst_124 {dimension_numbers = #tpu.dot_dimension_numbers<[1], [0], [0], [1], [0, 0, 1, 1], [], []>} : vector<16x32xf32>, vector<32x16xf32>, vector<16x16xf32> -> vector<16x16xf32>
      %c0_125 = arith.constant 0 : index
      %c0_126 = arith.constant 0 : index
      %180 = vector.load %arg8[%c0_125, %c0_126] : memref<1x16xf32, #tpu.memory_space<vmem>>, vector<1x16xf32>
      %c0_127 = arith.constant 0 : index
      %c0_128 = arith.constant 0 : index
      %181 = vector.load %arg9[%c0_127, %c0_128] : memref<1x16xf32, #tpu.memory_space<vmem>>, vector<1x16xf32>
      %cst_129 = arith.constant dense<0.000000e+00> : vector<16xf32>
      %182 = vector.multi_reduction <add>, %179, %cst_129 [1] : vector<16x16xf32> to vector<16xf32>
      %183 = vector.shape_cast %182 : vector<16xf32> to vector<16x1xf32>
      %cst_130 = arith.constant 1.600000e+01 : f32
      %184 = vector.broadcast %cst_130 : f32 to vector<16x1xf32>
      %185 = arith.divf %183, %184 : vector<16x1xf32>
      %186 = arith.mulf %179, %179 : vector<16x16xf32>
      %cst_131 = arith.constant dense<0.000000e+00> : vector<16xf32>
      %187 = vector.multi_reduction <add>, %186, %cst_131 [1] : vector<16x16xf32> to vector<16xf32>
      %188 = vector.shape_cast %187 : vector<16xf32> to vector<16x1xf32>
      %cst_132 = arith.constant 1.600000e+01 : f32
      %189 = vector.broadcast %cst_132 : f32 to vector<16x1xf32>
      %190 = arith.divf %188, %189 : vector<16x1xf32>
      %191 = arith.mulf %185, %185 : vector<16x1xf32>
      %192 = arith.subf %190, %191 : vector<16x1xf32>
      %cst_133 = arith.constant 0.000000e+00 : f32
      %193 = vector.broadcast %cst_133 : f32 to vector<16x1xf32>
      %194 = arith.maximumf %192, %193 : vector<16x1xf32>
      %195 = vector.broadcast %185 : vector<16x1xf32> to vector<16x16xf32>
      %196 = arith.subf %179, %195 : vector<16x16xf32>
      %cst_134 = arith.constant 9.99999997E-7 : f32
      %197 = vector.broadcast %cst_134 : f32 to vector<16x1xf32>
      %198 = arith.addf %194, %197 : vector<16x1xf32>
      %199 = math.rsqrt %198 : vector<16x1xf32>
      %200 = vector.broadcast %199 : vector<16x1xf32> to vector<16x16xf32>
      %201 = arith.mulf %196, %200 : vector<16x16xf32>
      %202 = vector.broadcast %180 : vector<1x16xf32> to vector<16x16xf32>
      %203 = arith.mulf %201, %202 : vector<16x16xf32>
      %204 = vector.broadcast %181 : vector<1x16xf32> to vector<16x16xf32>
      %205 = arith.addf %203, %204 : vector<16x16xf32>
      %cst_135 = arith.constant 5.000000e-01 : f32
      %206 = vector.broadcast %cst_135 : f32 to vector<16x16xf32>
      %207 = arith.mulf %206, %205 : vector<16x16xf32>
      %cst_136 = arith.constant 0.707106769 : f32
      %208 = vector.broadcast %cst_136 : f32 to vector<16x16xf32>
      %209 = arith.mulf %205, %208 : vector<16x16xf32>
      %210 = math.erf %209 : vector<16x16xf32>
      %cst_137 = arith.constant 1.000000e+00 : f32
      %211 = vector.broadcast %cst_137 : f32 to vector<16x16xf32>
      %212 = arith.addf %211, %210 : vector<16x16xf32>
      %213 = arith.mulf %207, %212 : vector<16x16xf32>
      %214 = vector.shape_cast %213 : vector<16x16xf32> to vector<1x16x16xf32>
      %c17 = arith.constant 17 : index
      %c8_138 = arith.constant 8 : index
      %c0_139 = arith.constant 0 : index
      %215 = vector.load %arg15[%c17, %c8_138, %c0_139] : memref<18x32x16xf32, #tpu.memory_space<vmem>>, vector<1x16x16xf32>
      tpu.vector_store %arg15[%c17, %c8_138, %c0_139], %214 {strides = array<i32>} : memref<18x32x16xf32, #tpu.memory_space<vmem>>, vector<1x16x16xf32>,
    } else {
    }
    %c0_31 = arith.constant 0 : index
    %c7_32 = arith.constant 7 : index
    %c0_33 = arith.constant 0 : index
    %56 = vector.load %arg15[%c0_31, %c7_32, %c0_33] : memref<18x32x16xf32, #tpu.memory_space<vmem>>, vector<16x16x16xf32>
    %57 = vector.shape_cast %56 : vector<16x16x16xf32> to vector<256x16xf32>
    %c0_34 = arith.constant 0 : index
    %c0_35 = arith.constant 0 : index
    %c0_36 = arith.constant 0 : index
    %58 = vector.load %arg6[%c0_34, %c0_35, %c0_36] : memref<9x16x16xf32, #tpu.memory_space<vmem>>, vector<1x16x16xf32>
    %59 = vector.shape_cast %58 : vector<1x16x16xf32> to vector<16x16xf32>
    %cst_37 = arith.constant dense<0.000000e+00> : vector<256x16xf32>
    %60 = tpu.matmul %57, %59, %cst_37 {dimension_numbers = #tpu.dot_dimension_numbers<[1], [0], [0], [1], [0, 0, 1, 1], [], []>} : vector<256x16xf32>, vector<16x16xf32>, vector<256x16xf32> -> vector<256x16xf32>
    %c0_38 = arith.constant 0 : index
    %c8_39 = arith.constant 8 : index
    %c0_40 = arith.constant 0 : index
    %61 = vector.load %arg15[%c0_38, %c8_39, %c0_40] : memref<18x32x16xf32, #tpu.memory_space<vmem>>, vector<16x16x16xf32>
    %62 = vector.shape_cast %61 : vector<16x16x16xf32> to vector<256x16xf32>
    %c1_41 = arith.constant 1 : index
    %c0_42 = arith.constant 0 : index
    %c0_43 = arith.constant 0 : index
    %63 = vector.load %arg6[%c1_41, %c0_42, %c0_43] : memref<9x16x16xf32, #tpu.memory_space<vmem>>, vector<1x16x16xf32>
    %64 = vector.shape_cast %63 : vector<1x16x16xf32> to vector<16x16xf32>
    %cst_44 = arith.constant dense<0.000000e+00> : vector<256x16xf32>
    %65 = tpu.matmul %62, %64, %cst_44 {dimension_numbers = #tpu.dot_dimension_numbers<[1], [0], [0], [1], [0, 0, 1, 1], [], []>} : vector<256x16xf32>, vector<16x16xf32>, vector<256x16xf32> -> vector<256x16xf32>
    %66 = arith.addf %60, %65 : vector<256x16xf32>
    %c0_45 = arith.constant 0 : index
    %c9 = arith.constant 9 : index
    %c0_46 = arith.constant 0 : index
    %67 = vector.load %arg15[%c0_45, %c9, %c0_46] : memref<18x32x16xf32, #tpu.memory_space<vmem>>, vector<16x16x16xf32>
    %68 = vector.shape_cast %67 : vector<16x16x16xf32> to vector<256x16xf32>
    %c2 = arith.constant 2 : index
    %c0_47 = arith.constant 0 : index
    %c0_48 = arith.constant 0 : index
    %69 = vector.load %arg6[%c2, %c0_47, %c0_48] : memref<9x16x16xf32, #tpu.memory_space<vmem>>, vector<1x16x16xf32>
    %70 = vector.shape_cast %69 : vector<1x16x16xf32> to vector<16x16xf32>
    %cst_49 = arith.constant dense<0.000000e+00> : vector<256x16xf32>
    %71 = tpu.matmul %68, %70, %cst_49 {dimension_numbers = #tpu.dot_dimension_numbers<[1], [0], [0], [1], [0, 0, 1, 1], [], []>} : vector<256x16xf32>, vector<16x16xf32>, vector<256x16xf32> -> vector<256x16xf32>
    %72 = arith.addf %66, %71 : vector<256x16xf32>
    %c1_50 = arith.constant 1 : index
    %c7_51 = arith.constant 7 : index
    %c0_52 = arith.constant 0 : index
    %73 = vector.load %arg15[%c1_50, %c7_51, %c0_52] : memref<18x32x16xf32, #tpu.memory_space<vmem>>, vector<16x16x16xf32>
    %74 = vector.shape_cast %73 : vector<16x16x16xf32> to vector<256x16xf32>
    %c3 = arith.constant 3 : index
    %c0_53 = arith.constant 0 : index
    %c0_54 = arith.constant 0 : index
    %75 = vector.load %arg6[%c3, %c0_53, %c0_54] : memref<9x16x16xf32, #tpu.memory_space<vmem>>, vector<1x16x16xf32>
    %76 = vector.shape_cast %75 : vector<1x16x16xf32> to vector<16x16xf32>
    %cst_55 = arith.constant dense<0.000000e+00> : vector<256x16xf32>
    %77 = tpu.matmul %74, %76, %cst_55 {dimension_numbers = #tpu.dot_dimension_numbers<[1], [0], [0], [1], [0, 0, 1, 1], [], []>} : vector<256x16xf32>, vector<16x16xf32>, vector<256x16xf32> -> vector<256x16xf32>
    %78 = arith.addf %72, %77 : vector<256x16xf32>
    %c1_56 = arith.constant 1 : index
    %c8_57 = arith.constant 8 : index
    %c0_58 = arith.constant 0 : index
    %79 = vector.load %arg15[%c1_56, %c8_57, %c0_58] : memref<18x32x16xf32, #tpu.memory_space<vmem>>, vector<16x16x16xf32>
    %80 = vector.shape_cast %79 : vector<16x16x16xf32> to vector<256x16xf32>
    %c4 = arith.constant 4 : index
    %c0_59 = arith.constant 0 : index
    %c0_60 = arith.constant 0 : index
    %81 = vector.load %arg6[%c4, %c0_59, %c0_60] : memref<9x16x16xf32, #tpu.memory_space<vmem>>, vector<1x16x16xf32>
    %82 = vector.shape_cast %81 : vector<1x16x16xf32> to vector<16x16xf32>
    %cst_61 = arith.constant dense<0.000000e+00> : vector<256x16xf32>
    %83 = tpu.matmul %80, %82, %cst_61 {dimension_numbers = #tpu.dot_dimension_numbers<[1], [0], [0], [1], [0, 0, 1, 1], [], []>} : vector<256x16xf32>, vector<16x16xf32>, vector<256x16xf32> -> vector<256x16xf32>
    %84 = arith.addf %78, %83 : vector<256x16xf32>
    %c1_62 = arith.constant 1 : index
    %c9_63 = arith.constant 9 : index
    %c0_64 = arith.constant 0 : index
    %85 = vector.load %arg15[%c1_62, %c9_63, %c0_64] : memref<18x32x16xf32, #tpu.memory_space<vmem>>, vector<16x16x16xf32>
    %86 = vector.shape_cast %85 : vector<16x16x16xf32> to vector<256x16xf32>
    %c5 = arith.constant 5 : index
    %c0_65 = arith.constant 0 : index
    %c0_66 = arith.constant 0 : index
    %87 = vector.load %arg6[%c5, %c0_65, %c0_66] : memref<9x16x16xf32, #tpu.memory_space<vmem>>, vector<1x16x16xf32>
    %88 = vector.shape_cast %87 : vector<1x16x16xf32> to vector<16x16xf32>
    %cst_67 = arith.constant dense<0.000000e+00> : vector<256x16xf32>
    %89 = tpu.matmul %86, %88, %cst_67 {dimension_numbers = #tpu.dot_dimension_numbers<[1], [0], [0], [1], [0, 0, 1, 1], [], []>} : vector<256x16xf32>, vector<16x16xf32>, vector<256x16xf32> -> vector<256x16xf32>
    %90 = arith.addf %84, %89 : vector<256x16xf32>
    %c2_68 = arith.constant 2 : index
    %c7_69 = arith.constant 7 : index
    %c0_70 = arith.constant 0 : index
    %91 = vector.load %arg15[%c2_68, %c7_69, %c0_70] : memref<18x32x16xf32, #tpu.memory_space<vmem>>, vector<16x16x16xf32>
    %92 = vector.shape_cast %91 : vector<16x16x16xf32> to vector<256x16xf32>
    %c6 = arith.constant 6 : index
    %c0_71 = arith.constant 0 : index
    %c0_72 = arith.constant 0 : index
    %93 = vector.load %arg6[%c6, %c0_71, %c0_72] : memref<9x16x16xf32, #tpu.memory_space<vmem>>, vector<1x16x16xf32>
    %94 = vector.shape_cast %93 : vector<1x16x16xf32> to vector<16x16xf32>
    %cst_73 = arith.constant dense<0.000000e+00> : vector<256x16xf32>
    %95 = tpu.matmul %92, %94, %cst_73 {dimension_numbers = #tpu.dot_dimension_numbers<[1], [0], [0], [1], [0, 0, 1, 1], [], []>} : vector<256x16xf32>, vector<16x16xf32>, vector<256x16xf32> -> vector<256x16xf32>
    %96 = arith.addf %90, %95 : vector<256x16xf32>
    %c2_74 = arith.constant 2 : index
    %c8_75 = arith.constant 8 : index
    %c0_76 = arith.constant 0 : index
    %97 = vector.load %arg15[%c2_74, %c8_75, %c0_76] : memref<18x32x16xf32, #tpu.memory_space<vmem>>, vector<16x16x16xf32>
    %98 = vector.shape_cast %97 : vector<16x16x16xf32> to vector<256x16xf32>
    %c7_77 = arith.constant 7 : index
    %c0_78 = arith.constant 0 : index
    %c0_79 = arith.constant 0 : index
    %99 = vector.load %arg6[%c7_77, %c0_78, %c0_79] : memref<9x16x16xf32, #tpu.memory_space<vmem>>, vector<1x16x16xf32>
    %100 = vector.shape_cast %99 : vector<1x16x16xf32> to vector<16x16xf32>
    %cst_80 = arith.constant dense<0.000000e+00> : vector<256x16xf32>
    %101 = tpu.matmul %98, %100, %cst_80 {dimension_numbers = #tpu.dot_dimension_numbers<[1], [0], [0], [1], [0, 0, 1, 1], [], []>} : vector<256x16xf32>, vector<16x16xf32>, vector<256x16xf32> -> vector<256x16xf32>
    %102 = arith.addf %96, %101 : vector<256x16xf32>
    %c2_81 = arith.constant 2 : index
    %c9_82 = arith.constant 9 : index
    %c0_83 = arith.constant 0 : index
    %103 = vector.load %arg15[%c2_81, %c9_82, %c0_83] : memref<18x32x16xf32, #tpu.memory_space<vmem>>, vector<16x16x16xf32>
    %104 = vector.shape_cast %103 : vector<16x16x16xf32> to vector<256x16xf32>
    %c8_84 = arith.constant 8 : index
    %c0_85 = arith.constant 0 : index
    %c0_86 = arith.constant 0 : index
    %105 = vector.load %arg6[%c8_84, %c0_85, %c0_86] : memref<9x16x16xf32, #tpu.memory_space<vmem>>, vector<1x16x16xf32>
    %106 = vector.shape_cast %105 : vector<1x16x16xf32> to vector<16x16xf32>
    %cst_87 = arith.constant dense<0.000000e+00> : vector<256x16xf32>
    %107 = tpu.matmul %104, %106, %cst_87 {dimension_numbers = #tpu.dot_dimension_numbers<[1], [0], [0], [1], [0, 0, 1, 1], [], []>} : vector<256x16xf32>, vector<16x16xf32>, vector<256x16xf32> -> vector<256x16xf32>
    %108 = arith.addf %102, %107 : vector<256x16xf32>
    %c0_88 = arith.constant 0 : index
    %c0_89 = arith.constant 0 : index
    %109 = vector.load %arg10[%c0_88, %c0_89] : memref<1x16xf32, #tpu.memory_space<vmem>>, vector<1x16xf32>
    %c0_90 = arith.constant 0 : index
    %c0_91 = arith.constant 0 : index
    %110 = vector.load %arg11[%c0_90, %c0_91] : memref<1x16xf32, #tpu.memory_space<vmem>>, vector<1x16xf32>
    %cst_92 = arith.constant dense<0.000000e+00> : vector<256xf32>
    %111 = vector.multi_reduction <add>, %108, %cst_92 [1] : vector<256x16xf32> to vector<256xf32>
    %112 = vector.shape_cast %111 : vector<256xf32> to vector<256x1xf32>
    %cst_93 = arith.constant 1.600000e+01 : f32
    %113 = vector.broadcast %cst_93 : f32 to vector<256x1xf32>
    %114 = arith.divf %112, %113 : vector<256x1xf32>
    %115 = arith.mulf %108, %108 : vector<256x16xf32>
    %cst_94 = arith.constant dense<0.000000e+00> : vector<256xf32>
    %116 = vector.multi_reduction <add>, %115, %cst_94 [1] : vector<256x16xf32> to vector<256xf32>
    %117 = vector.shape_cast %116 : vector<256xf32> to vector<256x1xf32>
    %cst_95 = arith.constant 1.600000e+01 : f32
    %118 = vector.broadcast %cst_95 : f32 to vector<256x1xf32>
    %119 = arith.divf %117, %118 : vector<256x1xf32>
    %120 = arith.mulf %114, %114 : vector<256x1xf32>
    %121 = arith.subf %119, %120 : vector<256x1xf32>
    %cst_96 = arith.constant 0.000000e+00 : f32
    %122 = vector.broadcast %cst_96 : f32 to vector<256x1xf32>
    %123 = arith.maximumf %121, %122 : vector<256x1xf32>
    %124 = vector.broadcast %114 : vector<256x1xf32> to vector<256x16xf32>
    %125 = arith.subf %108, %124 : vector<256x16xf32>
    %cst_97 = arith.constant 9.99999997E-7 : f32
    %126 = vector.broadcast %cst_97 : f32 to vector<256x1xf32>
    %127 = arith.addf %123, %126 : vector<256x1xf32>
    %128 = math.rsqrt %127 : vector<256x1xf32>
    %129 = vector.broadcast %128 : vector<256x1xf32> to vector<256x16xf32>
    %130 = arith.mulf %125, %129 : vector<256x16xf32>
    %131 = vector.broadcast %109 : vector<1x16xf32> to vector<256x16xf32>
    %132 = arith.mulf %130, %131 : vector<256x16xf32>
    %133 = vector.broadcast %110 : vector<1x16xf32> to vector<256x16xf32>
    %134 = arith.addf %132, %133 : vector<256x16xf32>
    %cst_98 = arith.constant 5.000000e-01 : f32
    %135 = vector.broadcast %cst_98 : f32 to vector<256x16xf32>
    %136 = arith.mulf %135, %134 : vector<256x16xf32>
    %cst_99 = arith.constant 0.707106769 : f32
    %137 = vector.broadcast %cst_99 : f32 to vector<256x16xf32>
    %138 = arith.mulf %134, %137 : vector<256x16xf32>
    %139 = math.erf %138 : vector<256x16xf32>
    %cst_100 = arith.constant 1.000000e+00 : f32
    %140 = vector.broadcast %cst_100 : f32 to vector<256x16xf32>
    %141 = arith.addf %140, %139 : vector<256x16xf32>
    %142 = arith.mulf %136, %141 : vector<256x16xf32>
    %c0_101 = arith.constant 0 : index
    %c0_102 = arith.constant 0 : index
    %143 = vector.load %arg7[%c0_101, %c0_102] : memref<16x32xf32, #tpu.memory_space<vmem>>, vector<16x32xf32>
    %cst_103 = arith.constant dense<0.000000e+00> : vector<256x32xf32>
    %144 = tpu.matmul %142, %143, %cst_103 {dimension_numbers = #tpu.dot_dimension_numbers<[1], [0], [0], [1], [0, 0, 1, 1], [], []>} : vector<256x16xf32>, vector<16x32xf32>, vector<256x32xf32> -> vector<256x32xf32>
    %c0_104 = arith.constant 0 : index
    %c0_105 = arith.constant 0 : index
    %145 = vector.load %arg12[%c0_104, %c0_105] : memref<1x32xf32, #tpu.memory_space<vmem>>, vector<1x32xf32>
    %c0_106 = arith.constant 0 : index
    %c0_107 = arith.constant 0 : index
    %146 = vector.load %arg13[%c0_106, %c0_107] : memref<1x32xf32, #tpu.memory_space<vmem>>, vector<1x32xf32>
    %cst_108 = arith.constant dense<0.000000e+00> : vector<256xf32>
    %147 = vector.multi_reduction <add>, %144, %cst_108 [1] : vector<256x32xf32> to vector<256xf32>
    %148 = vector.shape_cast %147 : vector<256xf32> to vector<256x1xf32>
    %cst_109 = arith.constant 3.200000e+01 : f32
    %149 = vector.broadcast %cst_109 : f32 to vector<256x1xf32>
    %150 = arith.divf %148, %149 : vector<256x1xf32>
    %151 = arith.mulf %144, %144 : vector<256x32xf32>
    %cst_110 = arith.constant dense<0.000000e+00> : vector<256xf32>
    %152 = vector.multi_reduction <add>, %151, %cst_110 [1] : vector<256x32xf32> to vector<256xf32>
    %153 = vector.shape_cast %152 : vector<256xf32> to vector<256x1xf32>
    %cst_111 = arith.constant 3.200000e+01 : f32
    %154 = vector.broadcast %cst_111 : f32 to vector<256x1xf32>
    %155 = arith.divf %153, %154 : vector<256x1xf32>
    %156 = arith.mulf %150, %150 : vector<256x1xf32>
    %157 = arith.subf %155, %156 : vector<256x1xf32>
    %cst_112 = arith.constant 0.000000e+00 : f32
    %158 = vector.broadcast %cst_112 : f32 to vector<256x1xf32>
    %159 = arith.maximumf %157, %158 : vector<256x1xf32>
    %160 = vector.broadcast %150 : vector<256x1xf32> to vector<256x32xf32>
    %161 = arith.subf %144, %160 : vector<256x32xf32>
    %cst_113 = arith.constant 9.99999997E-7 : f32
    %162 = vector.broadcast %cst_113 : f32 to vector<256x1xf32>
    %163 = arith.addf %159, %162 : vector<256x1xf32>
    %164 = math.rsqrt %163 : vector<256x1xf32>
    %165 = vector.broadcast %164 : vector<256x1xf32> to vector<256x32xf32>
    %166 = arith.mulf %161, %165 : vector<256x32xf32>
    %167 = vector.broadcast %145 : vector<1x32xf32> to vector<256x32xf32>
    %168 = arith.mulf %166, %167 : vector<256x32xf32>
    %169 = vector.broadcast %146 : vector<1x32xf32> to vector<256x32xf32>
    %170 = arith.addf %168, %169 : vector<256x32xf32>
    %171 = vector.shape_cast %170 : vector<256x32xf32> to vector<16x16x32xf32>
    %172 = arith.addf %4, %171 : vector<16x16x32xf32>
    %c0_114 = arith.constant 0 : index
    %c0_115 = arith.constant 0 : index
    %c0_116 = arith.constant 0 : index
    %c0_117 = arith.constant 0 : index
    %173 = vector.load %arg14[%c0_114, %c0_115, %c0_116, %c0_117] : memref<1x16x16x32xf32, #tpu.memory_space<vmem>>, vector<1x16x16x32xf32>
    %174 = vector.shape_cast %173 : vector<1x16x16x32xf32> to vector<16x16x32xf32>
    %175 = vector.shape_cast %172 : vector<16x16x32xf32> to vector<1x16x16x32xf32>
    tpu.vector_store %arg14[%c0_114, %c0_115, %c0_116, %c0_117], %175 {strides = array<i32>} : memref<1x16x16x32xf32, #tpu.memory_space<vmem>>, vector<1x16x16x32xf32>,
    return
  }
  func.func @transform_0(%arg0: i32, %arg1: i32) -> (i32, i32, i32, i32) {
    %c0_i32 = arith.constant 0 : i32
    %c0_i32_0 = arith.constant 0 : i32
    %c0_i32_1 = arith.constant 0 : i32
    return %arg0, %arg1, %c0_i32, %c0_i32_0 : i32, i32, i32, i32
  }
  func.func @transform_1(%arg0: i32, %arg1: i32) -> (i32, i32, i32, i32) {
    %c16_i32 = arith.constant 16 : i32
    %0 = arith.muli %arg1, %c16_i32 : i32
    %c1_i32 = arith.constant 1 : i32
    %1 = arith.subi %0, %c1_i32 : i32
    %c0_i32 = arith.constant 0 : i32
    %2 = arith.maxsi %1, %c0_i32 : i32
    %c0_i32_0 = arith.constant 0 : i32
    %c0_i32_1 = arith.constant 0 : i32
    %c0_i32_2 = arith.constant 0 : i32
    return %arg0, %2, %c0_i32_0, %c0_i32_1 : i32, i32, i32, i32
  }
  func.func @transform_2(%arg0: i32, %arg1: i32) -> (i32, i32, i32, i32) {
    %c16_i32 = arith.constant 16 : i32
    %0 = arith.muli %arg1, %c16_i32 : i32
    %c16_i32_0 = arith.constant 16 : i32
    %1 = arith.addi %0, %c16_i32_0 : i32
    %c15_i32 = arith.constant 15 : i32
    %2 = arith.minsi %1, %c15_i32 : i32
    %c0_i32 = arith.constant 0 : i32
    %c0_i32_1 = arith.constant 0 : i32
    %c0_i32_2 = arith.constant 0 : i32
    return %arg0, %2, %c0_i32, %c0_i32_1 : i32, i32, i32, i32
  }
  func.func @transform_3(%arg0: i32, %arg1: i32) -> (i32, i32) {
    %c0_i32 = arith.constant 0 : i32
    %c0_i32_0 = arith.constant 0 : i32
    %c0_i32_1 = arith.constant 0 : i32
    return %c0_i32, %c0_i32_0 : i32, i32
  }
  func.func @transform_4(%arg0: i32, %arg1: i32) -> (i32, i32, i32) {
    %c0_i32 = arith.constant 0 : i32
    %c0_i32_0 = arith.constant 0 : i32
    %c0_i32_1 = arith.constant 0 : i32
    %c0_i32_2 = arith.constant 0 : i32
    return %c0_i32, %c0_i32_0, %c0_i32_1 : i32, i32, i32
  }
  func.func @transform_5(%arg0: i32, %arg1: i32) -> (i32, i32) {
    %c0_i32 = arith.constant 0 : i32
    %c0_i32_0 = arith.constant 0 : i32
    %c0_i32_1 = arith.constant 0 : i32
    return %c0_i32, %c0_i32_0 : i32, i32
  }
  func.func @transform_6(%arg0: i32, %arg1: i32) -> (i32, i32) {
    %c0_i32 = arith.constant 0 : i32
    %c0_i32_0 = arith.constant 0 : i32
    %c0_i32_1 = arith.constant 0 : i32
    return %c0_i32, %c0_i32_0 : i32, i32
  }
  func.func @transform_7(%arg0: i32, %arg1: i32) -> (i32, i32) {
    %c0_i32 = arith.constant 0 : i32
    %c0_i32_0 = arith.constant 0 : i32
    %c0_i32_1 = arith.constant 0 : i32
    return %c0_i32, %c0_i32_0 : i32, i32
  }
  func.func @transform_8(%arg0: i32, %arg1: i32) -> (i32, i32) {
    %c0_i32 = arith.constant 0 : i32
    %c0_i32_0 = arith.constant 0 : i32
    %c0_i32_1 = arith.constant 0 : i32
    return %c0_i32, %c0_i32_0 : i32, i32
  }
  func.func @transform_9(%arg0: i32, %arg1: i32) -> (i32, i32) {
    %c0_i32 = arith.constant 0 : i32
    %c0_i32_0 = arith.constant 0 : i32
    %c0_i32_1 = arith.constant 0 : i32
    return %c0_i32, %c0_i32_0 : i32, i32
  }
  func.func @transform_10(%arg0: i32, %arg1: i32) -> (i32, i32) {
    %c0_i32 = arith.constant 0 : i32
    %c0_i32_0 = arith.constant 0 : i32
    %c0_i32_1 = arith.constant 0 : i32
    return %c0_i32, %c0_i32_0 : i32, i32
  }
  func.func @transform_11(%arg0: i32, %arg1: i32) -> (i32, i32) {
    %c0_i32 = arith.constant 0 : i32
    %c0_i32_0 = arith.constant 0 : i32
    %c0_i32_1 = arith.constant 0 : i32
    return %c0_i32, %c0_i32_0 : i32, i32
  }
  func.func @transform_12(%arg0: i32, %arg1: i32) -> (i32, i32, i32, i32) {
    %c0_i32 = arith.constant 0 : i32
    %c0_i32_0 = arith.constant 0 : i32
    %c0_i32_1 = arith.constant 0 : i32
    return %arg0, %arg1, %c0_i32, %c0_i32_0 : i32, i32, i32, i32
  }
}

</mosaic_0001>

<bundles_post_ra>
// kernel: tpu_custom_call.1
= control target key start
LH: loop header
LB: loop body
LE: loop exit
PB: predicated region body
PF: predicated region fallthrough
CT: control target
= control target key end

     0   :  { %s18230_s0 = inlined_call_operand.hbm [shape: f32[2,16,16,32], index: 0, kind: input, shape index: {}]   ;;  %s18231_s1 = inlined_call_operand.hbm [shape: f32[2,16,16,32], index: 1, kind: input, shape index: {}]   ;;  %s18232_s2 = inlined_call_operand.hbm [shape: f32[2,16,16,32], index: 2, kind: input, shape index: {}]   ;;  %s18233_s3 = inlined_call_operand.vmem [shape: f32[32,16], index: 3, kind: input, shape index: {}]   ;;  %s18234_s4 = inlined_call_operand.hbm [shape: f32[9,16,16], index: 4, kind: input, shape index: {}]   ;;  %s18235_s5 = inlined_call_operand.vmem [shape: f32[16,32], index: 5, kind: input, shape index: {}]   ;;  %s18236_s6 = inlined_call_operand.vmem [shape: f32[1,16], index: 6, kind: input, shape index: {}]   ;;  %s18237_s7 = inlined_call_operand.vmem [shape: f32[1,16], index: 7, kind: input, shape index: {}]   ;;  %s18238_s8 = inlined_call_operand.vmem [shape: f32[1,16], index: 8, kind: input, shape index: {}]   ;;  %s18239_s9 = inlined_call_operand.vmem [shape: f32[1,16], index: 9, kind: input, shape index: {}]   ;;  %s18240_s10 = inlined_call_operand.vmem [shape: f32[1,32], index: 10, kind: input, shape index: {}]   ;;  %s18241_s11 = inlined_call_operand.vmem [shape: f32[1,32], index: 11, kind: input, shape index: {}]   ;;  %s18242_s12 = inlined_call_operand.hbm [shape: f32[2,16,16,32], index: 12, kind: output, shape index: {}]  }
   0x1   :  { %18322 = sst [smem:[#allocation167_spill]] %s18230_s0 }
   0x2   :  { %18323 = sst [smem:[#allocation168_spill]] %s18231_s1 }
   0x3   :  { %18324 = sst [smem:[#allocation169_spill]] %s18234_s4 }
   0x4   :  { %18325 = sst [smem:[#allocation170_spill]] %s18241_s11 }
   0x5   :  { %18326 = sst [smem:[#allocation171_spill]] %s18242_s12 }
   0x6   :  { %17 = vsyncpa [#allocation4], 0 }
   0x7   :  { %19 = vsyncpa [#allocation4 + $0x1], 0 }
   0x8   :  { %20 = vsyncpa [#allocation7], 0 }
   0x9   :  { %22 = vsyncpa [#allocation7 + $0x1], 0 }
   0xa   :  { %23 = vsyncpa [#allocation10], 0 }
   0xb   :  { %24 = vsyncpa [#allocation5], 0 }
   0xc   :  { %26 = vsyncpa [#allocation5 + $0x1], 0  ;;  %s10847_s21 = smov 0   ;;  %s10849_s22 = smov 0  }
   0xd   :  { %s10851_s23 = smov 0   ;;  %s10853_s24 = smov 0  }
   0xe   :  { %s10855_s25 = smov 0   ;;  %s10857_s26 = smov 0  }
   0xf LB: > { %18327 = sst [smem:[#allocation16_spill]] %s10752_s21  ;;  %s44_s27 = sadd.s32 1, %s10768_s25  ;;  %s10772_s26 = sphi %s10857_s26, %s32_s26   ;;  %s10768_s25 = sphi %s10855_s25, %s18837_s25   ;;  %s10764_s24 = sphi %s10853_s24, %s18836_s24   ;;  %s10760_s23 = sphi %s10851_s23, %s18835_s23   ;;  %s10756_s22 = sphi %s10849_s22, %s18839_s22   ;;  %s10752_s21 = sphi %s10847_s21, %s18838_s21  }
  0x10   : > { %18328 = sst [smem:[#allocation17_spill]] %s10760_s23  ;;  %s53_s28 = sadd.s32 1, %s10760_s23 }
  0x11   : > { %18329 = sst [smem:[#allocation18_spill]] %s10764_s24  ;;  %p46_p0 = scmp.ge.s32.totalorder %s44_s27, 2 }
  0x12   : > { %18330 = sst [smem:[#allocation19_spill]] %s10768_s25  ;;  %p60_p1 = scmp.ne.s32.totalorder %s10760_s23, %s10756_s22 }
  0x13   : > { %18331 = sst [smem:[#allocation20_spill]] %s10772_s26  ;;  %p61_p2 = scmp.eq.s32.totalorder %s10772_s26, 0 }
  0x14   : > { %s18841_s27 = smov (%p46_p0, %s44_s27), 0  ;;  %p9619_p4 = scmp.ge.s32.totalorder %s10772_s26, 2 }
  0x15   : > { %18332 = sst [smem:[#allocation21_spill]] %s18841_s27  ;;  %p62_p3 = por %p61_p2, %p60_p1 }
  0x16   : > { %s48_s29 = ssub.s32 %s10768_s25, %s18841_s27  ;;  %p10107_p6 = scmp.lt.s32.totalorder %s10772_s26, 2 }
  0x17   : > { %p51_p5 = scmp.eq.s32.totalorder %s48_s29, 0  ;;  %s10892_s30 = sand.u32 1, %s10760_s23  }
  0x18   : > { %s10895_s13 = sshll.u32 %s10768_s25, 8  ;;  %p10900_p7 = pnand %p10107_p6, %p62_p3 }
  0x19   : > { %s10898_s14 = scalar_select %p51_p5, %s10760_s23, %s53_s28  }
  0x1a   : > { %s442_s16 = sand.u32 1, %s10772_s26   ;;  %s9623_s17 = sshll.u32 %s10892_s30, 4 }
  0x1b   : > { %18333 = sst [smem:[#allocation22_spill]] %s10898_s14  ;;  %s446_s29 = scalar_lea.vmem [#allocation6], %s9623_s17 }
  0x1c   : > { %s18335_s1 = sld [smem:[#allocation168_spill]]  ;;  %s460_s27 = sshll.u32 %s446_s29, 4  ;;  %s461_s27 = int_to_ptr.vmem [resolvable:$true] %s460_s27 }
  0x1d   : > { %s10910_s28 = scalar_lea.sflag [#allocation7], %s442_s16  ;;  %s18246_s14 = smov 128  }
  0x1e   : > { %s18248_s12 = smov 8   ;;  %s10918_s18 = scalar_lea.vmem [#allocation8], %s9623_s17 }
  0x1f   : > { %s9616_s16 = sadd.s32 4294967294, %s10772_s26   ;;  %p66_p8 = scmp.ne.s32.totalorder %s10756_s22, %s10752_s21 }
  0x20   : > { %p359_p11 = scmp.eq.s32.totalorder %s9616_s16, 1  ;;  %p9617_p13 = scmp.ge.s32.totalorder %s10772_s26, 1 }
  0x21   : > { %p366_p3 = scmp.lt.s32.totalorder %s10772_s26, 3  ;;  %s18341_s4 = sld [smem:[#allocation169_spill]] }
  0x22   : > { %s457_s20 = scalar_lea.hbm %s18335_s1, %s10895_s13  ;;  %p10943_p2 = por %p359_p11, %p66_p8 }
  0x23   : > { %s458_s25 = sshll.u32 %s457_s20, 4  ;;  %s10922_s20 = sadd.s32 4294967295, %s10772_s26   ;;  %s459_s25 = int_to_ptr.hbm [resolvable:$true] %s458_s25 }
  0x24   : > { %10098 = dma.hbm_to_vmem [thread:$0]  (!%p10900_p7), %s459_s25, 256, %s461_s27, %s10910_s28, %s18246_s14, %s18246_s14, %s18248_s12  }
  0x25   : > { %p67_p9 = scmp.eq.s32.totalorder %s10922_s20, 0  ;;  %p353_p10 = scmp.eq.s32.totalorder %s10922_s20, 1 }
  0x26   : > { %s18339_s17 = scalar_select %p10943_p2, 1, 0 }
  0x27   : > { %p10931_p12 = por %p67_p9, %p66_p8  ;;  %p10939_p0 = por %p353_p10, %p60_p1 }
  0x28   : > { %18340 = sst [smem:[#allocation24_spill]] %s18339_s17  ;;  %s380_s16 = sshll.u32 %s18341_s4, 4  ;;  %s381_s16 = int_to_ptr.hbm [resolvable:$true] %s380_s16 }
  0x29   : > { %s18337_s27 = scalar_select %p10939_p0, 1, 0 }
  0x2a   : > { %p10951_p5 = pnand %p9617_p13, %p366_p3  ;;  %s10776_s12 = smov [#allocation9]  }
  0x2b   : > { %18338 = sst [smem:[#allocation23_spill]] %s18337_s27  ;;  %s382_s1 = sshll.u32 %s10776_s12, 4  ;;  %s383_s1 = int_to_ptr.vmem [resolvable:$true] %s382_s1 }
  0x2c   : > { %p10088_p1 = pneg %p10951_p5  ;;  %s9620_s23 = sshll.u32 %s10892_s30, 8 }
  0x2d   : > { %s18343_s0 = sld [smem:[#allocation167_spill]]  ;;  %s421_s4 = scalar_lea.vmem [#allocation3], %s9620_s23 }
  0x2e   : > { %p10089_p6 = pnand %p10088_p1, %p67_p9  ;;  %s432_s21 = sshll.u32 %s421_s4, 4  ;;  %s433_s21 = int_to_ptr.vmem [resolvable:$true] %s432_s21 }
  0x2f   : > { %s18344_s27 = smov 8   ;;  %s18345_s24 = smov 128  }
  0x30   : > { %10091 = dma.hbm_to_vmem [thread:$0]  (!%p10089_p6), %s381_s16, 2304, %s383_s1, [#allocation10], %s18345_s24, %s18345_s24, %s18344_s27  }
  0x31   : > { %s10067_s12 = sadd.s32 240, %s10895_s13  ;;  %s418_s11 = scalar_lea.sflag [#allocation4], %s10892_s30 }
  0x32   : > { %s18346_s26 = sshll.u32 %s10918_s18, 4  ;;  %s485_s23 = scalar_lea.hbm %s18232_s2, %s10067_s12  ;;  %s489_s26 = int_to_ptr.vmem [resolvable:$true] %s18346_s26 }
  0x33   : > { %s429_s19 = scalar_lea.hbm %s18343_s0, %s10895_s13  ;;  %s486_s4 = sshll.u32 %s485_s23, 4  ;;  %s487_s4 = int_to_ptr.hbm [resolvable:$true] %s486_s4 }
  0x34   : > { %s430_s29 = sshll.u32 %s429_s19, 4  ;;  %500 = sbr.rel (%p10951_p5) target bundleno = 2224 (0x8b0), region = 68  ;;  %s431_s29 = int_to_ptr.hbm [resolvable:$true] %s430_s29 }
  0x35   : > { %10095 = dma.hbm_to_vmem [thread:$0]  (!%p10900_p7), %s431_s29, 4096, %s433_s21, %s418_s11, %s18345_s24, %s18345_s24, %s18344_s27  }
  0x36   : > { %10101 = dma.hbm_to_vmem [thread:$0]  (!%p10900_p7), %s487_s4, 256, %s489_s26, %s10910_s28, %s18345_s24, %s18345_s24, %s18344_s27  }
  0x39   : > { %s10988_s1 = sand.u32 1, %s10756_s22  }
  0x3a   : > { %s9630_s11 = sshll.u32 %s10988_s1, 8  ;;  %s503_s0 = scalar_lea.sflag [#allocation4], %s10988_s1 }
  0x3b   : > { %s10994_s21 = scalar_lea.vmem [#allocation3], %s9630_s11 }
  0x3c   : > { %10735 = dma.done.wait (%p10931_p12), %s503_s0, 4096  }
  0x3d   : > { %10737 = vsyncadd (%p10931_p12), %s503_s0, 4294963200  ;;  %s512_s24 = sand.u32 1, %s10922_s20  }
  0x3e   : > { %s513_s30 = scalar_lea.sflag [#allocation7], %s512_s24 }
  0x3f   : > { %10739 = dma.done.wait (%p10931_p12), %s513_s30, 512  }
  0x40   : > { %10741 = vsyncadd (%p10931_p12), %s513_s30, 4294966784 }
  0x41   : > { %10743 = dma.done.wait (%p67_p9), [#allocation10], 2304  }
  0x42   : > { %10745 = vsyncadd (%p67_p9), [#allocation10], 4294964992  ;;  %v665_v0 = vld [vmem:[%s18233_s3 + $0x18] sm:$0xff]  ;;  %v664_v1 = vld [vmem:[%s18233_s3 + $0x10] sm:$0xff]  ;;  %vm666_vm0 = vcmask 261120   ;;  %vm878_vm1 = vcmask 130048  }
  0x43   : > { %775 = vmatpush.msra.mxu0 %v665_v0  ;;  %v663_v2 = vld [vmem:[%s18233_s3 + $0x8] sm:$0xff]  ;;  %v662_v3 = vld [vmem:[%s18233_s3] sm:$0xff]  ;;  %v632_v6 = vld [vmem:[%s10994_s21 + $0x10] sm:$0xff]  ;;  %s18827_s30 = sld [smem:[#allocation170_spill]]  ;;  %s17670_s13 = scalar_lea.vmem [#allocation11], %s9630_s11 }
  0x44   : > { %v630_v4 = vld [vmem:[%s10994_s21] sm:$0xff]  ;;  %v631_v5 = vld [vmem:[%s10994_s21 + $0x8] sm:$0xff]  ;;  %v633_v7 = vld [vmem:[%s10994_s21 + $0x18] sm:$0xff]  ;;  %s18828_s18 = sld [smem:[#allocation18_spill]]  ;;  %s9466_s12 = sshll.u32 %s17670_s13, 4  ;;  %s9467_s12 = int_to_ptr.vmem [resolvable:$true] %s9466_s12 }
  0x45   : > { %776 = vmatpush.msra.mxu0 %v664_v1  ;;  %v634_v8 = vld [vmem:[%s10994_s21 + $0x20] sm:$0xff]  ;;  %v635_v9 = vld [vmem:[%s10994_s21 + $0x28] sm:$0xff]  ;;  %v636_v10 = vld [vmem:[%s10994_s21 + $0x30] sm:$0xff]  ;;  %s18829_s16 = sld [smem:[#allocation171_spill]]  ;;  %s9451_s17 = scalar_lea.sflag [#allocation5], %s10988_s1 }
  0x46   : > { %v637_v11 = vld [vmem:[%s10994_s21 + $0x38] sm:$0xff]  ;;  %v638_v12 = vld [vmem:[%s10994_s21 + $0x40] sm:$0xff]  ;;  %v639_v13 = vld [vmem:[%s10994_s21 + $0x48] sm:$0xff] }
  0x47   : > { %777 = vmatpush.msra.mxu0 %v663_v2  ;;  %v640_v14 = vld [vmem:[%s10994_s21 + $0x50] sm:$0xff]  ;;  %v641_v15 = vld [vmem:[%s10994_s21 + $0x58] sm:$0xff]  ;;  %v642_v16 = vld [vmem:[%s10994_s21 + $0x60] sm:$0xff] }
  0x48   : > { %v643_v17 = vld [vmem:[%s10994_s21 + $0x68] sm:$0xff]  ;;  %v644_v18 = vld [vmem:[%s10994_s21 + $0x70] sm:$0xff]  ;;  %v645_v19 = vld [vmem:[%s10994_s21 + $0x78] sm:$0xff] }
  0x49   : > { %778 = vmatpush.msra.mxu0 %v662_v3  ;;  %v646_v21 = vld [vmem:[%s10994_s21 + $0x80] sm:$0xff]  ;;  %v647_v23 = vld [vmem:[%s10994_s21 + $0x88] sm:$0xff]  ;;  %v648_v25 = vld [vmem:[%s10994_s21 + $0x90] sm:$0xff] }
  0x4a   : > { %9635 = vmatmul.msk.f32.vlgmr.msra.gmra.mxu0 %vm666_vm0, %v630_v4  ;;  %v649_v27 = vld [vmem:[%s10994_s21 + $0x98] sm:$0xff]  ;;  %v650_v29 = vld [vmem:[%s10994_s21 + $0xa0] sm:$0xff]  ;;  %v651_v34 = vld [vmem:[%s10994_s21 + $0xa8] sm:$0xff]  ;;  %s10068_s25 = sshll.u32 %s18828_s18, 8 }
  0x4b   : > { %v652_v39 = vld [vmem:[%s10994_s21 + $0xb0] sm:$0xff]  ;;  %v653_v43 = vld [vmem:[%s10994_s21 + $0xb8] sm:$0xff]  ;;  %v654_v49 = vld [vmem:[%s10994_s21 + $0xc0] sm:$0xff]  ;;  %s9465_s19 = scalar_lea.hbm %s18829_s16, %s10068_s25  ;;  %s10702_s11 = scalar_lea.hbm %s18829_s16, 512 }
  0x4c   : > { %v655_v54 = vld [vmem:[%s10994_s21 + $0xc8] sm:$0xff]  ;;  %v656_v59 = vld [vmem:[%s10994_s21 + $0xd0] sm:$0xff]  ;;  %v657_v0 = vld [vmem:[%s10994_s21 + $0xd8] sm:$0xff]  ;;  %s9468_s26 = sshll.u32 %s9465_s19, 4  ;;  %s9469_s26 = int_to_ptr.hbm [resolvable:$true] %s9468_s26 }
  0x4d   : > { %s10696_s23 = sshra.s32 %s9469_s26, 4  ;;  %s10697_s23 = int_to_ptr.hbm [resolvable:$true] %s10696_s23 }
  0x4e   : > { %s10698_s4 = scalar_lea.hbm %s10697_s23, 256  ;;  %p10703_p10 = scmp.lt.s32.totalorder %s10697_s23, %s18829_s16 }
  0x4f   : > { %p10699_p7 = scmp.ne.s32.totalorder %s10697_s23, %s10698_s4  ;;  %p10704_p11 = scmp.lt.s32.totalorder %s10702_s11, %s10698_s4 }
  0x51   : > { %p10700_p8 = pnand %p10699_p7, %p10939_p0  ;;  %p10705_p12 = por %p10704_p11, %p10703_p10 }
  0x52   : > { %9636 = vmatmul.msk.f32.gmra.mxu0 %vm666_vm0, %v631_v5  ;;  %v658_v5 = vld [vmem:[%s10994_s21 + $0xe0] sm:$0xff] }
  0x53   : > { %p10701_p9 = pneg %p10700_p8 }
  0x55   : > { %p10706_p13 = pnand %p10705_p12, %p10701_p9 }
  0x5a   : > { %9637 = vmatmul.msk.f32.gmra.mxu0 %vm666_vm0, %v632_v6 }
  0x62   : > { %9638 = vmatmul.msk.f32.gmra.mxu0 %vm666_vm0, %v633_v7 }
  0x6a   : > { %9639 = vmatmul.msk.f32.gmra.mxu0 %vm666_vm0, %v634_v8 }
  0x72   : > { %9640 = vmatmul.msk.f32.gmra.mxu0 %vm666_vm0, %v635_v9 }
  0x7a   : > { %9641 = vmatmul.msk.f32.gmra.mxu0 %vm666_vm0, %v636_v10  ;;  %v659_v10 = vld [vmem:[%s10994_s21 + $0xe8] sm:$0xff] }
  0x82   : > { %9642 = vmatmul.msk.f32.gmra.mxu0 %vm666_vm0, %v637_v11 }
  0x8a   : > { %9643 = vmatmul.msk.f32.gmra.mxu0 %vm666_vm0, %v638_v12 }
  0x92   : > { %9644 = vmatmul.msk.f32.gmra.mxu0 %vm666_vm0, %v639_v13 }
  0x9a   : > { %9645 = vmatmul.msk.f32.gmra.mxu0 %vm666_vm0, %v640_v14 }
  0xa2   : > { %9646 = vmatmul.msk.f32.gmra.mxu0 %vm666_vm0, %v641_v15 }
  0xaa   : > { %9647 = vmatmul.msk.f32.gmra.mxu0 %vm666_vm0, %v642_v16 }
  0xb2   : > { %9648 = vmatmul.msk.f32.gmra.mxu0 %vm666_vm0, %v643_v17 }
  0xba   : > { %9649 = vmatmul.msk.f32.gmra.mxu0 %vm666_vm0, %v644_v18 }
  0xc2   : > { %9650 = vmatmul.msk.f32.gmra.mxu0 %vm666_vm0, %v645_v19 }
  0xc7   : > { %v11053_v20 = vpop.f32.mrf.mxu0 }
  0xc8   : > { %18347 = vst [vmem:[#allocation25_spill] sm:$0xff] %v11053_v20 }
  0xca   : > { %9651 = vmatmul.msk.f32.gmra.mxu0 %vm666_vm0, %v646_v21 }
  0xcf   : > { %v11057_v22 = vpop.f32.mrf.mxu0 }
  0xd0   : > { %18348 = vst [vmem:[#allocation26_spill] sm:$0xff] %v11057_v22 }
  0xd2   : > { %9652 = vmatmul.msk.f32.gmra.mxu0 %vm666_vm0, %v647_v23  ;;  %v10777_v23 = vmov 16.0  }
  0xd3   : > { %10172 = vrcp.f32 %v10777_v23 }
  0xd7   : > { %v11061_v24 = vpop.f32.mrf.mxu0 }
  0xd8   : > { %18349 = vst [vmem:[#allocation27_spill] sm:$0xff] %v11061_v24 }
  0xda   : > { %9653 = vmatmul.msk.f32.gmra.mxu0 %vm666_vm0, %v648_v25 }
  0xdf   : > { %v11065_v26 = vpop.f32.mrf.mxu0 }
  0xe2   : > { %9654 = vmatmul.msk.f32.gmra.mxu0 %vm666_vm0, %v649_v27  ;;  %v10173_v27 = vpop.eup %10172 }
  0xe3   : > { %vm980_vm2 = vweird.f32 %v10173_v27 }
  0xe7   : > { %v11069_v28 = vpop.f32.mrf.mxu0 }
  0xe8   : > { %v891_v30 = vsel %vm878_vm1, %v11069_v28, 0.0  ;;  %v1018_v31 = vmul.f32 %v11069_v28, %v11069_v28 }
  0xe9   : > { %892 = vadd.xlane.f32.xlu0 %v891_v30 }
  0xea   : > { %9655 = vmatmul.msk.f32.gmra.mxu0 %vm666_vm0, %v650_v29  ;;  %v1058_v32 = vsel %vm878_vm1, %v1018_v31, 0.0 }
  0xeb   : > { %1059 = vadd.xlane.f32.xlu1 %v1058_v32 }
  0xef   : > { %v11078_v33 = vpop.f32.mrf.mxu0 }
  0xf0   : > { %v894_v35 = vsel %vm878_vm1, %v11078_v33, 0.0  ;;  %v1019_v36 = vmul.f32 %v11078_v33, %v11078_v33 }
  0xf1   : > { %895 = vadd.xlane.f32.xlu0 %v894_v35  ;;  %v660_v35 = vld [vmem:[%s10994_s21 + $0xf0] sm:$0xff] }
  0xf2   : > { %9656 = vmatmul.msk.f32.gmra.mxu0 %vm666_vm0, %v651_v34  ;;  %v1061_v37 = vsel %vm878_vm1, %v1019_v36, 0.0  ;;  %v976_v34 = vmul.f32 16.0, %v10173_v27 }
  0xf3   : > { %1062 = vadd.xlane.f32.xlu1 %v1061_v37 }
  0xf4   : > { %v977_v36 = vsub.f32 1.0, %v976_v34 }
  0xf7   : > { %v11087_v38 = vpop.f32.mrf.mxu0 }
  0xf8   : > { %v897_v40 = vsel %vm878_vm1, %v11087_v38, 0.0  ;;  %v1020_v41 = vmul.f32 %v11087_v38, %v11087_v38 }
  0xf9   : > { %898 = vadd.xlane.f32.xlu2 %v897_v40 }
  0xfa   : > { %9657 = vmatmul.msk.f32.gmra.mxu0 %vm666_vm0, %v652_v39  ;;  %v1064_v44 = vsel %vm878_vm1, %v1020_v41, 0.0 }
  0xff   : > { %v11095_v42 = vpop.f32.mrf.mxu0 }
 0x100   : > { %v900_v45 = vsel %vm878_vm1, %v11095_v42, 0.0  ;;  %v1021_v46 = vmul.f32 %v11095_v42, %v11095_v42 }
 0x101   : > { %1065 = vadd.xlane.f32.xlu2 %v1064_v44  ;;  %901 = vadd.xlane.f32.xlu0 %v900_v45  ;;  %v661_v44 = vld [vmem:[%s10994_s21 + $0xf8] sm:$0xff] }
 0x102   : > { %9658 = vmatmul.msk.f32.gmra.mxu0 %vm666_vm0, %v653_v43  ;;  %v1067_v47 = vsel %vm878_vm1, %v1021_v46, 0.0  ;;  %v978_v43 = vmul.f32 %v10173_v27, %v977_v36 }
 0x103   : > { %1068 = vadd.xlane.f32.xlu1 %v1067_v47 }
 0x104   : > { %v979_v45 = vadd.f32 %v10173_v27, %v978_v43 }
 0x107   : > { %v11105_v48 = vpop.f32.mrf.mxu0 }
 0x108   : > { %v903_v50 = vsel %vm878_vm1, %v11105_v48, 0.0  ;;  %v1022_v51 = vmul.f32 %v11105_v48, %v11105_v48 }
 0x109   : > { %904 = vadd.xlane.f32.xlu2 %v903_v50 }
 0x10a   : > { %9659 = vmatmul.msk.f32.gmra.mxu0 %vm666_vm0, %v654_v49  ;;  %v1070_v52 = vsel %vm878_vm1, %v1022_v51, 0.0  ;;  %v11198_v51 = vsel %vm980_vm2, %v10173_v27, %v979_v45 }
 0x10b   : > { %1071 = vadd.xlane.f32.xlu0 %v1070_v52  ;;  %18350 = vst [vmem:[#allocation28_spill] sm:$0xff] %v11198_v51 }
 0x10f   : > { %v11114_v53 = vpop.f32.mrf.mxu0 }
 0x110   : > { %v906_v55 = vsel %vm878_vm1, %v11114_v53, 0.0  ;;  %v1023_v56 = vmul.f32 %v11114_v53, %v11114_v53 }
 0x111   : > { %907 = vadd.xlane.f32.xlu1 %v906_v55 }
 0x112   : > { %9660 = vmatmul.msk.f32.gmra.mxu0 %vm666_vm0, %v655_v54  ;;  %v1073_v57 = vsel %vm878_vm1, %v1023_v56, 0.0 }
 0x113   : > { %1074 = vadd.xlane.f32.xlu2 %v1073_v57 }
 0x117   : > { %v11123_v58 = vpop.f32.mrf.mxu0 }
 0x118   : > { %v909_v60 = vsel %vm878_vm1, %v11123_v58, 0.0  ;;  %v1024_v61 = vmul.f32 %v11123_v58, %v11123_v58 }
 0x119   : > { %910 = vadd.xlane.f32.xlu0 %v909_v60 }
 0x11a   : > { %9661 = vmatmul.msk.f32.gmra.mxu0 %vm666_vm0, %v656_v59  ;;  %v1076_v62 = vsel %vm878_vm1, %v1024_v61, 0.0 }
 0x11b   : > { %1077 = vadd.xlane.f32.xlu1 %v1076_v62 }
 0x11f   : > { %v11132_v63 = vpop.f32.mrf.mxu0 }
 0x120   : > { %v912_v1 = vsel %vm878_vm1, %v11132_v63, 0.0  ;;  %v1025_v2 = vmul.f32 %v11132_v63, %v11132_v63 }
 0x121   : > { %913 = vadd.xlane.f32.xlu2 %v912_v1 }
 0x122   : > { %9662 = vmatmul.msk.f32.gmra.mxu0 %vm666_vm0, %v657_v0  ;;  %v1079_v3 = vsel %vm878_vm1, %v1025_v2, 0.0 }
 0x123   : > { %1080 = vadd.xlane.f32.xlu0 %v1079_v3 }
 0x127   : > { %v11141_v4 = vpop.f32.mrf.mxu0 }
 0x128   : > { %v915_v6 = vsel %vm878_vm1, %v11141_v4, 0.0  ;;  %v1026_v7 = vmul.f32 %v11141_v4, %v11141_v4 }
 0x129   : > { %916 = vadd.xlane.f32.xlu1 %v915_v6 }
 0x12a   : > { %9663 = vmatmul.msk.f32.gmra.mxu0 %vm666_vm0, %v658_v5  ;;  %v1082_v8 = vsel %vm878_vm1, %v1026_v7, 0.0 }
 0x12b   : > { %1083 = vadd.xlane.f32.xlu2 %v1082_v8 }
 0x12f   : > { %v11150_v9 = vpop.f32.mrf.mxu0 }
 0x130   : > { %v918_v11 = vsel %vm878_vm1, %v11150_v9, 0.0  ;;  %v1027_v12 = vmul.f32 %v11150_v9, %v11150_v9 }
 0x131   : > { %919 = vadd.xlane.f32.xlu0 %v918_v11 }
 0x132   : > { %9664 = vmatmul.msk.f32.gmra.mxu0 %vm666_vm0, %v659_v10  ;;  %v1085_v13 = vsel %vm878_vm1, %v1027_v12, 0.0 }
 0x133   : > { %1086 = vadd.xlane.f32.xlu1 %v1085_v13 }
 0x137   : > { %v11159_v14 = vpop.f32.mrf.mxu0 }
 0x138   : > { %v921_v15 = vsel %vm878_vm1, %v11159_v14, 0.0  ;;  %v1028_v16 = vmul.f32 %v11159_v14, %v11159_v14 }
 0x139   : > { %922 = vadd.xlane.f32.xlu2 %v921_v15 }
 0x13a   : > { %v1088_v17 = vsel %vm878_vm1, %v1028_v16, 0.0  ;;  %9665 = vmatmul.msk.f32.gmra.mxu0 %vm666_vm0, %v660_v35 }
 0x13b   : > { %1089 = vadd.xlane.f32.xlu0 %v1088_v17 }
 0x13f   : > { %v11166_v18 = vpop.f32.mrf.mxu0 }
 0x140   : > { %v924_v19 = vsel %vm878_vm1, %v11166_v18, 0.0  ;;  %v1029_v21 = vmul.f32 %v11166_v18, %v11166_v18 }
 0x141   : > { %925 = vadd.xlane.f32.xlu1 %v924_v19 }
 0x142   : > { %v1091_v25 = vsel %vm878_vm1, %v1029_v21, 0.0  ;;  %9666 = vmatmul.msk.f32.gmra.mxu0 %vm666_vm0, %v661_v44 }
 0x143   : > { %1092 = vadd.xlane.f32.xlu2 %v1091_v25 }
 0x147   : > { %v11173_v29 = vpop.f32.mrf.mxu0 }
 0x148   : > { %v927_v30 = vsel %vm878_vm1, %v11173_v29, 0.0  ;;  %v1030_v31 = vmul.f32 %v11173_v29, %v11173_v29 }
 0x149   : > { %928 = vadd.xlane.f32.xlu0 %v927_v30 }
 0x14a   : > { %v1094_v32 = vsel %vm878_vm1, %v1030_v31, 0.0 }
 0x14b   : > { %1095 = vadd.xlane.f32.xlu1 %v1094_v32 }
 0x14f   : > { %v11182_v37 = vpop.f32.mrf.mxu0 }
 0x150   : > { %v930_v39 = vsel %vm878_vm1, %v11182_v37, 0.0  ;;  %v1031_v40 = vmul.f32 %v11182_v37, %v11182_v37 }
 0x151   : > { %931 = vadd.xlane.f32.xlu2 %v930_v39 }
 0x152   : > { %v1097_v41 = vsel %vm878_vm1, %v1031_v40, 0.0 }
 0x153   : > { %1098 = vadd.xlane.f32.xlu0 %v1097_v41 }
 0x157   : > { %v11191_v46 = vpop.f32.mrf.mxu0 }
 0x158   : > { %v933_v47 = vsel %vm878_vm1, %v11191_v46, 0.0  ;;  %v1032_v49 = vmul.f32 %v11191_v46, %v11191_v46 }
 0x159   : > { %934 = vadd.xlane.f32.xlu1 %v933_v47 }
 0x15a   : > { %v1100_v50 = vsel %vm878_vm1, %v1032_v49, 0.0 }
 0x15b   : > { %1101 = vadd.xlane.f32.xlu2 %v1100_v50 }
 0x15c   : > { %v893_v52 = vpop.xlane.xlu0 %892 }
 0x15d   : > { %v11201_v54 = vmul.f32 %v11198_v51, %v893_v52  ;;  %v11247_v52 = vld [vmem:[%s18236_s6] ss:$0 sm:$0xff] }
 0x15e   : > { %v1060_v55 = vpop.xlane.xlu1 %1059 }
 0x15f   : > { %v1178_v56 = vmul.f32 %v11201_v54, %v11201_v54  ;;  %v1146_v57 = vmul.f32 %v1060_v55, %v11198_v51  ;;  %v11206_v59 = vpop.f32.mrf.mxu0  ;;  %v1274_v50 = vsub.f32 %v11069_v28, %v11201_v54  ;;  %v11259_v28 = vld [vmem:[%s18237_s7] ss:$0 sm:$0xff] }
 0x160   : > { %v936_v60 = vsel %vm878_vm1, %v11206_v59, 0.0  ;;  %v1033_v61 = vmul.f32 %v11206_v59, %v11206_v59 }
 0x161   : > { %v1210_v62 = vsub.f32 %v1146_v57, %v1178_v56  ;;  %937 = vadd.xlane.f32.xlu0 %v936_v60 }
 0x162   : > { %v1103_v0 = vsel %vm878_vm1, %v1033_v61, 0.0 }
 0x163   : > { %v1242_v1 = vmax.f32 %v1210_v62, 0.0  ;;  %1104 = vadd.xlane.f32.xlu1 %v1103_v0 }
 0x164   : > { %v896_v2 = vpop.xlane.xlu0 %895 }
 0x165   : > { %v1306_v3 = vadd.f32 1e-06, %v1242_v1  ;;  %v11214_v5 = vmul.f32 %v11198_v51, %v896_v2 }
 0x166   : > { %v1063_v6 = vpop.xlane.xlu1 %1062 }
 0x167   : > { %10174 = vrsqrt.f32 %v1306_v3  ;;  %v1179_v7 = vmul.f32 %v11214_v5, %v11214_v5  ;;  %v11218_v8 = vpop.f32.mrf.mxu0  ;;  %v1147_v10 = vmul.f32 %v1063_v6, %v11198_v51  ;;  %vm1380_vm4 = vweird.f32 %v1306_v3 }
 0x168   : > { %v939_v11 = vsel %vm878_vm1, %v11218_v8, 0.0  ;;  %v1034_v12 = vmul.f32 %v11218_v8, %v11218_v8 }
 0x169   : > { %940 = vadd.xlane.f32.xlu2 %v939_v11  ;;  %v1211_v13 = vsub.f32 %v1147_v10, %v1179_v7 }
 0x16a   : > { %v1106_v15 = vsel %vm878_vm1, %v1034_v12, 0.0 }
 0x16b   : > { %1107 = vadd.xlane.f32.xlu0 %v1106_v15  ;;  %v1243_v16 = vmax.f32 %v1211_v13, 0.0 }
 0x16c   : > { %v899_v17 = vpop.xlane.xlu2 %898 }
 0x16d   : > { %v10175_v19 = vpop.eup %10174  ;;  %v1307_v23 = vadd.f32 1e-06, %v1243_v16  ;;  %v11231_v31 = vmul.f32 %v11198_v51, %v899_v17 }
 0x16e   : > { %v1375_v21 = vmul.f32 %v10175_v19, %v1306_v3  ;;  %vm1381_vm3 = vweird.f32 %v10175_v19 }
 0x16f   : > { %v11226_v25 = vpop.f32.mrf.mxu0  ;;  %10176 = vrsqrt.f32 %v1307_v23  ;;  %v1180_v41 = vmul.f32 %v11231_v31, %v11231_v31  ;;  %vm1382_vm5 = vmor %vm1380_vm4, %vm1381_vm3  ;;  %vm1390_vm7 = vweird.f32 %v1307_v23 }
 0x170   : > { %v1376_v27 = vmul.f32 %v10175_v19, %v1375_v21  ;;  %v942_v30 = vsel %vm878_vm1, %v11226_v25, 0.0  ;;  %v1035_v32 = vmul.f32 %v11226_v25, %v11226_v25 }
 0x171   : > { %943 = vadd.xlane.f32.xlu1 %v942_v30  ;;  %v1014_v30 = vmul.f32 %v11053_v20, %v11053_v20 }
 0x172   : > { %v1377_v34 = vmul.f32 0.5, %v1376_v27  ;;  %v1109_v35 = vsel %vm878_vm1, %v1035_v32, 0.0 }
 0x173   : > { %1110 = vadd.xlane.f32.xlu2 %v1109_v35 }
 0x174   : > { %v1378_v36 = vsub.f32 1.5, %v1377_v34  ;;  %v1066_v39 = vpop.xlane.xlu2 %1065  ;;  %v902_v40 = vpop.xlane.xlu0 %901 }
 0x175   : > { %v1148_v43 = vmul.f32 %v1066_v39, %v11198_v51  ;;  %v11240_v44 = vmul.f32 %v11198_v51, %v902_v40  ;;  %v10177_v45 = vpop.eup %10176  ;;  %v1275_v39 = vsub.f32 %v11078_v33, %v11214_v5 }
 0x176   : > { %v1379_v47 = vmul.f32 %v10175_v19, %v1378_v36  ;;  %v1069_v49 = vpop.xlane.xlu1 %1068  ;;  %v1385_v55 = vmul.f32 %v10177_v45, %v1307_v23  ;;  %vm1391_vm6 = vweird.f32 %v10177_v45 }
 0x177   : > { %v1212_v56 = vsub.f32 %v1148_v43, %v1180_v41  ;;  %v1181_v57 = vmul.f32 %v11240_v44, %v11240_v44  ;;  %v11251_v60 = vpop.f32.mrf.mxu0  ;;  %v1149_v62 = vmul.f32 %v1069_v49, %v11198_v51  ;;  %vm1392_vm8 = vmor %vm1390_vm7, %vm1391_vm6  ;;  %v1015_v41 = vmul.f32 %v11057_v22, %v11057_v22 }
 0x178   : > { %v1383_v61 = vsel %vm1382_vm5, %v10175_v19, %v1379_v47  ;;  %v945_v0 = vsel %vm878_vm1, %v11251_v60, 0.0  ;;  %v1386_v1 = vmul.f32 %v10177_v45, %v1385_v55  ;;  %v1036_v3 = vmul.f32 %v11251_v60, %v11251_v60 }
 0x179   : > { %v1658_v54 = vmul.f32 %v1383_v61, %v1274_v50  ;;  %v1244_v2 = vmax.f32 %v1212_v56, 0.0  ;;  %946 = vadd.xlane.f32.xlu0 %v945_v0  ;;  %v1213_v6 = vsub.f32 %v1149_v62, %v1181_v57  ;;  %v11302_v57 = vsel %vm878_vm1, %v11053_v20, 0.0 }
 0x17a   : > { %v1387_v10 = vmul.f32 0.5, %v1386_v1  ;;  %v1112_v12 = vsel %vm878_vm1, %v1036_v3, 0.0  ;;  %v11311_v1 = vsel %vm878_vm1, %v11057_v22, 0.0 }
 0x17b   : > { %v1693_v7 = vmul.f32 %v11247_v52, %v1658_v54  ;;  %v11264_v11 = vadd.f32 1e-06, %v1244_v2  ;;  %v1245_v13 = vmax.f32 %v1213_v6, 0.0  ;;  %1113 = vadd.xlane.f32.xlu1 %v1112_v12  ;;  %v1276_v6 = vsub.f32 %v11087_v38, %v11231_v31 }
 0x17c   : > { %v905_v15 = vpop.xlane.xlu2 %904  ;;  %v1388_v17 = vsub.f32 1.5, %v1387_v10 }
 0x17d   : > { %v11268_v16 = vadd.f32 %v11259_v28, %v1693_v7  ;;  %10178 = vrsqrt.f32 %v11264_v11  ;;  %v11271_v19 = vadd.f32 1e-06, %v1245_v13  ;;  %v11274_v21 = vmul.f32 %v11198_v51, %v905_v15 }
 0x17e   : > { %v1072_v27 = vpop.xlane.xlu0 %1071  ;;  %v1389_v34 = vmul.f32 %v10177_v45, %v1388_v17  ;;  %v11318_v7 = vsel %vm878_vm1, %v1015_v41, 0.0  ;;  %vm1400_vm9 = vweird.f32 %v11264_v11 }
 0x17f   : > { %v11279_v32 = vmul.f32 0.70710677, %v11268_v16  ;;  %v1150_v35 = vmul.f32 %v1072_v27, %v11198_v51  ;;  %v11282_v36 = vpop.f32.mrf.mxu0  ;;  %10180 = vrsqrt.f32 %v11271_v19  ;;  %v1182_v40 = vmul.f32 %v11274_v21, %v11274_v21 }
 0x180   : > { %v1393_v23 = vsel %vm1392_vm8, %v10177_v45, %v1389_v34  ;;  %v948_v47 = vsel %vm878_vm1, %v11282_v36, 0.0  ;;  %v1037_v49 = vmul.f32 %v11282_v36, %v11282_v36  ;;  %v11305_v45 = vsel %vm878_vm1, %v1014_v30, 0.0 }
 0x181   : > { %v1980_v43 = vmul.f32 %v11279_v32, %v11279_v32  ;;  %v1659_v33 = vmul.f32 %v1393_v23, %v1275_v39  ;;  %v1214_v5 = vsub.f32 %v1150_v35, %v1182_v40  ;;  %949 = vadd.xlane.f32.xlu2 %v948_v47  ;;  %v1277_v34 = vsub.f32 %v11095_v42, %v11240_v44 }
 0x182   : > { %v1115_v56 = vsel %vm878_vm1, %v1037_v49, 0.0  ;;  %vm1410_vm10 = vweird.f32 %v11271_v19 }
 0x183   : > { %v10179_v50 = vpop.eup %10178  ;;  %v11297_v55 = vmin.f32 %v1980_v43, 16.0  ;;  %v1694_v61 = vmul.f32 %v11247_v52, %v1659_v33  ;;  %v1246_v0 = vmax.f32 %v1214_v5, 0.0  ;;  %1116 = vadd.xlane.f32.xlu0 %v1115_v56 }
 0x184   : > { %v1395_v62 = vmul.f32 %v10179_v50, %v11264_v11  ;;  %v908_v54 = vpop.xlane.xlu1 %907  ;;  %vm1401_vm11 = vweird.f32 %v10179_v50 }
 0x185   : > { %v1982_v2 = vmul.f32 2.1237322e-06, %v11297_v55  ;;  %v1993_v3 = vmul.f32 3.8918573e-05, %v11297_v55  ;;  %v10181_v10 = vpop.eup %10180  ;;  %v11321_v12 = vadd.f32 %v11259_v28, %v1694_v61  ;;  %v11323_v15 = vadd.f32 1e-06, %v1246_v0  ;;  %vm1402_vm12 = vmor %vm1400_vm9, %vm1401_vm11 }
 0x186   : > { %v1396_v13 = vmul.f32 %v10179_v50, %v1395_v62  ;;  %v11326_v17 = vmul.f32 %v11198_v51, %v908_v54  ;;  %v1405_v38 = vmul.f32 %v10181_v10, %v11271_v19  ;;  %v1075_v39 = vpop.xlane.xlu2 %1074  ;;  %vm1411_vm13 = vweird.f32 %v10181_v10 }
 0x187   : > { %v1983_v27 = vadd.f32 0.00028619796, %v1982_v2  ;;  %v1994_v30 = vadd.f32 0.001143296, %v1993_v3  ;;  %v11332_v31 = vmul.f32 0.70710677, %v11321_v12  ;;  %10182 = vrsqrt.f32 %v11323_v15  ;;  %v11339_v23 = vpop.f32.mrf.mxu0  ;;  %vm1412_vm14 = vmor %vm1410_vm10, %vm1411_vm13 }
 0x188   : > { %v1397_v35 = vmul.f32 0.5, %v1396_v13  ;;  %v1406_v43 = vmul.f32 %v10181_v10, %v1405_v38  ;;  %18351 = vst [vmem:[#allocation29_spill] sm:$0xff] %v11339_v23  ;;  %v1183_v47 = vmul.f32 %v11326_v17, %v11326_v17  ;;  %v1151_v56 = vmul.f32 %v1075_v39, %v11198_v51 }
 0x189   : > { %v1984_v40 = vmul.f32 %v1983_v27, %v11297_v55  ;;  %v1995_v41 = vmul.f32 %v1994_v30, %v11297_v55  ;;  %v2020_v42 = vmul.f32 %v11332_v31, %v11332_v31  ;;  %v951_v0 = vsel %vm878_vm1, %v11339_v23, 0.0 }
 0x18a   : > { %v1398_v44 = vsub.f32 1.5, %v1397_v35  ;;  %v1407_v5 = vmul.f32 0.5, %v1406_v43  ;;  %v1038_v54 = vmul.f32 %v11339_v23, %v11339_v23  ;;  %952 = vadd.xlane.f32.xlu1 %v951_v0  ;;  %vm1420_vm15 = vweird.f32 %v11323_v15 }
 0x18b   : > { %v1985_v49 = vadd.f32 0.0036580483, %v1984_v40  ;;  %v1996_v33 = vadd.f32 0.014752088, %v1995_v41  ;;  %v11346_v61 = vmin.f32 %v2020_v42, 16.0 }
 0x18c   : > { %v1399_v62 = vmul.f32 %v10179_v50, %v1398_v44  ;;  %v1408_v13 = vsub.f32 1.5, %v1407_v5  ;;  %v1118_v39 = vsel %vm878_vm1, %v1038_v54, 0.0 }
 0x18d   : > { %v1986_v2 = vmul.f32 %v1985_v49, %v11297_v55  ;;  %v1997_v3 = vmul.f32 %v1996_v33, %v11297_v55  ;;  %v11356_v27 = vpop.eup %10182  ;;  %v2022_v30 = vmul.f32 2.1237322e-06, %v11346_v61  ;;  %v2033_v38 = vmul.f32 3.8918573e-05, %v11346_v61  ;;  %1119 = vadd.xlane.f32.xlu2 %v1118_v39 }
 0x18e   : > { %v1403_v35 = vsel %vm1402_vm12, %v10179_v50, %v1399_v62  ;;  %v1409_v42 = vmul.f32 %v10181_v10, %v1408_v13  ;;  %v1415_v49 = vmul.f32 %v11356_v27, %v11323_v15  ;;  %v1215_v33 = vsub.f32 %v1151_v56, %v1183_v47 }
 0x18f   : > { %v1987_v40 = vadd.f32 0.05243302, %v1986_v2  ;;  %v1998_v41 = vadd.f32 0.112945676, %v1997_v3  ;;  %v1660_v43 = vmul.f32 %v1403_v35, %v1276_v6  ;;  %v2023_v44 = vadd.f32 0.00028619796, %v2022_v30 }
 0x190   : > { %v2034_v11 = vadd.f32 0.001143296, %v2033_v38  ;;  %v1413_v0 = vsel %vm1412_vm14, %v10181_v10, %v1409_v42  ;;  %v1416_v3 = vmul.f32 %v11356_v27, %v1415_v49  ;;  %v11374_v47 = vsel %vm878_vm1, %v11061_v24, 0.0 }
 0x191   : > { %v1988_v5 = vmul.f32 %v1987_v40, %v11297_v55  ;;  %v1999_v50 = vmul.f32 %v1998_v41, %v11297_v55  ;;  %v1695_v62 = vmul.f32 %v11247_v52, %v1660_v43  ;;  %v2024_v6 = vmul.f32 %v2023_v44, %v11346_v61 }
 0x192   : > { %v2035_v54 = vmul.f32 %v2034_v11, %v11346_v61  ;;  %v1661_v2 = vmul.f32 %v1413_v0, %v1277_v34  ;;  %v1016_v56 = vmul.f32 %v11061_v24, %v11061_v24  ;;  %v1417_v35 = vmul.f32 0.5, %v1416_v3 }
 0x193   : > { %v2000_v19 = vadd.f32 0.4994258, %v1999_v50  ;;  %v1730_v13 = vadd.f32 %v11259_v28, %v1695_v62  ;;  %v2025_v30 = vadd.f32 0.0036580483, %v2024_v6  ;;  %v1989_v39 = vadd.f32 0.18741608, %v1988_v5 }
 0x194   : > { %v2036_v38 = vadd.f32 0.014752088, %v2035_v54  ;;  %v1696_v10 = vmul.f32 %v11247_v52, %v1661_v2  ;;  %v1418_v42 = vsub.f32 1.5, %v1417_v35  ;;  %v1247_v44 = vmax.f32 %v1215_v33, 0.0 }
 0x195   : > { %v2001_v34 = vmul.f32 %v2000_v19, %v11297_v55  ;;  %v11380_v40 = vmul.f32 0.70710677, %v1730_v13  ;;  %v2026_v41 = vmul.f32 %v2025_v30, %v11346_v61  ;;  %vm1421_vm2 = vweird.f32 %v11356_v27 }
 0x196   : > { %v2037_v43 = vmul.f32 %v2036_v38, %v11346_v61  ;;  %v1731_v50 = vadd.f32 %v11259_v28, %v1696_v10  ;;  %v1419_v0 = vmul.f32 %v11356_v27, %v1418_v42  ;;  %v11393_v6 = vsel %vm878_vm1, %v1016_v56, 0.0  ;;  %vm1422_vm3 = vmor %vm1420_vm15, %vm1421_vm2 }
 0x197   : > { %v11385_v11 = vadd.f32 1.0, %v2001_v34  ;;  %v2060_v49 = vmul.f32 %v11380_v40, %v11380_v40  ;;  %v2027_v5 = vadd.f32 0.05243302, %v2026_v41  ;;  %v11396_v54 = vmul.f32 0.5, %v11268_v16 }
 0x198   : > { %v2038_v62 = vadd.f32 0.112945676, %v2037_v43  ;;  %v1990_v33 = vmul.f32 %v1989_v39, %v11297_v55  ;;  %v1278_v2 = vsub.f32 %v11105_v48, %v11274_v21  ;;  %v11408_v56 = vadd.f32 1e-06, %v1247_v44 }
 0x199   : > { %10184 = vrcp.f32 %v11385_v11  ;;  %v2028_v3 = vmul.f32 %v2027_v5, %v11346_v61  ;;  %v11404_v30 = vmin.f32 %v2060_v49, 16.0  ;;  %v11411_v16 = vmul.f32 0.5, %v11321_v12 }
 0x19a   : > { %v2039_v19 = vmul.f32 %v2038_v62, %v11346_v61  ;;  %v11413_v55 = vmul.f32 0.70710677, %v1731_v50  ;;  %v1423_v38 = vsel %vm1422_vm3, %v11356_v27, %v1419_v0  ;;  %v11418_v35 = vmul.f32 0.5, %v1730_v13 }
 0x19b   : > { %v2029_v21 = vadd.f32 0.18741608, %v2028_v3  ;;  %v1662_v39 = vmul.f32 %v1423_v38, %v1278_v2  ;;  %v1991_v34 = vadd.f32 1.1283791, %v1990_v33  ;;  %v2062_v15 = vmul.f32 2.1237322e-06, %v11404_v30 }
 0x19c   : > { %v2040_v10 = vadd.f32 0.4994258, %v2039_v19  ;;  %v2073_v41 = vmul.f32 3.8918573e-05, %v11404_v30  ;;  %v2100_v12 = vmul.f32 %v11413_v55, %v11413_v55  ;;  %v2012_v43 = vand.u32 2147483647, %v11385_v11 }
 0x19d   : > { %v2030_v27 = vmul.f32 %v2029_v21, %v11346_v61  ;;  %10186 = vrsqrt.f32 %v11408_v56  ;;  %v2063_v13 = vadd.f32 0.00028619796, %v2062_v15  ;;  %v1697_v62 = vmul.f32 %v11247_v52, %v1662_v39 }
 0x19e   : > { %v2041_v42 = vmul.f32 %v2040_v10, %v11346_v61  ;;  %v2074_v49 = vadd.f32 0.001143296, %v2073_v41  ;;  %v11428_v5 = vmin.f32 %v2100_v12, 16.0  ;;  %v2014_v33 = vand.u32 2147483648, %v11385_v11 }
 0x19f   : > { %v10185_v44 = vpop.eup %10184  ;;  %v2031_v2 = vadd.f32 1.1283791, %v2030_v27  ;;  %v2064_v19 = vmul.f32 %v2063_v13, %v11404_v30  ;;  %v1992_v10 = vmul.f32 %v1991_v34, %v11279_v32  ;;  %v11441_v39 = vmul.f32 0.5, %v1731_v50 }
 0x1a0   : > { %v2004_v0 = vmul.f32 %v10185_v44, %v11385_v11  ;;  %v11433_v3 = vadd.f32 1.0, %v2041_v42  ;;  %v2075_v61 = vmul.f32 %v2074_v49, %v11404_v30  ;;  %v2102_v38 = vmul.f32 2.1237322e-06, %v11428_v5 }
 0x1a1   : > { %v2113_v21 = vmul.f32 3.8918573e-05, %v11428_v5  ;;  %vm2008_vm4 = vweird.f32 %v11385_v11  ;;  %vm2009_vm5 = vweird.f32 %v10185_v44  ;;  %v2065_v41 = vadd.f32 0.0036580483, %v2064_v19 }
 0x1a2   : > { %v2005_v15 = vsub.f32 1.0, %v2004_v0  ;;  %10188 = vrcp.f32 %v11433_v3  ;;  %v11445_v12 = vadd.f32 %v11259_v28, %v1697_v62  ;;  %v2076_v13 = vadd.f32 0.014752088, %v2075_v61  ;;  %vm2010_vm7 = vmor %vm2008_vm4, %vm2009_vm5 }
 0x1a3   : > { %v11447_v27 = vpop.eup %10186  ;;  %v2103_v49 = vadd.f32 0.00028619796, %v2102_v38  ;;  %v2114_v48 = vadd.f32 0.001143296, %v2113_v21  ;;  %vm11449_vm6 = vcmp.eq.f32.partialorder %v2012_v43, 8.507059e+37  ;;  %v2015_v34 = vor.u32 1.1754944e-38, %v2014_v33 }
 0x1a4   : > { %v2006_v42 = vmul.f32 %v10185_v44, %v2005_v15  ;;  %v2032_v50 = vmul.f32 %v2031_v2, %v11332_v31  ;;  %v2066_v0 = vmul.f32 %v2065_v41, %v11404_v30  ;;  %v2077_v19 = vmul.f32 %v2076_v13, %v11404_v30 }
 0x1a5   : > { %v2104_v62 = vmul.f32 %v2103_v49, %v11428_v5  ;;  %v2115_v22 = vmul.f32 %v2114_v48, %v11428_v5  ;;  %vm2048_vm8 = vweird.f32 %v11433_v3  ;;  %v2052_v43 = vand.u32 2147483647, %v11433_v3 }
 0x1a6   : > { %v2007_v24 = vadd.f32 %v10185_v44, %v2006_v42  ;;  %v2067_v33 = vadd.f32 0.05243302, %v2066_v0  ;;  %v11464_v31 = vmul.f32 0.70710677, %v11445_v12  ;;  %v1425_v2 = vmul.f32 %v11447_v27, %v11408_v56 }
 0x1a7   : > { %v2078_v21 = vadd.f32 0.112945676, %v2077_v19  ;;  %v2105_v15 = vadd.f32 0.0036580483, %v2104_v62  ;;  %v2116_v48 = vadd.f32 0.014752088, %v2115_v22  ;;  %vm1430_vm12 = vweird.f32 %v11408_v56 }
 0x1a8   : > { %v10189_v61 = vpop.eup %10188  ;;  %v2011_v38 = vsel %vm2010_vm7, %v10185_v44, %v2007_v24  ;;  %v2054_v42 = vand.u32 2147483648, %v11433_v3  ;;  %v2068_v13 = vmul.f32 %v2067_v33, %v11404_v30  ;;  %vm11476_vm9 = vcmp.eq.f32.partialorder %v2052_v43, 8.507059e+37 }
 0x1a9   : > { %v2016_v11 = vsel %vm11449_vm6, %v2015_v34, %v2011_v38  ;;  %v2044_v41 = vmul.f32 %v10189_v61, %v11433_v3  ;;  %v2079_v0 = vmul.f32 %v2078_v21, %v11404_v30  ;;  %v2106_v20 = vmul.f32 %v2105_v15, %v11428_v5 }
 0x1aa   : > { %v2017_v49 = vmul.f32 %v2016_v11, %v1992_v10  ;;  %v2117_v23 = vmul.f32 %v2116_v48, %v11428_v5  ;;  %v2069_v22 = vadd.f32 0.18741608, %v2068_v13  ;;  %v2140_v32 = vmul.f32 %v11464_v31, %v11464_v31 }
 0x1ab   : > { %v2045_v24 = vsub.f32 1.0, %v2044_v41  ;;  %v2080_v19 = vadd.f32 0.4994258, %v2079_v0  ;;  %v2107_v62 = vadd.f32 0.05243302, %v2106_v20  ;;  %v1426_v10 = vmul.f32 %v11447_v27, %v1425_v2  ;;  %v911_v0 = vpop.xlane.xlu0 %910 }
 0x1ac   : > { %v9671_v34 = vclamps-f32 %v2017_v49, 1.0  ;;  %vm2049_vm10 = vweird.f32 %v10189_v61  ;;  %v2118_v38 = vadd.f32 0.112945676, %v2117_v23  ;;  %v11483_v21 = vmin.f32 %v2140_v32, 16.0 }
 0x1ad   : > { %v2046_v33 = vmul.f32 %v10189_v61, %v2045_v24  ;;  %v2055_v48 = vor.u32 1.1754944e-38, %v2054_v42  ;;  %v2081_v43 = vmul.f32 %v2080_v19, %v11404_v30  ;;  %v2108_v11 = vmul.f32 %v2107_v62, %v11428_v5  ;;  %vm2050_vm11 = vmor %vm2048_vm8, %vm2049_vm10 }
 0x1ae   : > { %v3104_v15 = vadd.f32 1.0, %v9671_v34  ;;  %v2070_v13 = vmul.f32 %v2069_v22, %v11404_v30  ;;  %v2119_v49 = vmul.f32 %v2118_v38, %v11428_v5  ;;  %v2142_v20 = vmul.f32 2.1237322e-06, %v11483_v21 }
 0x1af   : > { %v2047_v41 = vadd.f32 %v10189_v61, %v2046_v33  ;;  %v11493_v23 = vadd.f32 1.0, %v2081_v43  ;;  %v2153_v42 = vmul.f32 3.8918573e-05, %v11483_v21  ;;  %v1427_v24 = vmul.f32 0.5, %v1426_v10 }
 0x1b0   : > { %v3136_v2 = vmul.f32 %v3104_v15, %v11396_v54  ;;  %v2109_v34 = vadd.f32 0.18741608, %v2108_v11  ;;  %v2120_v19 = vadd.f32 0.4994258, %v2119_v49  ;;  %v2143_v62 = vadd.f32 0.00028619796, %v2142_v20 }
 0x1b1   : > { %v2051_v32 = vsel %vm2050_vm11, %v10189_v61, %v2047_v41  ;;  %10190 = vrcp.f32 %v11493_v23  ;;  %v11502_v54 = vmul.f32 %v11198_v51, %v911_v0  ;;  %v2071_v22 = vadd.f32 1.1283791, %v2070_v13  ;;  %v1078_v61 = vpop.xlane.xlu1 %1077 }
 0x1b2   : > { %3169 = vst.msk [vmem:[#allocation2 + $0x68] sm:$0xff] %vm878_vm1, %v3136_v2  ;;  %v2056_v30 = vsel %vm11476_vm9, %v2055_v48, %v2051_v32  ;;  %v2121_v10 = vmul.f32 %v2120_v19, %v11428_v5  ;;  %vm1431_vm13 = vweird.f32 %v11447_v27  ;;  %v2094_v33 = vand.u32 2147483648, %v11493_v23 }
 0x1b3   : > { %v2057_v3 = vmul.f32 %v2056_v30, %v2032_v50  ;;  %v2144_v38 = vmul.f32 %v2143_v62, %v11483_v21  ;;  %v2154_v44 = vadd.f32 0.001143296, %v2153_v42  ;;  %v1428_v15 = vsub.f32 1.5, %v1427_v24  ;;  %v11519_v24 = vpop.f32.mrf.mxu0  ;;  %vm1432_vm15 = vmor %vm1430_vm12, %vm1431_vm13 }
 0x1b4   : > { %v2092_v43 = vand.u32 2147483647, %v11493_v23  ;;  %v2110_v11 = vmul.f32 %v2109_v34, %v11428_v5  ;;  %v11510_v41 = vadd.f32 1.0, %v2121_v10  ;;  %v1152_v20 = vmul.f32 %v1078_v61, %v11198_v51 }
 0x1b5   : > { %v9672_v48 = vclamps-f32 %v2057_v3, 1.0  ;;  %v2145_v50 = vadd.f32 0.0036580483, %v2144_v38  ;;  %v2155_v13 = vmul.f32 %v2154_v44, %v11483_v21  ;;  %v1429_v49 = vmul.f32 %v11447_v27, %v1428_v15 }
 0x1b6   : > { %v2072_v2 = vmul.f32 %v2071_v22, %v11380_v40  ;;  %10192 = vrcp.f32 %v11510_v41  ;;  %v1184_v42 = vmul.f32 %v11502_v54, %v11502_v54  ;;  %vm2088_vm14 = vweird.f32 %v11493_v23 }
 0x1b7   : > { %v3105_v0 = vadd.f32 1.0, %v9672_v48  ;;  %v10191_v5 = vpop.eup %10190  ;;  %v2095_v32 = vor.u32 1.1754944e-38, %v2094_v33  ;;  %v2146_v34 = vmul.f32 %v2145_v50, %v11483_v21  ;;  %v2156_v19 = vadd.f32 0.014752088, %v2155_v13 }
 0x1b8   : > { %v2084_v62 = vmul.f32 %v10191_v5, %v11493_v23  ;;  %vm11529_vm2 = vcmp.eq.f32.partialorder %v2092_v43, 8.507059e+37  ;;  %v2111_v3 = vadd.f32 1.1283791, %v2110_v11  ;;  %v1433_v22 = vsel %vm1432_vm15, %v11447_v27, %v1429_v49  ;;  %v914_v27 = vpop.xlane.xlu2 %913 }
 0x1b9   : > { %v3137_v40 = vmul.f32 %v3105_v0, %v11411_v16  ;;  %v2132_v10 = vand.u32 2147483647, %v11510_v41  ;;  %v2147_v61 = vadd.f32 0.05243302, %v2146_v34  ;;  %v2157_v33 = vmul.f32 %v2156_v19, %v11483_v21 }
 0x1ba   : > { %v1280_v56 = vsub.f32 %v11123_v58, %v11502_v54  ;;  %v2085_v16 = vsub.f32 1.0, %v2084_v62  ;;  %v18358_v38 = vsub.f32 %v11114_v53, %v11326_v17  ;;  %v1216_v15 = vsub.f32 %v1152_v20, %v1184_v42  ;;  %v1081_v20 = vpop.xlane.xlu0 %1080 }
 0x1bb   : > { %3170 = vst.msk [vmem:[#allocation2 + $0x70] sm:$0xff] %vm878_vm1, %v3137_v40  ;;  %v954_v48 = vsel %vm878_vm1, %v11519_v24, 0.0  ;;  %v2134_v43 = vand.u32 2147483648, %v11510_v41  ;;  %v2148_v11 = vmul.f32 %v2147_v61, %v11483_v21  ;;  %v2158_v50 = vadd.f32 0.112945676, %v2157_v33 }
 0x1bc   : > { %v1663_v44 = vmul.f32 %v1433_v22, %v18358_v38  ;;  %955 = vadd.xlane.f32.xlu0 %v954_v48  ;;  %v1039_v13 = vmul.f32 %v11519_v24, %v11519_v24  ;;  %v10193_v49 = vpop.eup %10192  ;;  %v2086_v0 = vmul.f32 %v10191_v5, %v2085_v16  ;;  %vm2089_vm3 = vweird.f32 %v10191_v5 }
 0x1bd   : > { %v1248_v17 = vmax.f32 %v1216_v15, 0.0  ;;  %v2124_v42 = vmul.f32 %v10193_v49, %v11510_v41  ;;  %v2149_v34 = vadd.f32 0.18741608, %v2148_v11  ;;  %v2159_v19 = vmul.f32 %v2158_v50, %v11483_v21  ;;  %vm2090_vm4 = vmor %vm2088_vm14, %vm2089_vm3  ;;  %v11568_v11 = vpop.f32.mrf.mxu0 }
 0x1be   : > { %v1698_v53 = vmul.f32 %v11247_v52, %v1663_v44  ;;  %v11552_v40 = vmul.f32 %v11198_v51, %v914_v27  ;;  %v2087_v62 = vadd.f32 %v10191_v5, %v2086_v0  ;;  %v1121_v33 = vsel %vm878_vm1, %v1039_v13, 0.0 }
 0x1bf   : > { %v11557_v61 = vadd.f32 1e-06, %v1248_v17  ;;  %v2125_v16 = vsub.f32 1.0, %v2124_v42  ;;  %v2150_v38 = vmul.f32 %v2149_v34, %v11483_v21  ;;  %v2160_v44 = vadd.f32 0.4994258, %v2159_v19  ;;  %1122 = vadd.xlane.f32.xlu1 %v1121_v33 }
 0x1c0   : > { %v11555_v22 = vadd.f32 %v11259_v28, %v1698_v53  ;;  %v1153_v15 = vmul.f32 %v1081_v20, %v11198_v51  ;;  %v2091_v48 = vsel %vm2090_vm4, %v10191_v5, %v2087_v62  ;;  %vm2129_vm5 = vweird.f32 %v10193_v49 }
 0x1c1   : > { %10194 = vrsqrt.f32 %v11557_v61  ;;  %v2096_v23 = vsel %vm11529_vm2, %v2095_v32, %v2091_v48  ;;  %v2126_v50 = vmul.f32 %v10193_v49, %v2125_v16  ;;  %v2161_v13 = vmul.f32 %v2160_v44, %v11483_v21  ;;  %v917_v44 = vpop.xlane.xlu1 %916 }
 0x1c2   : > { %v11565_v27 = vmul.f32 0.70710677, %v11555_v22  ;;  %v1185_v0 = vmul.f32 %v11552_v40, %v11552_v40  ;;  %v2097_v53 = vmul.f32 %v2096_v23, %v2072_v2  ;;  %v2112_v5 = vmul.f32 %v2111_v3, %v11413_v55 }
 0x1c3   : > { %vm2128_vm6 = vweird.f32 %v11510_v41  ;;  %v2127_v20 = vadd.f32 %v10193_v49, %v2126_v50  ;;  %vm2133_vm7 = vcmp.eq.f32.partialorder %v2132_v10, 8.507059e+37  ;;  %v2151_v42 = vadd.f32 1.1283791, %v2150_v38 }
 0x1c4   : > { %v2180_v17 = vmul.f32 %v11565_v27, %v11565_v27  ;;  %v11579_v34 = vadd.f32 1.0, %v2161_v13  ;;  %v9673_v32 = vclamps-f32 %v2097_v53, 1.0  ;;  %vm2130_vm8 = vmor %vm2128_vm6, %vm2129_vm5  ;;  %v2135_v21 = vor.u32 1.1754944e-38, %v2134_v43 }
 0x1c5   : > { %v957_v2 = vsel %vm878_vm1, %v11568_v11, 0.0  ;;  %v2131_v55 = vsel %vm2130_vm8, %v10193_v49, %v2127_v20  ;;  %vm1440_vm9 = vweird.f32 %v11557_v61  ;;  %v1217_v41 = vsub.f32 %v1153_v15, %v1185_v0  ;;  %v1084_v15 = vpop.xlane.xlu2 %1083 }
 0x1c6   : > { %v11582_v30 = vmin.f32 %v2180_v17, 16.0  ;;  %10196 = vrcp.f32 %v11579_v34  ;;  %958 = vadd.xlane.f32.xlu2 %v957_v2  ;;  %v3106_v10 = vadd.f32 1.0, %v9673_v32  ;;  %v2136_v19 = vsel %vm2133_vm7, %v2135_v21, %v2131_v55  ;;  %v11611_v32 = vpop.f32.mrf.mxu0 }
 0x1c7   : > { %v11588_v3 = vpop.eup %10194  ;;  %v1040_v43 = vmul.f32 %v11568_v11, %v11568_v11  ;;  %v2137_v33 = vmul.f32 %v2136_v19, %v2112_v5  ;;  %v11594_v16 = vmul.f32 %v2151_v42, %v11464_v31  ;;  %v2172_v23 = vand.u32 2147483647, %v11579_v34 }
 0x1c8   : > { %v2182_v62 = vmul.f32 2.1237322e-06, %v11582_v30  ;;  %v2193_v49 = vmul.f32 3.8918573e-05, %v11582_v30  ;;  %v1435_v38 = vmul.f32 %v11588_v3, %v11557_v61  ;;  %v3138_v48 = vmul.f32 %v3106_v10, %v11418_v35 }
 0x1c9   : > { %v2174_v50 = vand.u32 2147483648, %v11579_v34  ;;  %v9674_v0 = vclamps-f32 %v2137_v33, 1.0  ;;  %v1249_v31 = vmax.f32 %v1217_v41, 0.0  ;;  %vm2168_vm10 = vweird.f32 %v11579_v34 }
 0x1ca   : > { %v2183_v13 = vadd.f32 0.00028619796, %v2182_v62  ;;  %v2194_v53 = vadd.f32 0.001143296, %v2193_v49  ;;  %v1436_v5 = vmul.f32 %v11588_v3, %v1435_v38  ;;  %3171 = vst.msk [vmem:[#allocation2 + $0x88] sm:$0xff] %vm878_vm1, %v3138_v48  ;;  %v1124_v20 = vsel %vm878_vm1, %v1040_v43, 0.0 }
 0x1cb   : > { %v11608_v35 = vmul.f32 %v11198_v51, %v917_v44  ;;  %v1154_v42 = vmul.f32 %v1084_v15, %v11198_v51  ;;  %v3107_v2 = vadd.f32 1.0, %v9674_v0  ;;  %v11614_v10 = vadd.f32 1e-06, %v1249_v31  ;;  %1125 = vadd.xlane.f32.xlu0 %v1124_v20  ;;  %v920_v44 = vpop.xlane.xlu0 %919 }
 0x1cc   : > { %v2184_v17 = vmul.f32 %v2183_v13, %v11582_v30  ;;  %v10197_v21 = vpop.eup %10196  ;;  %v2195_v55 = vmul.f32 %v2194_v53, %v11582_v30  ;;  %v1437_v41 = vmul.f32 0.5, %v1436_v5  ;;  %vm1441_vm11 = vweird.f32 %v11588_v3 }
 0x1cd   : > { %v2164_v19 = vmul.f32 %v10197_v21, %v11579_v34  ;;  %v1186_v43 = vmul.f32 %v11608_v35, %v11608_v35  ;;  %v3139_v33 = vmul.f32 %v3107_v2, %v11441_v39  ;;  %10198 = vrsqrt.f32 %v11614_v10  ;;  %vm1442_vm14 = vmor %vm1440_vm9, %vm1441_vm11  ;;  %v1087_v2 = vpop.xlane.xlu1 %1086 }
 0x1ce   : > { %v2185_v62 = vadd.f32 0.0036580483, %v2184_v17  ;;  %v2196_v49 = vadd.f32 0.014752088, %v2195_v55  ;;  %v1438_v38 = vsub.f32 1.5, %v1437_v41  ;;  %vm2169_vm12 = vweird.f32 %v10197_v21 }
 0x1cf   : > { %v2165_v15 = vsub.f32 1.0, %v2164_v19  ;;  %vm11622_vm13 = vcmp.eq.f32.partialorder %v2172_v23, 8.507059e+37  ;;  %3172 = vst.msk [vmem:[#allocation2 + $0x90] sm:$0xff] %vm878_vm1, %v3139_v33  ;;  %v1218_v39 = vsub.f32 %v1154_v42, %v1186_v43  ;;  %v960_v5 = vsel %vm878_vm1, %v11611_v32, 0.0  ;;  %vm2170_vm15 = vmor %vm2168_vm10, %vm2169_vm12 }
 0x1d0   : > { %v2186_v13 = vmul.f32 %v2185_v62, %v11582_v30  ;;  %v2197_v0 = vmul.f32 %v2196_v49, %v11582_v30  ;;  %v1439_v53 = vmul.f32 %v11588_v3, %v1438_v38  ;;  %961 = vadd.xlane.f32.xlu1 %v960_v5  ;;  %v1041_v23 = vmul.f32 %v11611_v32, %v11611_v32 }
 0x1d1   : > { %v2166_v31 = vmul.f32 %v10197_v21, %v2165_v15  ;;  %v11639_v20 = vmul.f32 %v11198_v51, %v920_v44  ;;  %v2175_v55 = vor.u32 1.1754944e-38, %v2174_v50  ;;  %v1250_v19 = vmax.f32 %v1218_v39, 0.0 }
 0x1d2   : > { %v2187_v17 = vadd.f32 0.05243302, %v2186_v13  ;;  %v2198_v42 = vadd.f32 0.112945676, %v2197_v0  ;;  %v1443_v41 = vsel %vm1442_vm14, %v11588_v3, %v1439_v53  ;;  %v1127_v33 = vsel %vm878_vm1, %v1041_v23, 0.0  ;;  %v11661_v13 = vpop.f32.mrf.mxu0 }
 0x1d3   : > { %v2167_v62 = vadd.f32 %v10197_v21, %v2166_v31  ;;  %v1664_v61 = vmul.f32 %v1443_v41, %v1280_v56  ;;  %v11647_v49 = vpop.eup %10198  ;;  %v11653_v38 = vadd.f32 1e-06, %v1250_v19  ;;  %1128 = vadd.xlane.f32.xlu2 %v1127_v33  ;;  %v1187_v3 = vmul.f32 %v11639_v20, %v11639_v20  ;;  %v923_v19 = vpop.xlane.xlu2 %922 }
 0x1d4   : > { %v2188_v43 = vmul.f32 %v2187_v17, %v11582_v30  ;;  %v2199_v50 = vmul.f32 %v2198_v42, %v11582_v30  ;;  %v1155_v44 = vmul.f32 %v1087_v2, %v11198_v51  ;;  %v1445_v15 = vmul.f32 %v11647_v49, %v11614_v10 }
 0x1d5   : > { %v2171_v58 = vsel %vm2170_vm15, %v10197_v21, %v2167_v62  ;;  %v1699_v56 = vmul.f32 %v11247_v52, %v1664_v61  ;;  %10200 = vrsqrt.f32 %v11653_v38  ;;  %v11668_v53 = vsel %vm878_vm1, %v11065_v26, 0.0 }
 0x1d6   : > { %v2189_v54 = vadd.f32 0.18741608, %v2188_v43  ;;  %v2176_v34 = vsel %vm11622_vm13, %v2175_v55, %v2171_v58  ;;  %v2200_v0 = vadd.f32 0.4994258, %v2199_v50  ;;  %v1446_v31 = vmul.f32 %v11647_v49, %v1445_v15 }
 0x1d7   : > { %v2177_v21 = vmul.f32 %v2176_v34, %v11594_v16  ;;  %v11673_v5 = vadd.f32 %v11259_v28, %v1699_v56  ;;  %v1219_v48 = vsub.f32 %v1155_v44, %v1187_v3  ;;  %v963_v23 = vsel %vm878_vm1, %v11661_v13, 0.0 }
 0x1d8   : > { %v2190_v39 = vmul.f32 %v2189_v54, %v11582_v30  ;;  %v2201_v17 = vmul.f32 %v2200_v0, %v11582_v30  ;;  %v11681_v2 = vmul.f32 %v11065_v26, %v11065_v26  ;;  %v1764_v55 = vmul.f32 0.5, %v11445_v12  ;;  %964 = vadd.xlane.f32.xlu0 %v963_v23 }
 0x1d9   : > { %v9675_v16 = vclamps-f32 %v2177_v21, 1.0  ;;  %v11685_v42 = vmul.f32 0.5, %v11555_v22  ;;  %v11688_v41 = vmul.f32 0.70710677, %v11673_v5  ;;  %v1447_v43 = vmul.f32 0.5, %v1446_v31 }
 0x1da   : > { %v2191_v30 = vadd.f32 1.1283791, %v2190_v39  ;;  %v11690_v62 = vadd.f32 1.0, %v2201_v17  ;;  %v1251_v61 = vmax.f32 %v1219_v48, 0.0  ;;  %v1281_v12 = vsub.f32 %v11132_v63, %v11552_v40  ;;  %v1090_v17 = vpop.xlane.xlu0 %1089 }
 0x1db   : > { %v3108_v33 = vadd.f32 1.0, %v9675_v16  ;;  %v2220_v50 = vmul.f32 %v11688_v41, %v11688_v41  ;;  %vm1450_vm2 = vweird.f32 %v11614_v10  ;;  %v11697_v22 = vpop.eup %10200  ;;  %vm1451_vm3 = vweird.f32 %v11647_v49 }
 0x1dc   : > { %10202 = vrcp.f32 %v11690_v62  ;;  %v1042_v3 = vmul.f32 %v11661_v13, %v11661_v13  ;;  %v11704_v44 = vmul.f32 %v11198_v51, %v923_v19  ;;  %v1448_v56 = vsub.f32 1.5, %v1447_v43  ;;  %vm1452_vm5 = vmor %vm1450_vm2, %vm1451_vm3 }
 0x1dd   : > { %v3140_v58 = vmul.f32 %v3108_v33, %v1764_v55  ;;  %v11706_v54 = vmin.f32 %v2220_v50, 16.0  ;;  %v1455_v63 = vmul.f32 %v11697_v22, %v11653_v38  ;;  %v11711_v40 = vmul.f32 %v2191_v30, %v11565_v27  ;;  %v11723_v27 = vpop.f32.mrf.mxu0 }
 0x1de   : > { %v1282_v15 = vsub.f32 %v11141_v4, %v11608_v35  ;;  %vm1460_vm4 = vweird.f32 %v11653_v38  ;;  %v11716_v34 = vadd.f32 1e-06, %v1251_v61  ;;  %v1449_v39 = vmul.f32 %v11647_v49, %v1448_v56 }
 0x1df   : > { %3173 = vst.msk [vmem:[#allocation2 + $0xa8] sm:$0xff] %vm878_vm1, %v3140_v58  ;;  %v2222_v0 = vmul.f32 2.1237322e-06, %v11706_v54  ;;  %v2233_v21 = vmul.f32 3.8918573e-05, %v11706_v54  ;;  %v1456_v31 = vmul.f32 %v11697_v22, %v1455_v63  ;;  %v1130_v4 = vsel %vm878_vm1, %v1042_v3, 0.0 }
 0x1e0   : > { %v2212_v48 = vand.u32 2147483647, %v11690_v62  ;;  %10204 = vrsqrt.f32 %v11716_v34  ;;  %v1188_v35 = vmul.f32 %v11704_v44, %v11704_v44  ;;  %vm2208_vm6 = vweird.f32 %v11690_v62  ;;  %1131 = vadd.xlane.f32.xlu1 %v1130_v4 }
 0x1e1   : > { %v2223_v23 = vadd.f32 0.00028619796, %v2222_v0  ;;  %v2234_v55 = vadd.f32 0.001143296, %v2233_v21  ;;  %v1453_v16 = vsel %vm1452_vm5, %v11647_v49, %v1449_v39  ;;  %v1457_v19 = vmul.f32 0.5, %v1456_v31 }
 0x1e2   : > { %v10203_v30 = vpop.eup %10202  ;;  %v2214_v43 = vand.u32 2147483648, %v11690_v62  ;;  %v1665_v10 = vmul.f32 %v1453_v16, %v1281_v12  ;;  %v1156_v61 = vmul.f32 %v1090_v17, %v11198_v51  ;;  %v966_v33 = vsel %vm878_vm1, %v11723_v27, 0.0 }
 0x1e3   : > { %v2204_v50 = vmul.f32 %v10203_v30, %v11690_v62  ;;  %v2224_v3 = vmul.f32 %v2223_v23, %v11706_v54  ;;  %v2235_v58 = vmul.f32 %v2234_v55, %v11706_v54  ;;  %vm1461_vm7 = vweird.f32 %v11697_v22  ;;  %967 = vadd.xlane.f32.xlu2 %v966_v33 }
 0x1e4   : > { %v1700_v49 = vmul.f32 %v11247_v52, %v1665_v10  ;;  %v1458_v56 = vsub.f32 1.5, %v1457_v19  ;;  %v1220_v63 = vsub.f32 %v1156_v61, %v1188_v35  ;;  %v1043_v12 = vmul.f32 %v11723_v27, %v11723_v27  ;;  %vm1462_vm9 = vmor %vm1460_vm4, %vm1461_vm7 }
 0x1e5   : > { %v2205_v0 = vsub.f32 1.0, %v2204_v50  ;;  %vm2209_vm8 = vweird.f32 %v10203_v30  ;;  %v2225_v21 = vadd.f32 0.0036580483, %v2224_v3  ;;  %v2236_v39 = vadd.f32 0.014752088, %v2235_v58 }
 0x1e6   : > { %v11747_v31 = vpop.eup %10204  ;;  %v11750_v17 = vadd.f32 %v11259_v28, %v1700_v49  ;;  %v1459_v4 = vmul.f32 %v11697_v22, %v1458_v56  ;;  %v1252_v23 = vmax.f32 %v1220_v63, 0.0  ;;  %v1133_v55 = vsel %vm878_vm1, %v1043_v12, 0.0  ;;  %vm2210_vm11 = vmor %vm2208_vm6, %vm2209_vm8 }
 0x1e7   : > { %v2206_v52 = vmul.f32 %v10203_v30, %v2205_v0  ;;  %v2226_v35 = vmul.f32 %v2225_v21, %v11706_v54  ;;  %v2237_v16 = vmul.f32 %v2236_v39, %v11706_v54  ;;  %v1465_v19 = vmul.f32 %v11747_v31, %v11716_v34  ;;  %1134 = vadd.xlane.f32.xlu0 %v1133_v55 }
 0x1e8   : > { %vm11762_vm10 = vcmp.eq.f32.partialorder %v2212_v48, 8.507059e+37  ;;  %v2215_v10 = vor.u32 1.1754944e-38, %v2214_v43  ;;  %v11767_v61 = vmul.f32 0.70710677, %v11750_v17  ;;  %v1463_v33 = vsel %vm1462_vm9, %v11697_v22, %v1459_v4  ;;  %880 = vadd.xlane.f32.xlu1 %v11302_v57  ;;  %v11785_v57 = vld [vmem:[%s18236_s6] ss:$0 sm:$0xff] }
 0x1e9   : > { %v2207_v50 = vadd.f32 %v10203_v30, %v2206_v52  ;;  %v2227_v3 = vadd.f32 0.05243302, %v2226_v35  ;;  %v2238_v58 = vadd.f32 0.112945676, %v2237_v16  ;;  %v1666_v49 = vmul.f32 %v1463_v33, %v1282_v15 }
 0x1ea   : > { %v2260_v38 = vmul.f32 %v11767_v61, %v11767_v61  ;;  %v1466_v48 = vmul.f32 %v11747_v31, %v1465_v19  ;;  %vm1470_vm12 = vweird.f32 %v11716_v34  ;;  %v11778_v43 = vadd.f32 1e-06, %v1252_v23  ;;  %v11798_v23 = vld [vmem:[%s18237_s7] ss:$0 sm:$0xff] }
 0x1eb   : > { %v2211_v22 = vsel %vm2210_vm11, %v10203_v30, %v2207_v50  ;;  %v2228_v56 = vmul.f32 %v2227_v3, %v11706_v54  ;;  %v2239_v15 = vmul.f32 %v2238_v58, %v11706_v54  ;;  %v1701_v62 = vmul.f32 %v11785_v57, %v1666_v49  ;;  %1047 = vadd.xlane.f32.xlu2 %v11305_v45  ;;  %v926_v30 = vpop.xlane.xlu1 %925 }
 0x1ec   : > { %v2216_v63 = vsel %vm11762_vm10, %v2215_v10, %v2211_v22  ;;  %v11791_v12 = vmin.f32 %v2260_v38, 16.0  ;;  %v1467_v0 = vmul.f32 0.5, %v1466_v48  ;;  %10206 = vrsqrt.f32 %v11778_v43  ;;  %v3629_v48 = vld [vmem:[#allocation9 + $0x8] sm:$0xff] }
 0x1ed   : > { %v2217_v21 = vmul.f32 %v2216_v63, %v11711_v40  ;;  %v2229_v39 = vadd.f32 0.18741608, %v2228_v56  ;;  %v2240_v4 = vadd.f32 0.4994258, %v2239_v15  ;;  %v11801_v45 = vadd.f32 %v11798_v23, %v1701_v62  ;;  %v4117_v63 = vld [vmem:[#allocation9 + $0x28] sm:$0xff]  ;;  %10072 = vmatpush.msra.mxu2 %v3629_v48 }
 0x1ee   : > { %v2262_v55 = vmul.f32 2.1237322e-06, %v11791_v12  ;;  %v2273_v52 = vmul.f32 3.8918573e-05, %v11791_v12  ;;  %v1468_v35 = vsub.f32 1.5, %v1467_v0  ;;  %vm1471_vm13 = vweird.f32 %v11747_v31  ;;  %v3663_v0 = vld [vmem:[#allocation9 + $0x10] sm:$0xff]  ;;  %10074 = vmatpush.msra.mxu3 %v4117_v63 }
 0x1ef   : > { %v9676_v16 = vclamps-f32 %v2217_v21, 1.0  ;;  %v2230_v40 = vmul.f32 %v2229_v39, %v11706_v54  ;;  %v2241_v19 = vmul.f32 %v2240_v4, %v11706_v54  ;;  %v11809_v28 = vmul.f32 %v11198_v51, %v926_v30  ;;  %883 = vadd.xlane.f32.xlu0 %v11311_v1  ;;  %vm11820_vm14 = vmor %vm1470_vm12, %vm1471_vm13  ;;  %v3664_v1 = vld [vmem:[#allocation9 + $0x18] sm:$0xff]  ;;  %v3628_v30 = vld [vmem:[#allocation9] sm:$0xff] }
 0x1f0   : > { %v2263_v10 = vadd.f32 0.00028619796, %v2262_v55  ;;  %v2274_v33 = vadd.f32 0.001143296, %v2273_v52  ;;  %v11813_v50 = vmul.f32 0.70710677, %v11801_v45  ;;  %v1469_v3 = vmul.f32 %v11747_v31, %v1468_v35  ;;  %1050 = vadd.xlane.f32.xlu1 %v11318_v7  ;;  %10070 = vmatpush.msra.mxu1 %v3664_v1 }
 0x1f1   : > { %v3109_v58 = vadd.f32 1.0, %v9676_v16  ;;  %v2231_v49 = vadd.f32 1.1283791, %v2230_v40  ;;  %v11816_v38 = vadd.f32 1.0, %v2241_v19  ;;  %v1283_v21 = vsub.f32 %v11150_v9, %v11639_v20  ;;  %v4116_v39 = vld [vmem:[#allocation9 + $0x20] sm:$0xff]  ;;  %v3637_v4 = vld [vmem:[#allocation2 + $0x70] sm:$0xff]  ;;  %10073 = vmatpush.msra.mxu2 %v3628_v30  ;;  %3775 = vmatpush.msrb.mxu0 %v3664_v1 }
 0x1f2   : > { %v11825_v22 = vpop.eup %10206  ;;  %v2264_v56 = vmul.f32 %v2263_v10, %v11791_v12  ;;  %v2275_v15 = vmul.f32 %v2274_v33, %v11791_v12  ;;  %v2300_v62 = vmul.f32 %v11813_v50, %v11813_v50  ;;  %v1473_v34 = vsel %vm11820_vm14, %v11747_v31, %v1469_v3  ;;  %v3603_v55 = vld [vmem:[#allocation2 + $0x6f] sm:$0xff]  ;;  %10071 = vmatpush.msra.mxu1 %v3663_v0 }
 0x1f3   : > { %v3141_v7 = vmul.f32 %v3109_v58, %v11685_v42  ;;  %10208 = vrcp.f32 %v11816_v38  ;;  %v1055_v52 = vsel %vm878_vm1, %v11681_v2, 0.0  ;;  %v1284_v16 = vsub.f32 %v11159_v14, %v11704_v44  ;;  %886 = vadd.xlane.f32.xlu2 %v11374_v47  ;;  %10075 = vmatpush.msra.mxu3 %v4116_v39 }
 0x1f4   : > { %v2265_v31 = vadd.f32 0.0036580483, %v2264_v56  ;;  %v11840_v35 = vmin.f32 %v2300_v62, 16.0  ;;  %v11846_v42 = vmul.f32 %v11809_v28, %v11809_v28  ;;  %v11851_v9 = vmul.f32 0.5, %v11673_v5  ;;  %9714 = vmatmul.msk.f32.vlgmr.msra.gmra.mxu1 %vm878_vm1, %v3637_v4  ;;  %9746 = vmatmul.msk.f32.vlgmr.msra.gmra.mxu2 %vm878_vm1, %v3603_v55  ;;  %v1093_v56 = vpop.xlane.xlu2 %1092 }
 0x1f5   : > { %3174 = vst.msk [vmem:[#allocation2 + $0xb0] sm:$0xff] %vm878_vm1, %v3141_v7  ;;  %v2276_v20 = vadd.f32 0.014752088, %v2275_v15  ;;  %v1667_v2 = vmul.f32 %v1473_v34, %v1283_v21  ;;  %v1475_v40 = vmul.f32 %v11825_v22, %v11778_v43  ;;  %v11856_v19 = vmul.f32 %v2231_v49, %v11688_v41  ;;  %3776 = vmatpush.msrb.mxu0 %v3663_v0 }
 0x1f6   : > { %v2266_v10 = vmul.f32 %v2265_v31, %v11791_v12  ;;  %v2302_v33 = vmul.f32 2.1237322e-06, %v11840_v35  ;;  %vm1480_vm15 = vweird.f32 %v11778_v43  ;;  %v2313_v5 = vmul.f32 3.8918573e-05, %v11840_v35 }
 0x1f7   : > { %v2277_v47 = vmul.f32 %v2276_v20, %v11791_v12  ;;  %v1702_v3 = vmul.f32 %v11785_v57, %v1667_v2  ;;  %v1476_v58 = vmul.f32 %v11825_v22, %v1475_v40  ;;  %1053 = vadd.xlane.f32.xlu0 %v11393_v6  ;;  %vm2248_vm2 = vweird.f32 %v11816_v38  ;;  %3984 = vmatpush.msra.mxu0 %v3629_v48 }
 0x1f8   : > { %v2254_v41 = vand.u32 2147483648, %v11816_v38  ;;  %v2267_v49 = vadd.f32 0.05243302, %v2266_v10  ;;  %v2303_v54 = vadd.f32 0.00028619796, %v2302_v33  ;;  %889 = vadd.xlane.f32.xlu1 %v11668_v53  ;;  %vm1481_vm3 = vweird.f32 %v11825_v22 }
 0x1f9   : > { %v10209_v15 = vpop.eup %10208  ;;  %v2278_v62 = vadd.f32 0.112945676, %v2277_v47  ;;  %v2314_v34 = vadd.f32 0.001143296, %v2313_v5  ;;  %v11871_v63 = vadd.f32 %v11798_v23, %v1702_v3  ;;  %v1477_v7 = vmul.f32 0.5, %v1476_v58  ;;  %3985 = vmatpush.msra.mxu0 %v3628_v30  ;;  %vm1482_vm5 = vmor %vm1480_vm15, %vm1481_vm3 }
 0x1fa   : > { %v2244_v6 = vmul.f32 %v10209_v15, %v11816_v38  ;;  %v2252_v1 = vand.u32 2147483647, %v11816_v38  ;;  %v2304_v21 = vmul.f32 %v2303_v54, %v11840_v35  ;;  %v1157_v31 = vmul.f32 %v1093_v56, %v11198_v51 }
 0x1fb   : > { %v2279_v39 = vmul.f32 %v2278_v62, %v11791_v12  ;;  %v2315_v4 = vmul.f32 %v2314_v34, %v11840_v35  ;;  %v11881_v55 = vmul.f32 0.70710677, %v11871_v63  ;;  %v2268_v0 = vmul.f32 %v2267_v49, %v11791_v12  ;;  %1056 = vadd.xlane.f32.xlu2 %v1055_v52 }
 0x1fc   : > { %v2245_v53 = vsub.f32 1.0, %v2244_v6  ;;  %v2305_v20 = vadd.f32 0.0036580483, %v2304_v21  ;;  %v1478_v2 = vsub.f32 1.5, %v1477_v7  ;;  %v2255_v40 = vor.u32 1.1754944e-38, %v2254_v41 }
 0x1fd   : > { %v2280_v10 = vadd.f32 0.4994258, %v2279_v39  ;;  %v2316_v33 = vadd.f32 0.014752088, %v2315_v4  ;;  %v2340_v48 = vmul.f32 %v11881_v55, %v11881_v55  ;;  %vm2249_vm4 = vweird.f32 %v10209_v15 }
 0x1fe   : > { %v2246_v47 = vmul.f32 %v10209_v15, %v2245_v53  ;;  %v2306_v5 = vmul.f32 %v2305_v20, %v11840_v35  ;;  %v1479_v3 = vmul.f32 %v11825_v22, %v1478_v2  ;;  %v1221_v30 = vsub.f32 %v1157_v31, %v11846_v42  ;;  %vm2250_vm6 = vmor %vm2248_vm2, %vm2249_vm4  ;;  %v929_v31 = vpop.xlane.xlu0 %928 }
 0x1ff   : > { %v2281_v58 = vmul.f32 %v2280_v10, %v11791_v12  ;;  %v2317_v49 = vmul.f32 %v2316_v33, %v11840_v35  ;;  %v11891_v54 = vmin.f32 %v2340_v48, 16.0  ;;  %v2269_v41 = vadd.f32 0.18741608, %v2268_v0 }
 0x200   : > { %v2247_v52 = vadd.f32 %v10209_v15, %v2246_v47  ;;  %v2307_v56 = vadd.f32 0.05243302, %v2306_v5  ;;  %v1483_v62 = vsel %vm1482_vm5, %v11825_v22, %v1479_v3  ;;  %vm2253_vm7 = vcmp.eq.f32.partialorder %v2252_v1, 8.507059e+37 }
 0x201   : > { %v11901_v34 = vadd.f32 1.0, %v2281_v58  ;;  %v2318_v7 = vadd.f32 0.112945676, %v2317_v49  ;;  %v2342_v6 = vmul.f32 2.1237322e-06, %v11891_v54  ;;  %v1668_v43 = vmul.f32 %v1483_v62, %v1284_v16 }
 0x202   : > { %v2251_v21 = vsel %vm2250_vm6, %v10209_v15, %v2247_v52  ;;  %v2308_v42 = vmul.f32 %v2307_v56, %v11840_v35  ;;  %v2353_v39 = vmul.f32 3.8918573e-05, %v11891_v54  ;;  %v11910_v22 = vmul.f32 0.5, %v11750_v17 }
 0x203   : > { %v2256_v4 = vsel %vm2253_vm7, %v2255_v40, %v2251_v21  ;;  %10210 = vrcp.f32 %v11901_v34  ;;  %v1253_v38 = vmax.f32 %v1221_v30, 0.0  ;;  %v2270_v0 = vmul.f32 %v2269_v41, %v11791_v12  ;;  %v1096_v41 = vpop.xlane.xlu1 %1095 }
 0x204   : > { %v2257_v53 = vmul.f32 %v2256_v4, %v11856_v19  ;;  %v2309_v14 = vadd.f32 0.18741608, %v2308_v42  ;;  %v2319_v44 = vmul.f32 %v2318_v7, %v11840_v35  ;;  %v11917_v16 = vmul.f32 0.5, %v11801_v45 }
 0x205   : > { %v2343_v15 = vadd.f32 0.00028619796, %v2342_v6  ;;  %v2354_v1 = vadd.f32 0.001143296, %v2353_v39  ;;  %v1703_v20 = vmul.f32 %v11785_v57, %v1668_v43  ;;  %v11922_v10 = vmul.f32 %v11198_v51, %v929_v31 }
 0x206   : > { %v9677_v17 = vclamps-f32 %v2257_v53, 1.0  ;;  %v2310_v2 = vmul.f32 %v2309_v14, %v11840_v35  ;;  %v2320_v40 = vadd.f32 0.4994258, %v2319_v44  ;;  %v11929_v45 = vadd.f32 1e-06, %v1253_v38 }
 0x207   : > { %v2344_v19 = vmul.f32 %v2343_v15, %v11891_v54  ;;  %v2355_v12 = vmul.f32 %v2354_v1, %v11891_v54  ;;  %v11927_v33 = vadd.f32 %v11798_v23, %v1703_v20  ;;  %v2271_v47 = vadd.f32 1.1283791, %v2270_v0 }
 0x208   : > { %v3110_v48 = vadd.f32 1.0, %v9677_v17  ;;  %v2292_v5 = vand.u32 2147483647, %v11901_v34  ;;  %v2321_v3 = vmul.f32 %v2320_v40, %v11840_v35  ;;  %v2294_v49 = vand.u32 2147483648, %v11901_v34 }
 0x209   : > { %v10211_v58 = vpop.eup %10210  ;;  %v2345_v30 = vadd.f32 0.0036580483, %v2344_v19  ;;  %v2356_v52 = vadd.f32 0.014752088, %v2355_v12  ;;  %10212 = vrsqrt.f32 %v11929_v45  ;;  %v2311_v7 = vadd.f32 1.1283791, %v2310_v2 }
 0x20a   : > { %v3142_v56 = vmul.f32 %v3110_v48, %v11851_v9  ;;  %v2284_v62 = vmul.f32 %v10211_v58, %v11901_v34  ;;  %v1190_v6 = vmul.f32 %v11922_v10, %v11922_v10  ;;  %v11939_v43 = vadd.f32 1.0, %v2321_v3 }
 0x20b   : > { %v2346_v35 = vmul.f32 %v2345_v30, %v11891_v54  ;;  %v2357_v21 = vmul.f32 %v2356_v52, %v11891_v54  ;;  %v11944_v42 = vmul.f32 0.70710677, %v11927_v33  ;;  %v2272_v39 = vmul.f32 %v2271_v47, %v11767_v61 }
 0x20c   : > { %3175 = vst.msk [vmem:[#allocation2 + $0xc8] sm:$0xff] %vm878_vm1, %v3142_v56  ;;  %v2285_v9 = vsub.f32 1.0, %v2284_v62  ;;  %v1285_v4 = vsub.f32 %v11166_v18, %v11809_v28  ;;  %v1158_v38 = vmul.f32 %v1096_v41, %v11198_v51  ;;  %vm2288_vm8 = vweird.f32 %v11901_v34  ;;  %v3639_v18 = vld [vmem:[#allocation2 + $0x90] sm:$0xff] }
 0x20d   : > { %vm2289_vm9 = vweird.f32 %v10211_v58  ;;  %vm11952_vm10 = vcmp.eq.f32.partialorder %v2292_v5, 8.507059e+37  ;;  %10214 = vrcp.f32 %v11939_v43  ;;  %v2347_v0 = vadd.f32 0.05243302, %v2346_v35 }
 0x20e   : > { %v2286_v53 = vmul.f32 %v10211_v58, %v2285_v9  ;;  %v2358_v14 = vadd.f32 0.112945676, %v2357_v21  ;;  %v2380_v61 = vmul.f32 %v11944_v42, %v11944_v42  ;;  %v2295_v15 = vor.u32 1.1754944e-38, %v2294_v49  ;;  %vm2290_vm11 = vmor %vm2288_vm8, %vm2289_vm9 }
 0x20f   : > { %v11959_v44 = vpop.eup %10212  ;;  %v11962_v1 = vmul.f32 %v2311_v7, %v11813_v50  ;;  %v2332_v20 = vand.u32 2147483647, %v11939_v43  ;;  %v1222_v17 = vsub.f32 %v1158_v38, %v1190_v6  ;;  %v2348_v40 = vmul.f32 %v2347_v0, %v11891_v54 }
 0x210   : > { %v2287_v2 = vadd.f32 %v10211_v58, %v2286_v53  ;;  %v2359_v19 = vmul.f32 %v2358_v14, %v11891_v54  ;;  %v11967_v12 = vmin.f32 %v2380_v61, 16.0  ;;  %v1485_v48 = vmul.f32 %v11959_v44, %v11929_v45 }
 0x211   : > { %vm1490_vm12 = vweird.f32 %v11929_v45  ;;  %v1254_v50 = vmax.f32 %v1222_v17, 0.0  ;;  %vm593_vm13 = vcmask 122880   ;;  %v2349_v5 = vadd.f32 0.18741608, %v2348_v40  ;;  %v3638_v17 = vld [vmem:[#allocation2 + $0x88] sm:$0xff] }
 0x212   : > { %v2291_v47 = vsel %vm2290_vm11, %v10211_v58, %v2287_v2  ;;  %v2360_v3 = vadd.f32 0.4994258, %v2359_v19  ;;  %v2382_v49 = vmul.f32 2.1237322e-06, %v11967_v12  ;;  %v2393_v34 = vmul.f32 3.8918573e-05, %v11967_v12  ;;  %9715 = vmatmul.msk.f32.gmra.mxu1 %vm878_vm1, %v3638_v17 }
 0x213   : > { %v11976_v30 = vpop.eup %10214  ;;  %v2296_v52 = vsel %vm11952_vm10, %v2295_v15, %v2291_v47  ;;  %v1486_v41 = vmul.f32 %v11959_v44, %v1485_v48  ;;  %v11982_v56 = vadd.f32 1e-06, %v1254_v50  ;;  %v10778_v62 = vmov 0.0   ;;  %v932_v48 = vpop.xlane.xlu2 %931  ;;  %v4091_v17 = vld [vmem:[#allocation2 + $0x89] sm:$0xff] }
 0x214   : > { %615 = vst.msk [vmem:[#allocation2 + $0x78] sm:$0x1] %vm593_vm13, %v10778_v62  ;;  %v2297_v58 = vmul.f32 %v2296_v52, %v2272_v39  ;;  %v2324_v7 = vmul.f32 %v11976_v30, %v11939_v43  ;;  %v2334_v6 = vand.u32 2147483648, %v11939_v43  ;;  %v2350_v35 = vmul.f32 %v2349_v5, %v11891_v54 }
 0x215   : > { %594 = vst.msk [vmem:[#allocation2 + $0x7] sm:$0x1] %vm593_vm13, %v10778_v62  ;;  %v2361_v21 = vmul.f32 %v2360_v3, %v11891_v54  ;;  %v2383_v9 = vadd.f32 0.00028619796, %v2382_v49  ;;  %v2394_v38 = vadd.f32 0.001143296, %v2393_v34  ;;  %10216 = vrsqrt.f32 %v11982_v56 }
 0x216   : > { %v1487_v31 = vmul.f32 0.5, %v1486_v41  ;;  %3202 = vst.msk [vmem:[#allocation2 + $0x8] sm:$0xff] %vm878_vm1, %v10778_v62  ;;  %v9678_v53 = vclamps-f32 %v2297_v58, 1.0  ;;  %v2325_v39 = vsub.f32 1.0, %v2324_v7  ;;  %v2351_v0 = vadd.f32 1.1283791, %v2350_v35 }
 0x217   : > { %595 = vst.msk [vmem:[#allocation2 + $0x27] sm:$0x1] %vm593_vm13, %v10778_v62  ;;  %v11998_v14 = vadd.f32 1.0, %v2361_v21  ;;  %v2384_v61 = vmul.f32 %v2383_v9, %v11967_v12  ;;  %v2395_v54 = vmul.f32 %v2394_v38, %v11967_v12  ;;  %vm2329_vm14 = vweird.f32 %v11976_v30 }
 0x218   : > { %v1488_v15 = vsub.f32 1.5, %v1487_v31  ;;  %596 = vst.msk [vmem:[#allocation2 + $0x47] sm:$0x1] %vm593_vm13, %v10778_v62  ;;  %v3111_v2 = vadd.f32 1.0, %v9678_v53  ;;  %v2326_v40 = vmul.f32 %v11976_v30, %v2325_v39  ;;  %v1286_v19 = vsub.f32 %v11173_v29, %v11922_v10 }
 0x219   : > { %597 = vst.msk [vmem:[#allocation2 + $0x67] sm:$0x1] %vm593_vm13, %v10778_v62  ;;  %vm2328_vm15 = vweird.f32 %v11939_v43  ;;  %vm12012_vm2 = vcmp.eq.f32.partialorder %v2332_v20, 8.507059e+37  ;;  %10218 = vrcp.f32 %v11998_v14  ;;  %vm1491_vm3 = vweird.f32 %v11959_v44  ;;  %v1099_v43 = vpop.xlane.xlu0 %1098 }
 0x21a   : > { %598 = vst.msk [vmem:[#allocation2 + $0x87] sm:$0x1] %vm593_vm13, %v10778_v62  ;;  %v3143_v47 = vmul.f32 %v3111_v2, %v11910_v22  ;;  %v2327_v5 = vadd.f32 %v11976_v30, %v2326_v40  ;;  %v2385_v3 = vadd.f32 0.0036580483, %v2384_v61  ;;  %v2396_v49 = vadd.f32 0.014752088, %v2395_v54  ;;  %vm2330_vm4 = vmor %vm2328_vm15, %vm2329_vm14  ;;  %v935_v61 = vpop.xlane.xlu1 %934  ;;  %9716 = vmatmul.msk.f32.gmra.mxu1 %vm878_vm1, %v3639_v18 }
 0x21b   : > { %v4090_v52 = vld [vmem:[#allocation2 + $0x71] sm:$0xff]  ;;  %3203 = vst.msk [vmem:[#allocation2 + $0x10] sm:$0xff] %vm878_vm1, %v10778_v62  ;;  %v2335_v20 = vor.u32 1.1754944e-38, %v2334_v6  ;;  %v12027_v34 = vmul.f32 %v2351_v0, %v11881_v55  ;;  %v1489_v41 = vmul.f32 %v11959_v44, %v1488_v15  ;;  %v12034_v22 = vmul.f32 %v11198_v51, %v932_v48  ;;  %v12036_v58 = vpop.eup %10216  ;;  %vm1492_vm5 = vmor %vm1490_vm12, %vm1491_vm3  ;;  %v3640_v18 = vld [vmem:[#allocation2 + $0xa8] sm:$0xff] }
 0x21c   : > { %9778 = vmatmul.msk.f32.vlgmr.msra.gmra.mxu3 %vm878_vm1, %v4090_v52  ;;  %599 = vst.msk [vmem:[#allocation2 + $0xa7] sm:$0x1] %vm593_vm13, %v10778_v62  ;;  %v2331_v7 = vsel %vm2330_vm4, %v11976_v30, %v2327_v5  ;;  %v2386_v6 = vmul.f32 %v2385_v3, %v11967_v12  ;;  %v2397_v55 = vmul.f32 %v2396_v49, %v11967_v12  ;;  %vm1500_vm6 = vweird.f32 %v11982_v56 }
 0x21d   : > { %3176 = vst.msk [vmem:[#allocation2 + $0xd0] sm:$0xff] %vm878_vm1, %v3143_v47  ;;  %v2336_v35 = vsel %vm12012_vm2, %v2335_v20, %v2331_v7  ;;  %v1493_v21 = vsel %vm1492_vm5, %v11959_v44, %v1489_v41  ;;  %v1495_v9 = vmul.f32 %v12036_v58, %v11982_v56  ;;  %v1159_v30 = vmul.f32 %v1099_v43, %v11198_v51 }
 0x21e   : > { %600 = vst.msk [vmem:[#allocation2 + $0xc7] sm:$0x1] %vm593_vm13, %v10778_v62  ;;  %v2337_v38 = vmul.f32 %v2336_v35, %v11962_v1  ;;  %v2387_v31 = vadd.f32 0.05243302, %v2386_v6  ;;  %v2398_v45 = vadd.f32 0.112945676, %v2397_v55  ;;  %v1669_v53 = vmul.f32 %v1493_v21, %v1285_v4  ;;  %v1102_v35 = vpop.xlane.xlu2 %1101 }
 0x21f   : > { %601 = vst.msk [vmem:[#allocation2 + $0xe7] sm:$0x1] %vm593_vm13, %v10778_v62  ;;  %v12061_v44 = vpop.eup %10218  ;;  %vm2368_vm7 = vweird.f32 %v11998_v14  ;;  %v2374_v39 = vand.u32 2147483648, %v11998_v14  ;;  %v1496_v0 = vmul.f32 %v12036_v58, %v1495_v9  ;;  %v1191_v1 = vmul.f32 %v12034_v22, %v12034_v22 }
 0x220   : > { %602 = vst.msk [vmem:[#allocation2 + $0x107] sm:$0x1] %vm593_vm13, %v10778_v62  ;;  %v9679_v28 = vclamps-f32 %v2337_v38, 1.0  ;;  %v2364_v4 = vmul.f32 %v12061_v44, %v11998_v14  ;;  %v2388_v54 = vmul.f32 %v2387_v31, %v11967_v12  ;;  %vm1501_vm8 = vweird.f32 %v12036_v58 }
 0x221   : > { %603 = vst.msk [vmem:[#allocation2 + $0x127] sm:$0x1] %vm593_vm13, %v10778_v62  ;;  %v3604_v15 = vld [vmem:[#allocation2 + $0x87] sm:$0xff]  ;;  %v2399_v2 = vmul.f32 %v2398_v45, %v11967_v12  ;;  %v1704_v40 = vmul.f32 %v11785_v57, %v1669_v53  ;;  %v1497_v48 = vmul.f32 0.5, %v1496_v0  ;;  %v1223_v50 = vsub.f32 %v1159_v30, %v1191_v1  ;;  %vm1502_vm10 = vmor %vm1500_vm6, %vm1501_vm8 }
 0x222   : > { %604 = vst.msk [vmem:[#allocation2 + $0x147] sm:$0x1] %vm593_vm13, %v10778_v62  ;;  %9747 = vmatmul.msk.f32.gmra.mxu2 %vm878_vm1, %v3604_v15  ;;  %v3112_v47 = vadd.f32 1.0, %v9679_v28  ;;  %v2365_v5 = vsub.f32 1.0, %v2364_v4  ;;  %v2389_v3 = vadd.f32 0.18741608, %v2388_v54  ;;  %v12085_v49 = vmul.f32 %v11198_v51, %v935_v61  ;;  %9717 = vmatmul.msk.f32.gmra.mxu1 %vm878_vm1, %v3640_v18 }
 0x223   : > { %605 = vst.msk [vmem:[#allocation2 + $0x167] sm:$0x1] %vm593_vm13, %v10778_v62  ;;  %v2400_v52 = vadd.f32 0.4994258, %v2399_v2  ;;  %v12088_v43 = vadd.f32 %v11798_v23, %v1704_v40  ;;  %v1498_v20 = vsub.f32 1.5, %v1497_v48  ;;  %v1255_v41 = vmax.f32 %v1223_v50, 0.0  ;;  %v1105_v40 = vpop.xlane.xlu1 %1104 }
 0x224   : > { %606 = vst.msk [vmem:[#allocation2 + $0x187] sm:$0x1] %vm593_vm13, %v10778_v62  ;;  %9779 = vmatmul.msk.f32.gmra.mxu3 %vm878_vm1, %v4091_v17  ;;  %v3144_v7 = vmul.f32 %v3112_v47, %v11917_v16  ;;  %v2366_v6 = vmul.f32 %v12061_v44, %v2365_v5  ;;  %vm2369_vm9 = vweird.f32 %v12061_v44  ;;  %v2372_v55 = vand.u32 2147483647, %v11998_v14 }
 0x225   : > { %607 = vst.msk [vmem:[#allocation2 + $0x1a7] sm:$0x1] %vm593_vm13, %v10778_v62  ;;  %v2375_v21 = vor.u32 1.1754944e-38, %v2374_v39  ;;  %v2401_v9 = vmul.f32 %v2400_v52, %v11967_v12  ;;  %v12101_v30 = vmul.f32 0.70710677, %v12088_v43  ;;  %v1499_v38 = vmul.f32 %v12036_v58, %v1498_v20  ;;  %v938_v39 = vpop.xlane.xlu0 %937  ;;  %vm12121_vm11 = vmor %vm2368_vm7, %vm2369_vm9 }
 0x226   : > { %608 = vst.msk [vmem:[#allocation2 + $0x1c7] sm:$0x1] %vm593_vm13, %v10778_v62  ;;  %v2367_v16 = vadd.f32 %v12061_v44, %v2366_v6  ;;  %v2390_v31 = vmul.f32 %v2389_v3, %v11967_v12  ;;  %v12113_v45 = vadd.f32 1e-06, %v1255_v41  ;;  %v1192_v53 = vmul.f32 %v12085_v49, %v12085_v49 }
 0x227   : > { %3177 = vst.msk [vmem:[#allocation2 + $0xe8] sm:$0xff] %vm878_vm1, %v3144_v7  ;;  %v12125_v12 = vadd.f32 1.0, %v2401_v9  ;;  %v2420_v56 = vmul.f32 %v12101_v30, %v12101_v30  ;;  %v1503_v1 = vsel %vm1502_vm10, %v12036_v58, %v1499_v38  ;;  %v1160_v61 = vmul.f32 %v1102_v35, %v11198_v51  ;;  %v3605_v58 = vld [vmem:[#allocation2 + $0x8f] sm:$0xff] }
 0x228   : > { %609 = vst.msk [vmem:[#allocation2 + $0x1e7] sm:$0x1] %vm593_vm13, %v10778_v62  ;;  %v2371_v14 = vsel %vm12121_vm11, %v12061_v44, %v2367_v16  ;;  %vm2373_vm12 = vcmp.eq.f32.partialorder %v2372_v55, 8.507059e+37  ;;  %v1670_v28 = vmul.f32 %v1503_v1, %v1286_v19  ;;  %10220 = vrsqrt.f32 %v12113_v45 }
 0x229   : > { %610 = vst.msk [vmem:[#allocation2 + $0x207] sm:$0x1] %vm593_vm13, %v10778_v62  ;;  %v1769_v4 = vmul.f32 0.5, %v11871_v63  ;;  %v2376_v54 = vsel %vm2373_vm12, %v2375_v21, %v2371_v14  ;;  %10222 = vrcp.f32 %v12125_v12  ;;  %v12148_v44 = vmul.f32 %v11198_v51, %v938_v39  ;;  %v3606_v39 = vld [vmem:[#allocation2 + $0xa7] sm:$0xff] }
 0x22a   : > { %611 = vst.msk [vmem:[#allocation2 + $0x227] sm:$0x1] %vm593_vm13, %v10778_v62  ;;  %9748 = vmatmul.msk.f32.gmra.mxu2 %vm878_vm1, %v3605_v58  ;;  %v2377_v29 = vmul.f32 %v2376_v54, %v12027_v34  ;;  %v12153_v10 = vmul.f32 0.5, %v11927_v33  ;;  %v12155_v19 = vmin.f32 %v2420_v56, 16.0  ;;  %v1705_v63 = vmul.f32 %v11785_v57, %v1670_v28 }
 0x22b   : > { %612 = vst.msk [vmem:[#allocation2 + $0x18] sm:$0x1] %vm593_vm13, %v10778_v62  ;;  %v2391_v15 = vadd.f32 1.1283791, %v2390_v31  ;;  %v2412_v17 = vand.u32 2147483647, %v12125_v12  ;;  %v1224_v2 = vsub.f32 %v1160_v61, %v1192_v53  ;;  %v1287_v50 = vsub.f32 %v11182_v37, %v12034_v22 }
 0x22c   : > { %613 = vst.msk [vmem:[#allocation2 + $0x38] sm:$0x1] %vm593_vm13, %v10778_v62  ;;  %v9680_v48 = vclamps-f32 %v2377_v29, 1.0  ;;  %v2422_v34 = vmul.f32 2.1237322e-06, %v12155_v19  ;;  %v2414_v47 = vand.u32 2147483648, %v12125_v12  ;;  %v12169_v5 = vadd.f32 %v11798_v23, %v1705_v63 }
 0x22d   : > { %v2433_v33 = vmul.f32 3.8918573e-05, %v12155_v19  ;;  %614 = vst.msk [vmem:[#allocation2 + $0x58] sm:$0x1] %vm593_vm13, %v10778_v62  ;;  %v1256_v3 = vmax.f32 %v1224_v2, 0.0  ;;  %v1193_v52 = vmul.f32 %v12148_v44, %v12148_v44  ;;  %v1161_v55 = vmul.f32 %v1105_v40, %v11198_v51  ;;  %v941_v2 = vpop.xlane.xlu2 %940 }
 0x22e   : > { %v12175_v20 = vpop.eup %10220  ;;  %v3113_v41 = vadd.f32 1.0, %v9680_v48  ;;  %v2423_v7 = vadd.f32 0.00028619796, %v2422_v34  ;;  %3401 = vst.msk [vmem:[#allocation2 + $0x228] sm:$0xff] %vm878_vm1, %v10778_v62  ;;  %v2392_v21 = vmul.f32 %v2391_v15, %v11944_v42  ;;  %vm2408_vm14 = vweird.f32 %v12125_v12 }
 0x22f   : > { %v2434_v6 = vadd.f32 0.001143296, %v2433_v33  ;;  %v10223_v35 = vpop.eup %10222  ;;  %v12183_v9 = vmul.f32 0.70710677, %v12169_v5  ;;  %616 = vst.msk [vmem:[#allocation2 + $0x98] sm:$0x1] %vm593_vm13, %v10778_v62  ;;  %v1505_v38 = vmul.f32 %v12175_v20, %v12113_v45  ;;  %v1225_v58 = vsub.f32 %v1161_v55, %v1193_v52 }
 0x230   : > { %v3145_v16 = vmul.f32 %v3113_v41, %v1769_v4  ;;  %v2404_v31 = vmul.f32 %v10223_v35, %v12125_v12  ;;  %vm12190_vm15 = vcmp.eq.f32.partialorder %v2412_v17, 8.507059e+37  ;;  %v2424_v42 = vmul.f32 %v2423_v7, %v12155_v19  ;;  %617 = vst.msk [vmem:[#allocation2 + $0xb8] sm:$0x1] %vm593_vm13, %v10778_v62 }
 0x231   : > { %v2435_v0 = vmul.f32 %v2434_v6, %v12155_v19  ;;  %v2460_v56 = vmul.f32 %v12183_v9, %v12183_v9  ;;  %618 = vst.msk [vmem:[#allocation2 + $0xd8] sm:$0x1] %vm593_vm13, %v10778_v62  ;;  %v1506_v1 = vmul.f32 %v12175_v20, %v1505_v38  ;;  %v12203_v61 = vadd.f32 1e-06, %v1256_v3 }
 0x232   : > { %9749 = vmatmul.msk.f32.gmra.mxu2 %vm878_vm1, %v3606_v39  ;;  %3178 = vst.msk [vmem:[#allocation2 + $0xf0] sm:$0xff] %vm878_vm1, %v3145_v16  ;;  %v2405_v18 = vsub.f32 1.0, %v2404_v31  ;;  %v2415_v14 = vor.u32 1.1754944e-38, %v2414_v47  ;;  %v2425_v28 = vadd.f32 0.0036580483, %v2424_v42  ;;  %vm2409_vm2 = vweird.f32 %v10223_v35 }
 0x233   : > { %v2436_v4 = vadd.f32 0.014752088, %v2435_v0  ;;  %v12207_v54 = vmin.f32 %v2460_v56, 16.0  ;;  %619 = vst.msk [vmem:[#allocation2 + $0xf8] sm:$0x1] %vm593_vm13, %v10778_v62  ;;  %v1507_v29 = vmul.f32 0.5, %v1506_v1  ;;  %10224 = vrsqrt.f32 %v12203_v61  ;;  %vm2410_vm5 = vmor %vm2408_vm14, %vm2409_vm2 }
 0x234   : > { %v2406_v63 = vmul.f32 %v10223_v35, %v2405_v18  ;;  %v2426_v15 = vmul.f32 %v2425_v28, %v12155_v19  ;;  %620 = vst.msk [vmem:[#allocation2 + $0x118] sm:$0x1] %vm593_vm13, %v10778_v62  ;;  %v1257_v17 = vmax.f32 %v1225_v58, 0.0  ;;  %vm1510_vm3 = vweird.f32 %v12113_v45 }
 0x235   : > { %v2437_v40 = vmul.f32 %v2436_v4, %v12155_v19  ;;  %v2462_v48 = vmul.f32 2.1237322e-06, %v12207_v54  ;;  %v2473_v34 = vmul.f32 3.8918573e-05, %v12207_v54  ;;  %621 = vst.msk [vmem:[#allocation2 + $0x138] sm:$0x1] %vm593_vm13, %v10778_v62  ;;  %vm1511_vm4 = vweird.f32 %v12175_v20 }
 0x236   : > { %v2407_v33 = vadd.f32 %v10223_v35, %v2406_v63  ;;  %v2427_v47 = vadd.f32 0.05243302, %v2426_v15  ;;  %622 = vst.msk [vmem:[#allocation2 + $0x158] sm:$0x1] %vm593_vm13, %v10778_v62  ;;  %v1508_v3 = vsub.f32 1.5, %v1507_v29  ;;  %v4092_v52 = vld [vmem:[#allocation2 + $0x91] sm:$0xff]  ;;  %v12229_v55 = vmul.f32 %v11198_v51, %v941_v2  ;;  %vm1512_vm6 = vmor %vm1510_vm3, %vm1511_vm4  ;;  %v1108_v63 = vpop.xlane.xlu0 %1107 }
 0x237   : > { %v2438_v41 = vadd.f32 0.112945676, %v2437_v40  ;;  %v2463_v7 = vadd.f32 0.00028619796, %v2462_v48  ;;  %v2474_v6 = vadd.f32 0.001143296, %v2473_v34  ;;  %9780 = vmatmul.msk.f32.gmra.mxu3 %vm878_vm1, %v4092_v52  ;;  %vm1520_vm7 = vweird.f32 %v12203_v61 }
 0x238   : > { %v2411_v38 = vsel %vm2410_vm5, %v10223_v35, %v2407_v33  ;;  %v2428_v16 = vmul.f32 %v2427_v47, %v12155_v19  ;;  %623 = vst.msk [vmem:[#allocation2 + $0x178] sm:$0x1] %vm593_vm13, %v10778_v62  ;;  %v1509_v31 = vmul.f32 %v12175_v20, %v1508_v3  ;;  %v12235_v42 = vadd.f32 1e-06, %v1257_v17  ;;  %v4093_v17 = vld [vmem:[#allocation2 + $0xa9] sm:$0xff] }
 0x239   : > { %v12237_v12 = vpop.eup %10224  ;;  %v2416_v39 = vsel %vm12190_vm15, %v2415_v14, %v2411_v38  ;;  %v2439_v0 = vmul.f32 %v2438_v41, %v12155_v19  ;;  %v2464_v56 = vmul.f32 %v2463_v7, %v12207_v54  ;;  %v2475_v35 = vmul.f32 %v2474_v6, %v12207_v54  ;;  %624 = vst.msk [vmem:[#allocation2 + $0x198] sm:$0x1] %vm593_vm13, %v10778_v62  ;;  %v3607_v48 = vld [vmem:[#allocation2 + $0xaf] sm:$0xff] }
 0x23a   : > { %v2417_v1 = vmul.f32 %v2416_v39, %v2392_v21  ;;  %v2429_v18 = vadd.f32 0.18741608, %v2428_v16  ;;  %625 = vst.msk [vmem:[#allocation2 + $0x1b8] sm:$0x1] %vm593_vm13, %v10778_v62  ;;  %v1513_v53 = vsel %vm1512_vm6, %v12175_v20, %v1509_v31  ;;  %v1515_v14 = vmul.f32 %v12237_v12, %v12203_v61  ;;  %9750 = vmatmul.msk.f32.gmra.mxu2 %vm878_vm1, %v3607_v48  ;;  %v944_v16 = vpop.xlane.xlu1 %943 }
 0x23b   : > { %v2440_v28 = vadd.f32 0.4994258, %v2439_v0  ;;  %v2465_v58 = vadd.f32 0.0036580483, %v2464_v56  ;;  %v2476_v4 = vadd.f32 0.014752088, %v2475_v35  ;;  %v1671_v29 = vmul.f32 %v1513_v53, %v1287_v50 }
 0x23c   : > { %v9681_v45 = vclamps-f32 %v2417_v1, 1.0  ;;  %v2430_v21 = vmul.f32 %v2429_v18, %v12155_v19  ;;  %626 = vst.msk [vmem:[#allocation2 + $0x1d8] sm:$0x1] %vm593_vm13, %v10778_v62  ;;  %v1516_v15 = vmul.f32 %v12237_v12, %v1515_v14  ;;  %v1194_v20 = vmul.f32 %v12229_v55, %v12229_v55  ;;  %v3641_v50 = vld [vmem:[#allocation2 + $0xb0] sm:$0xff] }
 0x23d   : > { %v2441_v2 = vmul.f32 %v2440_v28, %v12155_v19  ;;  %v2466_v40 = vmul.f32 %v2465_v58, %v12207_v54  ;;  %v2477_v37 = vmul.f32 %v2476_v4, %v12207_v54  ;;  %627 = vst.msk [vmem:[#allocation2 + $0x1f8] sm:$0x1] %vm593_vm13, %v10778_v62  ;;  %v1706_v22 = vmul.f32 %v11785_v57, %v1671_v29 }
 0x23e   : > { %v3114_v34 = vadd.f32 1.0, %v9681_v45  ;;  %628 = vst.msk [vmem:[#allocation2 + $0x218] sm:$0x1] %vm593_vm13, %v10778_v62  ;;  %v1517_v33 = vmul.f32 0.5, %v1516_v15  ;;  %10226 = vrsqrt.f32 %v12235_v42  ;;  %v1162_v19 = vmul.f32 %v1108_v63, %v11198_v51  ;;  %9718 = vmatmul.msk.f32.gmra.mxu1 %vm878_vm1, %v3641_v50  ;;  %v4094_v15 = vld [vmem:[#allocation2 + $0xb1] sm:$0xff] }
 0x23f   : > { %v12276_v47 = vadd.f32 1.0, %v2441_v2  ;;  %v2467_v3 = vadd.f32 0.05243302, %v2466_v40  ;;  %v2478_v52 = vadd.f32 0.112945676, %v2477_v37  ;;  %3402 = vst.msk [vmem:[#allocation2 + $0x230] sm:$0xff] %vm878_vm1, %v10778_v62  ;;  %v12281_v57 = vadd.f32 %v11798_v23, %v1706_v22  ;;  %9781 = vmatmul.msk.f32.gmra.mxu3 %vm878_vm1, %v4093_v17 }
 0x240   : > { %v3146_v41 = vmul.f32 %v3114_v34, %v12153_v10  ;;  %629 = vst.msk [vmem:[#allocation2 + $0x238] sm:$0x1] %vm593_vm13, %v10778_v62  ;;  %v1288_v7 = vsub.f32 %v11191_v46, %v12085_v49  ;;  %v1518_v6 = vsub.f32 1.5, %v1517_v33  ;;  %v2431_v38 = vadd.f32 1.1283791, %v2430_v21 }
 0x241   : > { %10228 = vrcp.f32 %v12276_v47  ;;  %3201 = vst.msk [vmem:[#allocation2] sm:$0xff] %vm878_vm1, %v10778_v62  ;;  %vm1521_vm8 = vweird.f32 %v12237_v12  ;;  %v12296_v10 = vmul.f32 0.5, %v12088_v43  ;;  %v2468_v31 = vmul.f32 %v2467_v3, %v12207_v54  ;;  %v12353_v22 = vld [vmem:[%s18236_s6] ss:$0 sm:$0xff] }
 0x242   : > { %3179 = vst.msk [vmem:[#allocation2 + $0x108] sm:$0xff] %vm878_vm1, %v3146_v41  ;;  %v2479_v46 = vmul.f32 %v2478_v52, %v12207_v54  ;;  %v12301_v49 = vmul.f32 0.70710677, %v12281_v57  ;;  %v2452_v39 = vand.u32 2147483647, %v12276_v47  ;;  %v1519_v0 = vmul.f32 %v12237_v12, %v1518_v6  ;;  %vm1522_vm13 = vmor %vm1520_vm7, %vm1521_vm8  ;;  %v3642_v41 = vld [vmem:[#allocation2 + $0xc8] sm:$0xff] }
 0x243   : > { %3204 = vst.msk [vmem:[#allocation2 + $0x18] sm:$0xff] %vm878_vm1, %v10778_v62  ;;  %v1289_v56 = vsub.f32 %v11206_v59, %v12148_v44  ;;  %v1226_v35 = vsub.f32 %v1162_v19, %v1194_v20  ;;  %v2469_v1 = vadd.f32 0.18741608, %v2468_v31  ;;  %v12320_v14 = vmul.f32 %v11198_v51, %v944_v16  ;;  %v1111_v16 = vpop.xlane.xlu2 %1110  ;;  %v3608_v31 = vld [vmem:[#allocation2 + $0xc7] sm:$0xff] }
 0x244   : > { %v12309_v43 = vpop.eup %10226  ;;  %v2480_v18 = vadd.f32 0.4994258, %v2479_v46  ;;  %3400 = vst.msk [vmem:[#allocation2 + $0x220] sm:$0xff] %vm878_vm1, %v10778_v62  ;;  %v2500_v53 = vmul.f32 %v12301_v49, %v12301_v49  ;;  %v12323_v28 = vmul.f32 %v2431_v38, %v12101_v30  ;;  %v1523_v58 = vsel %vm1522_vm13, %v12237_v12, %v1519_v0  ;;  %9751 = vmatmul.msk.f32.gmra.mxu2 %vm878_vm1, %v3608_v31 }
 0x245   : > { %3403 = vst.msk [vmem:[#allocation2 + $0x238] sm:$0xff] %vm878_vm1, %v10778_v62  ;;  %v1525_v4 = vmul.f32 %v12309_v43, %v12235_v42  ;;  %v1258_v29 = vmax.f32 %v1226_v35, 0.0  ;;  %v2454_v63 = vand.u32 2147483648, %v12276_v47  ;;  %v1672_v21 = vmul.f32 %v1523_v58, %v1288_v7  ;;  %v4393_v58 = vld [vmem:[#allocation9 + $0x38] sm:$0xff] }
 0x246   : > { %v2481_v61 = vmul.f32 %v2480_v18, %v12207_v54  ;;  %v12332_v45 = vmin.f32 %v2500_v53, 16.0  ;;  %vm2448_vm9 = vweird.f32 %v12276_v47  ;;  %v2470_v30 = vmul.f32 %v2469_v1, %v12207_v54  ;;  %9719 = vmatmul.msk.f32.gmra.mxu1 %vm878_vm1, %v3642_v41 }
 0x247   : > { %v10229_v20 = vpop.eup %10228  ;;  %v1526_v62 = vmul.f32 %v12309_v43, %v1525_v4  ;;  %vm1530_vm10 = vweird.f32 %v12235_v42  ;;  %9782 = vmatmul.msk.f32.gmra.mxu3 %vm878_vm1, %v4094_v15  ;;  %vm12340_vm11 = vcmp.eq.f32.partialorder %v2452_v39, 8.507059e+37  ;;  %v12346_v40 = vadd.f32 1e-06, %v1258_v29  ;;  %v12384_v4 = vpop.f32.mrf.mxu0  ;;  %4504 = vmatpush.msrb.mxu1 %v4393_v58 }
 0x248   : > { %v2444_v12 = vmul.f32 %v10229_v20, %v12276_v47  ;;  %v12344_v2 = vadd.f32 1.0, %v2481_v61  ;;  %v2502_v37 = vmul.f32 2.1237322e-06, %v12332_v45  ;;  %v2513_v54 = vmul.f32 3.8918573e-05, %v12332_v45 }
 0x249   : > { %v1707_v50 = vmul.f32 %v12353_v22, %v1672_v21  ;;  %v1527_v48 = vmul.f32 0.5, %v1526_v62  ;;  %v2455_v33 = vor.u32 1.1754944e-38, %v2454_v63  ;;  %vm1531_vm12 = vweird.f32 %v12309_v43 }
 0x24a   : > { %v2445_v34 = vsub.f32 1.0, %v2444_v12  ;;  %10230 = vrcp.f32 %v12344_v2  ;;  %vm2449_vm14 = vweird.f32 %v10229_v20  ;;  %v2471_v19 = vadd.f32 1.1283791, %v2470_v30  ;;  %vm12380_vm15 = vmor %vm1530_vm10, %vm1531_vm12 }
 0x24b   : > { %v2503_v3 = vadd.f32 0.00028619796, %v2502_v37  ;;  %v12359_v52 = vadd.f32 %v11798_v23, %v1707_v50  ;;  %v2514_v6 = vadd.f32 0.001143296, %v2513_v54  ;;  %v1528_v38 = vsub.f32 1.5, %v1527_v48  ;;  %vm2450_vm2 = vmor %vm2448_vm9, %vm2449_vm14 }
 0x24c   : > { %v2446_v7 = vmul.f32 %v10229_v20, %v2445_v34  ;;  %10232 = vrsqrt.f32 %v12346_v40  ;;  %v2492_v46 = vand.u32 2147483647, %v12344_v2  ;;  %v2494_v39 = vand.u32 2147483648, %v12344_v2 }
 0x24d   : > { %v2504_v0 = vmul.f32 %v2503_v3, %v12332_v45  ;;  %v12368_v23 = vmul.f32 %v12320_v14, %v12320_v14  ;;  %v2515_v1 = vmul.f32 %v2514_v6, %v12332_v45  ;;  %v12373_v18 = vmul.f32 0.70710677, %v12359_v52 }
 0x24e   : > { %v2447_v35 = vadd.f32 %v10229_v20, %v2446_v7  ;;  %v1529_v53 = vmul.f32 %v12309_v43, %v1528_v38  ;;  %v2472_v29 = vmul.f32 %v2471_v19, %v12183_v9  ;;  %v12391_v61 = vmul.f32 %v1111_v16, %v11198_v51 }
 0x24f   : > { %v2505_v63 = vadd.f32 0.0036580483, %v2504_v0  ;;  %v969_v21 = vsel %vm878_vm1, %v12384_v4, 0.0  ;;  %v2516_v30 = vadd.f32 0.014752088, %v2515_v1  ;;  %v2540_v62 = vmul.f32 %v12373_v18, %v12373_v18 }
 0x250   : > { %v10231_v42 = vpop.eup %10230  ;;  %v2451_v15 = vsel %vm2450_vm2, %v10229_v20, %v2447_v35  ;;  %v1533_v47 = vsel %vm12380_vm15, %v12309_v43, %v1529_v53  ;;  %970 = vadd.xlane.f32.xlu0 %v969_v21  ;;  %vm12403_vm3 = vcmp.eq.f32.partialorder %v2492_v46, 8.507059e+37  ;;  %v2495_v54 = vor.u32 1.1754944e-38, %v2494_v39  ;;  %v12428_v39 = vld [vmem:[%s18237_s7] ss:$0 sm:$0xff]  ;;  %v4669_v53 = vld [vmem:[#allocation9 + $0x48] sm:$0xff] }
 0x251   : > { %v2456_v9 = vsel %vm12340_vm11, %v2455_v33, %v2451_v15  ;;  %v2484_v12 = vmul.f32 %v10231_v42, %v12344_v2  ;;  %v2506_v20 = vmul.f32 %v2505_v63, %v12332_v45  ;;  %v2517_v34 = vmul.f32 %v2516_v30, %v12332_v45  ;;  %4780 = vmatpush.msrb.mxu2 %v4669_v53 }
 0x252   : > { %v12408_v50 = vpop.eup %10232  ;;  %v2457_v48 = vmul.f32 %v2456_v9, %v12323_v28  ;;  %v12412_v43 = vmin.f32 %v2540_v62, 16.0  ;;  %v1673_v17 = vmul.f32 %v1533_v47, %v1289_v56  ;;  %vm2489_vm4 = vweird.f32 %v10231_v42  ;;  %v4095_v47 = vld [vmem:[#allocation2 + $0xc9] sm:$0xff] }
 0x253   : > { %v2485_v33 = vsub.f32 1.0, %v2484_v12  ;;  %v2507_v19 = vadd.f32 0.05243302, %v2506_v20  ;;  %v1535_v3 = vmul.f32 %v12408_v50, %v12346_v40  ;;  %v2518_v7 = vadd.f32 0.112945676, %v2517_v34  ;;  %9783 = vmatmul.msk.f32.gmra.mxu3 %vm878_vm1, %v4095_v47 }
 0x254   : > { %v9682_v41 = vclamps-f32 %v2457_v48, 1.0  ;;  %v2542_v6 = vmul.f32 2.1237322e-06, %v12412_v43  ;;  %v1708_v28 = vmul.f32 %v12353_v22, %v1673_v17  ;;  %v2553_v31 = vmul.f32 3.8918573e-05, %v12412_v43 }
 0x255   : > { %v2486_v38 = vmul.f32 %v10231_v42, %v2485_v33  ;;  %v2508_v16 = vmul.f32 %v2507_v19, %v12332_v45  ;;  %v1536_v59 = vmul.f32 %v12408_v50, %v1535_v3  ;;  %v2519_v56 = vmul.f32 %v2518_v7, %v12332_v45 }
 0x256   : > { %v3115_v44 = vadd.f32 1.0, %v9682_v41  ;;  %v2543_v46 = vadd.f32 0.00028619796, %v2542_v6  ;;  %v12431_v0 = vadd.f32 %v12428_v39, %v1708_v28  ;;  %vm2488_vm5 = vweird.f32 %v12344_v2  ;;  %v3643_v6 = vld [vmem:[#allocation2 + $0xd0] sm:$0xff] }
 0x257   : > { %v2487_v35 = vadd.f32 %v10231_v42, %v2486_v38  ;;  %v2509_v1 = vadd.f32 0.18741608, %v2508_v16  ;;  %v2554_v63 = vadd.f32 0.001143296, %v2553_v31  ;;  %vm2490_vm6 = vmor %vm2488_vm5, %vm2489_vm4  ;;  %v2520_v15 = vadd.f32 0.4994258, %v2519_v56  ;;  %9720 = vmatmul.msk.f32.gmra.mxu1 %vm878_vm1, %v3643_v6 }
 0x258   : > { %v3147_v21 = vmul.f32 %v3115_v44, %v12296_v10  ;;  %v2544_v30 = vmul.f32 %v2543_v46, %v12412_v43  ;;  %v1227_v62 = vsub.f32 %v12391_v61, %v12368_v23  ;;  %v12442_v20 = vmul.f32 0.70710677, %v12431_v0  ;;  %v3609_v28 = vld [vmem:[#allocation2 + $0xcf] sm:$0xff] }
 0x259   : > { %v2491_v9 = vsel %vm2490_vm6, %v10231_v42, %v2487_v35  ;;  %v2510_v2 = vmul.f32 %v2509_v1, %v12332_v45  ;;  %v2555_v12 = vmul.f32 %v2554_v63, %v12412_v43  ;;  %v2521_v48 = vmul.f32 %v2520_v15, %v12332_v45  ;;  %9752 = vmatmul.msk.f32.gmra.mxu2 %vm878_vm1, %v3609_v28  ;;  %v947_v35 = vpop.xlane.xlu0 %946  ;;  %v4096_v1 = vld [vmem:[#allocation2 + $0xd1] sm:$0xff] }
 0x25a   : > { %3180 = vst.msk [vmem:[#allocation2 + $0x110] sm:$0xff] %vm878_vm1, %v3147_v21  ;;  %v2496_v10 = vsel %vm12403_vm3, %v2495_v54, %v2491_v9  ;;  %v2545_v34 = vadd.f32 0.0036580483, %v2544_v30  ;;  %v1537_v23 = vmul.f32 0.5, %v1536_v59  ;;  %v2580_v17 = vmul.f32 %v12442_v20, %v12442_v20 }
 0x25b   : > { %v2497_v61 = vmul.f32 %v2496_v10, %v2472_v29  ;;  %v2556_v42 = vadd.f32 0.014752088, %v2555_v12  ;;  %v12451_v33 = vadd.f32 1.0, %v2521_v48  ;;  %vm1540_vm7 = vweird.f32 %v12346_v40  ;;  %9784 = vmatmul.msk.f32.gmra.mxu3 %vm878_vm1, %v4096_v1 }
 0x25c   : > { %v2546_v19 = vmul.f32 %v2545_v34, %v12412_v43  ;;  %v1538_v3 = vsub.f32 1.5, %v1537_v23  ;;  %v12456_v54 = vmin.f32 %v2580_v17, 16.0  ;;  %vm1541_vm8 = vweird.f32 %v12408_v50 }
 0x25d   : > { %v9683_v41 = vclamps-f32 %v2497_v61, 1.0  ;;  %v2557_v37 = vmul.f32 %v2556_v42, %v12412_v43  ;;  %v1772_v45 = vmul.f32 0.5, %v12169_v5  ;;  %v2511_v29 = vadd.f32 1.1283791, %v2510_v2  ;;  %vm1542_vm13 = vmor %vm1540_vm7, %vm1541_vm8 }
 0x25e   : > { %10234 = vrcp.f32 %v12451_v33  ;;  %v1259_v7 = vmax.f32 %v1227_v62, 0.0  ;;  %v2547_v16 = vadd.f32 0.05243302, %v2546_v19  ;;  %v1539_v59 = vmul.f32 %v12408_v50, %v1538_v3  ;;  %v1114_v3 = vpop.xlane.xlu1 %1113 }
 0x25f   : > { %v3116_v38 = vadd.f32 1.0, %v9683_v41  ;;  %v2558_v31 = vadd.f32 0.112945676, %v2557_v37  ;;  %v12465_v44 = vmul.f32 0.5, %v12281_v57  ;;  %v2582_v5 = vmul.f32 2.1237322e-06, %v12456_v54 }
 0x260   : > { %v2593_v56 = vmul.f32 3.8918573e-05, %v12456_v54  ;;  %v1290_v46 = vsub.f32 %v11218_v8, %v12229_v55  ;;  %v2548_v58 = vmul.f32 %v2547_v16, %v12412_v43  ;;  %v1543_v63 = vsel %vm1542_vm13, %v12408_v50, %v1539_v59  ;;  %v3644_v41 = vld [vmem:[#allocation2 + $0xe8] sm:$0xff] }
 0x261   : > { %v3148_v53 = vmul.f32 %v3116_v38, %v1772_v45  ;;  %v2559_v57 = vmul.f32 %v2558_v31, %v12412_v43  ;;  %v2583_v21 = vadd.f32 0.00028619796, %v2582_v5  ;;  %v12479_v8 = vadd.f32 1e-06, %v1259_v7  ;;  %v3610_v37 = vld [vmem:[#allocation2 + $0xe7] sm:$0xff]  ;;  %9721 = vmatmul.msk.f32.gmra.mxu1 %vm878_vm1, %v3644_v41 }
 0x262   : > { %v2594_v15 = vadd.f32 0.001143296, %v2593_v56  ;;  %v1674_v30 = vmul.f32 %v1543_v63, %v1290_v46  ;;  %v2549_v55 = vadd.f32 0.18741608, %v2548_v58  ;;  %v1291_v62 = vsub.f32 %v11226_v25, %v12320_v14  ;;  %9753 = vmatmul.msk.f32.gmra.mxu2 %vm878_vm1, %v3610_v37 }
 0x263   : > { %3181 = vst.msk [vmem:[#allocation2 + $0x128] sm:$0xff] %vm878_vm1, %v3148_v53  ;;  %v2560_v40 = vadd.f32 0.4994258, %v2559_v57  ;;  %v12485_v47 = vmul.f32 %v11198_v51, %v947_v35  ;;  %v2584_v50 = vmul.f32 %v2583_v21, %v12456_v54  ;;  %10236 = vrsqrt.f32 %v12479_v8 }
 0x264   : > { %v10235_v9 = vpop.eup %10234  ;;  %v2595_v2 = vmul.f32 %v2594_v15, %v12456_v54  ;;  %v1709_v12 = vmul.f32 %v12353_v22, %v1674_v30  ;;  %v2532_v48 = vand.u32 2147483647, %v12451_v33  ;;  %v2534_v34 = vand.u32 2147483648, %v12451_v33 }
 0x265   : > { %v2524_v10 = vmul.f32 %v10235_v9, %v12451_v33  ;;  %v2561_v23 = vmul.f32 %v2560_v40, %v12412_v43  ;;  %v2512_v61 = vmul.f32 %v2511_v29, %v12301_v49  ;;  %v2585_v42 = vadd.f32 0.0036580483, %v2584_v50 }
 0x266   : > { %v2596_v17 = vadd.f32 0.014752088, %v2595_v2  ;;  %v12497_v19 = vadd.f32 %v12428_v39, %v1709_v12  ;;  %vm2528_vm9 = vweird.f32 %v12451_v33  ;;  %v1196_v6 = vmul.f32 %v12485_v47, %v12485_v47 }
 0x267   : > { %v2525_v45 = vsub.f32 1.0, %v2524_v10  ;;  %v12500_v7 = vadd.f32 1.0, %v2561_v23  ;;  %v2550_v49 = vmul.f32 %v2549_v55, %v12412_v43  ;;  %v2586_v29 = vmul.f32 %v2585_v42, %v12456_v54 }
 0x268   : > { %v2597_v28 = vmul.f32 %v2596_v17, %v12456_v54  ;;  %v12510_v38 = vmul.f32 0.70710677, %v12497_v19  ;;  %vm2529_vm10 = vweird.f32 %v10235_v9  ;;  %v1164_v31 = vmul.f32 %v1114_v3, %v11198_v51 }
 0x269   : > { %v2526_v16 = vmul.f32 %v10235_v9, %v2525_v45  ;;  %10238 = vrcp.f32 %v12500_v7  ;;  %v12514_v59 = vpop.eup %10236  ;;  %vm12516_vm11 = vcmp.eq.f32.partialorder %v2532_v48, 8.507059e+37  ;;  %v2535_v43 = vor.u32 1.1754944e-38, %v2534_v34  ;;  %vm2530_vm14 = vmor %vm2528_vm9, %vm2529_vm10 }
 0x26a   : > { %v2587_v56 = vadd.f32 0.05243302, %v2586_v29  ;;  %v2620_v46 = vmul.f32 %v12510_v38, %v12510_v38  ;;  %v2598_v1 = vadd.f32 0.112945676, %v2597_v28  ;;  %v1545_v53 = vmul.f32 %v12514_v59, %v12479_v8 }
 0x26b   : > { %v2527_v35 = vadd.f32 %v10235_v9, %v2526_v16  ;;  %vm1550_vm12 = vweird.f32 %v12479_v8  ;;  %v2551_v58 = vadd.f32 1.1283791, %v2550_v49  ;;  %v2572_v57 = vand.u32 2147483647, %v12500_v7 }
 0x26c   : > { %v2588_v63 = vmul.f32 %v2587_v56, %v12456_v54  ;;  %v12529_v21 = vmin.f32 %v2620_v46, 16.0  ;;  %v2599_v30 = vmul.f32 %v2598_v1, %v12456_v54  ;;  %v1546_v55 = vmul.f32 %v12514_v59, %v1545_v53  ;;  %v12551_v1 = vpop.f32.mrf.mxu0 }
 0x26d   : > { %v2531_v15 = vsel %vm2530_vm14, %v10235_v9, %v2527_v35  ;;  %v1228_v40 = vsub.f32 %v1164_v31, %v1196_v6  ;;  %v2574_v2 = vand.u32 2147483648, %v12500_v7  ;;  %v4097_v9 = vld [vmem:[#allocation2 + $0xe9] sm:$0xff]  ;;  %vm1551_vm15 = vweird.f32 %v12514_v59 }
 0x26e   : > { %v2536_v50 = vsel %vm12516_vm11, %v2535_v43, %v2531_v15  ;;  %v2622_v33 = vmul.f32 2.1237322e-06, %v12529_v21  ;;  %v2633_v12 = vmul.f32 3.8918573e-05, %v12529_v21  ;;  %v2600_v34 = vadd.f32 0.4994258, %v2599_v30  ;;  %9785 = vmatmul.msk.f32.gmra.mxu3 %vm878_vm1, %v4097_v9  ;;  %vm12563_vm4 = vmor %vm1550_vm12, %vm1551_vm15 }
 0x26f   : > { %v10239_v10 = vpop.eup %10238  ;;  %v2537_v48 = vmul.f32 %v2536_v50, %v2512_v61  ;;  %v1547_v23 = vmul.f32 0.5, %v1546_v55  ;;  %v1260_v42 = vmax.f32 %v1228_v40, 0.0  ;;  %v2589_v3 = vadd.f32 0.18741608, %v2588_v63 }
 0x270   : > { %v2564_v17 = vmul.f32 %v10239_v10, %v12500_v7  ;;  %v2623_v41 = vadd.f32 0.00028619796, %v2622_v33  ;;  %v2601_v45 = vmul.f32 %v2600_v34, %v12456_v54  ;;  %v2634_v6 = vadd.f32 0.001143296, %v2633_v12  ;;  %v4098_v34 = vld [vmem:[#allocation2 + $0xf1] sm:$0xff] }
 0x271   : > { %v9684_v37 = vclamps-f32 %v2537_v48, 1.0  ;;  %v1548_v49 = vsub.f32 1.5, %v1547_v23  ;;  %vm2569_vm2 = vweird.f32 %v10239_v10  ;;  %v12543_v28 = vadd.f32 1e-06, %v1260_v42 }
 0x272   : > { %v2565_v29 = vsub.f32 1.0, %v2564_v17  ;;  %v2624_v61 = vmul.f32 %v2623_v41, %v12529_v21  ;;  %v12545_v31 = vadd.f32 1.0, %v2601_v45  ;;  %v2635_v5 = vmul.f32 %v2634_v6, %v12529_v21 }
 0x273   : > { %v3117_v16 = vadd.f32 1.0, %v9684_v37  ;;  %v1549_v43 = vmul.f32 %v12514_v59, %v1548_v49  ;;  %v2590_v46 = vmul.f32 %v2589_v3, %v12456_v54  ;;  %10240 = vrsqrt.f32 %v12543_v28 }
 0x274   : > { %v2566_v56 = vmul.f32 %v10239_v10, %v2565_v29  ;;  %v2625_v35 = vadd.f32 0.0036580483, %v2624_v61  ;;  %v1774_v63 = vmul.f32 0.5, %v12359_v52  ;;  %v2552_v15 = vmul.f32 %v2551_v58, %v12373_v18  ;;  %v3645_v58 = vld [vmem:[#allocation2 + $0xf0] sm:$0xff] }
 0x275   : > { %v3149_v53 = vmul.f32 %v3117_v16, %v12465_v44  ;;  %10242 = vrcp.f32 %v12545_v31  ;;  %vm2568_vm3 = vweird.f32 %v12500_v7  ;;  %v2636_v40 = vadd.f32 0.014752088, %v2635_v5  ;;  %v950_v7 = vpop.xlane.xlu2 %949  ;;  %9722 = vmatmul.msk.f32.gmra.mxu1 %vm878_vm1, %v3645_v58  ;;  %v3612_v58 = vld [vmem:[#allocation2 + $0x107] sm:$0xff] }
 0x276   : > { %v2567_v30 = vadd.f32 %v10239_v10, %v2566_v56  ;;  %v2626_v55 = vmul.f32 %v2625_v35, %v12529_v21  ;;  %vm2570_vm5 = vmor %vm2568_vm3, %vm2569_vm2  ;;  %vm2573_vm6 = vcmp.eq.f32.partialorder %v2572_v57, 8.507059e+37  ;;  %v2575_v52 = vor.u32 1.1754944e-38, %v2574_v2  ;;  %v3611_v57 = vld [vmem:[#allocation2 + $0xef] sm:$0xff]  ;;  %9786 = vmatmul.msk.f32.gmra.mxu3 %vm878_vm1, %v4098_v34  ;;  %v1117_v35 = vpop.xlane.xlu0 %1116 }
 0x277   : > { %3182 = vst.msk [vmem:[#allocation2 + $0x130] sm:$0xff] %vm878_vm1, %v3149_v53  ;;  %v1553_v18 = vsel %vm12563_vm4, %v12514_v59, %v1549_v43  ;;  %v972_v44 = vsel %vm878_vm1, %v12551_v1, 0.0  ;;  %v12574_v50 = vadd.f32 1.1283791, %v2590_v46  ;;  %v2637_v12 = vmul.f32 %v2636_v40, %v12529_v21  ;;  %9754 = vmatmul.msk.f32.gmra.mxu2 %vm878_vm1, %v3611_v57  ;;  %v953_v40 = vpop.xlane.xlu1 %952 }
 0x278   : > { %v2571_v8 = vsel %vm2570_vm5, %v10239_v10, %v2567_v30  ;;  %v2627_v33 = vadd.f32 0.05243302, %v2626_v55  ;;  %973 = vadd.xlane.f32.xlu2 %v972_v44  ;;  %v1675_v59 = vmul.f32 %v1553_v18, %v1291_v62  ;;  %v1044_v48 = vmul.f32 %v12384_v4, %v12384_v4 }
 0x279   : > { %v2576_v2 = vsel %vm2573_vm6, %v2575_v52, %v2571_v8  ;;  %v1045_v10 = vmul.f32 %v12551_v1, %v12551_v1  ;;  %v12586_v23 = vpop.eup %10240  ;;  %vm2608_vm7 = vweird.f32 %v12545_v31  ;;  %v2614_v9 = vand.u32 2147483648, %v12545_v31 }
 0x27a   : > { %v2577_v42 = vmul.f32 %v2576_v2, %v2552_v15  ;;  %v2638_v17 = vadd.f32 0.112945676, %v2637_v12  ;;  %v1710_v14 = vmul.f32 %v12353_v22, %v1675_v59  ;;  %v1555_v62 = vmul.f32 %v12586_v23, %v12543_v28 }
 0x27b   : > { %v10243_v25 = vpop.eup %10242  ;;  %v1136_v3 = vsel %vm878_vm1, %v1044_v48, 0.0  ;;  %v12596_v41 = vmul.f32 %v11198_v51, %v950_v7  ;;  %v2612_v6 = vand.u32 2147483647, %v12545_v31  ;;  %v2628_v49 = vmul.f32 %v2627_v33, %v12529_v21  ;;  %v3646_v7 = vld [vmem:[#allocation2 + $0x108] sm:$0xff] }
 0x27c   : > { %v9685_v37 = vclamps-f32 %v2577_v42, 1.0  ;;  %v2604_v45 = vmul.f32 %v10243_v25, %v12545_v31  ;;  %1137 = vadd.xlane.f32.xlu1 %v1136_v3  ;;  %v2639_v29 = vmul.f32 %v2638_v17, %v12529_v21  ;;  %v1745_v61 = vadd.f32 %v12428_v39, %v1710_v14 }
 0x27d   : > { %v1556_v16 = vmul.f32 %v12586_v23, %v1555_v62  ;;  %v1139_v5 = vsel %vm878_vm1, %v1045_v10, 0.0  ;;  %v2615_v46 = vor.u32 1.1754944e-38, %v2614_v9  ;;  %vm1560_vm8 = vweird.f32 %v12543_v28  ;;  %v1120_v54 = vpop.xlane.xlu2 %1119  ;;  %9723 = vmatmul.msk.f32.gmra.mxu1 %vm878_vm1, %v3646_v7  ;;  %v4099_v28 = vld [vmem:[#allocation2 + $0x109] sm:$0xff] }
 0x27e   : > { %v3118_v43 = vadd.f32 1.0, %v9685_v37  ;;  %v2605_v56 = vsub.f32 1.0, %v2604_v45  ;;  %1140 = vadd.xlane.f32.xlu0 %v1139_v5  ;;  %v2640_v53 = vadd.f32 0.4994258, %v2639_v29  ;;  %v12606_v15 = vmul.f32 0.70710677, %v1745_v61  ;;  %9787 = vmatmul.msk.f32.gmra.mxu3 %vm878_vm1, %v4099_v28 }
 0x27f   : > { %v1557_v30 = vmul.f32 0.5, %v1556_v16  ;;  %v1197_v55 = vmul.f32 %v12596_v41, %v12596_v41  ;;  %vm2609_vm13 = vweird.f32 %v10243_v25  ;;  %v2629_v44 = vadd.f32 0.18741608, %v2628_v49  ;;  %9755 = vmatmul.msk.f32.gmra.mxu2 %vm878_vm1, %v3612_v58 }
 0x280   : > { %v3150_v52 = vmul.f32 %v3118_v43, %v1774_v63  ;;  %v2606_v18 = vmul.f32 %v10243_v25, %v2605_v56  ;;  %v2641_v8 = vmul.f32 %v2640_v53, %v12529_v21  ;;  %v2660_v33 = vmul.f32 %v12606_v15, %v12606_v15  ;;  %vm2610_vm10 = vmor %vm2608_vm7, %vm2609_vm13 }
 0x281   : > { %v1558_v12 = vsub.f32 1.5, %v1557_v30  ;;  %v1165_v57 = vmul.f32 %v1117_v35, %v11198_v51  ;;  %vm1561_vm9 = vweird.f32 %v12586_v23  ;;  %v12619_v2 = vmul.f32 %v11198_v51, %v953_v40 }
 0x282   : > { %3183 = vst.msk [vmem:[#allocation2 + $0x148] sm:$0xff] %vm878_vm1, %v3150_v52  ;;  %v2607_v63 = vadd.f32 %v10243_v25, %v2606_v18  ;;  %v1166_v59 = vmul.f32 %v1120_v54, %v11198_v51  ;;  %v12625_v48 = vadd.f32 1.0, %v2641_v8  ;;  %v12627_v10 = vmin.f32 %v2660_v33, 16.0  ;;  %vm1562_vm12 = vmor %vm1560_vm8, %vm1561_vm9  ;;  %v1123_v54 = vpop.xlane.xlu1 %1122 }
 0x283   : > { %v1559_v34 = vmul.f32 %v12586_v23, %v1558_v12  ;;  %v1229_v42 = vsub.f32 %v1165_v57, %v1197_v55  ;;  %v2592_v9 = vmul.f32 %v12574_v50, %v12442_v20  ;;  %vm2613_vm11 = vcmp.eq.f32.partialorder %v2612_v6, 8.507059e+37  ;;  %v956_v6 = vpop.xlane.xlu0 %955 }
 0x284   : > { %v2611_v17 = vsel %vm2610_vm10, %v10243_v25, %v2607_v63  ;;  %v1198_v14 = vmul.f32 %v12619_v2, %v12619_v2  ;;  %v1775_v62 = vmul.f32 0.5, %v12431_v0  ;;  %v2630_v31 = vmul.f32 %v2629_v44, %v12529_v21 }
 0x285   : > { %v2616_v3 = vsel %vm2613_vm11, %v2615_v46, %v2611_v17  ;;  %10244 = vrcp.f32 %v12625_v48  ;;  %v2662_v45 = vmul.f32 2.1237322e-06, %v12627_v10  ;;  %v2673_v49 = vmul.f32 3.8918573e-05, %v12627_v10 }
 0x286   : > { %v2617_v37 = vmul.f32 %v2616_v3, %v2592_v9  ;;  %v1292_v20 = vsub.f32 %v11251_v60, %v12485_v47  ;;  %v12646_v0 = vmul.f32 0.5, %v12497_v19  ;;  %v1563_v21 = vsel %vm1562_vm12, %v12586_v23, %v1559_v34  ;;  %v959_v3 = vpop.xlane.xlu2 %958 }
 0x287   : > { %v1261_v50 = vmax.f32 %v1229_v42, 0.0  ;;  %v1230_v25 = vsub.f32 %v1166_v59, %v1198_v14  ;;  %v12649_v16 = vmul.f32 0.5, %v1745_v61  ;;  %v2663_v5 = vadd.f32 0.00028619796, %v2662_v45 }
 0x288   : > { %v9686_v29 = vclamps-f32 %v2617_v37, 1.0  ;;  %v2674_v43 = vadd.f32 0.001143296, %v2673_v49  ;;  %v2631_v56 = vadd.f32 1.1283791, %v2630_v31  ;;  %v1676_v60 = vmul.f32 %v1563_v21, %v1292_v20 }
 0x289   : > { %v12651_v47 = vadd.f32 1e-06, %v1261_v50  ;;  %v1262_v46 = vmax.f32 %v1230_v25, 0.0  ;;  %v2664_v19 = vmul.f32 %v2663_v5, %v12627_v10  ;;  %v12656_v23 = vmul.f32 %v11198_v51, %v956_v6 }
 0x28a   : > { %v3119_v35 = vadd.f32 1.0, %v9686_v29  ;;  %v2675_v53 = vmul.f32 %v2674_v43, %v12627_v10  ;;  %v1711_v30 = vmul.f32 %v12353_v22, %v1676_v60  ;;  %v1293_v55 = vsub.f32 %v11282_v36, %v12596_v41  ;;  %v3647_v60 = vld [vmem:[#allocation2 + $0x110] sm:$0xff] }
 0x28b   : > { %v10245_v61 = vpop.eup %10244  ;;  %10246 = vrsqrt.f32 %v12651_v47  ;;  %v12663_v40 = vadd.f32 1e-06, %v1262_v46  ;;  %v2652_v44 = vand.u32 2147483647, %v12625_v48  ;;  %v2665_v7 = vadd.f32 0.0036580483, %v2664_v19  ;;  %v1126_v31 = vpop.xlane.xlu0 %1125  ;;  %9724 = vmatmul.msk.f32.gmra.mxu1 %vm878_vm1, %v3647_v60 }
 0x28c   : > { %v3151_v52 = vmul.f32 %v3119_v35, %v1775_v62  ;;  %v2644_v18 = vmul.f32 %v10245_v61, %v12625_v48  ;;  %v2654_v58 = vand.u32 2147483648, %v12625_v48  ;;  %v2676_v8 = vadd.f32 0.014752088, %v2675_v53  ;;  %v3613_v46 = vld [vmem:[#allocation2 + $0x10f] sm:$0xff] }
 0x28d   : > { %v12669_v33 = vadd.f32 %v12428_v39, %v1711_v30  ;;  %10248 = vrsqrt.f32 %v12663_v40  ;;  %v2666_v57 = vmul.f32 %v2665_v7, %v12627_v10  ;;  %v1199_v63 = vmul.f32 %v12656_v23, %v12656_v23  ;;  %9756 = vmatmul.msk.f32.gmra.mxu2 %vm878_vm1, %v3613_v46 }
 0x28e   : > { %3184 = vst.msk [vmem:[#allocation2 + $0x150] sm:$0xff] %vm878_vm1, %v3151_v52  ;;  %v2645_v12 = vsub.f32 1.0, %v2644_v18  ;;  %v1167_v59 = vmul.f32 %v1123_v54, %v11198_v51  ;;  %v2632_v34 = vmul.f32 %v2631_v56, %v12510_v38  ;;  %vm2648_vm14 = vweird.f32 %v12625_v48  ;;  %v4100_v48 = vld [vmem:[#allocation2 + $0x111] sm:$0xff] }
 0x28f   : > { %v2677_v42 = vmul.f32 %v2676_v8, %v12627_v10  ;;  %v12681_v9 = vmul.f32 0.70710677, %v12669_v33  ;;  %vm2649_vm15 = vweird.f32 %v10245_v61  ;;  %vm12683_vm2 = vcmp.eq.f32.partialorder %v2652_v44, 8.507059e+37  ;;  %9788 = vmatmul.msk.f32.gmra.mxu3 %vm878_vm1, %v4100_v48 }
 0x290   : > { %v2646_v17 = vmul.f32 %v10245_v61, %v2645_v12  ;;  %v2667_v62 = vadd.f32 0.05243302, %v2666_v57  ;;  %v2655_v45 = vor.u32 1.1754944e-38, %v2654_v58  ;;  %vm1570_vm3 = vweird.f32 %v12651_v47  ;;  %vm2650_vm4 = vmor %vm2648_vm14, %vm2649_vm15 }
 0x291   : > { %v10247_v37 = vpop.eup %10246  ;;  %v2678_v49 = vadd.f32 0.112945676, %v2677_v42  ;;  %v2700_v38 = vmul.f32 %v12681_v9, %v12681_v9  ;;  %v1231_v25 = vsub.f32 %v1167_v59, %v1199_v63  ;;  %v12701_v43 = vmul.f32 %v11198_v51, %v959_v3 }
 0x292   : > { %v2647_v20 = vadd.f32 %v10245_v61, %v2646_v17  ;;  %v2668_v21 = vmul.f32 %v2667_v62, %v12627_v10  ;;  %v1565_v50 = vmul.f32 %v10247_v37, %v12651_v47  ;;  %v1168_v56 = vmul.f32 %v1126_v31, %v11198_v51 }
 0x293   : > { %v12692_v6 = vpop.eup %10248  ;;  %v2679_v29 = vmul.f32 %v2678_v49, %v12627_v10  ;;  %v12698_v5 = vmin.f32 %v2700_v38, 16.0  ;;  %v1263_v58 = vmax.f32 %v1231_v25, 0.0  ;;  %v1200_v63 = vmul.f32 %v12701_v43, %v12701_v43 }
 0x294   : > { %v2651_v28 = vsel %vm2650_vm4, %v10245_v61, %v2647_v20  ;;  %v2669_v35 = vadd.f32 0.18741608, %v2668_v21  ;;  %v1566_v19 = vmul.f32 %v10247_v37, %v1565_v50  ;;  %v1575_v53 = vmul.f32 %v12692_v6, %v12663_v40 }
 0x295   : > { %v2656_v30 = vsel %vm12683_vm2, %v2655_v45, %v2651_v28  ;;  %v2680_v54 = vadd.f32 0.4994258, %v2679_v29  ;;  %v2702_v52 = vmul.f32 2.1237322e-06, %v12698_v5  ;;  %v2713_v18 = vmul.f32 3.8918573e-05, %v12698_v5  ;;  %v962_v29 = vpop.xlane.xlu1 %961 }
 0x296   : > { %v2657_v61 = vmul.f32 %v2656_v30, %v2632_v34  ;;  %v1567_v44 = vmul.f32 0.5, %v1566_v19  ;;  %v1576_v7 = vmul.f32 %v12692_v6, %v1575_v53  ;;  %vm1571_vm5 = vweird.f32 %v10247_v37  ;;  %v18385_v28 = vld [vmem:[#allocation29_spill] sm:$0xff]  ;;  %v1129_v30 = vpop.xlane.xlu2 %1128 }
 0x297   : > { %v2681_v8 = vmul.f32 %v2680_v54, %v12627_v10  ;;  %v2703_v12 = vadd.f32 0.00028619796, %v2702_v52  ;;  %v2714_v57 = vadd.f32 0.001143296, %v2713_v18  ;;  %v2670_v14 = vmul.f32 %v2669_v35, %v12627_v10  ;;  %vm1572_vm6 = vmor %vm1570_vm3, %vm1571_vm5 }
 0x298   : > { %v9687_v59 = vclamps-f32 %v2657_v61, 1.0  ;;  %v1568_v42 = vsub.f32 1.5, %v1567_v44  ;;  %v1577_v17 = vmul.f32 0.5, %v1576_v7  ;;  %v12722_v38 = vadd.f32 1e-06, %v1263_v58 }
 0x299   : > { %v12718_v62 = vadd.f32 1.0, %v2681_v8  ;;  %v2704_v34 = vmul.f32 %v2703_v12, %v12698_v5  ;;  %v2715_v3 = vmul.f32 %v2714_v57, %v12698_v5  ;;  %vm1580_vm7 = vweird.f32 %v12663_v40 }
 0x29a   : > { %v3120_v31 = vadd.f32 1.0, %v9687_v59  ;;  %v1569_v45 = vmul.f32 %v10247_v37, %v1568_v42  ;;  %v1578_v49 = vsub.f32 1.5, %v1577_v17  ;;  %vm1581_vm8 = vweird.f32 %v12692_v6 }
 0x29b   : > { %10250 = vrcp.f32 %v12718_v62  ;;  %v1232_v10 = vsub.f32 %v1168_v56, %v1200_v63  ;;  %v2705_v21 = vadd.f32 0.0036580483, %v2704_v34  ;;  %v2716_v50 = vadd.f32 0.014752088, %v2715_v3  ;;  %vm1582_vm13 = vmor %vm1580_vm7, %vm1581_vm8 }
 0x29c   : > { %v3152_v20 = vmul.f32 %v3120_v31, %v12646_v0  ;;  %v1573_v25 = vsel %vm1572_vm6, %v10247_v37, %v1569_v45  ;;  %v2671_v60 = vadd.f32 1.1283791, %v2670_v14  ;;  %v1294_v47 = vsub.f32 %v18385_v28, %v12619_v2 }
 0x29d   : > { %v1677_v46 = vmul.f32 %v1573_v25, %v1293_v55  ;;  %v1579_v35 = vmul.f32 %v12692_v6, %v1578_v49  ;;  %v2706_v56 = vmul.f32 %v2705_v21, %v12698_v5  ;;  %v2717_v0 = vmul.f32 %v2716_v50, %v12698_v5  ;;  %v3648_v25 = vld [vmem:[#allocation2 + $0x128] sm:$0xff] }
 0x29e   : > { %3185 = vst.msk [vmem:[#allocation2 + $0x168] sm:$0xff] %vm878_vm1, %v3152_v20  ;;  %v1295_v37 = vsub.f32 %v11519_v24, %v12656_v23  ;;  %10252 = vrsqrt.f32 %v12722_v38  ;;  %v1264_v2 = vmax.f32 %v1232_v10, 0.0  ;;  %v12747_v55 = vmul.f32 %v11198_v51, %v962_v29  ;;  %v3614_v29 = vld [vmem:[#allocation2 + $0x127] sm:$0xff]  ;;  %9725 = vmatmul.msk.f32.gmra.mxu1 %vm878_vm1, %v3648_v25 }
 0x29f   : > { %v1712_v36 = vmul.f32 %v12353_v22, %v1677_v46  ;;  %v1583_v41 = vsel %vm1582_vm13, %v12692_v6, %v1579_v35  ;;  %v2707_v19 = vadd.f32 0.05243302, %v2706_v56  ;;  %v2718_v53 = vadd.f32 0.112945676, %v2717_v0  ;;  %9757 = vmatmul.msk.f32.gmra.mxu2 %vm878_vm1, %v3614_v29 }
 0x2a0   : > { %v1678_v48 = vmul.f32 %v1583_v41, %v1294_v47  ;;  %v1296_v40 = vsub.f32 %v11568_v11, %v12701_v43  ;;  %v2672_v52 = vmul.f32 %v2671_v60, %v12606_v15  ;;  %vm2688_vm9 = vweird.f32 %v12718_v62 }
 0x2a1   : > { %v10251_v54 = vpop.eup %10250  ;;  %v12754_v18 = vadd.f32 %v12428_v39, %v1712_v36  ;;  %v12756_v6 = vadd.f32 1e-06, %v1264_v2  ;;  %v2694_v44 = vand.u32 2147483648, %v12718_v62  ;;  %v2708_v7 = vmul.f32 %v2707_v19, %v12698_v5 }
 0x2a2   : > { %v2684_v61 = vmul.f32 %v10251_v54, %v12718_v62  ;;  %v2719_v58 = vmul.f32 %v2718_v53, %v12698_v5  ;;  %v1713_v15 = vmul.f32 %v12353_v22, %v1678_v48  ;;  %v1201_v12 = vmul.f32 %v12747_v55, %v12747_v55 }
 0x2a3   : > { %v12763_v8 = vmul.f32 0.70710677, %v12754_v18  ;;  %v1169_v57 = vmul.f32 %v1129_v30, %v11198_v51  ;;  %v2709_v42 = vadd.f32 0.18741608, %v2708_v7  ;;  %10254 = vrsqrt.f32 %v12756_v6 }
 0x2a4   : > { %v12769_v63 = vpop.eup %10252  ;;  %v2685_v59 = vsub.f32 1.0, %v2684_v61  ;;  %v2720_v17 = vadd.f32 0.4994258, %v2719_v58  ;;  %v2692_v14 = vand.u32 2147483647, %v12718_v62  ;;  %v12776_v3 = vadd.f32 %v12428_v39, %v1713_v15 }
 0x2a5   : > { %v2740_v34 = vmul.f32 %v12763_v8, %v12763_v8  ;;  %v1585_v22 = vmul.f32 %v12769_v63, %v12722_v38  ;;  %vm2689_vm10 = vweird.f32 %v10251_v54  ;;  %v2710_v45 = vmul.f32 %v2709_v42, %v12698_v5 }
 0x2a6   : > { %v2686_v31 = vmul.f32 %v10251_v54, %v2685_v59  ;;  %v2721_v49 = vmul.f32 %v2720_v17, %v12698_v5  ;;  %v2695_v10 = vor.u32 1.1754944e-38, %v2694_v44  ;;  %v12785_v21 = vmul.f32 0.70710677, %v12776_v3  ;;  %vm2690_vm11 = vmor %vm2688_vm9, %vm2689_vm10 }
 0x2a7   : > { %v12782_v20 = vmin.f32 %v2740_v34, 16.0  ;;  %v1586_v50 = vmul.f32 %v12769_v63, %v1585_v22  ;;  %v2711_v46 = vadd.f32 1.1283791, %v2710_v45  ;;  %v1233_v47 = vsub.f32 %v1169_v57, %v1201_v12 }
 0x2a8   : > { %v2687_v60 = vadd.f32 %v10251_v54, %v2686_v31  ;;  %v12788_v28 = vadd.f32 1.0, %v2721_v49  ;;  %v2780_v56 = vmul.f32 %v12785_v21, %v12785_v21  ;;  %vm2693_vm12 = vcmp.eq.f32.partialorder %v2692_v14, 8.507059e+37  ;;  %v4101_v14 = vld [vmem:[#allocation2 + $0x129] sm:$0xff] }
 0x2a9   : > { %v2742_v5 = vmul.f32 2.1237322e-06, %v12782_v20  ;;  %v2753_v35 = vmul.f32 3.8918573e-05, %v12782_v20  ;;  %v1587_v0 = vmul.f32 0.5, %v1586_v50  ;;  %v12799_v36 = vpop.eup %10254  ;;  %vm1590_vm14 = vweird.f32 %v12722_v38  ;;  %9789 = vmatmul.msk.f32.gmra.mxu3 %vm878_vm1, %v4101_v14 }
 0x2aa   : > { %v2691_v41 = vsel %vm2690_vm11, %v10251_v54, %v2687_v60  ;;  %10256 = vrcp.f32 %v12788_v28  ;;  %v2734_v62 = vand.u32 2147483648, %v12788_v28  ;;  %vm1591_vm15 = vweird.f32 %v12769_v63 }
 0x2ab   : > { %v2696_v2 = vsel %vm2693_vm12, %v2695_v10, %v2691_v41  ;;  %v2743_v19 = vadd.f32 0.00028619796, %v2742_v5  ;;  %v2754_v48 = vadd.f32 0.001143296, %v2753_v35  ;;  %v12805_v30 = vmin.f32 %v2780_v56, 16.0  ;;  %vm1592_vm4 = vmor %vm1590_vm14, %vm1591_vm15 }
 0x2ac   : > { %v2697_v53 = vmul.f32 %v2696_v2, %v2672_v52  ;;  %v1588_v61 = vsub.f32 1.5, %v1587_v0  ;;  %v12808_v44 = vmul.f32 %v2711_v46, %v12681_v9  ;;  %v1595_v7 = vmul.f32 %v12799_v36, %v12756_v6 }
 0x2ad   : > { %v2744_v54 = vmul.f32 %v2743_v19, %v12782_v20  ;;  %v1265_v58 = vmax.f32 %v1233_v47, 0.0  ;;  %v2755_v12 = vmul.f32 %v2754_v48, %v12782_v20  ;;  %v2782_v57 = vmul.f32 2.1237322e-06, %v12805_v30 }
 0x2ae   : > { %v9688_v15 = vclamps-f32 %v2697_v53, 1.0  ;;  %v2793_v52 = vmul.f32 3.8918573e-05, %v12805_v30  ;;  %vm2728_vm2 = vweird.f32 %v12788_v28  ;;  %v2732_v59 = vand.u32 2147483647, %v12788_v28 }
 0x2af   : > { %v2735_v42 = vor.u32 1.1754944e-38, %v2734_v62  ;;  %v2745_v9 = vadd.f32 0.0036580483, %v2744_v54  ;;  %v1589_v17 = vmul.f32 %v12769_v63, %v1588_v61  ;;  %vm1600_vm3 = vweird.f32 %v12756_v6 }
 0x2b0   : > { %v10257_v34 = vpop.eup %10256  ;;  %v3121_v22 = vadd.f32 1.0, %v9688_v15  ;;  %v2756_v31 = vadd.f32 0.014752088, %v2755_v12  ;;  %v2783_v45 = vadd.f32 0.00028619796, %v2782_v57  ;;  %v1596_v49 = vmul.f32 %v12799_v36, %v1595_v7 }
 0x2b1   : > { %v2724_v10 = vmul.f32 %v10257_v34, %v12788_v28  ;;  %v2746_v50 = vmul.f32 %v2745_v9, %v12782_v20  ;;  %v2794_v25 = vadd.f32 0.001143296, %v2793_v52  ;;  %vm1601_vm5 = vweird.f32 %v12799_v36  ;;  %v3649_v9 = vld [vmem:[#allocation2 + $0x130] sm:$0xff] }
 0x2b2   : > { %v3153_v29 = vmul.f32 %v3121_v22, %v12649_v16  ;;  %v2757_v60 = vmul.f32 %v2756_v31, %v12782_v20  ;;  %v2784_v46 = vmul.f32 %v2783_v45, %v12805_v30  ;;  %v1593_v47 = vsel %vm1592_vm4, %v12769_v63, %v1589_v17  ;;  %v12842_v63 = vld [vmem:[%s18236_s6] ss:$0 sm:$0xff]  ;;  %9726 = vmatmul.msk.f32.gmra.mxu1 %vm878_vm1, %v3649_v9  ;;  %vm1602_vm13 = vmor %vm1600_vm3, %vm1601_vm5 }
 0x2b3   : > { %v2725_v5 = vsub.f32 1.0, %v2724_v10  ;;  %v2747_v35 = vadd.f32 0.05243302, %v2746_v50  ;;  %v2795_v56 = vmul.f32 %v2794_v25, %v12805_v30  ;;  %v1679_v0 = vmul.f32 %v1593_v47, %v1295_v37  ;;  %v965_v10 = vpop.xlane.xlu0 %964 }
 0x2b4   : > { %3186 = vst.msk [vmem:[#allocation2 + $0x170] sm:$0xff] %vm878_vm1, %v3153_v29  ;;  %vm2729_vm6 = vweird.f32 %v10257_v34  ;;  %v2758_v38 = vadd.f32 0.112945676, %v2757_v60  ;;  %v2785_v41 = vadd.f32 0.0036580483, %v2784_v46  ;;  %v1597_v16 = vmul.f32 0.5, %v1596_v49 }
 0x2b5   : > { %v2726_v2 = vmul.f32 %v10257_v34, %v2725_v5  ;;  %v2748_v62 = vmul.f32 %v2747_v35, %v12782_v20  ;;  %v2796_v19 = vadd.f32 0.014752088, %v2795_v56  ;;  %v1714_v53 = vmul.f32 %v12842_v63, %v1679_v0  ;;  %vm2730_vm7 = vmor %vm2728_vm2, %vm2729_vm6 }
 0x2b6   : > { %v2759_v24 = vmul.f32 %v2758_v38, %v12782_v20  ;;  %v2786_v23 = vmul.f32 %v2785_v41, %v12805_v30  ;;  %v1598_v37 = vsub.f32 1.5, %v1597_v16  ;;  %v12847_v48 = vadd.f32 1e-06, %v1265_v58  ;;  %v3615_v58 = vld [vmem:[#allocation2 + $0x12f] sm:$0xff] }
 0x2b7   : > { %v2727_v61 = vadd.f32 %v10257_v34, %v2726_v2  ;;  %v2749_v54 = vadd.f32 0.18741608, %v2748_v62  ;;  %v2797_v7 = vmul.f32 %v2796_v19, %v12805_v30  ;;  %v12851_v15 = vadd.f32 %v12428_v39, %v1714_v53  ;;  %9758 = vmatmul.msk.f32.gmra.mxu2 %vm878_vm1, %v3615_v58  ;;  %v4102_v39 = vld [vmem:[#allocation2 + $0x131] sm:$0xff] }
 0x2b8   : > { %v2760_v12 = vadd.f32 0.4994258, %v2759_v24  ;;  %v2787_v57 = vadd.f32 0.05243302, %v2786_v23  ;;  %v1599_v52 = vmul.f32 %v12799_v36, %v1598_v37  ;;  %10258 = vrsqrt.f32 %v12847_v48  ;;  %9790 = vmatmul.msk.f32.gmra.mxu3 %vm878_vm1, %v4102_v39 }
 0x2b9   : > { %v2731_v17 = vsel %vm2730_vm7, %v10257_v34, %v2727_v61  ;;  %vm2733_vm8 = vcmp.eq.f32.partialorder %v2732_v59, 8.507059e+37  ;;  %v2750_v14 = vmul.f32 %v2749_v54, %v12782_v20  ;;  %v2798_v22 = vadd.f32 0.112945676, %v2797_v7 }
 0x2ba   : > { %v2736_v28 = vsel %vm2733_vm8, %v2735_v42, %v2731_v17  ;;  %v2761_v31 = vmul.f32 %v2760_v12, %v12782_v20  ;;  %v2788_v45 = vmul.f32 %v2787_v57, %v12805_v30  ;;  %v12864_v49 = vmul.f32 0.70710677, %v12851_v15  ;;  %v1132_v57 = vpop.xlane.xlu1 %1131 }
 0x2bb   : > { %v2737_v59 = vmul.f32 %v2736_v28, %v12808_v44  ;;  %v2799_v34 = vmul.f32 %v2798_v22, %v12805_v30  ;;  %v1603_v42 = vsel %vm1602_vm13, %v12799_v36, %v1599_v52  ;;  %v1778_v29 = vmul.f32 0.5, %v12669_v33 }
 0x2bc   : > { %v12874_v20 = vadd.f32 1.0, %v2761_v31  ;;  %v2789_v50 = vadd.f32 0.18741608, %v2788_v45  ;;  %v2820_v25 = vmul.f32 %v12864_v49, %v12864_v49  ;;  %v1680_v6 = vmul.f32 %v1603_v42, %v1296_v40 }
 0x2bd   : > { %v9689_v60 = vclamps-f32 %v2737_v59, 1.0  ;;  %v2800_v46 = vadd.f32 0.4994258, %v2799_v34  ;;  %v2751_v47 = vadd.f32 1.1283791, %v2750_v14  ;;  %v1297_v36 = vsub.f32 %v11611_v32, %v12747_v55 }
 0x2be   : > { %v12882_v44 = vpop.eup %10258  ;;  %10260 = vrcp.f32 %v12874_v20  ;;  %v12888_v5 = vmul.f32 %v11198_v51, %v965_v10  ;;  %v2790_v56 = vmul.f32 %v2789_v50, %v12805_v30  ;;  %v12892_v43 = vmin.f32 %v2820_v25, 16.0 }
 0x2bf   : > { %v3122_v35 = vadd.f32 1.0, %v9689_v60  ;;  %v2801_v11 = vmul.f32 %v2800_v46, %v12805_v30  ;;  %v12895_v33 = vmul.f32 0.5, %v12754_v18  ;;  %v2774_v40 = vand.u32 2147483648, %v12874_v20  ;;  %v12909_v18 = vld [vmem:[%s18237_s7] ss:$0 sm:$0xff] }
 0x2c0   : > { %v1715_v0 = vmul.f32 %v12842_v63, %v1680_v6  ;;  %v1605_v38 = vmul.f32 %v12882_v44, %v12847_v48  ;;  %v2772_v16 = vand.u32 2147483647, %v12874_v20  ;;  %v2822_v62 = vmul.f32 2.1237322e-06, %v12892_v43 }
 0x2c1   : > { %v3154_v41 = vmul.f32 %v3122_v35, %v1778_v29  ;;  %v12902_v2 = vadd.f32 1.0, %v2801_v11  ;;  %v2833_v30 = vmul.f32 3.8918573e-05, %v12892_v43  ;;  %v1202_v24 = vmul.f32 %v12888_v5, %v12888_v5 }
 0x2c2   : > { %v12912_v19 = vadd.f32 %v12909_v18, %v1715_v0  ;;  %v1606_v53 = vmul.f32 %v12882_v44, %v1605_v38  ;;  %v2752_v23 = vmul.f32 %v2751_v47, %v12763_v8  ;;  %v2791_v37 = vadd.f32 1.1283791, %v2790_v56  ;;  %v1135_v38 = vpop.xlane.xlu0 %1134 }
 0x2c3   : > { %3187 = vst.msk [vmem:[#allocation2 + $0x188] sm:$0xff] %vm878_vm1, %v3154_v41  ;;  %10262 = vrcp.f32 %v12902_v2  ;;  %vm1610_vm9 = vweird.f32 %v12847_v48  ;;  %vm2768_vm10 = vweird.f32 %v12874_v20  ;;  %v2775_v54 = vor.u32 1.1754944e-38, %v2774_v40 }
 0x2c4   : > { %v10261_v61 = vpop.eup %10260  ;;  %v2823_v7 = vadd.f32 0.00028619796, %v2822_v62  ;;  %v2834_v12 = vadd.f32 0.001143296, %v2833_v30  ;;  %vm12923_vm11 = vcmp.eq.f32.partialorder %v2772_v16, 8.507059e+37  ;;  %v2814_v8 = vand.u32 2147483648, %v12902_v2 }
 0x2c5   : > { %v2764_v52 = vmul.f32 %v10261_v61, %v12874_v20  ;;  %v12929_v58 = vmul.f32 0.70710677, %v12912_v19  ;;  %vm1611_vm12 = vweird.f32 %v12882_v44  ;;  %v2812_v17 = vand.u32 2147483647, %v12902_v2 }
 0x2c6   : > { %v2824_v14 = vmul.f32 %v2823_v7, %v12892_v43  ;;  %v2835_v22 = vmul.f32 %v2834_v12, %v12892_v43  ;;  %v1607_v39 = vmul.f32 0.5, %v1606_v53  ;;  %v2792_v31 = vmul.f32 %v2791_v37, %v12785_v21  ;;  %vm12956_vm4 = vmor %vm1610_vm9, %vm1611_vm12 }
 0x2c7   : > { %v2765_v28 = vsub.f32 1.0, %v2764_v52  ;;  %v2860_v45 = vmul.f32 %v12929_v58, %v12929_v58  ;;  %v1170_v59 = vmul.f32 %v1132_v57, %v11198_v51  ;;  %vm2769_vm14 = vweird.f32 %v10261_v61 }
 0x2c8   : > { %vm2808_vm15 = vweird.f32 %v12902_v2  ;;  %v2825_v34 = vadd.f32 0.0036580483, %v2824_v14  ;;  %v2836_v42 = vadd.f32 0.014752088, %v2835_v22  ;;  %v1608_v10 = vsub.f32 1.5, %v1607_v39  ;;  %vm2770_vm5 = vmor %vm2768_vm10, %vm2769_vm14  ;;  %v3650_v14 = vld [vmem:[#allocation2 + $0x148] sm:$0xff] }
 0x2c9   : > { %v10263_v50 = vpop.eup %10262  ;;  %v2766_v25 = vmul.f32 %v10261_v61, %v2765_v28  ;;  %v2815_v6 = vor.u32 1.1754944e-38, %v2814_v8  ;;  %v12940_v29 = vmin.f32 %v2860_v45, 16.0  ;;  %v1234_v60 = vsub.f32 %v1170_v59, %v1202_v24  ;;  %v3616_v22 = vld [vmem:[#allocation2 + $0x147] sm:$0xff]  ;;  %v968_v28 = vpop.xlane.xlu2 %967  ;;  %9727 = vmatmul.msk.f32.gmra.mxu1 %vm878_vm1, %v3650_v14 }
 0x2ca   : > { %v2804_v46 = vmul.f32 %v10263_v50, %v12902_v2  ;;  %vm2809_vm2 = vweird.f32 %v10263_v50  ;;  %vm12943_vm3 = vcmp.eq.f32.partialorder %v2812_v17, 8.507059e+37  ;;  %v2826_v47 = vmul.f32 %v2825_v34, %v12892_v43  ;;  %9759 = vmatmul.msk.f32.gmra.mxu2 %vm878_vm1, %v3616_v22 }
 0x2cb   : > { %v2837_v35 = vmul.f32 %v2836_v42, %v12892_v43  ;;  %v2767_v56 = vadd.f32 %v10261_v61, %v2766_v25  ;;  %v2862_v11 = vmul.f32 2.1237322e-06, %v12940_v29  ;;  %v2873_v40 = vmul.f32 3.8918573e-05, %v12940_v29  ;;  %vm2810_vm6 = vmor %vm2808_vm15, %vm2809_vm2 }
 0x2cc   : > { %v1609_v0 = vmul.f32 %v12882_v44, %v1608_v10  ;;  %v2805_v41 = vsub.f32 1.0, %v2804_v46  ;;  %v2827_v16 = vadd.f32 0.05243302, %v2826_v47  ;;  %v1266_v30 = vmax.f32 %v1234_v60, 0.0 }
 0x2cd   : > { %v2838_v62 = vadd.f32 0.112945676, %v2837_v35  ;;  %v2771_v53 = vsel %vm2770_vm5, %v10261_v61, %v2767_v56  ;;  %v2863_v24 = vadd.f32 0.00028619796, %v2862_v11  ;;  %v2874_v37 = vadd.f32 0.001143296, %v2873_v40 }
 0x2ce   : > { %v1613_v7 = vsel %vm12956_vm4, %v12882_v44, %v1609_v0  ;;  %v2776_v48 = vsel %vm12923_vm11, %v2775_v54, %v2771_v53  ;;  %v2806_v12 = vmul.f32 %v10263_v50, %v2805_v41  ;;  %v2828_v57 = vmul.f32 %v2827_v16, %v12892_v43 }
 0x2cf   : > { %v2839_v20 = vmul.f32 %v2838_v62, %v12892_v43  ;;  %v2777_v52 = vmul.f32 %v2776_v48, %v2752_v23  ;;  %v2864_v8 = vmul.f32 %v2863_v24, %v12940_v29  ;;  %v2875_v17 = vmul.f32 %v2874_v37, %v12940_v29 }
 0x2d0   : > { %v1681_v61 = vmul.f32 %v1613_v7, %v1297_v36  ;;  %v2807_v44 = vadd.f32 %v10263_v50, %v2806_v12  ;;  %v2829_v39 = vadd.f32 0.18741608, %v2828_v57  ;;  %v12975_v54 = vadd.f32 1e-06, %v1266_v30 }
 0x2d1   : > { %v2840_v9 = vadd.f32 0.4994258, %v2839_v20  ;;  %v9690_v23 = vclamps-f32 %v2777_v52, 1.0  ;;  %v2865_v45 = vadd.f32 0.0036580483, %v2864_v8  ;;  %v12997_v56 = vmul.f32 %v11198_v51, %v968_v28  ;;  %v1048_v57 = vpop.xlane.xlu2 %1047 }
 0x2d2   : > { %v2876_v32 = vadd.f32 0.014752088, %v2875_v17  ;;  %v1716_v55 = vmul.f32 %v12842_v63, %v1681_v61  ;;  %v2811_v36 = vsel %vm2810_vm6, %v10263_v50, %v2807_v44  ;;  %v2830_v59 = vmul.f32 %v2829_v39, %v12892_v43 }
 0x2d3   : > { %v2841_v34 = vmul.f32 %v2840_v9, %v12892_v43  ;;  %10264 = vrsqrt.f32 %v12975_v54  ;;  %v3123_v42 = vadd.f32 1.0, %v9690_v23  ;;  %v2816_v10 = vsel %vm12943_vm3, %v2815_v6, %v2811_v36  ;;  %v881_v6 = vpop.xlane.xlu1 %880 }
 0x2d4   : > { %v2866_v25 = vmul.f32 %v2865_v45, %v12940_v29  ;;  %v2877_v2 = vmul.f32 %v2876_v32, %v12940_v29  ;;  %v2817_v60 = vmul.f32 %v2816_v10, %v2792_v31  ;;  %v12993_v47 = vadd.f32 %v12909_v18, %v1716_v55  ;;  %v3651_v55 = vld [vmem:[#allocation2 + $0x150] sm:$0xff] }
 0x2d5   : > { %v12990_v46 = vadd.f32 1.0, %v2841_v34  ;;  %v3155_v50 = vmul.f32 %v3123_v42, %v12895_v33  ;;  %v1780_v31 = vmul.f32 0.5, %v12776_v3  ;;  %v2831_v21 = vadd.f32 1.1283791, %v2830_v59  ;;  %v4103_v33 = vld [vmem:[#allocation2 + $0x149] sm:$0xff]  ;;  %9728 = vmatmul.msk.f32.gmra.mxu1 %vm878_vm1, %v3651_v55  ;;  %v4104_v10 = vld [vmem:[#allocation2 + $0x151] sm:$0xff] }
 0x2d6   : > { %v2867_v35 = vadd.f32 0.05243302, %v2866_v25  ;;  %v2878_v43 = vadd.f32 0.112945676, %v2877_v2  ;;  %v9691_v11 = vclamps-f32 %v2817_v60, 1.0  ;;  %v13007_v62 = vmul.f32 0.5, %v12851_v15  ;;  %9791 = vmatmul.msk.f32.gmra.mxu3 %vm878_vm1, %v4103_v33 }
 0x2d7   : > { %10266 = vrcp.f32 %v12990_v46  ;;  %3188 = vst.msk [vmem:[#allocation2 + $0x190] sm:$0xff] %vm878_vm1, %v3155_v50  ;;  %v13010_v30 = vmul.f32 0.70710677, %v12993_v47  ;;  %v1298_v53 = vsub.f32 %v11661_v13, %v12888_v5  ;;  %v13016_v3 = vmul.f32 0.5, %v12912_v19  ;;  %v3617_v42 = vld [vmem:[#allocation2 + $0x14f] sm:$0xff] }
 0x2d8   : > { %v2868_v40 = vmul.f32 %v2867_v35, %v12940_v29  ;;  %v2879_v0 = vmul.f32 %v2878_v43, %v12940_v29  ;;  %v3124_v16 = vadd.f32 1.0, %v9691_v11  ;;  %v1203_v37 = vmul.f32 %v12997_v56, %v12997_v56  ;;  %9760 = vmatmul.msk.f32.gmra.mxu2 %vm878_vm1, %v3617_v42  ;;  %v884_v43 = vpop.xlane.xlu0 %883 }
 0x2d9   : > { %v13004_v41 = vpop.eup %10264  ;;  %v13021_v7 = vmul.f32 %v11198_v51, %v881_v6  ;;  %v2900_v48 = vmul.f32 %v13010_v30, %v13010_v30  ;;  %vm1620_vm7 = vweird.f32 %v12975_v54  ;;  %v2832_v19 = vmul.f32 %v2831_v21, %v12864_v49 }
 0x2da   : > { %v2880_v24 = vadd.f32 0.4994258, %v2879_v0  ;;  %v3156_v15 = vmul.f32 %v3124_v16, %v1780_v31  ;;  %v1615_v12 = vmul.f32 %v13004_v41, %v12975_v54  ;;  %vm2848_vm8 = vweird.f32 %v12990_v46 }
 0x2db   : > { %v2869_v20 = vadd.f32 0.18741608, %v2868_v40  ;;  %v2852_v17 = vand.u32 2147483647, %v12990_v46  ;;  %v13033_v61 = vmin.f32 %v2900_v48, 16.0  ;;  %v1171_v22 = vmul.f32 %v1135_v38, %v11198_v51 }
 0x2dc   : > { %v2881_v52 = vmul.f32 %v2880_v24, %v12940_v29  ;;  %3189 = vst.msk [vmem:[#allocation2 + $0x1a8] sm:$0xff] %vm878_vm1, %v3156_v15  ;;  %v1616_v14 = vmul.f32 %v13004_v41, %v1615_v12  ;;  %v2854_v49 = vand.u32 2147483648, %v12990_v46  ;;  %v1142_v9 = vmul.f32 %v1048_v57, %v11198_v51 }
 0x2dd   : > { %v10267_v8 = vpop.eup %10266  ;;  %v2902_v28 = vmul.f32 2.1237322e-06, %v13033_v61  ;;  %v2913_v23 = vmul.f32 3.8918573e-05, %v13033_v61  ;;  %v1235_v32 = vsub.f32 %v1171_v22, %v1203_v37  ;;  %v2870_v59 = vmul.f32 %v2869_v20, %v12940_v29 }
 0x2de   : > { %v2844_v44 = vmul.f32 %v10267_v8, %v12990_v46  ;;  %v13039_v39 = vadd.f32 1.0, %v2881_v52  ;;  %v1617_v45 = vmul.f32 0.5, %v1616_v14  ;;  %v1174_v34 = vmul.f32 %v13021_v7, %v13021_v7  ;;  %9792 = vmatmul.msk.f32.gmra.mxu3 %vm878_vm1, %v4104_v10 }
 0x2df   : > { %vm2849_vm13 = vweird.f32 %v10267_v8  ;;  %v2903_v25 = vadd.f32 0.00028619796, %v2902_v28  ;;  %vm1621_vm9 = vweird.f32 %v13004_v41  ;;  %v2914_v29 = vadd.f32 0.001143296, %v2913_v23 }
 0x2e0   : > { %v2845_v36 = vsub.f32 1.0, %v2844_v44  ;;  %10268 = vrcp.f32 %v13039_v39  ;;  %v1618_v2 = vsub.f32 1.5, %v1617_v45  ;;  %v1267_v50 = vmax.f32 %v1235_v32, 0.0  ;;  %vm1622_vm11 = vmor %vm1620_vm7, %vm1621_vm9  ;;  %v1051_v44 = vpop.xlane.xlu1 %1050 }
 0x2e1   : > { %v1206_v35 = vsub.f32 %v1142_v9, %v1174_v34  ;;  %vm13052_vm10 = vcmp.eq.f32.partialorder %v2852_v17, 8.507059e+37  ;;  %v2855_v6 = vor.u32 1.1754944e-38, %v2854_v49  ;;  %v2904_v31 = vmul.f32 %v2903_v25, %v13033_v61  ;;  %vm2850_vm12 = vmor %vm2848_vm8, %vm2849_vm13 }
 0x2e2   : > { %v2846_v60 = vmul.f32 %v10267_v8, %v2845_v36  ;;  %v1619_v21 = vmul.f32 %v13004_v41, %v1618_v2  ;;  %v2871_v0 = vadd.f32 1.1283791, %v2870_v59  ;;  %v2915_v38 = vmul.f32 %v2914_v29, %v13033_v61 }
 0x2e3   : > { %v13063_v33 = vadd.f32 1e-06, %v1267_v50  ;;  %v2905_v16 = vadd.f32 0.0036580483, %v2904_v31  ;;  %v1238_v37 = vmax.f32 %v1206_v35, 0.0  ;;  %v13070_v15 = vmul.f32 %v11198_v51, %v884_v43 }
 0x2e4   : > { %v2847_v40 = vadd.f32 %v10267_v8, %v2846_v60  ;;  %v1623_v24 = vsel %vm1622_vm11, %v13004_v41, %v1619_v21  ;;  %v2916_v57 = vadd.f32 0.014752088, %v2915_v38  ;;  %vm2888_vm14 = vweird.f32 %v13039_v39 }
 0x2e5   : > { %v1682_v54 = vmul.f32 %v1623_v24, %v1298_v53  ;;  %10270 = vrsqrt.f32 %v13063_v33  ;;  %v2906_v41 = vmul.f32 %v2905_v16, %v13033_v61  ;;  %v2892_v17 = vand.u32 2147483647, %v13039_v39 }
 0x2e6   : > { %v10269_v48 = vpop.eup %10268  ;;  %v2851_v12 = vsel %vm2850_vm12, %v10267_v8, %v2847_v40  ;;  %v2917_v8 = vmul.f32 %v2916_v57, %v13033_v61  ;;  %v2894_v5 = vand.u32 2147483648, %v13039_v39  ;;  %v13085_v22 = vadd.f32 1e-06, %v1238_v37  ;;  %v3652_v57 = vld [vmem:[#allocation2 + $0x168] sm:$0xff] }
 0x2e7   : > { %v2856_v46 = vsel %vm13052_vm10, %v2855_v6, %v2851_v12  ;;  %v2884_v20 = vmul.f32 %v10269_v48, %v13039_v39  ;;  %v1717_v14 = vmul.f32 %v12842_v63, %v1682_v54  ;;  %v2907_v53 = vadd.f32 0.05243302, %v2906_v41  ;;  %9729 = vmatmul.msk.f32.gmra.mxu1 %vm878_vm1, %v3652_v57  ;;  %v3619_v57 = vld [vmem:[#allocation2 + $0x16f] sm:$0xff] }
 0x2e8   : > { %v2857_v52 = vmul.f32 %v2856_v46, %v2832_v19  ;;  %v2918_v9 = vadd.f32 0.112945676, %v2917_v8  ;;  %v1175_v19 = vmul.f32 %v13070_v15, %v13070_v15  ;;  %vm2889_vm15 = vweird.f32 %v10269_v48 }
 0x2e9   : > { %v2885_v13 = vsub.f32 1.0, %v2884_v20  ;;  %v13088_v28 = vadd.f32 %v12909_v18, %v1717_v14  ;;  %v2908_v45 = vmul.f32 %v2907_v53, %v13033_v61  ;;  %10272 = vrsqrt.f32 %v13085_v22  ;;  %vm2890_vm2 = vmor %vm2888_vm14, %vm2889_vm15  ;;  %v18394_v20 = vld [vmem:[#allocation25_spill] sm:$0xff] }
 0x2ea   : > { %v9692_v49 = vclamps-f32 %v2857_v52, 1.0  ;;  %v2919_v36 = vmul.f32 %v2918_v9, %v13033_v61  ;;  %v1143_v34 = vmul.f32 %v1051_v44, %v11198_v51  ;;  %v2895_v10 = vor.u32 1.1754944e-38, %v2894_v5 }
 0x2eb   : > { %v2886_v23 = vmul.f32 %v10269_v48, %v2885_v13  ;;  %v10271_v32 = vpop.eup %10270  ;;  %v13096_v59 = vmul.f32 0.70710677, %v13088_v28  ;;  %v2909_v25 = vadd.f32 0.18741608, %v2908_v45  ;;  %v2872_v43 = vmul.f32 %v2871_v0, %v12929_v58  ;;  %v887_v0 = vpop.xlane.xlu2 %886 }
 0x2ec   : > { %v3125_v55 = vadd.f32 1.0, %v9692_v49  ;;  %v1625_v2 = vmul.f32 %v10271_v32, %v13063_v33  ;;  %v2920_v29 = vadd.f32 0.4994258, %v2919_v36  ;;  %v1207_v35 = vsub.f32 %v1143_v34, %v1175_v19  ;;  %v1054_v19 = vpop.xlane.xlu0 %1053 }
 0x2ed   : > { %v2887_v42 = vadd.f32 %v10269_v48, %v2886_v23  ;;  %v2940_v50 = vmul.f32 %v13096_v59, %v13096_v59  ;;  %vm2893_vm3 = vcmp.eq.f32.partialorder %v2892_v17, 8.507059e+37  ;;  %v2910_v21 = vmul.f32 %v2909_v25, %v13033_v61 }
 0x2ee   : > { %v3157_v60 = vmul.f32 %v3125_v55, %v13007_v62  ;;  %v1626_v6 = vmul.f32 %v10271_v32, %v1625_v2  ;;  %v2921_v62 = vmul.f32 %v2920_v29, %v13033_v61  ;;  %v1299_v16 = vsub.f32 %v11723_v27, %v12997_v56  ;;  %v3618_v27 = vld [vmem:[#allocation2 + $0x167] sm:$0xff] }
 0x2ef   : > { %v2891_v11 = vsel %vm2890_vm2, %v10269_v48, %v2887_v42  ;;  %v13109_v40 = vmin.f32 %v2940_v50, 16.0  ;;  %v13111_v39 = vpop.eup %10272  ;;  %v1239_v58 = vmax.f32 %v1207_v35, 0.0  ;;  %vm1630_vm4 = vweird.f32 %v13063_v33  ;;  %9761 = vmatmul.msk.f32.gmra.mxu2 %vm878_vm1, %v3618_v27  ;;  %v890_v35 = vpop.xlane.xlu1 %889 }
 0x2f0   : > { %3190 = vst.msk [vmem:[#allocation2 + $0x1b0] sm:$0xff] %vm878_vm1, %v3157_v60  ;;  %v2896_v31 = vsel %vm2893_vm3, %v2895_v10, %v2891_v11  ;;  %v1627_v24 = vmul.f32 0.5, %v1626_v6  ;;  %v13115_v37 = vadd.f32 1.0, %v2921_v62  ;;  %v1335_v61 = vmul.f32 %v13111_v39, %v13085_v22  ;;  %v4105_v60 = vld [vmem:[#allocation2 + $0x169] sm:$0xff] }
 0x2f1   : > { %v2897_v38 = vmul.f32 %v2896_v31, %v2872_v43  ;;  %v2942_v48 = vmul.f32 2.1237322e-06, %v13109_v40  ;;  %v2953_v12 = vmul.f32 3.8918573e-05, %v13109_v40  ;;  %vm1631_vm5 = vweird.f32 %v10271_v32  ;;  %9793 = vmatmul.msk.f32.gmra.mxu3 %vm878_vm1, %v4105_v60  ;;  %v3620_v60 = vld [vmem:[#allocation2 + $0x187] sm:$0xff] }
 0x2f2   : > { %v1628_v46 = vsub.f32 1.5, %v1627_v24  ;;  %v2911_v56 = vadd.f32 1.1283791, %v2910_v21  ;;  %10274 = vrcp.f32 %v13115_v37  ;;  %v1270_v41 = vsub.f32 %v18394_v20, %v13021_v7  ;;  %vm1632_vm6 = vmor %vm1630_vm4, %vm1631_vm5 }
 0x2f3   : > { %v9693_v54 = vclamps-f32 %v2897_v38, 1.0  ;;  %v13127_v52 = vmul.f32 %v11198_v51, %v887_v0  ;;  %v2943_v8 = vadd.f32 0.00028619796, %v2942_v48  ;;  %v2954_v14 = vadd.f32 0.001143296, %v2953_v12  ;;  %v1057_v24 = vpop.xlane.xlu2 %1056 }
 0x2f4   : > { %v1629_v13 = vmul.f32 %v10271_v32, %v1628_v46  ;;  %v2932_v33 = vand.u32 2147483647, %v13115_v37  ;;  %v1336_v5 = vmul.f32 %v13111_v39, %v1335_v61  ;;  %vm1340_vm7 = vweird.f32 %v13085_v22 }
 0x2f5   : > { %v3126_v17 = vadd.f32 1.0, %v9693_v54  ;;  %v13133_v53 = vadd.f32 1e-06, %v1239_v58  ;;  %v2944_v44 = vmul.f32 %v2943_v8, %v13109_v40  ;;  %v2955_v49 = vmul.f32 %v2954_v14, %v13109_v40  ;;  %v3653_v58 = vld [vmem:[#allocation2 + $0x170] sm:$0xff] }
 0x2f6   : > { %v1633_v9 = vsel %vm1632_vm6, %v10271_v32, %v1629_v13  ;;  %v2934_v23 = vand.u32 2147483648, %v13115_v37  ;;  %v1337_v55 = vmul.f32 0.5, %v1336_v5  ;;  %v13142_v36 = vmul.f32 %v2911_v56, %v13010_v30  ;;  %9730 = vmatmul.msk.f32.gmra.mxu1 %vm878_vm1, %v3653_v58  ;;  %v3799_v5 = vpop.f32.mrf.mxu1  ;;  %v13224_v58 = vpop.f32.mrf.mxu3 }
 0x2f7   : > { %v3158_v7 = vmul.f32 %v3126_v17, %v13016_v3  ;;  %v1683_v45 = vmul.f32 %v1633_v9, %v1299_v16  ;;  %10276 = vrsqrt.f32 %v13133_v53  ;;  %v2945_v34 = vadd.f32 0.0036580483, %v2944_v44  ;;  %9762 = vmatmul.msk.f32.gmra.mxu2 %vm878_vm1, %v3619_v57  ;;  %v4106_v9 = vld [vmem:[#allocation2 + $0x171] sm:$0xff] }
 0x2f8   : > { %v2956_v42 = vadd.f32 0.014752088, %v2955_v49  ;;  %v1176_v3 = vmul.f32 %v13127_v52, %v13127_v52  ;;  %v10275_v10 = vpop.eup %10274  ;;  %v1338_v25 = vsub.f32 1.5, %v1337_v55  ;;  %vm1341_vm8 = vweird.f32 %v13111_v39 }
 0x2f9   : > { %3191 = vst.msk [vmem:[#allocation2 + $0x1c8] sm:$0xff] %vm878_vm1, %v3158_v7  ;;  %v1718_v32 = vmul.f32 %v12842_v63, %v1683_v45  ;;  %v1144_v2 = vmul.f32 %v1054_v19, %v11198_v51  ;;  %v2924_v29 = vmul.f32 %v10275_v10, %v13115_v37  ;;  %vm2928_vm13 = vweird.f32 %v13115_v37  ;;  %vm1342_vm10 = vmor %vm1340_vm7, %vm1341_vm8  ;;  %9794 = vmatmul.msk.f32.gmra.mxu3 %vm878_vm1, %v4106_v9 }
 0x2fa   : > { %v2946_v30 = vmul.f32 %v2945_v34, %v13109_v40  ;;  %v2957_v50 = vmul.f32 %v2956_v42, %v13109_v40  ;;  %vm13154_vm9 = vcmp.eq.f32.partialorder %v2932_v33, 8.507059e+37  ;;  %v2935_v11 = vor.u32 1.1754944e-38, %v2934_v23 }
 0x2fb   : > { %v13159_v6 = vadd.f32 %v12909_v18, %v1718_v32  ;;  %v1339_v31 = vmul.f32 %v13111_v39, %v1338_v25  ;;  %v2925_v21 = vsub.f32 1.0, %v2924_v29  ;;  %v1208_v16 = vsub.f32 %v1144_v2, %v1176_v3 }
 0x2fc   : > { %v2947_v62 = vadd.f32 0.05243302, %v2946_v30  ;;  %v2958_v38 = vadd.f32 0.112945676, %v2957_v50  ;;  %vm2929_vm11 = vweird.f32 %v10275_v10  ;;  %v13173_v61 = vmul.f32 %v11198_v51, %v890_v35 }
 0x2fd   : > { %v13166_v0 = vpop.eup %10276  ;;  %v13169_v48 = vmul.f32 0.70710677, %v13159_v6  ;;  %v1343_v12 = vsel %vm1342_vm10, %v13111_v39, %v1339_v31  ;;  %v2926_v54 = vmul.f32 %v10275_v10, %v2925_v21  ;;  %v1240_v20 = vmax.f32 %v1208_v16, 0.0  ;;  %vm2930_vm12 = vmor %vm2928_vm13, %vm2929_vm11  ;;  %v4008_v31 = vpop.f32.mrf.mxu2 }
 0x2fe   : > { %v2948_v22 = vmul.f32 %v2947_v62, %v13109_v40  ;;  %v2959_v46 = vmul.f32 %v2958_v38, %v13109_v40  ;;  %v1654_v27 = vmul.f32 %v1343_v12, %v1270_v41  ;;  %v1345_v39 = vmul.f32 %v13166_v0, %v13133_v53 }
 0x2ff   : > { %v2980_v56 = vmul.f32 %v13169_v48, %v13169_v48  ;;  %v1145_v17 = vmul.f32 %v1057_v24, %v11198_v51  ;;  %v2927_v8 = vadd.f32 %v10275_v10, %v2926_v54  ;;  %v1177_v44 = vmul.f32 %v13173_v61, %v13173_v61  ;;  %9763 = vmatmul.msk.f32.gmra.mxu2 %vm878_vm1, %v3620_v60 }
 0x300   : > { %v2949_v14 = vadd.f32 0.18741608, %v2948_v22  ;;  %v2960_v13 = vadd.f32 0.4994258, %v2959_v46  ;;  %v1689_v33 = vmul.f32 %v12842_v63, %v1654_v27  ;;  %v1346_v7 = vmul.f32 %v13166_v0, %v1345_v39 }
 0x301   : > { %v13188_v41 = vmin.f32 %v2980_v56, 16.0  ;;  %v13193_v49 = vadd.f32 1e-06, %v1240_v20  ;;  %v2931_v19 = vsel %vm2930_vm12, %v10275_v10, %v2927_v8  ;;  %v1209_v3 = vsub.f32 %v1145_v17, %v1177_v44 }
 0x302   : > { %v2950_v23 = vmul.f32 %v2949_v14, %v13109_v40  ;;  %v2961_v45 = vmul.f32 %v2960_v13, %v13109_v40  ;;  %v13198_v55 = vadd.f32 %v12909_v18, %v1689_v33  ;;  %v2936_v37 = vsel %vm13154_vm9, %v2935_v11, %v2931_v19  ;;  %v3654_v40 = vld [vmem:[#allocation2 + $0x188] sm:$0xff] }
 0x303   : > { %v2982_v34 = vmul.f32 2.1237322e-06, %v13188_v41  ;;  %v2993_v42 = vmul.f32 3.8918573e-05, %v13188_v41  ;;  %v2937_v32 = vmul.f32 %v2936_v37, %v13142_v36  ;;  %v1347_v2 = vmul.f32 0.5, %v1346_v7  ;;  %9731 = vmatmul.msk.f32.gmra.mxu1 %vm878_vm1, %v3654_v40  ;;  %v18397_v36 = vld [vmem:[#allocation26_spill] sm:$0xff] }
 0x304   : > { %v2951_v10 = vadd.f32 1.1283791, %v2950_v23  ;;  %v13206_v25 = vadd.f32 1.0, %v2961_v45  ;;  %v13209_v50 = vmul.f32 0.70710677, %v13198_v55  ;;  %10278 = vrsqrt.f32 %v13193_v49  ;;  %v4107_v19 = vld [vmem:[#allocation2 + $0x189] sm:$0xff] }
 0x305   : > { %v2983_v29 = vadd.f32 0.00028619796, %v2982_v34  ;;  %v2994_v30 = vadd.f32 0.001143296, %v2993_v42  ;;  %v1783_v35 = vmul.f32 0.5, %v12993_v47  ;;  %v9694_v43 = vclamps-f32 %v2937_v32, 1.0  ;;  %9795 = vmatmul.msk.f32.gmra.mxu3 %vm878_vm1, %v4107_v19 }
 0x306   : > { %10280 = vrcp.f32 %v13206_v25  ;;  %v1271_v11 = vsub.f32 %v18397_v36, %v13070_v15  ;;  %vm1350_vm14 = vweird.f32 %v13133_v53  ;;  %v1241_v38 = vmax.f32 %v1209_v3, 0.0  ;;  %v13226_v15 = vpop.f32.mrf.mxu1  ;;  %v3655_v37 = vld [vmem:[#allocation2 + $0x190] sm:$0xff] }
 0x307   : > { %v2984_v21 = vmul.f32 %v2983_v29, %v13188_v41  ;;  %v2995_v62 = vmul.f32 %v2994_v30, %v13188_v41  ;;  %v3127_v16 = vadd.f32 1.0, %v9694_v43  ;;  %v1820_v47 = vmul.f32 %v13209_v50, %v13209_v50  ;;  %v3621_v34 = vld [vmem:[#allocation2 + $0x18f] sm:$0xff]  ;;  %v4668_v29 = vld [vmem:[#allocation9 + $0x40] sm:$0xff] }
 0x308   : > { %v1348_v24 = vsub.f32 1.5, %v1347_v2  ;;  %vm1351_vm15 = vweird.f32 %v13166_v0  ;;  %v13229_v12 = vmul.f32 %v2951_v10, %v13096_v59  ;;  %v2972_v57 = vand.u32 2147483647, %v13206_v25  ;;  %9764 = vmatmul.msk.f32.gmra.mxu2 %vm878_vm1, %v3621_v34 }
 0x309   : > { %v2985_v54 = vadd.f32 0.0036580483, %v2984_v21  ;;  %v2996_v22 = vadd.f32 0.014752088, %v2995_v62  ;;  %v3159_v46 = vmul.f32 %v3127_v16, %v1783_v35  ;;  %v2974_v27 = vand.u32 2147483648, %v13206_v25  ;;  %vm13242_vm2 = vmor %vm1350_vm14, %vm1351_vm15  ;;  %4781 = vmatpush.msrb.mxu2 %v4668_v29 }
 0x30a   : > { %v13233_v56 = vmin.f32 %v1820_v47, 16.0  ;;  %v1349_v39 = vmul.f32 %v13166_v0, %v1348_v24  ;;  %v13236_v20 = vpop.eup %10278  ;;  %v13246_v14 = vadd.f32 1e-06, %v1241_v38  ;;  %v13248_v13 = vadd.f32 %v4008_v31, %v3799_v5  ;;  %v13273_v31 = vpop.f32.mrf.mxu3 }
 0x30b   : > { %v2986_v17 = vmul.f32 %v2985_v54, %v13188_v41  ;;  %v2997_v8 = vmul.f32 %v2996_v22, %v13188_v41  ;;  %3192 = vst.msk [vmem:[#allocation2 + $0x1d0] sm:$0xff] %vm878_vm1, %v3159_v46  ;;  %v1355_v53 = vmul.f32 %v13236_v20, %v13193_v49  ;;  %vm2968_vm3 = vweird.f32 %v13206_v25  ;;  %9732 = vmatmul.msk.f32.gmra.mxu1 %vm878_vm1, %v3655_v37 }
 0x30c   : > { %v10281_v33 = vpop.eup %10280  ;;  %v1822_v7 = vmul.f32 2.1237322e-06, %v13233_v56  ;;  %v1833_v44 = vmul.f32 3.8918573e-05, %v13233_v56  ;;  %v1353_v9 = vsel %vm13242_vm2, %v13166_v0, %v1349_v39  ;;  %v13262_v0 = vpop.f32.mrf.mxu2  ;;  %10282 = vrsqrt.f32 %v13246_v14 }
 0x30d   : > { %v2964_v23 = vmul.f32 %v10281_v33, %v13206_v25  ;;  %v2987_v5 = vadd.f32 0.05243302, %v2986_v17  ;;  %v2998_v45 = vadd.f32 0.112945676, %v2997_v8  ;;  %v1655_v32 = vmul.f32 %v1353_v9, %v1271_v11  ;;  %v3656_v25 = vld [vmem:[#allocation2 + $0x1a8] sm:$0xff] }
 0x30e   : > { %v1823_v42 = vadd.f32 0.00028619796, %v1822_v7  ;;  %v1834_v3 = vadd.f32 0.001143296, %v1833_v44  ;;  %v1356_v10 = vmul.f32 %v13236_v20, %v1355_v53  ;;  %vm2969_vm4 = vweird.f32 %v10281_v33  ;;  %v13271_v11 = vpop.f32.mrf.mxu1  ;;  %v3622_v53 = vld [vmem:[#allocation2 + $0x1a7] sm:$0xff] }
 0x30f   : > { %v2965_v2 = vsub.f32 1.0, %v2964_v23  ;;  %v2988_v40 = vmul.f32 %v2987_v5, %v13188_v41  ;;  %v2999_v60 = vmul.f32 %v2998_v45, %v13188_v41  ;;  %v1690_v43 = vmul.f32 %v12842_v63, %v1655_v32  ;;  %vm2970_vm6 = vmor %vm2968_vm3, %vm2969_vm4 }
 0x310   : > { %v1824_v30 = vmul.f32 %v1823_v42, %v13233_v56  ;;  %v1835_v35 = vmul.f32 %v1834_v3, %v13233_v56  ;;  %v1357_v36 = vmul.f32 0.5, %v1356_v10  ;;  %vm13279_vm5 = vcmp.eq.f32.partialorder %v2972_v57, 8.507059e+37  ;;  %v4108_v57 = vld [vmem:[#allocation2 + $0x191] sm:$0xff]  ;;  %9765 = vmatmul.msk.f32.gmra.mxu2 %vm878_vm1, %v3622_v53  ;;  %v18402_v10 = vld [vmem:[#allocation27_spill] sm:$0xff] }
 0x311   : > { %v2966_v21 = vmul.f32 %v10281_v33, %v2965_v2  ;;  %v2989_v62 = vadd.f32 0.18741608, %v2988_v40  ;;  %v3000_v38 = vadd.f32 0.4994258, %v2999_v60  ;;  %v13277_v24 = vadd.f32 %v12909_v18, %v1690_v43  ;;  %9796 = vmatmul.msk.f32.gmra.mxu3 %vm878_vm1, %v4108_v57  ;;  %v3657_v57 = vld [vmem:[#allocation2 + $0x1b0] sm:$0xff] }
 0x312   : > { %v1825_v16 = vadd.f32 0.0036580483, %v1824_v30  ;;  %v1836_v47 = vadd.f32 0.014752088, %v1835_v35  ;;  %v1358_v54 = vsub.f32 1.5, %v1357_v36  ;;  %v2975_v46 = vor.u32 1.1754944e-38, %v2974_v27 }
 0x313   : > { %v2967_v22 = vadd.f32 %v10281_v33, %v2966_v21  ;;  %v3001_v39 = vmul.f32 %v3000_v38, %v13188_v41  ;;  %v13290_v59 = vmul.f32 0.70710677, %v13277_v24  ;;  %vm1361_vm7 = vweird.f32 %v13236_v20  ;;  %9733 = vmatmul.msk.f32.gmra.mxu1 %vm878_vm1, %v3656_v25 }
 0x314   : > { %v1826_v17 = vmul.f32 %v1825_v16, %v13233_v56  ;;  %v1837_v8 = vmul.f32 %v1836_v47, %v13233_v56  ;;  %v2990_v44 = vmul.f32 %v2989_v62, %v13188_v41  ;;  %v1359_v9 = vmul.f32 %v13236_v20, %v1358_v54  ;;  %v13302_v37 = vpop.f32.mrf.mxu2  ;;  %v13306_v41 = vpop.eup %10282  ;;  %v4109_v54 = vld [vmem:[#allocation2 + $0x1a9] sm:$0xff] }
 0x315   : > { %v2971_v7 = vsel %vm2970_vm6, %v10281_v33, %v2967_v22  ;;  %v13294_v27 = vadd.f32 1.0, %v3001_v39  ;;  %v1860_v45 = vmul.f32 %v13290_v59, %v13290_v59  ;;  %v1784_v33 = vmul.f32 0.5, %v13088_v28 }
 0x316   : > { %v2976_v19 = vsel %vm13279_vm5, %v2975_v46, %v2971_v7  ;;  %v1827_v23 = vadd.f32 0.05243302, %v1826_v17  ;;  %v1838_v5 = vadd.f32 0.112945676, %v1837_v8  ;;  %vm1360_vm8 = vweird.f32 %v13193_v49  ;;  %v13321_v28 = vpop.f32.mrf.mxu1  ;;  %v13344_v17 = vld [vmem:[%s18236_s6] ss:$0 sm:$0xff] }
 0x317   : > { %v2977_v34 = vmul.f32 %v2976_v19, %v13229_v12  ;;  %10284 = vrcp.f32 %v13294_v27  ;;  %v13313_v42 = vmul.f32 0.5, %v13159_v6  ;;  %v1272_v2 = vsub.f32 %v18402_v10, %v13127_v52  ;;  %vm1362_vm13 = vmor %vm1360_vm8, %vm1361_vm7  ;;  %v13323_v12 = vpop.f32.mrf.mxu3  ;;  %v3623_v7 = vld [vmem:[#allocation2 + $0x1af] sm:$0xff] }
 0x318   : > { %v1828_v3 = vmul.f32 %v1827_v23, %v13233_v56  ;;  %v1839_v32 = vmul.f32 %v1838_v5, %v13233_v56  ;;  %v13325_v60 = vmin.f32 %v1860_v45, 16.0  ;;  %v1363_v6 = vsel %vm1362_vm13, %v13236_v20, %v1359_v9  ;;  %9766 = vmatmul.msk.f32.gmra.mxu2 %vm878_vm1, %v3623_v7 }
 0x319   : > { %v9695_v40 = vclamps-f32 %v2977_v34, 1.0  ;;  %v1365_v49 = vmul.f32 %v13306_v41, %v13246_v14  ;;  %v2991_v29 = vadd.f32 1.1283791, %v2990_v44  ;;  %v1273_v52 = vsub.f32 %v11065_v26, %v13173_v61  ;;  %9797 = vmatmul.msk.f32.gmra.mxu3 %vm878_vm1, %v4109_v54 }
 0x31a   : > { %v1829_v30 = vadd.f32 0.18741608, %v1828_v3  ;;  %v1840_v35 = vadd.f32 0.4994258, %v1839_v32  ;;  %v1862_v36 = vmul.f32 2.1237322e-06, %v13325_v60  ;;  %v1656_v62 = vmul.f32 %v1363_v6, %v1272_v2 }
 0x31b   : > { %v3128_v43 = vadd.f32 1.0, %v9695_v40  ;;  %v1873_v21 = vmul.f32 3.8918573e-05, %v13325_v60  ;;  %vm1370_vm9 = vweird.f32 %v13246_v14  ;;  %v3012_v38 = vand.u32 2147483647, %v13294_v27  ;;  %9734 = vmatmul.msk.f32.gmra.mxu1 %vm878_vm1, %v3657_v57 }
 0x31c   : > { %v1830_v20 = vmul.f32 %v1829_v30, %v13233_v56  ;;  %v1841_v16 = vmul.f32 %v1840_v35, %v13233_v56  ;;  %v1366_v47 = vmul.f32 %v13306_v41, %v1365_v49  ;;  %v1863_v46 = vadd.f32 0.00028619796, %v1862_v36  ;;  %v13353_v53 = vpop.f32.mrf.mxu2 }
 0x31d   : > { %v13339_v22 = vpop.eup %10284  ;;  %v3160_v63 = vmul.f32 %v3128_v43, %v1784_v33  ;;  %v1874_v39 = vadd.f32 0.001143296, %v1873_v21  ;;  %v1691_v8 = vmul.f32 %v13344_v17, %v1656_v62  ;;  %v3014_v44 = vand.u32 2147483648, %v13294_v27 }
 0x31e   : > { %v3004_v56 = vmul.f32 %v13339_v22, %v13294_v27  ;;  %v1831_v9 = vadd.f32 1.1283791, %v1830_v20  ;;  %v13351_v25 = vadd.f32 1.0, %v1841_v16  ;;  %v1864_v19 = vmul.f32 %v1863_v46, %v13325_v60  ;;  %v13366_v3 = vpop.f32.mrf.mxu1  ;;  %v3658_v16 = vld [vmem:[#allocation2 + $0x1c8] sm:$0xff] }
 0x31f   : > { %3193 = vst.msk [vmem:[#allocation2 + $0x1e8] sm:$0xff] %vm878_vm1, %v3160_v63  ;;  %v1875_v23 = vmul.f32 %v1874_v39, %v13325_v60  ;;  %v13361_v5 = vadd.f32 %v12909_v18, %v1691_v8  ;;  %v1367_v45 = vmul.f32 0.5, %v1366_v47  ;;  %v2992_v33 = vmul.f32 %v2991_v29, %v13169_v48  ;;  %v13368_v32 = vpop.f32.mrf.mxu3  ;;  %v3624_v47 = vld [vmem:[#allocation2 + $0x1c7] sm:$0xff]  ;;  %v971_v8 = vpop.xlane.xlu0 %970 }
 0x320   : > { %v3005_v34 = vsub.f32 1.0, %v3004_v56  ;;  %vm3008_vm10 = vweird.f32 %v13294_v27  ;;  %10286 = vrcp.f32 %v13351_v25  ;;  %18403 = vst [vmem:[#allocation29_spill] sm:$0xff] %v13366_v3  ;;  %vm3009_vm11 = vweird.f32 %v13339_v22  ;;  %9767 = vmatmul.msk.f32.gmra.mxu2 %vm878_vm1, %v3624_v47 }
 0x321   : > { %vm13371_vm12 = vcmp.eq.f32.partialorder %v3012_v38, 8.507059e+37  ;;  %v1865_v18 = vadd.f32 0.0036580483, %v1864_v19  ;;  %vm1371_vm14 = vweird.f32 %v13306_v41  ;;  %v1876_v2 = vadd.f32 0.014752088, %v1875_v23  ;;  %v4110_v38 = vld [vmem:[#allocation2 + $0x1b1] sm:$0xff]  ;;  %vm13403_vm2 = vmor %vm3008_vm10, %vm3009_vm11 }
 0x322   : > { %v3006_v48 = vmul.f32 %v13339_v22, %v3005_v34  ;;  %v13378_v40 = vmul.f32 0.70710677, %v13361_v5  ;;  %v1368_v6 = vsub.f32 1.5, %v1367_v45  ;;  %v3015_v49 = vor.u32 1.1754944e-38, %v3014_v44  ;;  %vm13395_vm15 = vmor %vm1370_vm9, %vm1371_vm14  ;;  %9798 = vmatmul.msk.f32.gmra.mxu3 %vm878_vm1, %v4110_v38  ;;  %v4392_v23 = vld [vmem:[#allocation9 + $0x30] sm:$0xff] }
 0x323   : > { %v13381_v29 = vmul.f32 %v1831_v9, %v13209_v50  ;;  %v1866_v30 = vmul.f32 %v1865_v18, %v13325_v60  ;;  %v13386_v35 = vadd.f32 %v13224_v58, %v13248_v13  ;;  %v1877_v36 = vmul.f32 %v1876_v2, %v13325_v60  ;;  %9735 = vmatmul.msk.f32.gmra.mxu1 %vm878_vm1, %v3658_v16  ;;  %v3659_v38 = vld [vmem:[#allocation2 + $0x1d0] sm:$0xff] }
 0x324   : > { %v3007_v43 = vadd.f32 %v13339_v22, %v3006_v48  ;;  %v1900_v21 = vmul.f32 %v13378_v40, %v13378_v40  ;;  %v1369_v62 = vmul.f32 %v13306_v41, %v1368_v6  ;;  %vm1848_vm3 = vweird.f32 %v13351_v25  ;;  %4505 = vmatpush.msrb.mxu1 %v4392_v23  ;;  %v3625_v58 = vld [vmem:[#allocation2 + $0x1cf] sm:$0xff] }
 0x325   : > { %v1852_v13 = vand.u32 2147483647, %v13351_v25  ;;  %v4012_v14 = vadd.f32 %v13262_v0, %v13226_v15  ;;  %v4015_v20 = vadd.f32 %v13302_v37, %v13271_v11  ;;  %v1878_v63 = vadd.f32 0.112945676, %v1877_v36  ;;  %v13422_v15 = vpop.f32.mrf.mxu2 }
 0x326   : > { %v10287_v54 = vpop.eup %10286  ;;  %v3011_v27 = vsel %vm13403_vm2, %v13339_v22, %v3007_v43  ;;  %v13417_v46 = vmin.f32 %v1900_v21, 16.0  ;;  %v1373_v39 = vsel %vm13395_vm15, %v13306_v41, %v1369_v62  ;;  %18410 = vst [vmem:[#allocation25_spill] sm:$0xff] %v13422_v15  ;;  %v1854_v37 = vand.u32 2147483648, %v13351_v25  ;;  %v13433_v44 = vpop.f32.mrf.mxu1 }
 0x327   : > { %v3016_v0 = vsel %vm13371_vm12, %v3015_v49, %v3011_v27  ;;  %v1844_v11 = vmul.f32 %v10287_v54, %v13351_v25  ;;  %v1867_v22 = vadd.f32 0.05243302, %v1866_v30  ;;  %v1879_v7 = vmul.f32 %v1878_v63, %v13325_v60  ;;  %18411 = vst [vmem:[#allocation26_spill] sm:$0xff] %v13433_v44  ;;  %v13435_v9 = vpop.f32.mrf.mxu3  ;;  %v14026_v44 = vld [vmem:[#allocation2 + $0x130] sm:$0xff] }
 0x328   : > { %v3017_v57 = vmul.f32 %v3016_v0, %v2992_v33  ;;  %v1902_v41 = vmul.f32 2.1237322e-06, %v13417_v46  ;;  %v1913_v56 = vmul.f32 3.8918573e-05, %v13417_v46  ;;  %18412 = vst [vmem:[#allocation27_spill] sm:$0xff] %v13435_v9  ;;  %vm1849_vm4 = vweird.f32 %v10287_v54  ;;  %9768 = vmatmul.msk.f32.gmra.mxu2 %vm878_vm1, %v3625_v58  ;;  %v974_v0 = vpop.xlane.xlu2 %973 }
 0x329   : > { %v1845_v19 = vsub.f32 1.0, %v1844_v11  ;;  %v1657_v45 = vmul.f32 %v1373_v39, %v1273_v52  ;;  %v13441_v34 = vadd.f32 %v13273_v31, %v4012_v14  ;;  %v1880_v10 = vadd.f32 0.4994258, %v1879_v7  ;;  %v4111_v31 = vld [vmem:[#allocation2 + $0x1c9] sm:$0xff]  ;;  %vm1850_vm5 = vmor %vm1848_vm3, %vm1849_vm4  ;;  %18488 = vst [vmem:[#allocation97_spill] sm:$0xff] %v14026_v44 }
 0x32a   : > { %v9696_v33 = vclamps-f32 %v3017_v57, 1.0  ;;  %v1903_v18 = vadd.f32 0.00028619796, %v1902_v41  ;;  %v13444_v48 = vadd.f32 %v13323_v12, %v4015_v20  ;;  %v1868_v6 = vmul.f32 %v1867_v22, %v13325_v60  ;;  %v13454_v12 = vld [vmem:[%s18237_s7] ss:$0 sm:$0xff]  ;;  %9799 = vmatmul.msk.f32.gmra.mxu3 %vm878_vm1, %v4111_v31  ;;  %v1138_v22 = vpop.xlane.xlu1 %1137  ;;  %v3630_v41 = vld [vmem:[#allocation2 + $0x8] sm:$0xff] }
 0x32b   : > { %v1846_v2 = vmul.f32 %v10287_v54, %v1845_v19  ;;  %v1914_v49 = vadd.f32 0.001143296, %v1913_v56  ;;  %v1692_v30 = vmul.f32 %v13344_v17, %v1657_v45  ;;  %v1855_v36 = vor.u32 1.1754944e-38, %v1854_v37  ;;  %9736 = vmatmul.msk.f32.gmra.mxu1 %vm878_vm1, %v3659_v38  ;;  %9707 = vmatmul.msk.f32.vlgmr.msrb.gmra.mxu0 %vm878_vm1, %v3630_v41 }
 0x32c   : > { %v3129_v43 = vadd.f32 1.0, %v9696_v33  ;;  %v1881_v26 = vmul.f32 %v1880_v10, %v13325_v60  ;;  %v1904_v61 = vmul.f32 %v1903_v18, %v13417_v46  ;;  %v13460_v50 = vmul.f32 %v11198_v51, %v971_v8  ;;  %v1141_v8 = vpop.xlane.xlu0 %1140  ;;  %v4112_v18 = vld [vmem:[#allocation2 + $0x1d1] sm:$0xff] }
 0x32d   : > { %v1847_v52 = vadd.f32 %v10287_v54, %v1846_v2  ;;  %v1915_v21 = vmul.f32 %v1914_v49, %v13417_v46  ;;  %v13457_v62 = vadd.f32 %v13454_v12, %v1692_v30  ;;  %v13471_v47 = vadd.f32 %v13353_v53, %v13321_v28  ;;  %v13473_v27 = vpop.f32.mrf.mxu2  ;;  %v10504_v2 = vld [vmem:[#allocation9 + $0x28] sm:$0xff] }
 0x32e   : > { %v3161_v14 = vmul.f32 %v3129_v43, %v13313_v42  ;;  %v13467_v20 = vadd.f32 1.0, %v1881_v26  ;;  %v1905_v16 = vadd.f32 0.0036580483, %v1904_v61  ;;  %18413 = vst [vmem:[#allocation30_spill] sm:$0xff] %v13473_v27  ;;  %vm1853_vm6 = vcmp.eq.f32.partialorder %v1852_v13, 8.507059e+37  ;;  %v13479_v11 = vpop.f32.mrf.mxu1  ;;  %4228 = vmatpush.msrb.mxu0 %v10504_v2  ;;  %v3660_v30 = vld [vmem:[#allocation2 + $0x1e8] sm:$0xff] }
 0x32f   : > { %v1851_v63 = vsel %vm1850_vm5, %v10287_v54, %v1847_v52  ;;  %v1869_v42 = vadd.f32 0.18741608, %v1868_v6  ;;  %v1916_v39 = vadd.f32 0.014752088, %v1915_v21  ;;  %18414 = vst [vmem:[#allocation31_spill] sm:$0xff] %v13479_v11  ;;  %v13481_v28 = vpop.f32.mrf.mxu3  ;;  %v1204_v57 = vmul.f32 %v13460_v50, %v13460_v50  ;;  %v3626_v43 = vld [vmem:[#allocation2 + $0x1e7] sm:$0xff] }
 0x330   : > { %3194 = vst.msk [vmem:[#allocation2 + $0x1f0] sm:$0xff] %vm878_vm1, %v3161_v14  ;;  %v1856_v25 = vsel %vm1853_vm6, %v1855_v36, %v1851_v63  ;;  %10288 = vrcp.f32 %v13467_v20  ;;  %v1906_v13 = vmul.f32 %v1905_v16, %v13417_v46  ;;  %v13487_v54 = vmul.f32 0.70710677, %v13457_v62  ;;  %9769 = vmatmul.msk.f32.gmra.mxu2 %vm878_vm1, %v3626_v43  ;;  %v10505_v14 = vld [vmem:[#allocation9 + $0x20] sm:$0xff]  ;;  %v14024_v27 = vld [vmem:[#allocation2 + $0x12f] sm:$0xff] }
 0x331   : > { %18415 = vst [vmem:[#allocation32_spill] sm:$0xff] %v13481_v28  ;;  %v1857_v53 = vmul.f32 %v1856_v25, %v13381_v29  ;;  %v1917_v37 = vmul.f32 %v1916_v39, %v13417_v46  ;;  %v13492_v7 = vmul.f32 %v11198_v51, %v974_v0  ;;  %v1870_v19 = vmul.f32 %v1869_v42, %v13325_v60 }
 0x332   : > { %v1940_v23 = vmul.f32 %v13487_v54, %v13487_v54  ;;  %v1172_v33 = vmul.f32 %v1138_v22, %v11198_v51  ;;  %v1173_v10 = vmul.f32 %v1141_v8, %v11198_v51  ;;  %v1756_v6 = vmul.f32 0.5, %v13198_v55  ;;  %9800 = vmatmul.msk.f32.gmra.mxu3 %vm878_vm1, %v4112_v18  ;;  %4229 = vmatpush.msrb.mxu0 %v10505_v14 }
 0x333   : > { %v9667_v56 = vclamps-f32 %v1857_v53, 1.0  ;;  %v1918_v29 = vadd.f32 0.112945676, %v1917_v37  ;;  %v1205_v45 = vmul.f32 %v13492_v7, %v13492_v7  ;;  %v1907_v26 = vadd.f32 0.05243302, %v1906_v13  ;;  %9737 = vmatmul.msk.f32.gmra.mxu1 %vm878_vm1, %v3660_v30 }
 0x334   : > { %v13505_v61 = vmin.f32 %v1940_v23, 16.0  ;;  %v1236_v31 = vsub.f32 %v1172_v33, %v1204_v57  ;;  %v1871_v38 = vadd.f32 1.1283791, %v1870_v19  ;;  %v1894_v53 = vand.u32 2147483648, %v13467_v20 }
 0x335   : > { %v3100_v49 = vadd.f32 1.0, %v9667_v56  ;;  %v1919_v60 = vmul.f32 %v1918_v29, %v13417_v46  ;;  %v1237_v52 = vsub.f32 %v1173_v10, %v1205_v45  ;;  %v13507_v21 = vpop.f32.mrf.mxu2  ;;  %v1908_v8 = vmul.f32 %v1907_v26, %v13417_v46  ;;  %v3631_v56 = vld [vmem:[#allocation2 + $0x10] sm:$0xff] }
 0x336   : > { %v10289_v36 = vpop.eup %10288  ;;  %18416 = vst [vmem:[#allocation33_spill] sm:$0xff] %v13507_v21  ;;  %v1942_v63 = vmul.f32 2.1237322e-06, %v13505_v61  ;;  %v1953_v42 = vmul.f32 3.8918573e-05, %v13505_v61  ;;  %v13514_v39 = vpop.f32.mrf.mxu1  ;;  %v1268_v37 = vmax.f32 %v1236_v31, 0.0  ;;  %9708 = vmatmul.msk.f32.gmra.mxu0 %vm878_vm1, %v3631_v56  ;;  %vm1888_vm8 = vweird.f32 %v13467_v20 }
 0x337   : > { %v3132_v55 = vmul.f32 %v3100_v49, %v1756_v6  ;;  %v1884_v58 = vmul.f32 %v10289_v36, %v13467_v20  ;;  %v1920_v16 = vadd.f32 0.4994258, %v1919_v60  ;;  %18417 = vst [vmem:[#allocation34_spill] sm:$0xff] %v13514_v39  ;;  %v13516_v0 = vpop.f32.mrf.mxu3  ;;  %v1269_v22 = vmax.f32 %v1237_v52, 0.0  ;;  %v4113_v18 = vld [vmem:[#allocation2 + $0x1e9] sm:$0xff] }
 0x338   : > { %18418 = vst [vmem:[#allocation35_spill] sm:$0xff] %v13516_v0  ;;  %v1943_v57 = vadd.f32 0.00028619796, %v1942_v63  ;;  %v1954_v41 = vadd.f32 0.001143296, %v1953_v42  ;;  %vm1889_vm7 = vweird.f32 %v10289_v36  ;;  %v3661_v49 = vld [vmem:[#allocation2 + $0x1f0] sm:$0xff]  ;;  %v1872_v30 = vmul.f32 %v1871_v38, %v13290_v59 }
 0x339   : > { %3165 = vst.msk [vmem:[#allocation2 + $0x28] sm:$0xff] %vm878_vm1, %v3132_v55  ;;  %v1885_v25 = vsub.f32 1.0, %v1884_v58  ;;  %v1921_v13 = vmul.f32 %v1920_v16, %v13417_v46  ;;  %v1892_v29 = vand.u32 2147483647, %v13467_v20  ;;  %v13523_v23 = vadd.f32 1e-06, %v1268_v37  ;;  %vm1890_vm13 = vmor %vm1888_vm8, %vm1889_vm7 }
 0x33a   : > { %v1955_v33 = vmul.f32 %v1954_v41, %v13505_v61  ;;  %v13529_v10 = vadd.f32 1e-06, %v1269_v22  ;;  %v1944_v6 = vmul.f32 %v1943_v57, %v13505_v61  ;;  %9801 = vmatmul.msk.f32.gmra.mxu3 %vm878_vm1, %v4113_v18  ;;  %v3627_v60 = vld [vmem:[#allocation2 + $0x1ef] sm:$0xff]  ;;  %v1895_v43 = vor.u32 1.1754944e-38, %v1894_v53  ;;  %v14004_v0 = vld [vmem:[#allocation2 + $0x127] sm:$0xff] }
 0x33b   : > { %v1886_v19 = vmul.f32 %v10289_v36, %v1885_v25  ;;  %v13526_v45 = vadd.f32 1.0, %v1921_v13  ;;  %10290 = vrsqrt.f32 %v13523_v23  ;;  %v1909_v26 = vadd.f32 0.18741608, %v1908_v8  ;;  %9738 = vmatmul.msk.f32.gmra.mxu1 %vm878_vm1, %v3661_v49  ;;  %9770 = vmatmul.msk.f32.gmra.mxu2 %vm878_vm1, %v3627_v60  ;;  %v13554_v8 = vld [vmem:[#allocation2 + $0x1f1] sm:$0xff]  ;;  %v14006_v21 = vld [vmem:[#allocation2 + $0x128] sm:$0xff] }
 0x33c   : > { %vm1893_vm9 = vcmp.eq.f32.partialorder %v1892_v29, 8.507059e+37  ;;  %v1956_v52 = vadd.f32 0.014752088, %v1955_v33  ;;  %v1945_v14 = vadd.f32 0.0036580483, %v1944_v6  ;;  %v1757_v57 = vmul.f32 0.5, %v13277_v24 }
 0x33d   : > { %v1887_v2 = vadd.f32 %v10289_v36, %v1886_v19  ;;  %10292 = vrcp.f32 %v13526_v45  ;;  %v13538_v31 = vpop.f32.mrf.mxu2  ;;  %v1910_v63 = vmul.f32 %v1909_v26, %v13417_v46  ;;  %v1934_v60 = vand.u32 2147483648, %v13526_v45  ;;  %v13986_v39 = vld [vmem:[#allocation2 + $0x110] sm:$0xff] }
 0x33e   : > { %18419 = vst [vmem:[#allocation36_spill] sm:$0xff] %v13538_v31  ;;  %10294 = vrsqrt.f32 %v13529_v10  ;;  %v13543_v58 = vpop.f32.mrf.mxu1  ;;  %v1957_v16 = vmul.f32 %v1956_v52, %v13505_v61  ;;  %v1946_v56 = vmul.f32 %v1945_v14, %v13505_v61  ;;  %vm1640_vm10 = vweird.f32 %v13523_v23  ;;  %v13984_v31 = vld [vmem:[#allocation2 + $0x10f] sm:$0xff] }
 0x33f   : > { %v1891_v20 = vsel %vm1890_vm13, %v10289_v36, %v1887_v2  ;;  %18420 = vst [vmem:[#allocation37_spill] sm:$0xff] %v13543_v58  ;;  %v13545_v59 = vpop.f32.mrf.mxu3  ;;  %v1911_v29 = vadd.f32 1.1283791, %v1910_v63  ;;  %vm1928_vm14 = vweird.f32 %v13526_v45  ;;  %vm1650_vm2 = vweird.f32 %v13529_v10  ;;  %v13964_v58 = vld [vmem:[#allocation2 + $0x107] sm:$0xff] }
 0x340   : > { %v1896_v55 = vsel %vm1893_vm9, %v1895_v43, %v1891_v20  ;;  %18421 = vst [vmem:[#allocation38_spill] sm:$0xff] %v13545_v59  ;;  %v3632_v42 = vld [vmem:[#allocation2 + $0x28] sm:$0xff]  ;;  %v1958_v36 = vadd.f32 0.112945676, %v1957_v16  ;;  %v1947_v14 = vadd.f32 0.05243302, %v1946_v56 }
 0x341   : > { %v1897_v38 = vmul.f32 %v1896_v55, %v1872_v30  ;;  %v13549_v25 = vpop.eup %10290  ;;  %9709 = vmatmul.msk.f32.gmra.mxu0 %vm878_vm1, %v3632_v42  ;;  %v13563_v19 = vld [vmem:[#allocation2 + $0x27] sm:$0xff]  ;;  %v4945_v16 = vld [vmem:[#allocation9 + $0x58] sm:$0xff] }
 0x342   : > { %v1635_v22 = vmul.f32 %v13549_v25, %v13523_v23  ;;  %9802 = vmatmul.msk.f32.gmra.mxu3 %vm878_vm1, %v13554_v8  ;;  %v1959_v33 = vmul.f32 %v1958_v36, %v13505_v61  ;;  %vm1641_vm11 = vweird.f32 %v13549_v25  ;;  %v1912_v23 = vmul.f32 %v1911_v29, %v13378_v40  ;;  %v13966_v59 = vld [vmem:[#allocation2 + $0x108] sm:$0xff] }
 0x343   : > { %v9668_v53 = vclamps-f32 %v1897_v38, 1.0  ;;  %v10293_v37 = vpop.eup %10292  ;;  %9803 = vmatmul.msk.f32.vlgmr.msrb.gmra.mxu1 %vm878_vm1, %v13563_v19  ;;  %9835 = vmatmul.msk.f32.vlgmr.msrb.gmra.mxu2 %vm878_vm1, %v3632_v42  ;;  %v1932_v38 = vand.u32 2147483647, %v13526_v45  ;;  %v1300_v42 = vsub.f32 %v12384_v4, %v13460_v50  ;;  %vm13592_vm15 = vmor %vm1640_vm10, %vm1641_vm11  ;;  %v1935_v4 = vor.u32 1.1754944e-38, %v1934_v60 }
 0x344   : > { %v13556_v13 = vpop.eup %10294  ;;  %v1924_v46 = vmul.f32 %v10293_v37, %v13526_v45  ;;  %v1636_v18 = vmul.f32 %v13549_v25, %v1635_v22  ;;  %v1960_v30 = vadd.f32 0.4994258, %v1959_v33  ;;  %vm1929_vm12 = vweird.f32 %v10293_v37  ;;  %5056 = vmatpush.msrb.mxu3 %v4945_v16 }
 0x345   : > { %v3101_v41 = vadd.f32 1.0, %v9668_v53  ;;  %v1645_v2 = vmul.f32 %v13556_v13, %v13529_v10  ;;  %v13569_v6 = vpop.f32.mrf.mxu2  ;;  %vm1651_vm3 = vweird.f32 %v13556_v13  ;;  %vm1930_vm4 = vmor %vm1928_vm14, %vm1929_vm12  ;;  %vm1933_vm5 = vcmp.eq.f32.partialorder %v1932_v38, 8.507059e+37 }
 0x346   : > { %18422 = vst [vmem:[#allocation39_spill] sm:$0xff] %v13569_v6  ;;  %v1925_v49 = vsub.f32 1.0, %v1924_v46  ;;  %v1637_v43 = vmul.f32 0.5, %v1636_v18  ;;  %v13578_v20 = vpop.f32.mrf.mxu1  ;;  %v1961_v63 = vmul.f32 %v1960_v30, %v13505_v61  ;;  %v1948_v33 = vmul.f32 %v1947_v14, %v13505_v61  ;;  %vm13611_vm6 = vmor %vm1650_vm2, %vm1651_vm3  ;;  %v13958_v6 = vld [vmem:[#allocation2 + $0xf1] sm:$0xff] }
 0x347   : > { %v3133_v24 = vmul.f32 %v3101_v41, %v1757_v57  ;;  %v1646_v26 = vmul.f32 %v13556_v13, %v1645_v2  ;;  %18423 = vst [vmem:[#allocation40_spill] sm:$0xff] %v13578_v20  ;;  %v13580_v52 = vpop.f32.mrf.mxu3  ;;  %v4944_v41 = vld [vmem:[#allocation9 + $0x50] sm:$0xff]  ;;  %v1301_v2 = vsub.f32 %v12551_v1, %v13492_v7  ;;  %v1758_v16 = vmul.f32 0.5, %v13361_v5 }
 0x348   : > { %18424 = vst [vmem:[#allocation41_spill] sm:$0xff] %v13580_v52  ;;  %v1926_v55 = vmul.f32 %v10293_v37, %v1925_v49  ;;  %v1638_v53 = vsub.f32 1.5, %v1637_v43  ;;  %v13599_v50 = vadd.f32 1.0, %v1961_v63  ;;  %5057 = vmatpush.msrb.mxu3 %v4944_v41 }
 0x349   : > { %3166 = vst.msk [vmem:[#allocation2 + $0x30] sm:$0xff] %vm878_vm1, %v3133_v24  ;;  %v1647_v36 = vmul.f32 0.5, %v1646_v26  ;;  %v1949_v26 = vadd.f32 0.18741608, %v1948_v33 }
 0x34a   : > { %v1927_v22 = vadd.f32 %v10293_v37, %v1926_v55  ;;  %v1639_v45 = vmul.f32 %v13549_v25, %v1638_v53  ;;  %10296 = vrcp.f32 %v13599_v50  ;;  %vm1968_vm8 = vweird.f32 %v13599_v50 }
 0x34b   : > { %v1648_v46 = vsub.f32 1.5, %v1647_v36 }
 0x34c   : > { %v1931_v56 = vsel %vm1930_vm4, %v10293_v37, %v1927_v22  ;;  %v1643_v37 = vsel %vm13592_vm15, %v13549_v25, %v1639_v45  ;;  %v1950_v22 = vmul.f32 %v1949_v26, %v13505_v61 }
 0x34d   : > { %v1936_v18 = vsel %vm1933_vm5, %v1935_v4, %v1931_v56  ;;  %v13615_v49 = vpop.f32.mrf.mxu2  ;;  %v1649_v29 = vmul.f32 %v13556_v13, %v1648_v46  ;;  %v1684_v60 = vmul.f32 %v1643_v37, %v1300_v42  ;;  %v1974_v46 = vand.u32 2147483648, %v13599_v50 }
 0x34e   : > { %18429 = vst [vmem:[#allocation42_spill] sm:$0xff] %v13615_v49  ;;  %v1937_v40 = vmul.f32 %v1936_v18, %v1912_v23  ;;  %v13623_v7 = vpop.f32.mrf.mxu1  ;;  %v5497_v49 = vld [vmem:[#allocation9 + $0x70] sm:$0xff] }
 0x34f   : > { %18430 = vst [vmem:[#allocation43_spill] sm:$0xff] %v13623_v7  ;;  %v13625_v10 = vpop.f32.mrf.mxu3  ;;  %v1653_v55 = vsel %vm13611_vm6, %v13556_v13, %v1649_v29  ;;  %v1719_v38 = vmul.f32 %v13344_v17, %v1684_v60  ;;  %v1975_v29 = vor.u32 1.1754944e-38, %v1974_v46  ;;  %v13939_v7 = vld [vmem:[#allocation2 + $0xef] sm:$0xff] }
 0x350   : > { %v3633_v30 = vld [vmem:[#allocation2 + $0x30] sm:$0xff]  ;;  %18431 = vst [vmem:[#allocation44_spill] sm:$0xff] %v13625_v10  ;;  %v9669_v43 = vclamps-f32 %v1937_v40, 1.0  ;;  %v1685_v14 = vmul.f32 %v1653_v55, %v1301_v2  ;;  %v10297_v42 = vpop.eup %10296  ;;  %v1972_v2 = vand.u32 2147483647, %v13599_v50  ;;  %v5773_v10 = vld [vmem:[#allocation9 + $0x80] sm:$0xff] }
 0x351   : > { %v13621_v1 = vld [vmem:[#allocation2 + $0x29] sm:$0xff]  ;;  %9710 = vmatmul.msk.f32.gmra.mxu0 %vm878_vm1, %v3633_v30  ;;  %9836 = vmatmul.msk.f32.gmra.mxu2 %vm878_vm1, %v3633_v30  ;;  %v13641_v13 = vadd.f32 %v13454_v12, %v1719_v38  ;;  %v1964_v57 = vmul.f32 %v10297_v42, %v13599_v50  ;;  %v13661_v23 = vld [vmem:[#allocation2 + $0x31] sm:$0xff]  ;;  %vm1969_vm7 = vweird.f32 %v10297_v42 }
 0x352   : > { %9867 = vmatmul.msk.f32.vlgmr.msrb.gmra.mxu3 %vm878_vm1, %v13621_v1  ;;  %v13633_v25 = vld [vmem:[#allocation2 + $0x2f] sm:$0xff]  ;;  %v3102_v63 = vadd.f32 1.0, %v9669_v43  ;;  %v1720_v53 = vmul.f32 %v13344_v17, %v1685_v14  ;;  %vm1970_vm13 = vmor %vm1968_vm8, %vm1969_vm7  ;;  %vm1973_vm9 = vcmp.eq.f32.partialorder %v1972_v2, 8.507059e+37 }
 0x353   : > { %9804 = vmatmul.msk.f32.gmra.mxu1 %vm878_vm1, %v13633_v25  ;;  %v13647_v41 = vmul.f32 0.70710677, %v13641_v13  ;;  %v1965_v5 = vsub.f32 1.0, %v1964_v57 }
 0x354   : > { %v3134_v36 = vmul.f32 %v3102_v63, %v1758_v16  ;;  %v13650_v4 = vadd.f32 %v13454_v12, %v1720_v53  ;;  %v1951_v12 = vadd.f32 1.1283791, %v1950_v22 }
 0x355   : > { %v13652_v45 = vpop.f32.mrf.mxu2  ;;  %v3020_v17 = vmul.f32 %v13647_v41, %v13647_v41  ;;  %v1966_v18 = vmul.f32 %v10297_v42, %v1965_v5 }
 0x356   : > { %18432 = vst [vmem:[#allocation45_spill] sm:$0xff] %v13652_v45  ;;  %v13659_v61 = vmul.f32 0.70710677, %v13650_v4  ;;  %v13663_v56 = vpop.f32.mrf.mxu1  ;;  %v1952_v26 = vmul.f32 %v1951_v12, %v13487_v54  ;;  %v13937_v45 = vld [vmem:[#allocation2 + $0xe9] sm:$0xff] }
 0x357   : > { %3167 = vst.msk [vmem:[#allocation2 + $0x48] sm:$0xff] %vm878_vm1, %v3134_v36  ;;  %v13665_v33 = vpop.f32.mrf.mxu3  ;;  %v13670_v24 = vmin.f32 %v3020_v17, 16.0  ;;  %v1967_v37 = vadd.f32 %v10297_v42, %v1966_v18 }
 0x358   : > { %18433 = vst [vmem:[#allocation46_spill] sm:$0xff] %v13663_v56  ;;  %v3060_v40 = vmul.f32 %v13659_v61, %v13659_v61  ;;  %v3596_v56 = vld [vmem:[#allocation2 + $0x7] sm:$0xff] }
 0x359   : > { %18434 = vst [vmem:[#allocation47_spill] sm:$0xff] %v13665_v33  ;;  %v3022_v60 = vmul.f32 2.1237322e-06, %v13670_v24  ;;  %v3033_v30 = vmul.f32 3.8918573e-05, %v13670_v24  ;;  %v1971_v55 = vsel %vm1970_vm13, %v10297_v42, %v1967_v37 }
 0x35a   : > { %9868 = vmatmul.msk.f32.gmra.mxu3 %vm878_vm1, %v13661_v23  ;;  %v13677_v43 = vmin.f32 %v3060_v40, 16.0  ;;  %v1976_v38 = vsel %vm1973_vm9, %v1975_v29, %v1971_v55  ;;  %v1759_v29 = vmul.f32 0.5, %v13457_v62 }
 0x35b   : > { %v3023_v14 = vadd.f32 0.00028619796, %v3022_v60  ;;  %v3034_v16 = vadd.f32 0.001143296, %v3033_v30  ;;  %v1977_v50 = vmul.f32 %v1976_v38, %v1952_v26 }
 0x35c   : > { %v3062_v63 = vmul.f32 2.1237322e-06, %v13677_v43  ;;  %v3073_v36 = vmul.f32 3.8918573e-05, %v13677_v43 }
 0x35d   : > { %v13681_v53 = vpop.f32.mrf.mxu2  ;;  %v3024_v5 = vmul.f32 %v3023_v14, %v13670_v24  ;;  %v3035_v54 = vmul.f32 %v3034_v16, %v13670_v24  ;;  %v9670_v12 = vclamps-f32 %v1977_v50, 1.0 }
 0x35e   : > { %18435 = vst [vmem:[#allocation48_spill] sm:$0xff] %v13681_v53  ;;  %v13684_v22 = vld [vmem:[#allocation2 + $0x48] sm:$0xff]  ;;  %v3063_v42 = vadd.f32 0.00028619796, %v3062_v63  ;;  %v13694_v46 = vpop.f32.mrf.mxu1  ;;  %v3074_v18 = vadd.f32 0.001143296, %v3073_v36 }
 0x35f   : > { %v13686_v57 = vld [vmem:[#allocation2 + $0x47] sm:$0xff]  ;;  %9711 = vmatmul.msk.f32.gmra.mxu0 %vm878_vm1, %v13684_v22  ;;  %18436 = vst [vmem:[#allocation49_spill] sm:$0xff] %v13694_v46  ;;  %v13696_v17 = vpop.f32.mrf.mxu3  ;;  %9837 = vmatmul.msk.f32.gmra.mxu2 %vm878_vm1, %v13684_v22  ;;  %v3025_v2 = vadd.f32 0.0036580483, %v3024_v5  ;;  %v3036_v40 = vadd.f32 0.014752088, %v3035_v54 }
 0x360   : > { %9805 = vmatmul.msk.f32.gmra.mxu1 %vm878_vm1, %v13686_v57  ;;  %18437 = vst [vmem:[#allocation50_spill] sm:$0xff] %v13696_v17  ;;  %v3064_v37 = vmul.f32 %v3063_v42, %v13677_v43  ;;  %v3103_v60 = vadd.f32 1.0, %v9670_v12  ;;  %v3075_v30 = vmul.f32 %v3074_v18, %v13677_v43 }
 0x361   : > { %v3026_v26 = vmul.f32 %v3025_v2, %v13670_v24  ;;  %v3037_v55 = vmul.f32 %v3036_v40, %v13670_v24 }
 0x362   : > { %v3065_v38 = vadd.f32 0.0036580483, %v3064_v37  ;;  %v3135_v14 = vmul.f32 %v3103_v60, %v1759_v29  ;;  %v3076_v16 = vadd.f32 0.014752088, %v3075_v30  ;;  %v5774_v30 = vld [vmem:[#allocation9 + $0x88] sm:$0xff] }
 0x363   : > { %v3038_v63 = vadd.f32 0.112945676, %v3037_v55  ;;  %v3027_v62 = vadd.f32 0.05243302, %v3026_v26  ;;  %v5498_v55 = vld [vmem:[#allocation9 + $0x78] sm:$0xff]  ;;  %5885 = vmatpush.msra.mxu2 %v5774_v30 }
 0x364   : > { %3168 = vst.msk [vmem:[#allocation2 + $0x50] sm:$0xff] %vm878_vm1, %v3135_v14  ;;  %v3066_v36 = vmul.f32 %v3065_v38, %v13677_v43  ;;  %v3077_v5 = vmul.f32 %v3076_v16, %v13677_v43  ;;  %5609 = vmatpush.msra.mxu1 %v5498_v55  ;;  %v13741_v55 = vld [vmem:[#allocation2 + $0x68] sm:$0xff] }
 0x365   : > { %v13705_v50 = vpop.f32.mrf.mxu2  ;;  %v3039_v54 = vmul.f32 %v3038_v63, %v13670_v24  ;;  %v3028_v29 = vmul.f32 %v3027_v62, %v13670_v24  ;;  %5886 = vmatpush.msra.mxu2 %v5773_v10 }
 0x366   : > { %18438 = vst [vmem:[#allocation51_spill] sm:$0xff] %v13705_v50  ;;  %v13711_v42 = vpop.f32.mrf.mxu1  ;;  %v3078_v18 = vadd.f32 0.112945676, %v3077_v5  ;;  %v3067_v40 = vadd.f32 0.05243302, %v3066_v36  ;;  %5610 = vmatpush.msra.mxu1 %v5497_v49 }
 0x367   : > { %18439 = vst [vmem:[#allocation52_spill] sm:$0xff] %v13711_v42  ;;  %v13713_v12 = vpop.f32.mrf.mxu3  ;;  %v3040_v2 = vadd.f32 0.4994258, %v3039_v54  ;;  %v3029_v54 = vadd.f32 0.18741608, %v3028_v29 }
 0x368   : > { %18440 = vst [vmem:[#allocation53_spill] sm:$0xff] %v13713_v12  ;;  %v3079_v37 = vmul.f32 %v3078_v18, %v13677_v43  ;;  %v3068_v36 = vmul.f32 %v3067_v40, %v13677_v43 }
 0x369   : > { %v3041_v60 = vmul.f32 %v3040_v2, %v13670_v24 }
 0x36a   : > { %v3080_v38 = vadd.f32 0.4994258, %v3079_v37  ;;  %v3069_v37 = vadd.f32 0.18741608, %v3068_v36  ;;  %v13752_v36 = vld [vmem:[#allocation2 + $0x67] sm:$0xff] }
 0x36b   : > { %v3042_v26 = vadd.f32 1.0, %v3041_v60  ;;  %v13718_v14 = vld [vmem:[#allocation2 + $0x50] sm:$0xff]  ;;  %v3030_v60 = vmul.f32 %v3029_v54, %v13670_v24 }
 0x36c   : > { %v13720_v16 = vld [vmem:[#allocation2 + $0x49] sm:$0xff]  ;;  %v3081_v5 = vmul.f32 %v3080_v38, %v13677_v43  ;;  %9712 = vmatmul.msk.f32.gmra.mxu0 %vm878_vm1, %v13718_v14  ;;  %9838 = vmatmul.msk.f32.gmra.mxu2 %vm878_vm1, %v13718_v14  ;;  %v13743_v29 = vld [vmem:[#allocation2 + $0x51] sm:$0xff]  ;;  %v3070_v42 = vmul.f32 %v3069_v37, %v13677_v43 }
 0x36d   : > { %v13722_v63 = vpop.f32.mrf.mxu2  ;;  %9869 = vmatmul.msk.f32.gmra.mxu3 %vm878_vm1, %v13720_v16  ;;  %v13730_v62 = vld [vmem:[#allocation2 + $0x4f] sm:$0xff]  ;;  %10298 = vrcp.f32 %v3042_v26  ;;  %v3031_v24 = vadd.f32 1.1283791, %v3030_v60  ;;  %vm3048_vm10 = vweird.f32 %v3042_v26 }
 0x36e   : > { %18441 = vst [vmem:[#allocation54_spill] sm:$0xff] %v13722_v63  ;;  %9806 = vmatmul.msk.f32.gmra.mxu1 %vm878_vm1, %v13730_v62  ;;  %v13736_v18 = vpop.f32.mrf.mxu1  ;;  %v3082_v40 = vadd.f32 1.0, %v3081_v5  ;;  %v3054_v63 = vand.u32 2147483648, %v3042_v26  ;;  %v3071_v46 = vadd.f32 1.1283791, %v3070_v42 }
 0x36f   : > { %18442 = vst [vmem:[#allocation55_spill] sm:$0xff] %v13736_v18  ;;  %v13738_v2 = vpop.f32.mrf.mxu3 }
 0x370   : > { %18443 = vst [vmem:[#allocation56_spill] sm:$0xff] %v13738_v2  ;;  %10300 = vrcp.f32 %v3082_v40  ;;  %v3052_v2 = vand.u32 2147483647, %v3042_v26  ;;  %v3055_v50 = vor.u32 1.1754944e-38, %v3054_v63  ;;  %v3094_v60 = vand.u32 2147483648, %v3082_v40 }
 0x371   : > { %vm3088_vm14 = vweird.f32 %v3082_v40 }
 0x372   : > { %vm3053_vm2 = vcmp.eq.f32.partialorder %v3052_v2, 8.507059e+37  ;;  %v3072_v2 = vmul.f32 %v3071_v46, %v13659_v61  ;;  %v3597_v46 = vld [vmem:[#allocation2 + $0xf] sm:$0xff] }
 0x373   : > { %v10299_v30 = vpop.eup %10298 }
 0x374   : > { %v3044_v12 = vmul.f32 %v10299_v30, %v3042_v26  ;;  %9713 = vmatmul.msk.f32.gmra.mxu0 %vm878_vm1, %v13741_v55  ;;  %9839 = vmatmul.msk.f32.gmra.mxu2 %vm878_vm1, %v13741_v55  ;;  %vm3049_vm11 = vweird.f32 %v10299_v30  ;;  %v13767_v26 = vld [vmem:[#allocation2 + $0x69] sm:$0xff] }
 0x375   : > { %v13745_v38 = vpop.f32.mrf.mxu2  ;;  %9870 = vmatmul.msk.f32.gmra.mxu3 %vm878_vm1, %v13743_v29  ;;  %vm13762_vm12 = vmor %vm3048_vm10, %vm3049_vm11 }
 0x376   : > { %18444 = vst [vmem:[#allocation57_spill] sm:$0xff] %v13745_v38  ;;  %9807 = vmatmul.msk.f32.gmra.mxu1 %vm878_vm1, %v13752_v36  ;;  %v13758_v5 = vpop.f32.mrf.mxu1  ;;  %v10301_v43 = vpop.eup %10300  ;;  %v3045_v37 = vsub.f32 1.0, %v3044_v12 }
 0x377   : > { %18445 = vst [vmem:[#allocation58_spill] sm:$0xff] %v13758_v5  ;;  %v13760_v54 = vpop.f32.mrf.mxu3  ;;  %v3084_v38 = vmul.f32 %v10301_v43, %v3082_v40  ;;  %vm3089_vm15 = vweird.f32 %v10301_v43  ;;  %v3092_v5 = vand.u32 2147483647, %v3082_v40 }
 0x378   : > { %18446 = vst [vmem:[#allocation59_spill] sm:$0xff] %v13760_v54  ;;  %v3046_v18 = vmul.f32 %v10299_v30, %v3045_v37  ;;  %v3032_v54 = vmul.f32 %v3031_v24, %v13647_v41  ;;  %vm13773_vm3 = vmor %vm3088_vm14, %vm3089_vm15  ;;  %v13780_v41 = vld [vmem:[#allocation2 + $0x6f] sm:$0xff] }
 0x379   : > { %v3085_v53 = vsub.f32 1.0, %v3084_v38  ;;  %v3095_v38 = vor.u32 1.1754944e-38, %v3094_v60  ;;  %vm3093_vm4 = vcmp.eq.f32.partialorder %v3092_v5, 8.507059e+37 }
 0x37a   : > { %v3047_v12 = vadd.f32 %v10299_v30, %v3046_v18 }
 0x37b   : > { %v3086_v33 = vmul.f32 %v10301_v43, %v3085_v53  ;;  %v13782_v53 = vld [vmem:[#allocation2 + $0x70] sm:$0xff] }
 0x37c   : > { %v3051_v42 = vsel %vm13762_vm12, %v10299_v30, %v3047_v12  ;;  %9739 = vmatmul.msk.f32.vlgmr.msra.gmra.mxu0 %vm878_vm1, %v3596_v56  ;;  %9840 = vmatmul.msk.f32.gmra.mxu2 %vm878_vm1, %v13782_v53  ;;  %v1787_v12 = vmul.f32 0.5, %v13650_v4 }
 0x37d   : > { %v13769_v37 = vpop.f32.mrf.mxu2  ;;  %9871 = vmatmul.msk.f32.gmra.mxu3 %vm878_vm1, %v13767_v26  ;;  %v3056_v18 = vsel %vm3053_vm2, %v3055_v50, %v3051_v42  ;;  %v3087_v40 = vadd.f32 %v10301_v43, %v3086_v33  ;;  %v1786_v50 = vmul.f32 0.5, %v13641_v13  ;;  %v13806_v13 = vld [vmem:[#allocation2 + $0x88] sm:$0xff] }
 0x37e   : > { %18449 = vst [vmem:[#allocation60_spill] sm:$0xff] %v13769_v37  ;;  %9808 = vmatmul.msk.f32.gmra.mxu1 %vm878_vm1, %v13780_v41  ;;  %v13789_v17 = vpop.f32.mrf.mxu1  ;;  %v3057_v30 = vmul.f32 %v3056_v18, %v3032_v54  ;;  %v13797_v37 = vld [vmem:[#allocation2 + $0x71] sm:$0xff]  ;;  %v13804_v54 = vld [vmem:[#allocation2 + $0x87] sm:$0xff] }
 0x37f   : > { %18452 = vst [vmem:[#allocation61_spill] sm:$0xff] %v13789_v17  ;;  %v13791_v56 = vpop.f32.mrf.mxu3  ;;  %v3091_v24 = vsel %vm13773_vm3, %v10301_v43, %v3087_v40  ;;  %v13818_v18 = vld [vmem:[#allocation2 + $0x89] sm:$0xff] }
 0x380   : > { %18453 = vst [vmem:[#allocation62_spill] sm:$0xff] %v13791_v56  ;;  %v9697_v60 = vclamps-f32 %v3057_v30, 1.0  ;;  %v3096_v61 = vsel %vm3093_vm4, %v3095_v38, %v3091_v24  ;;  %v13826_v40 = vld [vmem:[#allocation2 + $0x8f] sm:$0xff] }
 0x381   : > { %v3097_v33 = vmul.f32 %v3096_v61, %v3072_v2  ;;  %v13828_v30 = vld [vmem:[#allocation2 + $0x90] sm:$0xff]  ;;  %v13848_v61 = vld [vmem:[#allocation2 + $0xa8] sm:$0xff] }
 0x382   : > { %v3130_v5 = vadd.f32 1.0, %v9697_v60  ;;  %v13846_v60 = vld [vmem:[#allocation2 + $0xa7] sm:$0xff] }
 0x383   : > { %v9698_v42 = vclamps-f32 %v3097_v33, 1.0 }
 0x384   : > { %v3162_v17 = vmul.f32 %v3130_v5, %v1786_v50  ;;  %9740 = vmatmul.msk.f32.gmra.mxu0 %vm878_vm1, %v3597_v46  ;;  %9841 = vmatmul.msk.f32.gmra.mxu2 %vm878_vm1, %v13806_v13  ;;  %v13838_v50 = vld [vmem:[#allocation2 + $0x91] sm:$0xff]  ;;  %v13858_v5 = vld [vmem:[#allocation2 + $0xa9] sm:$0xff] }
 0x385   : > { %v13799_v51 = vpop.f32.mrf.mxu2  ;;  %9872 = vmatmul.msk.f32.gmra.mxu3 %vm878_vm1, %v13797_v37  ;;  %v3131_v43 = vadd.f32 1.0, %v9698_v42  ;;  %v13868_v42 = vld [vmem:[#allocation2 + $0xb0] sm:$0xff] }
 0x386   : > { %18454 = vst [vmem:[#allocation63_spill] sm:$0xff] %v13799_v51  ;;  %9809 = vmatmul.msk.f32.gmra.mxu1 %vm878_vm1, %v13804_v54  ;;  %v13812_v4 = vpop.f32.mrf.mxu1 }
 0x387   : > { %18455 = vst [vmem:[#allocation64_spill] sm:$0xff] %v13812_v4  ;;  %v13814_v63 = vpop.f32.mrf.mxu3  ;;  %v3163_v38 = vmul.f32 %v3131_v43, %v1787_v12  ;;  %v13866_v12 = vld [vmem:[#allocation2 + $0xaf] sm:$0xff] }
 0x388   : > { %18456 = vst [vmem:[#allocation65_spill] sm:$0xff] %v13814_v63  ;;  %v13908_v63 = vld [vmem:[#allocation2 + $0xd0] sm:$0xff]  ;;  %v13925_v4 = vld [vmem:[#allocation2 + $0xe8] sm:$0xff] }
 0x389   : > { %3195 = vst.msk [vmem:[#allocation2 + $0x208] sm:$0xff] %vm878_vm1, %v3162_v17 }
 0x38a   : > { %3196 = vst.msk [vmem:[#allocation2 + $0x210] sm:$0xff] %vm878_vm1, %v3163_v38 }
 0x38c   : > { %9741 = vmatmul.msk.f32.gmra.mxu0 %vm878_vm1, %v13563_v19  ;;  %9842 = vmatmul.msk.f32.gmra.mxu2 %vm878_vm1, %v13828_v30 }
 0x38d   : > { %v13820_v2 = vpop.f32.mrf.mxu2  ;;  %9873 = vmatmul.msk.f32.gmra.mxu3 %vm878_vm1, %v13818_v18 }
 0x38e   : > { %18457 = vst [vmem:[#allocation66_spill] sm:$0xff] %v13820_v2  ;;  %9810 = vmatmul.msk.f32.gmra.mxu1 %vm878_vm1, %v13826_v40  ;;  %v13834_v17 = vpop.f32.mrf.mxu1  ;;  %v13923_v2 = vld [vmem:[#allocation2 + $0xe7] sm:$0xff] }
 0x38f   : > { %18458 = vst [vmem:[#allocation67_spill] sm:$0xff] %v13834_v17  ;;  %v13836_v24 = vpop.f32.mrf.mxu3  ;;  %v13906_v17 = vld [vmem:[#allocation2 + $0xcf] sm:$0xff] }
 0x390   : > { %18459 = vst [vmem:[#allocation68_spill] sm:$0xff] %v13836_v24 }
 0x394   : > { %9742 = vmatmul.msk.f32.gmra.mxu0 %vm878_vm1, %v13633_v25  ;;  %9843 = vmatmul.msk.f32.gmra.mxu2 %vm878_vm1, %v13848_v61 }
 0x395   : > { %v13840_v19 = vpop.f32.mrf.mxu2  ;;  %9874 = vmatmul.msk.f32.gmra.mxu3 %vm878_vm1, %v13838_v50 }
 0x396   : > { %18460 = vst [vmem:[#allocation69_spill] sm:$0xff] %v13840_v19  ;;  %9811 = vmatmul.msk.f32.gmra.mxu1 %vm878_vm1, %v13846_v60  ;;  %v13854_v33 = vpop.f32.mrf.mxu1 }
 0x397   : > { %18461 = vst [vmem:[#allocation70_spill] sm:$0xff] %v13854_v33  ;;  %v13856_v46 = vpop.f32.mrf.mxu3  ;;  %v13888_v33 = vld [vmem:[#allocation2 + $0xc8] sm:$0xff] }
 0x398   : > { %18462 = vst [vmem:[#allocation71_spill] sm:$0xff] %v13856_v46  ;;  %v13878_v46 = vld [vmem:[#allocation2 + $0xb1] sm:$0xff] }
 0x39c   : > { %9743 = vmatmul.msk.f32.gmra.mxu0 %vm878_vm1, %v13686_v57  ;;  %9844 = vmatmul.msk.f32.gmra.mxu2 %vm878_vm1, %v13868_v42 }
 0x39d   : > { %v13860_v25 = vpop.f32.mrf.mxu2  ;;  %9875 = vmatmul.msk.f32.gmra.mxu3 %vm878_vm1, %v13858_v5 }
 0x39e   : > { %18463 = vst [vmem:[#allocation72_spill] sm:$0xff] %v13860_v25  ;;  %9812 = vmatmul.msk.f32.gmra.mxu1 %vm878_vm1, %v13866_v12  ;;  %v13874_v43 = vpop.f32.mrf.mxu1  ;;  %v13886_v25 = vld [vmem:[#allocation2 + $0xc7] sm:$0xff] }
 0x39f   : > { %18464 = vst [vmem:[#allocation73_spill] sm:$0xff] %v13874_v43  ;;  %v13876_v38 = vpop.f32.mrf.mxu3 }
 0x3a0   : > { %18465 = vst [vmem:[#allocation74_spill] sm:$0xff] %v13876_v38 }
 0x3a4   : > { %9744 = vmatmul.msk.f32.gmra.mxu0 %vm878_vm1, %v13730_v62  ;;  %9845 = vmatmul.msk.f32.gmra.mxu2 %vm878_vm1, %v13888_v33 }
 0x3a5   : > { %v13880_v24 = vpop.f32.mrf.mxu2  ;;  %9876 = vmatmul.msk.f32.gmra.mxu3 %vm878_vm1, %v13878_v46 }
 0x3a6   : > { %18466 = vst [vmem:[#allocation75_spill] sm:$0xff] %v13880_v24  ;;  %9813 = vmatmul.msk.f32.gmra.mxu1 %vm878_vm1, %v13886_v25  ;;  %v13894_v38 = vpop.f32.mrf.mxu1  ;;  %v13898_v24 = vld [vmem:[#allocation2 + $0xc9] sm:$0xff] }
 0x3a7   : > { %18467 = vst [vmem:[#allocation76_spill] sm:$0xff] %v13894_v38  ;;  %v13896_v43 = vpop.f32.mrf.mxu3  ;;  %v4083_v38 = vld [vmem:[#allocation2 + $0x9] sm:$0xff] }
 0x3a8   : > { %18468 = vst [vmem:[#allocation77_spill] sm:$0xff] %v13896_v43 }
 0x3ac   : > { %9745 = vmatmul.msk.f32.gmra.mxu0 %vm878_vm1, %v13752_v36  ;;  %9846 = vmatmul.msk.f32.gmra.mxu2 %vm878_vm1, %v13908_v63 }
 0x3ad   : > { %v13900_v19 = vpop.f32.mrf.mxu2  ;;  %9877 = vmatmul.msk.f32.gmra.mxu3 %vm878_vm1, %v13898_v24 }
 0x3ae   : > { %18469 = vst [vmem:[#allocation78_spill] sm:$0xff] %v13900_v19  ;;  %9814 = vmatmul.msk.f32.gmra.mxu1 %vm878_vm1, %v13906_v17  ;;  %v13914_v43 = vpop.f32.mrf.mxu1  ;;  %v13916_v19 = vld [vmem:[#allocation2 + $0xd1] sm:$0xff] }
 0x3af   : > { %18470 = vst [vmem:[#allocation79_spill] sm:$0xff] %v13914_v43  ;;  %v13918_v56 = vpop.f32.mrf.mxu3  ;;  %v13933_v43 = vpop.f32.mrf.mxu0 }
 0x3b0   : > { %18471 = vst [vmem:[#allocation80_spill] sm:$0xff] %v13918_v56 }
 0x3b4   : > { %9771 = vmatmul.msk.f32.vlgmr.msrb.gmra.mxu0 %vm878_vm1, %v4083_v38  ;;  %9847 = vmatmul.msk.f32.gmra.mxu2 %vm878_vm1, %v13925_v4  ;;  %v4084_v38 = vld [vmem:[#allocation2 + $0x11] sm:$0xff] }
 0x3b5   : > { %9878 = vmatmul.msk.f32.gmra.mxu3 %vm878_vm1, %v13916_v19  ;;  %v13927_v51 = vpop.f32.mrf.mxu2 }
 0x3b6   : > { %18472 = vst [vmem:[#allocation81_spill] sm:$0xff] %v13927_v51  ;;  %9815 = vmatmul.msk.f32.gmra.mxu1 %vm878_vm1, %v13923_v2  ;;  %v13935_v56 = vpop.f32.mrf.mxu1  ;;  %v13944_v51 = vld [vmem:[#allocation2 + $0xf0] sm:$0xff] }
 0x3b7   : > { %18473 = vst [vmem:[#allocation82_spill] sm:$0xff] %v13935_v56  ;;  %v13950_v56 = vpop.f32.mrf.mxu3 }
 0x3b8   : > { %18474 = vst [vmem:[#allocation83_spill] sm:$0xff] %v13950_v56 }
 0x3bc   : > { %9772 = vmatmul.msk.f32.gmra.mxu0 %vm878_vm1, %v4084_v38  ;;  %9848 = vmatmul.msk.f32.gmra.mxu2 %vm878_vm1, %v13944_v51  ;;  %v13954_v38 = vpop.f32.mrf.mxu0 }
 0x3bd   : > { %9879 = vmatmul.msk.f32.gmra.mxu3 %vm878_vm1, %v13937_v45  ;;  %v13952_v20 = vpop.f32.mrf.mxu2  ;;  %18476 = vst [vmem:[#allocation85_spill] sm:$0xff] %v13954_v38 }
 0x3be   : > { %9816 = vmatmul.msk.f32.gmra.mxu1 %vm878_vm1, %v13939_v7  ;;  %18475 = vst [vmem:[#allocation84_spill] sm:$0xff] %v13952_v20  ;;  %v13956_v52 = vpop.f32.mrf.mxu1  ;;  %v5221_v20 = vld [vmem:[#allocation9 + $0x60] sm:$0xff] }
 0x3bf   : > { %18477 = vst [vmem:[#allocation86_spill] sm:$0xff] %v13956_v52  ;;  %v13972_v49 = vpop.f32.mrf.mxu3  ;;  %v5222_v52 = vld [vmem:[#allocation9 + $0x68] sm:$0xff] }
 0x3c0   : > { %18478 = vst [vmem:[#allocation87_spill] sm:$0xff] %v13972_v49  ;;  %5333 = vmatpush.msra.mxu0 %v5222_v52 }
 0x3c2   : > { %5334 = vmatpush.msra.mxu0 %v5221_v20 }
 0x3c4   : > { %9773 = vmatmul.msk.f32.gmra.mxu0 %vm878_vm1, %v13621_v1  ;;  %9849 = vmatmul.msk.f32.gmra.mxu2 %vm878_vm1, %v13966_v59  ;;  %v13976_v1 = vld [vmem:[#allocation2 + $0x109] sm:$0xff]  ;;  %v13978_v56 = vpop.f32.mrf.mxu0 }
 0x3c5   : > { %9880 = vmatmul.msk.f32.gmra.mxu3 %vm878_vm1, %v13958_v6  ;;  %v13974_v10 = vpop.f32.mrf.mxu2  ;;  %18480 = vst [vmem:[#allocation89_spill] sm:$0xff] %v13978_v56  ;;  %v14044_v56 = vld [vmem:[#allocation2 + $0x147] sm:$0xff] }
 0x3c6   : > { %9817 = vmatmul.msk.f32.gmra.mxu1 %vm878_vm1, %v13964_v58  ;;  %18479 = vst [vmem:[#allocation88_spill] sm:$0xff] %v13974_v10  ;;  %v13988_v49 = vpop.f32.mrf.mxu1 }
 0x3c7   : > { %18481 = vst [vmem:[#allocation90_spill] sm:$0xff] %v13988_v49  ;;  %v13994_v52 = vpop.f32.mrf.mxu3  ;;  %v14134_v49 = vld [vmem:[#allocation2 + $0x188] sm:$0xff] }
 0x3c8   : > { %18482 = vst [vmem:[#allocation91_spill] sm:$0xff] %v13994_v52  ;;  %v14016_v52 = vld [vmem:[#allocation2 + $0x129] sm:$0xff] }
 0x3c9   : > { %18486 = vst [vmem:[#allocation95_spill] sm:$0xff] %v14016_v52 }
 0x3ca   : > { %18516 = vst [vmem:[#allocation125_spill] sm:$0xff] %v14134_v49 }
 0x3cc   : > { %9774 = vmatmul.msk.f32.gmra.mxu0 %vm878_vm1, %v13661_v23  ;;  %9850 = vmatmul.msk.f32.gmra.mxu2 %vm878_vm1, %v13986_v39  ;;  %v13998_v23 = vld [vmem:[#allocation2 + $0x111] sm:$0xff] }
 0x3cd   : > { %9881 = vmatmul.msk.f32.gmra.mxu3 %vm878_vm1, %v13976_v1  ;;  %v13996_v10 = vpop.f32.mrf.mxu2 }
 0x3ce   : > { %9818 = vmatmul.msk.f32.gmra.mxu1 %vm878_vm1, %v13984_v31  ;;  %18483 = vst [vmem:[#allocation92_spill] sm:$0xff] %v13996_v10  ;;  %v14008_v11 = vpop.f32.mrf.mxu0  ;;  %v14060_v10 = vld [vmem:[#allocation2 + $0x149] sm:$0xff] }
 0x3cf   : > { %18484 = vst [vmem:[#allocation93_spill] sm:$0xff] %v14008_v11  ;;  %v14038_v11 = vld [vmem:[#allocation2 + $0x131] sm:$0xff] }
 0x3d0   : > { %v14014_v20 = vpop.f32.mrf.mxu1  ;;  %18492 = vst [vmem:[#allocation101_spill] sm:$0xff] %v14038_v11 }
 0x3d1   : > { %18485 = vst [vmem:[#allocation94_spill] sm:$0xff] %v14014_v20 }
 0x3d2   : > { %18498 = vst [vmem:[#allocation107_spill] sm:$0xff] %v14060_v10 }
 0x3d4   : > { %9775 = vmatmul.msk.f32.gmra.mxu0 %vm878_vm1, %v13720_v16  ;;  %9851 = vmatmul.msk.f32.gmra.mxu2 %vm878_vm1, %v14006_v21 }
 0x3d5   : > { %9882 = vmatmul.msk.f32.gmra.mxu3 %vm878_vm1, %v13998_v23  ;;  %v14018_v28 = vpop.f32.mrf.mxu3  ;;  %v14028_v9 = vpop.f32.mrf.mxu2 }
 0x3d6   : > { %9819 = vmatmul.msk.f32.gmra.mxu1 %vm878_vm1, %v14004_v0  ;;  %18487 = vst [vmem:[#allocation96_spill] sm:$0xff] %v14018_v28 }
 0x3d7   : > { %18489 = vst [vmem:[#allocation98_spill] sm:$0xff] %v14028_v9  ;;  %v14046_v9 = vld [vmem:[#allocation2 + $0x148] sm:$0xff] }
 0x3d8   : > { %18493 = vst [vmem:[#allocation102_spill] sm:$0xff] %v14046_v9 }
 0x3dc   : > { %9776 = vmatmul.msk.f32.gmra.mxu0 %vm878_vm1, %v13743_v29  ;;  %9852 = vmatmul.msk.f32.gmra.mxu2 %vm878_vm1, %v14026_v44  ;;  %v14034_v15 = vpop.f32.mrf.mxu0  ;;  %v14090_v44 = vld [vmem:[#allocation2 + $0x168] sm:$0xff] }
 0x3dd   : > { %9883 = vmatmul.msk.f32.gmra.mxu3 %vm878_vm1, %v14016_v52  ;;  %18490 = vst [vmem:[#allocation99_spill] sm:$0xff] %v14034_v15  ;;  %v14036_v3 = vpop.f32.mrf.mxu1  ;;  %v14048_v28 = vpop.f32.mrf.mxu3  ;;  %v14171_v52 = vld [vmem:[#allocation2 + $0x1a7] sm:$0xff] }
 0x3de   : > { %9820 = vmatmul.msk.f32.gmra.mxu1 %vm878_vm1, %v14024_v27  ;;  %18491 = vst [vmem:[#allocation100_spill] sm:$0xff] %v14036_v3 }
 0x3df   : > { %18494 = vst [vmem:[#allocation103_spill] sm:$0xff] %v14048_v28  ;;  %v14066_v28 = vld [vmem:[#allocation2 + $0x14f] sm:$0xff] }
 0x3e0   : > { %18505 = vst [vmem:[#allocation114_spill] sm:$0xff] %v14090_v44 }
 0x3e2   : > { %v14054_v15 = vpop.f32.mrf.mxu2 }
 0x3e3   : > { %18495 = vst [vmem:[#allocation104_spill] sm:$0xff] %v14054_v15 }
 0x3e4   : > { %9777 = vmatmul.msk.f32.gmra.mxu0 %vm878_vm1, %v13767_v26  ;;  %9853 = vmatmul.msk.f32.gmra.mxu2 %vm878_vm1, %v14046_v9  ;;  %v14082_v9 = vld [vmem:[#allocation2 + $0x151] sm:$0xff] }
 0x3e5   : > { %9884 = vmatmul.msk.f32.gmra.mxu3 %vm878_vm1, %v14038_v11  ;;  %v14068_v11 = vld [vmem:[#allocation2 + $0x150] sm:$0xff]  ;;  %18504 = vst [vmem:[#allocation113_spill] sm:$0xff] %v14082_v9 }
 0x3e6   : > { %9821 = vmatmul.msk.f32.gmra.mxu1 %vm878_vm1, %v14044_v56  ;;  %18499 = vst [vmem:[#allocation108_spill] sm:$0xff] %v14068_v11 }
 0x3e9   : > { %v14056_v3 = vpop.f32.mrf.mxu0 }
 0x3ea   : > { %18496 = vst [vmem:[#allocation105_spill] sm:$0xff] %v14056_v3 }
 0x3eb   : > { %v14058_v20 = vpop.f32.mrf.mxu1 }
 0x3ec   : > { %18497 = vst [vmem:[#allocation106_spill] sm:$0xff] %v14058_v20  ;;  %9899 = vmatmul.msk.f32.vlgmr.msra.gmra.mxu0 %vm878_vm1, %v13686_v57  ;;  %9854 = vmatmul.msk.f32.gmra.mxu2 %vm878_vm1, %v14068_v11  ;;  %v14112_v11 = vld [vmem:[#allocation2 + $0x170] sm:$0xff] }
 0x3ed   : > { %9885 = vmatmul.msk.f32.gmra.mxu3 %vm878_vm1, %v14060_v10  ;;  %v14088_v10 = vld [vmem:[#allocation2 + $0x167] sm:$0xff]  ;;  %18510 = vst [vmem:[#allocation119_spill] sm:$0xff] %v14112_v11 }
 0x3ee   : > { %9822 = vmatmul.msk.f32.gmra.mxu1 %vm878_vm1, %v14066_v28 }
 0x3ef   : > { %v14076_v20 = vpop.f32.mrf.mxu2 }
 0x3f0   : > { %v14074_v3 = vpop.f32.mrf.mxu3  ;;  %18501 = vst [vmem:[#allocation110_spill] sm:$0xff] %v14076_v20 }
 0x3f1   : > { %18500 = vst [vmem:[#allocation109_spill] sm:$0xff] %v14074_v3  ;;  %v14078_v15 = vpop.f32.mrf.mxu0  ;;  %v14104_v3 = vld [vmem:[#allocation2 + $0x169] sm:$0xff] }
 0x3f2   : > { %18502 = vst [vmem:[#allocation111_spill] sm:$0xff] %v14078_v15 }
 0x3f3   : > { %v14080_v57 = vpop.f32.mrf.mxu1  ;;  %18509 = vst [vmem:[#allocation118_spill] sm:$0xff] %v14104_v3 }
 0x3f4   : > { %18503 = vst [vmem:[#allocation112_spill] sm:$0xff] %v14080_v57  ;;  %9900 = vmatmul.msk.f32.gmra.mxu0 %vm878_vm1, %v13730_v62  ;;  %9855 = vmatmul.msk.f32.gmra.mxu2 %vm878_vm1, %v14090_v44  ;;  %v14126_v44 = vld [vmem:[#allocation2 + $0x171] sm:$0xff] }
 0x3f5   : > { %9886 = vmatmul.msk.f32.gmra.mxu3 %vm878_vm1, %v14082_v9  ;;  %v14110_v9 = vld [vmem:[#allocation2 + $0x16f] sm:$0xff]  ;;  %18515 = vst [vmem:[#allocation124_spill] sm:$0xff] %v14126_v44 }
 0x3f6   : > { %9823 = vmatmul.msk.f32.gmra.mxu1 %vm878_vm1, %v14088_v10 }
 0x3f7   : > { %v14098_v57 = vpop.f32.mrf.mxu2 }
 0x3f8   : > { %v14096_v15 = vpop.f32.mrf.mxu3  ;;  %18507 = vst [vmem:[#allocation116_spill] sm:$0xff] %v14098_v57 }
 0x3f9   : > { %18506 = vst [vmem:[#allocation115_spill] sm:$0xff] %v14096_v15  ;;  %v14100_v20 = vpop.f32.mrf.mxu0 }
 0x3fb   : > { %v14102_v62 = vpop.f32.mrf.mxu1 }
 0x3fc   : > { %18508 = vst [vmem:[#allocation117_spill] sm:$0xff] %v14102_v62  ;;  %9901 = vmatmul.msk.f32.gmra.mxu0 %vm878_vm1, %v13752_v36  ;;  %9856 = vmatmul.msk.f32.gmra.mxu2 %vm878_vm1, %v14112_v11  ;;  %v14146_v11 = vld [vmem:[#allocation2 + $0x189] sm:$0xff] }
 0x3fd   : > { %9887 = vmatmul.msk.f32.gmra.mxu3 %vm878_vm1, %v14104_v3  ;;  %v14132_v3 = vld [vmem:[#allocation2 + $0x187] sm:$0xff]  ;;  %18520 = vst [vmem:[#allocation129_spill] sm:$0xff] %v14146_v11 }
 0x3fe   : > { %9824 = vmatmul.msk.f32.gmra.mxu1 %vm878_vm1, %v14110_v9 }
 0x3ff   : > { %v14120_v62 = vpop.f32.mrf.mxu2 }
 0x400   : > { %v14118_v57 = vpop.f32.mrf.mxu3  ;;  %18512 = vst [vmem:[#allocation121_spill] sm:$0xff] %v14120_v62 }
 0x401   : > { %18511 = vst [vmem:[#allocation120_spill] sm:$0xff] %v14118_v57  ;;  %v14122_v15 = vpop.f32.mrf.mxu0 }
 0x402   : > { %18513 = vst [vmem:[#allocation122_spill] sm:$0xff] %v14122_v15  ;;  %v14154_v15 = vld [vmem:[#allocation2 + $0x190] sm:$0xff] }
 0x403   : > { %v14124_v36 = vpop.f32.mrf.mxu1  ;;  %18521 = vst [vmem:[#allocation130_spill] sm:$0xff] %v14154_v15 }
 0x404   : > { %18514 = vst [vmem:[#allocation123_spill] sm:$0xff] %v14124_v36  ;;  %9902 = vmatmul.msk.f32.gmra.mxu0 %vm878_vm1, %v13780_v41  ;;  %9857 = vmatmul.msk.f32.gmra.mxu2 %vm878_vm1, %v14134_v49 }
 0x405   : > { %9888 = vmatmul.msk.f32.gmra.mxu3 %vm878_vm1, %v14126_v44  ;;  %v14152_v44 = vld [vmem:[#allocation2 + $0x18f] sm:$0xff] }
 0x406   : > { %9825 = vmatmul.msk.f32.gmra.mxu1 %vm878_vm1, %v14132_v3 }
 0x407   : > { %v14142_v36 = vpop.f32.mrf.mxu2 }
 0x408   : > { %v14140_v62 = vpop.f32.mrf.mxu3  ;;  %18518 = vst [vmem:[#allocation127_spill] sm:$0xff] %v14142_v36 }
 0x409   : > { %18517 = vst [vmem:[#allocation126_spill] sm:$0xff] %v14140_v62  ;;  %v14144_v57 = vpop.f32.mrf.mxu0 }
 0x40a   : > { %18519 = vst [vmem:[#allocation128_spill] sm:$0xff] %v14144_v57 }
 0x40b   : > { %v4528_v41 = vpop.f32.mrf.mxu1 }
 0x40c   : > { %9903 = vmatmul.msk.f32.gmra.mxu0 %vm878_vm1, %v13804_v54  ;;  %9858 = vmatmul.msk.f32.gmra.mxu2 %vm878_vm1, %v14154_v15  ;;  %v4610_v36 = vadd.f32 %v4528_v41, %v13386_v35  ;;  %v14173_v15 = vld [vmem:[#allocation2 + $0x1a8] sm:$0xff] }
 0x40d   : > { %9889 = vmatmul.msk.f32.gmra.mxu3 %vm878_vm1, %v14146_v11  ;;  %v14165_v11 = vld [vmem:[#allocation2 + $0x191] sm:$0xff]  ;;  %18525 = vst [vmem:[#allocation134_spill] sm:$0xff] %v14173_v15 }
 0x40e   : > { %9826 = vmatmul.msk.f32.gmra.mxu1 %vm878_vm1, %v14152_v44  ;;  %18524 = vst [vmem:[#allocation133_spill] sm:$0xff] %v14165_v11 }
 0x40f   : > { %v4804_v49 = vpop.f32.mrf.mxu2 }
 0x410   : > { %v14161_v62 = vpop.f32.mrf.mxu3  ;;  %v4886_v54 = vadd.f32 %v4804_v49, %v4610_v36 }
 0x411   : > { %18522 = vst [vmem:[#allocation131_spill] sm:$0xff] %v14161_v62  ;;  %v14163_v57 = vpop.f32.mrf.mxu0 }
 0x412   : > { %18523 = vst [vmem:[#allocation132_spill] sm:$0xff] %v14163_v57  ;;  %v14186_v57 = vld [vmem:[#allocation2 + $0x1a9] sm:$0xff] }
 0x413   : > { %v4531_v38 = vpop.f32.mrf.mxu1 }
 0x414   : > { %9904 = vmatmul.msk.f32.gmra.mxu0 %vm878_vm1, %v13826_v40  ;;  %9859 = vmatmul.msk.f32.gmra.mxu2 %vm878_vm1, %v14173_v15  ;;  %v4611_v35 = vadd.f32 %v4531_v38, %v13441_v34  ;;  %v10506_v15 = vld [vmem:[#allocation2 + $0x1af] sm:$0xff] }
 0x415   : > { %9890 = vmatmul.msk.f32.gmra.mxu3 %vm878_vm1, %v14165_v11  ;;  %v10507_v34 = vld [vmem:[#allocation2 + $0x1b0] sm:$0xff] }
 0x416   : > { %9827 = vmatmul.msk.f32.gmra.mxu1 %vm878_vm1, %v14171_v52 }
 0x417   : > { %v4807_v41 = vpop.f32.mrf.mxu2 }
 0x418   : > { %v5080_v49 = vpop.f32.mrf.mxu3  ;;  %v14184_v62 = vadd.f32 %v4807_v41, %v4611_v35 }
 0x419   : > { %v14180_v36 = vadd.f32 %v5080_v49, %v4886_v54  ;;  %v14182_v40 = vpop.f32.mrf.mxu0 }
 0x41a   : > { %18526 = vst [vmem:[#allocation135_spill] sm:$0xff] %v14184_v62  ;;  %v10509_v62 = vld [vmem:[#allocation2 + $0x1c7] sm:$0xff] }
 0x41b   : > { %v4534_v11 = vpop.f32.mrf.mxu1 }
 0x41c   : > { %9905 = vmatmul.msk.f32.gmra.mxu0 %vm878_vm1, %v13846_v60  ;;  %9860 = vmatmul.msk.f32.gmra.mxu2 %vm878_vm1, %v10507_v34  ;;  %v4612_v38 = vadd.f32 %v4534_v11, %v13444_v48  ;;  %v10508_v60 = vld [vmem:[#allocation2 + $0x1b1] sm:$0xff]  ;;  %v10510_v34 = vld [vmem:[#allocation2 + $0x1c8] sm:$0xff] }
 0x41d   : > { %9891 = vmatmul.msk.f32.gmra.mxu3 %vm878_vm1, %v14186_v57 }
 0x41e   : > { %9828 = vmatmul.msk.f32.gmra.mxu1 %vm878_vm1, %v10506_v15  ;;  %v4337_v15 = vadd.f32 %v13368_v32, %v13471_v47  ;;  %v10512_v32 = vld [vmem:[#allocation2 + $0x1cf] sm:$0xff] }
 0x41f   : > { %v4810_v54 = vpop.f32.mrf.mxu2  ;;  %v10513_v47 = vld [vmem:[#allocation2 + $0x1d0] sm:$0xff] }
 0x420   : > { %v14197_v49 = vadd.f32 %v4810_v54, %v4612_v38 }
 0x421   : > { %v14195_v35 = vpop.f32.mrf.mxu0 }
 0x422   : > { %18527 = vst [vmem:[#allocation136_spill] sm:$0xff] %v14197_v49 }
 0x423   : > { %v4537_v41 = vpop.f32.mrf.mxu1 }
 0x424   : > { %9906 = vmatmul.msk.f32.gmra.mxu0 %vm878_vm1, %v13866_v12  ;;  %9861 = vmatmul.msk.f32.gmra.mxu2 %vm878_vm1, %v10510_v34  ;;  %v4613_v48 = vadd.f32 %v4537_v41, %v4337_v15  ;;  %v10511_v12 = vld [vmem:[#allocation2 + $0x1c9] sm:$0xff]  ;;  %v10514_v15 = vld [vmem:[#allocation2 + $0x1d1] sm:$0xff] }
 0x425   : > { %9892 = vmatmul.msk.f32.gmra.mxu3 %vm878_vm1, %v10508_v60  ;;  %v10516_v34 = vld [vmem:[#allocation2 + $0x1e8] sm:$0xff] }
 0x426   : > { %9829 = vmatmul.msk.f32.gmra.mxu1 %vm878_vm1, %v10509_v62 }
 0x427   : > { %v4813_v11 = vpop.f32.mrf.mxu2 }
 0x428   : > { %v14208_v54 = vadd.f32 %v4813_v11, %v4613_v48 }
 0x429   : > { %v14206_v38 = vpop.f32.mrf.mxu0 }
 0x42b   : > { %v14210_v49 = vpop.f32.mrf.mxu1 }
 0x42c   : > { %9907 = vmatmul.msk.f32.gmra.mxu0 %vm878_vm1, %v13886_v25  ;;  %9862 = vmatmul.msk.f32.gmra.mxu2 %vm878_vm1, %v10513_v47  ;;  %v10515_v25 = vld [vmem:[#allocation2 + $0x1e7] sm:$0xff]  ;;  %v10519_v47 = vld [vmem:[#allocation2 + $0x1f0] sm:$0xff] }
 0x42d   : > { %9893 = vmatmul.msk.f32.gmra.mxu3 %vm878_vm1, %v10511_v12 }
 0x42e   : > { %9830 = vmatmul.msk.f32.gmra.mxu1 %vm878_vm1, %v10512_v32  ;;  %v10517_v32 = vld [vmem:[#allocation2 + $0x1e9] sm:$0xff] }
 0x42f   : > { %v14217_v62 = vpop.f32.mrf.mxu2 }
 0x431   : > { %v14219_v41 = vpop.f32.mrf.mxu0 }
 0x433   : > { %v14221_v60 = vpop.f32.mrf.mxu1 }
 0x434   : > { %9908 = vmatmul.msk.f32.gmra.mxu0 %vm878_vm1, %v13906_v17  ;;  %9863 = vmatmul.msk.f32.gmra.mxu2 %vm878_vm1, %v10516_v34  ;;  %v10518_v17 = vld [vmem:[#allocation2 + $0x1ef] sm:$0xff] }
 0x435   : > { %9894 = vmatmul.msk.f32.gmra.mxu3 %vm878_vm1, %v10514_v15 }
 0x436   : > { %9831 = vmatmul.msk.f32.gmra.mxu1 %vm878_vm1, %v10515_v25 }
 0x437   : > { %v14228_v48 = vpop.f32.mrf.mxu2 }
 0x439   : > { %v14230_v11 = vpop.f32.mrf.mxu0 }
 0x43b   : > { %v14232_v12 = vpop.f32.mrf.mxu1 }
 0x43c   : > { %9909 = vmatmul.msk.f32.gmra.mxu0 %vm878_vm1, %v13923_v2  ;;  %9864 = vmatmul.msk.f32.gmra.mxu2 %vm878_vm1, %v10519_v47  ;;  %v14249_v2 = vld [vmem:[#allocation2 + $0x207] sm:$0xff] }
 0x43d   : > { %9895 = vmatmul.msk.f32.gmra.mxu3 %vm878_vm1, %v10517_v32  ;;  %v14251_v32 = vld [vmem:[#allocation2 + $0x208] sm:$0xff] }
 0x43e   : > { %9832 = vmatmul.msk.f32.gmra.mxu1 %vm878_vm1, %v10518_v17  ;;  %18530 = vst [vmem:[#allocation139_spill] sm:$0xff] %v14251_v32 }
 0x43f   : > { %v14239_v15 = vpop.f32.mrf.mxu2 }
 0x440   : > { %18528 = vst [vmem:[#allocation137_spill] sm:$0xff] %v14239_v15  ;;  %v14271_v15 = vld [vmem:[#allocation2 + $0x210] sm:$0xff] }
 0x441   : > { %v14241_v25 = vpop.f32.mrf.mxu0  ;;  %18534 = vst [vmem:[#allocation143_spill] sm:$0xff] %v14271_v15 }
 0x443   : > { %v14243_v34 = vpop.f32.mrf.mxu1 }
 0x444   : > { %18529 = vst [vmem:[#allocation138_spill] sm:$0xff] %v14243_v34  ;;  %9910 = vmatmul.msk.f32.gmra.mxu0 %vm878_vm1, %v13939_v7  ;;  %9865 = vmatmul.msk.f32.gmra.mxu2 %vm878_vm1, %v14251_v32  ;;  %v14263_v7 = vld [vmem:[#allocation2 + $0x209] sm:$0xff] }
 0x445   : > { %9896 = vmatmul.msk.f32.gmra.mxu3 %vm878_vm1, %v13554_v8  ;;  %18533 = vst [vmem:[#allocation142_spill] sm:$0xff] %v14263_v7  ;;  %v14269_v8 = vld [vmem:[#allocation2 + $0x20f] sm:$0xff] }
 0x446   : > { %9833 = vmatmul.msk.f32.gmra.mxu1 %vm878_vm1, %v14249_v2 }
 0x447   : > { %v14257_v17 = vpop.f32.mrf.mxu2 }
 0x448   : > { %18531 = vst [vmem:[#allocation140_spill] sm:$0xff] %v14257_v17 }
 0x449   : > { %v14259_v47 = vpop.f32.mrf.mxu0 }
 0x44b   : > { %v14261_v34 = vpop.f32.mrf.mxu1 }
 0x44c   : > { %18532 = vst [vmem:[#allocation141_spill] sm:$0xff] %v14261_v34  ;;  %9911 = vmatmul.msk.f32.gmra.mxu0 %vm878_vm1, %v13964_v58  ;;  %9866 = vmatmul.msk.f32.gmra.mxu2 %vm878_vm1, %v14271_v15  ;;  %v14283_v58 = vld [vmem:[#allocation2 + $0x211] sm:$0xff] }
 0x44d   : > { %9897 = vmatmul.msk.f32.gmra.mxu3 %vm878_vm1, %v14263_v7 }
 0x44e   : > { %9834 = vmatmul.msk.f32.gmra.mxu1 %vm878_vm1, %v14269_v8 }
 0x44f   : > { %v14277_v17 = vpop.f32.mrf.mxu2 }
 0x450   : > { %18535 = vst [vmem:[#allocation144_spill] sm:$0xff] %v14277_v17 }
 0x451   : > { %v14279_v34 = vpop.f32.mrf.mxu0 }
 0x453   : > { %v14281_v32 = vpop.f32.mrf.mxu1 }
 0x454   : > { %9912 = vmatmul.msk.f32.gmra.mxu0 %vm878_vm1, %v13984_v31  ;;  %9963 = vmatmul.msk.f32.vlgmr.msra.gmra.mxu2 %vm878_vm1, %v13720_v16 }
 0x455   : > { %9898 = vmatmul.msk.f32.gmra.mxu3 %vm878_vm1, %v14283_v58 }
 0x456   : > { %9931 = vmatmul.msk.f32.vlgmr.msra.gmra.mxu1 %vm878_vm1, %v13684_v22 }
 0x457   : > { %v14293_v15 = vpop.f32.mrf.mxu2 }
 0x459   : > { %v14295_v17 = vpop.f32.mrf.mxu0 }
 0x45b   : > { %v14297_v7 = vpop.f32.mrf.mxu1 }
 0x45c   : > { %9913 = vmatmul.msk.f32.gmra.mxu0 %vm878_vm1, %v14004_v0  ;;  %9964 = vmatmul.msk.f32.gmra.mxu2 %vm878_vm1, %v13743_v29 }
 0x45e   : > { %9932 = vmatmul.msk.f32.gmra.mxu1 %vm878_vm1, %v13718_v14 }
 0x45f   : > { %v14305_v31 = vpop.f32.mrf.mxu2 }
 0x461   : > { %v14307_v22 = vpop.f32.mrf.mxu0 }
 0x463   : > { %v14309_v16 = vpop.f32.mrf.mxu1 }
 0x464   : > { %9914 = vmatmul.msk.f32.gmra.mxu0 %vm878_vm1, %v14024_v27  ;;  %9965 = vmatmul.msk.f32.gmra.mxu2 %vm878_vm1, %v13767_v26 }
 0x466   : > { %9933 = vmatmul.msk.f32.gmra.mxu1 %vm878_vm1, %v13741_v55 }
 0x467   : > { %v14317_v0 = vpop.f32.mrf.mxu2 }
 0x469   : > { %v14319_v14 = vpop.f32.mrf.mxu0 }
 0x46b   : > { %v14321_v29 = vpop.f32.mrf.mxu1 }
 0x46c   : > { %9915 = vmatmul.msk.f32.gmra.mxu0 %vm878_vm1, %v14044_v56  ;;  %9966 = vmatmul.msk.f32.gmra.mxu2 %vm878_vm1, %v13797_v37 }
 0x46e   : > { %9934 = vmatmul.msk.f32.gmra.mxu1 %vm878_vm1, %v13782_v53 }
 0x46f   : > { %v14329_v27 = vpop.f32.mrf.mxu2 }
 0x471   : > { %v14331_v55 = vpop.f32.mrf.mxu0 }
 0x473   : > { %v14333_v26 = vpop.f32.mrf.mxu1 }
 0x474   : > { %18536 = vst [vmem:[#allocation145_spill] sm:$0xff] %v14333_v26  ;;  %9916 = vmatmul.msk.f32.gmra.mxu0 %vm878_vm1, %v14066_v28  ;;  %9967 = vmatmul.msk.f32.gmra.mxu2 %vm878_vm1, %v13818_v18 }
 0x476   : > { %9935 = vmatmul.msk.f32.gmra.mxu1 %vm878_vm1, %v13806_v13 }
 0x477   : > { %v14341_v56 = vpop.f32.mrf.mxu2 }
 0x478   : > { %18537 = vst [vmem:[#allocation146_spill] sm:$0xff] %v14341_v56 }
 0x479   : > { %v14343_v53 = vpop.f32.mrf.mxu0 }
 0x47b   : > { %v14345_v37 = vpop.f32.mrf.mxu1 }
 0x47c   : > { %18538 = vst [vmem:[#allocation147_spill] sm:$0xff] %v14345_v37  ;;  %9917 = vmatmul.msk.f32.gmra.mxu0 %vm878_vm1, %v14088_v10  ;;  %9968 = vmatmul.msk.f32.gmra.mxu2 %vm878_vm1, %v13838_v50 }
 0x47e   : > { %9936 = vmatmul.msk.f32.gmra.mxu1 %vm878_vm1, %v13828_v30 }
 0x47f   : > { %v14353_v28 = vpop.f32.mrf.mxu2 }
 0x480   : > { %18539 = vst [vmem:[#allocation148_spill] sm:$0xff] %v14353_v28  ;;  %v8297_v28 = vld [vmem:[%s18235_s5 + $0x8] sm:$0xff] }
 0x481   : > { %v14355_v13 = vpop.f32.mrf.mxu0  ;;  %8408 = vmatpush.msra.mxu3 %v8297_v28 }
 0x483   : > { %v14357_v18 = vpop.f32.mrf.mxu1 }
 0x484   : > { %18540 = vst [vmem:[#allocation149_spill] sm:$0xff] %v14357_v18  ;;  %9918 = vmatmul.msk.f32.gmra.mxu0 %vm878_vm1, %v14110_v9  ;;  %9969 = vmatmul.msk.f32.gmra.mxu2 %vm878_vm1, %v13858_v5 }
 0x486   : > { %9937 = vmatmul.msk.f32.gmra.mxu1 %vm878_vm1, %v13848_v61 }
 0x487   : > { %v14365_v10 = vpop.f32.mrf.mxu2 }
 0x488   : > { %18541 = vst [vmem:[#allocation150_spill] sm:$0xff] %v14365_v10 }
 0x489   : > { %v14367_v30 = vpop.f32.mrf.mxu0 }
 0x48b   : > { %v14369_v50 = vpop.f32.mrf.mxu1 }
 0x48c   : > { %18542 = vst [vmem:[#allocation151_spill] sm:$0xff] %v14369_v50  ;;  %9919 = vmatmul.msk.f32.gmra.mxu0 %vm878_vm1, %v14132_v3  ;;  %9970 = vmatmul.msk.f32.gmra.mxu2 %vm878_vm1, %v13878_v46  ;;  %v14396_v46 = vpop.f32.mrf.mxu3 }
 0x48e   : > { %9938 = vmatmul.msk.f32.gmra.mxu1 %vm878_vm1, %v13868_v42 }
 0x48f   : > { %v14380_v9 = vpop.f32.mrf.mxu2 }
 0x490   : > { %18543 = vst [vmem:[#allocation152_spill] sm:$0xff] %v14380_v9 }
 0x491   : > { %v14382_v61 = vpop.f32.mrf.mxu0 }
 0x493   : > { %v14384_v5 = vpop.f32.mrf.mxu1 }
 0x494   : > { %18544 = vst [vmem:[#allocation153_spill] sm:$0xff] %v14384_v5  ;;  %9920 = vmatmul.msk.f32.gmra.mxu0 %vm878_vm1, %v14152_v44  ;;  %9971 = vmatmul.msk.f32.gmra.mxu2 %vm878_vm1, %v13898_v24  ;;  %v14412_v9 = vpop.f32.mrf.mxu3  ;;  %v18561_v5 = vld [vmem:[#allocation122_spill] sm:$0xff] }
 0x496   : > { %9939 = vmatmul.msk.f32.gmra.mxu1 %vm878_vm1, %v13888_v33 }
 0x497   : > { %v14392_v3 = vpop.f32.mrf.mxu2 }
 0x498   : > { %18545 = vst [vmem:[#allocation154_spill] sm:$0xff] %v14392_v3  ;;  %v5211_v3 = vld [vmem:[#allocation2 + $0x1af] sm:$0xff] }
 0x499   : > { %v14394_v42 = vpop.f32.mrf.mxu0 }
 0x49b   : > { %v14398_v28 = vpop.f32.mrf.mxu1 }
 0x49c   : > { %18546 = vst [vmem:[#allocation155_spill] sm:$0xff] %v14398_v28  ;;  %9921 = vmatmul.msk.f32.gmra.mxu0 %vm878_vm1, %v14171_v52  ;;  %9972 = vmatmul.msk.f32.gmra.mxu2 %vm878_vm1, %v13916_v19 }
 0x49e   : > { %9940 = vmatmul.msk.f32.gmra.mxu1 %vm878_vm1, %v13908_v63 }
 0x49f   : > { %v14406_v44 = vpop.f32.mrf.mxu2 }
 0x4a0   : > { %18547 = vst [vmem:[#allocation156_spill] sm:$0xff] %v14406_v44  ;;  %v5212_v44 = vld [vmem:[#allocation2 + $0x1c7] sm:$0xff] }
 0x4a1   : > { %v14408_v24 = vpop.f32.mrf.mxu0 }
 0x4a3   : > { %v14410_v33 = vpop.f32.mrf.mxu1 }
 0x4a4   : > { %18548 = vst [vmem:[#allocation157_spill] sm:$0xff] %v14410_v33  ;;  %9922 = vmatmul.msk.f32.gmra.mxu0 %vm878_vm1, %v5211_v3  ;;  %9973 = vmatmul.msk.f32.gmra.mxu2 %vm878_vm1, %v13937_v45  ;;  %v14430_v3 = vpop.f32.mrf.mxu3  ;;  %v5213_v33 = vld [vmem:[#allocation2 + $0x1cf] sm:$0xff] }
 0x4a6   : > { %9941 = vmatmul.msk.f32.gmra.mxu1 %vm878_vm1, %v13925_v4 }
 0x4a7   : > { %v14419_v63 = vpop.f32.mrf.mxu2 }
 0x4a8   : > { %18549 = vst [vmem:[#allocation158_spill] sm:$0xff] %v14419_v63 }
 0x4a9   : > { %v14421_v19 = vpop.f32.mrf.mxu0 }
 0x4ab   : > { %v14423_v52 = vpop.f32.mrf.mxu1 }
 0x4ac   : > { %18550 = vst [vmem:[#allocation159_spill] sm:$0xff] %v14423_v52  ;;  %9923 = vmatmul.msk.f32.gmra.mxu0 %vm878_vm1, %v5212_v44  ;;  %9974 = vmatmul.msk.f32.gmra.mxu2 %vm878_vm1, %v13958_v6  ;;  %v5214_v52 = vld [vmem:[#allocation2 + $0x1e7] sm:$0xff] }
 0x4ae   : > { %9942 = vmatmul.msk.f32.gmra.mxu1 %vm878_vm1, %v13944_v51  ;;  %v14443_v51 = vpop.f32.mrf.mxu3 }
 0x4af   : > { %v14432_v4 = vpop.f32.mrf.mxu2 }
 0x4b0   : > { %18551 = vst [vmem:[#allocation160_spill] sm:$0xff] %v14432_v4 }
 0x4b1   : > { %v14434_v45 = vpop.f32.mrf.mxu0 }
 0x4b3   : > { %v14436_v63 = vpop.f32.mrf.mxu1 }
 0x4b4   : > { %18552 = vst [vmem:[#allocation161_spill] sm:$0xff] %v14436_v63  ;;  %9924 = vmatmul.msk.f32.gmra.mxu0 %vm878_vm1, %v5213_v33  ;;  %9975 = vmatmul.msk.f32.gmra.mxu2 %vm878_vm1, %v13976_v1  ;;  %v5215_v63 = vld [vmem:[#allocation2 + $0x1ef] sm:$0xff] }
 0x4b6   : > { %9943 = vmatmul.msk.f32.gmra.mxu1 %vm878_vm1, %v13966_v59  ;;  %v14460_v33 = vpop.f32.mrf.mxu3 }
 0x4b7   : > { %v14445_v6 = vpop.f32.mrf.mxu2 }
 0x4b8   : > { %18553 = vst [vmem:[#allocation162_spill] sm:$0xff] %v14445_v6 }
 0x4b9   : > { %v14447_v44 = vpop.f32.mrf.mxu0 }
 0x4bb   : > { %v14449_v4 = vpop.f32.mrf.mxu1 }
 0x4bc   : > { %18554 = vst [vmem:[#allocation163_spill] sm:$0xff] %v14449_v4  ;;  %9925 = vmatmul.msk.f32.gmra.mxu0 %vm878_vm1, %v5214_v52  ;;  %9976 = vmatmul.msk.f32.gmra.mxu2 %vm878_vm1, %v13998_v23  ;;  %v3988_v4 = vadd.f32 %v14100_v20, %v13933_v43  ;;  %v18562_v20 = vld [vmem:[#allocation90_spill] sm:$0xff] }
 0x4be   : > { %9944 = vmatmul.msk.f32.gmra.mxu1 %vm878_vm1, %v13986_v39  ;;  %v18557_v39 = vld [vmem:[#allocation95_spill] sm:$0xff]  ;;  %v4327_v23 = vadd.f32 %v14219_v41, %v3988_v4  ;;  %v18564_v41 = vld [vmem:[#allocation101_spill] sm:$0xff] }
 0x4bf   : > { %v14456_v59 = vpop.f32.mrf.mxu2 }
 0x4c0   : > { %18555 = vst [vmem:[#allocation164_spill] sm:$0xff] %v14456_v59  ;;  %v4603_v10 = vadd.f32 %v18562_v20, %v4327_v23  ;;  %v18568_v20 = vld [vmem:[#allocation96_spill] sm:$0xff] }
 0x4c1   : > { %v14458_v1 = vpop.f32.mrf.mxu0 }
 0x4c3   : > { %v14462_v6 = vpop.f32.mrf.mxu1 }
 0x4c4   : > { %18556 = vst [vmem:[#allocation165_spill] sm:$0xff] %v14462_v6  ;;  %9926 = vmatmul.msk.f32.gmra.mxu0 %vm878_vm1, %v5215_v63  ;;  %9977 = vmatmul.msk.f32.gmra.mxu2 %vm878_vm1, %v18557_v39  ;;  %v18560_v6 = vld [vmem:[#allocation85_spill] sm:$0xff]  ;;  %v14481_v63 = vpop.f32.mrf.mxu3  ;;  %v18565_v39 = vld [vmem:[#allocation92_spill] sm:$0xff] }
 0x4c5   : > { %v3991_v43 = vadd.f32 %v18561_v5, %v18560_v6  ;;  %v18567_v6 = vld [vmem:[#allocation94_spill] sm:$0xff] }
 0x4c6   : > { %9945 = vmatmul.msk.f32.gmra.mxu1 %vm878_vm1, %v14006_v21  ;;  %v18563_v21 = vld [vmem:[#allocation97_spill] sm:$0xff] }
 0x4c7   : > { %v14472_v52 = vpop.f32.mrf.mxu2  ;;  %v4328_v4 = vadd.f32 %v14230_v11, %v3991_v43  ;;  %v18571_v11 = vld [vmem:[#allocation102_spill] sm:$0xff] }
 0x4c8   : > { %18558 = vst [vmem:[#allocation95_spill] sm:$0xff] %v14472_v52  ;;  %v4879_v52 = vadd.f32 %v18565_v39, %v4603_v10  ;;  %v18572_v10 = vld [vmem:[#allocation107_spill] sm:$0xff] }
 0x4c9   : > { %v14474_v59 = vpop.f32.mrf.mxu0  ;;  %v4604_v23 = vadd.f32 %v18567_v6, %v4328_v4  ;;  %v18573_v4 = vld [vmem:[#allocation98_spill] sm:$0xff] }
 0x4ca   : > { %v5155_v50 = vadd.f32 %v18568_v20, %v4879_v52 }
 0x4cb   : > { %v14476_v28 = vpop.f32.mrf.mxu1  ;;  %v4880_v39 = vadd.f32 %v18573_v4, %v4604_v23 }
 0x4cc   : > { %18559 = vst [vmem:[#allocation166_spill] sm:$0xff] %v14476_v28  ;;  %9927 = vmatmul.msk.f32.gmra.mxu0 %vm878_vm1, %v14249_v2  ;;  %9978 = vmatmul.msk.f32.gmra.mxu2 %vm878_vm1, %v18564_v41  ;;  %v18569_v2 = vld [vmem:[#allocation89_spill] sm:$0xff]  ;;  %v5432_v41 = vadd.f32 %v14319_v14, %v5155_v50  ;;  %v14506_v43 = vpop.f32.mrf.mxu3  ;;  %v18575_v50 = vld [vmem:[#allocation103_spill] sm:$0xff] }
 0x4cd   : > { %v5156_v56 = vadd.f32 %v18575_v50, %v4880_v39 }
 0x4ce   : > { %9946 = vmatmul.msk.f32.gmra.mxu1 %vm878_vm1, %v18563_v21  ;;  %v18570_v21 = vld [vmem:[#allocation128_spill] sm:$0xff] }
 0x4cf   : > { %v14491_v28 = vpop.f32.mrf.mxu2  ;;  %v3994_v37 = vadd.f32 %v18570_v21, %v18569_v2  ;;  %v18574_v21 = vld [vmem:[#allocation100_spill] sm:$0xff]  ;;  %v5433_v23 = vadd.f32 %v14331_v55, %v5156_v56 }
 0x4d0   : > { %18566 = vst [vmem:[#allocation85_spill] sm:$0xff] %v14491_v28  ;;  %v5219_v55 = vld [vmem:[#allocation2 + $0x22f] sm:$0xff] }
 0x4d1   : > { %v14495_v18 = vpop.f32.mrf.mxu0  ;;  %v4329_v52 = vadd.f32 %v14241_v25, %v3994_v37  ;;  %v18576_v25 = vld [vmem:[#allocation93_spill] sm:$0xff]  ;;  %v18577_v37 = vld [vmem:[#allocation132_spill] sm:$0xff] }
 0x4d3   : > { %v5612_v5 = vpop.f32.mrf.mxu1  ;;  %v4605_v14 = vadd.f32 %v18574_v21, %v4329_v52  ;;  %v18579_v52 = vld [vmem:[#allocation113_spill] sm:$0xff] }
 0x4d4   : > { %9928 = vmatmul.msk.f32.gmra.mxu0 %vm878_vm1, %v14269_v8  ;;  %9979 = vmatmul.msk.f32.gmra.mxu2 %vm878_vm1, %v18572_v10  ;;  %v5708_v6 = vadd.f32 %v5612_v5, %v5432_v41  ;;  %v5218_v8 = vld [vmem:[#allocation2 + $0x227] sm:$0xff]  ;;  %v3997_v5 = vadd.f32 %v18577_v37, %v18576_v25  ;;  %v14531_v50 = vpop.f32.mrf.mxu3  ;;  %v18581_v37 = vld [vmem:[#allocation106_spill] sm:$0xff] }
 0x4d5   : > { %v18578_v41 = vld [vmem:[#allocation108_spill] sm:$0xff] }
 0x4d6   : > { %9947 = vmatmul.msk.f32.gmra.mxu1 %vm878_vm1, %v18571_v11 }
 0x4d7   : > { %v5888_v20 = vpop.f32.mrf.mxu2 }
 0x4d8   : > { %v14510_v28 = vadd.f32 %v5888_v20, %v5708_v6  ;;  %v4330_v6 = vadd.f32 %v14259_v47, %v3997_v5  ;;  %v18580_v20 = vld [vmem:[#allocation104_spill] sm:$0xff] }
 0x4d9   : > { %v14527_v39 = vpop.f32.mrf.mxu0 }
 0x4da   : > { %v6018_v11 = vsel %vm878_vm1, %v14510_v28, 0.0  ;;  %v6146_v10 = vmul.f32 %v14510_v28, %v14510_v28 }
 0x4db   : > { %v5615_v2 = vpop.f32.mrf.mxu1  ;;  %6019 = vadd.xlane.f32.xlu1 %v6018_v11 }
 0x4dc   : > { %9929 = vmatmul.msk.f32.gmra.mxu0 %vm878_vm1, %v5218_v8  ;;  %9980 = vmatmul.msk.f32.gmra.mxu2 %vm878_vm1, %v18579_v52  ;;  %v6178_v4 = vsel %vm878_vm1, %v6146_v10, 0.0  ;;  %v4881_v8 = vadd.f32 %v18580_v20, %v4605_v14  ;;  %v5709_v21 = vadd.f32 %v5615_v2, %v5433_v23  ;;  %v18582_v52 = vld [vmem:[#allocation109_spill] sm:$0xff]  ;;  %v18583_v2 = vld [vmem:[#allocation99_spill] sm:$0xff]  ;;  %v18584_v23 = vld [vmem:[#allocation114_spill] sm:$0xff] }
 0x4dd   : > { %6179 = vadd.xlane.f32.xlu2 %v6178_v4  ;;  %v4000_v14 = vadd.f32 %v14182_v40, %v18583_v2  ;;  %v18585_v4 = vld [vmem:[#allocation118_spill] sm:$0xff]  ;;  %v18588_v2 = vld [vmem:[#allocation115_spill] sm:$0xff] }
 0x4de   : > { %9948 = vmatmul.msk.f32.gmra.mxu1 %vm878_vm1, %v18578_v41  ;;  %v4606_v41 = vadd.f32 %v18581_v37, %v4330_v6  ;;  %v5157_v26 = vadd.f32 %v18582_v52, %v4881_v8  ;;  %v18586_v8 = vld [vmem:[#allocation110_spill] sm:$0xff]  ;;  %v18587_v52 = vld [vmem:[#allocation112_spill] sm:$0xff] }
 0x4df   : > { %v5891_v11 = vpop.f32.mrf.mxu2  ;;  %v4331_v20 = vadd.f32 %v14279_v34, %v4000_v14 }
 0x4e0   : > { %v14533_v56 = vadd.f32 %v5891_v11, %v5709_v21  ;;  %v5434_v5 = vadd.f32 %v14343_v53, %v5157_v26  ;;  %v4882_v21 = vadd.f32 %v18586_v8, %v4606_v41  ;;  %v14556_v26 = vpop.f32.mrf.mxu3  ;;  %v18592_v8 = vld [vmem:[#allocation116_spill] sm:$0xff] }
 0x4e2   : > { %v6021_v10 = vsel %vm878_vm1, %v14533_v56, 0.0  ;;  %v6147_v47 = vmul.f32 %v14533_v56, %v14533_v56 }
 0x4e3   : > { %v5618_v25 = vpop.f32.mrf.mxu1  ;;  %6022 = vadd.xlane.f32.xlu0 %v6021_v10  ;;  %v4607_v10 = vadd.f32 %v18587_v52, %v4331_v20 }
 0x4e4   : > { %9930 = vmatmul.msk.f32.gmra.mxu0 %vm878_vm1, %v5219_v55  ;;  %9981 = vmatmul.msk.f32.gmra.mxu2 %vm878_vm1, %v18585_v4  ;;  %v6181_v6 = vsel %vm878_vm1, %v6147_v47, 0.0  ;;  %v5710_v11 = vadd.f32 %v5618_v25, %v5434_v5  ;;  %v14552_v55 = vpop.f32.mrf.mxu0  ;;  %v18589_v25 = vld [vmem:[#allocation105_spill] sm:$0xff]  ;;  %v18590_v5 = vld [vmem:[#allocation119_spill] sm:$0xff]  ;;  %v18591_v4 = vld [vmem:[#allocation124_spill] sm:$0xff] }
 0x4e5   : > { %6182 = vadd.xlane.f32.xlu1 %v6181_v6  ;;  %v4003_v41 = vadd.f32 %v14195_v35, %v18589_v25 }
 0x4e6   : > { %9949 = vmatmul.msk.f32.gmra.mxu1 %vm878_vm1, %v18584_v23  ;;  %v5158_v23 = vadd.f32 %v18588_v2, %v4882_v21  ;;  %v4883_v21 = vadd.f32 %v18592_v8, %v4607_v10  ;;  %v18593_v2 = vld [vmem:[#allocation117_spill] sm:$0xff] }
 0x4e7   : > { %v5894_v37 = vpop.f32.mrf.mxu2  ;;  %v4332_v20 = vadd.f32 %v14295_v17, %v4003_v41  ;;  %v18598_v8 = vld [vmem:[#allocation121_spill] sm:$0xff] }
 0x4e8   : > { %v14554_v40 = vadd.f32 %v5894_v37, %v5710_v11  ;;  %v5435_v14 = vadd.f32 %v14355_v13, %v5158_v23  ;;  %v14584_v17 = vpop.f32.mrf.mxu3 }
 0x4e9   : > { %v4608_v23 = vadd.f32 %v18593_v2, %v4332_v20 }
 0x4ea   : > { %v6024_v47 = vsel %vm878_vm1, %v14554_v40, 0.0  ;;  %v6148_v34 = vmul.f32 %v14554_v40, %v14554_v40 }
 0x4eb   : > { %v5621_v53 = vpop.f32.mrf.mxu1  ;;  %6025 = vadd.xlane.f32.xlu2 %v6024_v47  ;;  %v18594_v47 = vld [vmem:[#allocation120_spill] sm:$0xff] }
 0x4ec   : > { %9982 = vmatmul.msk.f32.gmra.mxu2 %vm878_vm1, %v18591_v4  ;;  %v6184_v6 = vsel %vm878_vm1, %v6148_v34, 0.0  ;;  %v5711_v11 = vadd.f32 %v5621_v53, %v5435_v14  ;;  %v14576_v35 = vpop.f32.mrf.mxu0  ;;  %v5159_v25 = vadd.f32 %v18594_v47, %v4883_v21  ;;  %v18595_v53 = vld [vmem:[#allocation111_spill] sm:$0xff]  ;;  %v18596_v14 = vld [vmem:[#allocation125_spill] sm:$0xff]  ;;  %v4884_v21 = vadd.f32 %v18598_v8, %v4608_v23 }
 0x4ed   : > { %6185 = vadd.xlane.f32.xlu0 %v6184_v6  ;;  %v4006_v10 = vadd.f32 %v14206_v38, %v18595_v53  ;;  %v18597_v4 = vld [vmem:[#allocation129_spill] sm:$0xff]  ;;  %v18599_v47 = vld [vmem:[#allocation123_spill] sm:$0xff] }
 0x4ee   : > { %9950 = vmatmul.msk.f32.gmra.mxu1 %vm878_vm1, %v18590_v5  ;;  %v5436_v41 = vadd.f32 %v14367_v30, %v5159_v25  ;;  %v18600_v25 = vld [vmem:[#allocation126_spill] sm:$0xff]  ;;  %v18602_v23 = vld [vmem:[#allocation133_spill] sm:$0xff] }
 0x4ef   : > { %v5897_v37 = vpop.f32.mrf.mxu2  ;;  %v4333_v20 = vadd.f32 %v14307_v22, %v4006_v10 }
 0x4f0   : > { %v14574_v52 = vadd.f32 %v5897_v37, %v5711_v11 }
 0x4f1   : > { %v4609_v30 = vadd.f32 %v18599_v47, %v4333_v20 }
 0x4f2   : > { %v6027_v5 = vsel %vm878_vm1, %v14574_v52, 0.0  ;;  %v6149_v34 = vmul.f32 %v14574_v52, %v14574_v52 }
 0x4f3   : > { %v5624_v13 = vpop.f32.mrf.mxu1  ;;  %6028 = vadd.xlane.f32.xlu1 %v6027_v5  ;;  %v5160_v5 = vadd.f32 %v18600_v25, %v4884_v21 }
 0x4f4   : > { %9983 = vmatmul.msk.f32.gmra.mxu2 %vm878_vm1, %v18597_v4  ;;  %v6187_v6 = vsel %vm878_vm1, %v6149_v34, 0.0  ;;  %v5712_v11 = vadd.f32 %v5624_v13, %v5436_v41  ;;  %v18601_v13 = vld [vmem:[#allocation130_spill] sm:$0xff]  ;;  %v14612_v41 = vpop.f32.mrf.mxu3  ;;  %v18603_v4 = vld [vmem:[#allocation127_spill] sm:$0xff] }
 0x4f5   : > { %6188 = vadd.xlane.f32.xlu2 %v6187_v6  ;;  %v5437_v22 = vadd.f32 %v14382_v61, %v5160_v5  ;;  %v4885_v6 = vadd.f32 %v18603_v4, %v4609_v30 }
 0x4f6   : > { %9951 = vmatmul.msk.f32.gmra.mxu1 %vm878_vm1, %v18596_v14  ;;  %v14604_v14 = vpop.f32.mrf.mxu0 }
 0x4f7   : > { %v5900_v37 = vpop.f32.mrf.mxu2 }
 0x4f8   : > { %v14596_v2 = vadd.f32 %v5900_v37, %v5712_v11  ;;  %v18605_v37 = vld [vmem:[#allocation131_spill] sm:$0xff] }
 0x4f9   : > { %v5161_v61 = vadd.f32 %v18605_v37, %v4885_v6  ;;  %v5487_v6 = vld [vmem:[#allocation2 + $0x1b0] sm:$0xff] }
 0x4fa   : > { %v6030_v53 = vsel %vm878_vm1, %v14596_v2, 0.0  ;;  %v6150_v34 = vmul.f32 %v14596_v2, %v14596_v2 }
 0x4fb   : > { %v5627_v38 = vpop.f32.mrf.mxu1  ;;  %6031 = vadd.xlane.f32.xlu0 %v6030_v53  ;;  %v5438_v5 = vadd.f32 %v14394_v42, %v5161_v61  ;;  %v18606_v53 = vld [vmem:[#allocation134_spill] sm:$0xff]  ;;  %v8296_v42 = vld [vmem:[%s18235_s5] sm:$0xff] }
 0x4fc   : > { %9984 = vmatmul.msk.f32.gmra.mxu2 %vm878_vm1, %v18602_v23  ;;  %v6190_v10 = vsel %vm878_vm1, %v6150_v34, 0.0  ;;  %v5713_v20 = vadd.f32 %v5627_v38, %v5437_v22  ;;  %v14630_v22 = vpop.f32.mrf.mxu3  ;;  %8409 = vmatpush.msra.mxu3 %v8296_v42 }
 0x4fd   : > { %6191 = vadd.xlane.f32.xlu1 %v6190_v10 }
 0x4fe   : > { %9952 = vmatmul.msk.f32.gmra.mxu1 %vm878_vm1, %v18601_v13  ;;  %v14628_v30 = vpop.f32.mrf.mxu0 }
 0x4ff   : > { %v5903_v8 = vpop.f32.mrf.mxu2 }
 0x500   : > { %v14615_v21 = vadd.f32 %v5903_v8, %v5713_v20  ;;  %v5763_v20 = vld [vmem:[#allocation2 + $0x1b1] sm:$0xff]  ;;  %v5439_v8 = vadd.f32 %v14408_v24, %v14180_v36 }
 0x502   : > { %18604 = vst [vmem:[#allocation122_spill] sm:$0xff] %v14615_v21  ;;  %v6033_v47 = vsel %vm878_vm1, %v14615_v21, 0.0  ;;  %v6151_v25 = vmul.f32 %v14615_v21, %v14615_v21 }
 0x503   : > { %v5630_v11 = vpop.f32.mrf.mxu1  ;;  %6034 = vadd.xlane.f32.xlu2 %v6033_v47 }
 0x504   : > { %9985 = vmatmul.msk.f32.gmra.mxu2 %vm878_vm1, %v14186_v57  ;;  %v6193_v38 = vsel %vm878_vm1, %v6151_v25, 0.0  ;;  %v5714_v34 = vadd.f32 %v5630_v11, %v5438_v5  ;;  %v14650_v5 = vpop.f32.mrf.mxu3 }
 0x505   : > { %6194 = vadd.xlane.f32.xlu0 %v6193_v38  ;;  %v18609_v38 = vld [vmem:[#allocation135_spill] sm:$0xff] }
 0x506   : > { %9953 = vmatmul.msk.f32.gmra.mxu1 %vm878_vm1, %v18606_v53  ;;  %v14646_v61 = vpop.f32.mrf.mxu0 }
 0x507   : > { %v5906_v13 = vpop.f32.mrf.mxu2 }
 0x508   : > { %v14632_v23 = vadd.f32 %v5906_v13, %v5714_v34  ;;  %v5163_v34 = vadd.f32 %v14396_v46, %v18609_v38  ;;  %v5488_v13 = vld [vmem:[#allocation2 + $0x1c8] sm:$0xff] }
 0x50a   : > { %18607 = vst [vmem:[#allocation90_spill] sm:$0xff] %v14632_v23  ;;  %v6036_v4 = vsel %vm878_vm1, %v14632_v23, 0.0  ;;  %v6152_v57 = vmul.f32 %v14632_v23, %v14632_v23  ;;  %v5440_v42 = vadd.f32 %v14421_v19, %v5163_v34  ;;  %v5489_v34 = vld [vmem:[#allocation2 + $0x1d0] sm:$0xff] }
 0x50b   : > { %v5633_v10 = vpop.f32.mrf.mxu1  ;;  %6037 = vadd.xlane.f32.xlu1 %v6036_v4 }
 0x50c   : > { %9986 = vmatmul.msk.f32.gmra.mxu2 %vm878_vm1, %v5763_v20  ;;  %v6196_v11 = vsel %vm878_vm1, %v6152_v57, 0.0  ;;  %v5715_v37 = vadd.f32 %v5633_v10, %v5439_v8  ;;  %v5764_v10 = vld [vmem:[#allocation2 + $0x1c9] sm:$0xff]  ;;  %v14672_v38 = vpop.f32.mrf.mxu3 }
 0x50d   : > { %6197 = vadd.xlane.f32.xlu2 %v6196_v11  ;;  %v18611_v11 = vld [vmem:[#allocation136_spill] sm:$0xff] }
 0x50e   : > { %9954 = vmatmul.msk.f32.gmra.mxu1 %vm878_vm1, %v5487_v6  ;;  %v14664_v20 = vpop.f32.mrf.mxu0 }
 0x50f   : > { %v5909_v47 = vpop.f32.mrf.mxu2 }
 0x510   : > { %v14648_v25 = vadd.f32 %v5909_v47, %v5715_v37  ;;  %v5164_v37 = vadd.f32 %v14412_v9, %v18611_v11  ;;  %v18612_v9 = vld [vmem:[#allocation29_spill] sm:$0xff]  ;;  %v18615_v11 = vld [vmem:[#allocation27_spill] sm:$0xff] }
 0x512   : > { %18608 = vst [vmem:[#allocation97_spill] sm:$0xff] %v14648_v25  ;;  %v6039_v36 = vsel %vm878_vm1, %v14648_v25, 0.0  ;;  %v6153_v24 = vmul.f32 %v14648_v25, %v14648_v25 }
 0x513   : > { %v5636_v53 = vpop.f32.mrf.mxu1  ;;  %6040 = vadd.xlane.f32.xlu0 %v6039_v36  ;;  %v5441_v36 = vadd.f32 %v14434_v45, %v5164_v37  ;;  %v5165_v45 = vadd.f32 %v14430_v3, %v14208_v54 }
 0x514   : > { %9987 = vmatmul.msk.f32.gmra.mxu2 %vm878_vm1, %v5764_v10  ;;  %v6199_v4 = vsel %vm878_vm1, %v6153_v24, 0.0  ;;  %v5716_v57 = vadd.f32 %v5636_v53, %v5440_v42  ;;  %v5765_v53 = vld [vmem:[#allocation2 + $0x1d1] sm:$0xff]  ;;  %v14696_v3 = vpop.f32.mrf.mxu3 }
 0x515   : > { %6200 = vadd.xlane.f32.xlu1 %v6199_v4 }
 0x516   : > { %9955 = vmatmul.msk.f32.gmra.mxu1 %vm878_vm1, %v5488_v13  ;;  %v18613_v13 = vld [vmem:[#allocation25_spill] sm:$0xff] }
 0x517   : > { %v5912_v46 = vpop.f32.mrf.mxu2  ;;  %v4021_v10 = vadd.f32 %v18613_v13, %v18612_v9  ;;  %v18616_v9 = vld [vmem:[#allocation26_spill] sm:$0xff] }
 0x518   : > { %v14662_v6 = vadd.f32 %v5912_v46, %v5716_v57  ;;  %v18617_v13 = vld [vmem:[#allocation30_spill] sm:$0xff] }
 0x51a   : > { %18610 = vst [vmem:[#allocation101_spill] sm:$0xff] %v14662_v6  ;;  %v6042_v19 = vsel %vm878_vm1, %v14662_v6, 0.0  ;;  %v6154_v47 = vmul.f32 %v14662_v6, %v14662_v6 }
 0x51b   : > { %v5639_v8 = vpop.f32.mrf.mxu1  ;;  %6043 = vadd.xlane.f32.xlu2 %v6042_v19  ;;  %v4338_v19 = vadd.f32 %v18615_v11, %v4021_v10  ;;  %v4024_v10 = vadd.f32 %v18617_v13, %v18616_v9  ;;  %v18621_v9 = vld [vmem:[#allocation33_spill] sm:$0xff] }
 0x51c   : > { %9988 = vmatmul.msk.f32.gmra.mxu2 %vm878_vm1, %v5765_v53  ;;  %v6202_v24 = vsel %vm878_vm1, %v6154_v47, 0.0  ;;  %v5717_v42 = vadd.f32 %v5639_v8, %v5441_v36  ;;  %v5490_v53 = vld [vmem:[#allocation2 + $0x1e8] sm:$0xff] }
 0x51d   : > { %6203 = vadd.xlane.f32.xlu0 %v6202_v24  ;;  %v5766_v8 = vld [vmem:[#allocation2 + $0x1e9] sm:$0xff]  ;;  %v4614_v36 = vadd.f32 %v14210_v49, %v4338_v19  ;;  %v5442_v24 = vadd.f32 %v14447_v44, %v5165_v45 }
 0x51e   : > { %9956 = vmatmul.msk.f32.gmra.mxu1 %vm878_vm1, %v5489_v34  ;;  %v14689_v34 = vpop.f32.mrf.mxu0  ;;  %v18619_v44 = vld [vmem:[#allocation32_spill] sm:$0xff] }
 0x51f   : > { %v5915_v4 = vpop.f32.mrf.mxu2  ;;  %v4339_v19 = vadd.f32 %v18619_v44, %v4024_v10  ;;  %v18623_v44 = vld [vmem:[#allocation35_spill] sm:$0xff] }
 0x520   : > { %v14680_v57 = vadd.f32 %v5915_v4, %v5717_v42  ;;  %v4890_v42 = vadd.f32 %v14217_v62, %v4614_v36 }
 0x521   : > { %v4615_v62 = vadd.f32 %v14221_v60, %v4339_v19 }
 0x522   : > { %18614 = vst [vmem:[#allocation92_spill] sm:$0xff] %v14680_v57  ;;  %v6045_v37 = vsel %vm878_vm1, %v14680_v57, 0.0  ;;  %v6155_v47 = vmul.f32 %v14680_v57, %v14680_v57  ;;  %v5166_v45 = vadd.f32 %v14443_v51, %v4890_v42  ;;  %v18678_v57 = vld [vmem:[#allocation76_spill] sm:$0xff] }
 0x523   : > { %v5642_v46 = vpop.f32.mrf.mxu1  ;;  %6046 = vadd.xlane.f32.xlu1 %v6045_v37  ;;  %v4891_v10 = vadd.f32 %v14228_v48, %v4615_v62 }
 0x524   : > { %9989 = vmatmul.msk.f32.gmra.mxu2 %vm878_vm1, %v5766_v8  ;;  %v6205_v54 = vsel %vm878_vm1, %v6155_v47, 0.0  ;;  %v5718_v4 = vadd.f32 %v5642_v46, %v5442_v24  ;;  %v5491_v8 = vld [vmem:[#allocation2 + $0x1f0] sm:$0xff]  ;;  %v5443_v46 = vadd.f32 %v14458_v1, %v5166_v45  ;;  %v18620_v24 = vld [vmem:[#allocation31_spill] sm:$0xff] }
 0x525   : > { %6206 = vadd.xlane.f32.xlu2 %v6205_v54  ;;  %v5767_v54 = vld [vmem:[#allocation2 + $0x1f1] sm:$0xff]  ;;  %v4027_v13 = vadd.f32 %v18621_v9, %v18620_v24  ;;  %v5167_v45 = vadd.f32 %v14460_v33, %v4891_v10 }
 0x526   : > { %9957 = vmatmul.msk.f32.gmra.mxu1 %vm878_vm1, %v5490_v53  ;;  %v14714_v51 = vpop.f32.mrf.mxu0  ;;  %v18626_v33 = vld [vmem:[#allocation34_spill] sm:$0xff]  ;;  %v18628_v24 = vld [vmem:[#allocation137_spill] sm:$0xff] }
 0x527   : > { %v5918_v11 = vpop.f32.mrf.mxu2  ;;  %v4340_v19 = vadd.f32 %v18623_v44, %v4027_v13  ;;  %v18630_v44 = vld [vmem:[#allocation38_spill] sm:$0xff] }
 0x528   : > { %v14701_v37 = vadd.f32 %v5918_v11, %v5718_v4  ;;  %v14719_v4 = vpop.f32.mrf.mxu3 }
 0x529   : > { %v4616_v48 = vadd.f32 %v14232_v12, %v4340_v19 }
 0x52a   : > { %18618 = vst [vmem:[#allocation94_spill] sm:$0xff] %v14701_v37  ;;  %v6048_v47 = vsel %vm878_vm1, %v14701_v37, 0.0  ;;  %v6156_v53 = vmul.f32 %v14701_v37, %v14701_v37 }
 0x52b   : > { %v5645_v49 = vpop.f32.mrf.mxu1  ;;  %6049 = vadd.xlane.f32.xlu0 %v6048_v47  ;;  %v4892_v9 = vadd.f32 %v18628_v24, %v4616_v48 }
 0x52c   : > { %9990 = vmatmul.msk.f32.gmra.mxu2 %vm878_vm1, %v5767_v54  ;;  %v6208_v36 = vsel %vm878_vm1, %v6156_v53, 0.0  ;;  %v5719_v42 = vadd.f32 %v5645_v49, %v5443_v46  ;;  %v5444_v49 = vadd.f32 %v14474_v59, %v5167_v45  ;;  %v18625_v54 = vld [vmem:[#allocation142_spill] sm:$0xff]  ;;  %v18627_v46 = vld [vmem:[#allocation36_spill] sm:$0xff] }
 0x52d   : > { %6209 = vadd.xlane.f32.xlu1 %v6208_v36  ;;  %v4030_v36 = vadd.f32 %v18627_v46, %v18626_v33  ;;  %v5168_v45 = vadd.f32 %v14481_v63, %v4892_v9  ;;  %v18633_v63 = vld [vmem:[#allocation37_spill] sm:$0xff]  ;;  %v18635_v46 = vld [vmem:[#allocation140_spill] sm:$0xff] }
 0x52e   : > { %9958 = vmatmul.msk.f32.gmra.mxu1 %vm878_vm1, %v5491_v8  ;;  %v18624_v8 = vld [vmem:[#allocation139_spill] sm:$0xff]  ;;  %v14739_v10 = vpop.f32.mrf.mxu0 }
 0x52f   : > { %v5921_v60 = vpop.f32.mrf.mxu2  ;;  %v4341_v19 = vadd.f32 %v18630_v44, %v4030_v36  ;;  %v5494_v44 = vld [vmem:[#allocation2 + $0x228] sm:$0xff] }
 0x530   : > { %v14721_v11 = vadd.f32 %v5921_v60, %v5719_v42  ;;  %v14743_v59 = vpop.f32.mrf.mxu3 }
 0x532   : > { %18622 = vst [vmem:[#allocation96_spill] sm:$0xff] %v14721_v11  ;;  %v6051_v47 = vsel %vm878_vm1, %v14721_v11, 0.0  ;;  %v6157_v53 = vmul.f32 %v14721_v11, %v14721_v11 }
 0x533   : > { %v5648_v1 = vpop.f32.mrf.mxu1  ;;  %6052 = vadd.xlane.f32.xlu2 %v6051_v47 }
 0x534   : > { %9991 = vmatmul.msk.f32.gmra.mxu2 %vm878_vm1, %v18625_v54  ;;  %v6211_v62 = vsel %vm878_vm1, %v6157_v53, 0.0  ;;  %v5720_v13 = vadd.f32 %v5648_v1, %v5444_v49  ;;  %v18631_v1 = vld [vmem:[#allocation138_spill] sm:$0xff]  ;;  %v5445_v49 = vadd.f32 %v14495_v18, %v5168_v45  ;;  %v18637_v45 = vld [vmem:[#allocation41_spill] sm:$0xff] }
 0x535   : > { %6212 = vadd.xlane.f32.xlu0 %v6211_v62  ;;  %v4617_v48 = vadd.f32 %v18631_v1, %v4341_v19  ;;  %v18634_v62 = vld [vmem:[#allocation39_spill] sm:$0xff]  ;;  %v5770_v19 = vld [vmem:[#allocation2 + $0x229] sm:$0xff] }
 0x536   : > { %9959 = vmatmul.msk.f32.gmra.mxu1 %vm878_vm1, %v18624_v8  ;;  %v18632_v8 = vld [vmem:[#allocation143_spill] sm:$0xff]  ;;  %v4033_v33 = vadd.f32 %v18634_v62, %v18633_v63  ;;  %v18640_v63 = vld [vmem:[#allocation42_spill] sm:$0xff] }
 0x537   : > { %v5924_v12 = vpop.f32.mrf.mxu2  ;;  %v4893_v36 = vadd.f32 %v18635_v46, %v4617_v48 }
 0x538   : > { %v14741_v42 = vadd.f32 %v5924_v12, %v5720_v13  ;;  %v14763_v12 = vpop.f32.mrf.mxu0  ;;  %v14771_v48 = vpop.f32.mrf.mxu3 }
 0x53a   : > { %18629 = vst [vmem:[#allocation89_spill] sm:$0xff] %v14741_v42  ;;  %v6054_v47 = vsel %vm878_vm1, %v14741_v42, 0.0  ;;  %v6158_v53 = vmul.f32 %v14741_v42, %v14741_v42  ;;  %v18661_v42 = vld [vmem:[#allocation61_spill] sm:$0xff] }
 0x53b   : > { %v5651_v60 = vpop.f32.mrf.mxu1  ;;  %6055 = vadd.xlane.f32.xlu1 %v6054_v47  ;;  %v4342_v47 = vadd.f32 %v18637_v45, %v4033_v33  ;;  %v18641_v33 = vld [vmem:[#allocation144_spill] sm:$0xff] }
 0x53c   : > { %9992 = vmatmul.msk.f32.gmra.mxu2 %vm878_vm1, %v14283_v58  ;;  %v6214_v54 = vsel %vm878_vm1, %v6158_v53, 0.0  ;;  %v5721_v24 = vadd.f32 %v5651_v60, %v5445_v49  ;;  %v5169_v58 = vadd.f32 %v14506_v43, %v4893_v36  ;;  %v18638_v60 = vld [vmem:[#allocation141_spill] sm:$0xff]  ;;  %v18639_v43 = vld [vmem:[#allocation40_spill] sm:$0xff] }
 0x53d   : > { %6215 = vadd.xlane.f32.xlu2 %v6214_v54  ;;  %v4618_v49 = vadd.f32 %v18638_v60, %v4342_v47  ;;  %v4036_v62 = vadd.f32 %v18640_v63, %v18639_v43  ;;  %v5495_v47 = vld [vmem:[#allocation2 + $0x230] sm:$0xff] }
 0x53e   : > { %9960 = vmatmul.msk.f32.gmra.mxu1 %vm878_vm1, %v18632_v8  ;;  %v5446_v8 = vadd.f32 %v14527_v39, %v5169_v58  ;;  %v18643_v39 = vld [vmem:[#allocation44_spill] sm:$0xff]  ;;  %v18645_v43 = vld [vmem:[#allocation45_spill] sm:$0xff] }
 0x53f   : > { %v5927_v9 = vpop.f32.mrf.mxu2  ;;  %v4894_v46 = vadd.f32 %v18641_v33, %v4618_v49  ;;  %v4343_v58 = vadd.f32 %v18643_v39, %v4036_v62 }
 0x540   : > { %v14761_v13 = vadd.f32 %v5927_v9, %v5721_v24  ;;  %v14789_v60 = vpop.f32.mrf.mxu0 }
 0x542   : > { %18636 = vst [vmem:[#allocation128_spill] sm:$0xff] %v14761_v13  ;;  %v6057_v53 = vsel %vm878_vm1, %v14761_v13, 0.0  ;;  %v6159_v1 = vmul.f32 %v14761_v13, %v14761_v13 }
 0x543   : > { %v5654_v18 = vpop.f32.mrf.mxu1  ;;  %6058 = vadd.xlane.f32.xlu0 %v6057_v53  ;;  %v5771_v53 = vld [vmem:[#allocation2 + $0x231] sm:$0xff] }
 0x544   : > { %9993 = vmatmul.msk.f32.gmra.mxu2 %vm878_vm1, %v5770_v19  ;;  %v6217_v54 = vsel %vm878_vm1, %v6159_v1, 0.0  ;;  %v5722_v36 = vadd.f32 %v5654_v18, %v5446_v8  ;;  %v4619_v18 = vadd.f32 %v14281_v32, %v4343_v58 }
 0x545   : > { %6218 = vadd.xlane.f32.xlu1 %v6217_v54  ;;  %v18644_v54 = vld [vmem:[#allocation43_spill] sm:$0xff] }
 0x546   : > { %9961 = vmatmul.msk.f32.gmra.mxu1 %vm878_vm1, %v5494_v44  ;;  %v5170_v44 = vadd.f32 %v14531_v50, %v4894_v46  ;;  %v14796_v50 = vpop.f32.mrf.mxu3  ;;  %v4039_v63 = vadd.f32 %v18645_v43, %v18644_v54  ;;  %v4895_v62 = vadd.f32 %v14293_v15, %v4619_v18 }
 0x547   : > { %v5930_v24 = vpop.f32.mrf.mxu2 }
 0x548   : > { %v14781_v9 = vadd.f32 %v5930_v24, %v5722_v36  ;;  %v5447_v49 = vadd.f32 %v14552_v55, %v5170_v44  ;;  %v18646_v36 = vld [vmem:[#allocation28_spill] sm:$0xff]  ;;  %v18648_v44 = vld [vmem:[#allocation47_spill] sm:$0xff]  ;;  %v14818_v43 = vpop.f32.mrf.mxu0 }
 0x54a   : > { %18642 = vst [vmem:[#allocation102_spill] sm:$0xff] %v14781_v9  ;;  %v6060_v19 = vsel %vm878_vm1, %v14781_v9, 0.0  ;;  %v6160_v1 = vmul.f32 %v14781_v9, %v14781_v9  ;;  %v18660_v9 = vld [vmem:[#allocation60_spill] sm:$0xff] }
 0x54b   : > { %v5657_v45 = vpop.f32.mrf.mxu1  ;;  %6061 = vadd.xlane.f32.xlu2 %v6060_v19  ;;  %v4344_v19 = vadd.f32 %v18648_v44, %v4039_v63  ;;  %v18649_v63 = vld [vmem:[#allocation46_spill] sm:$0xff] }
 0x54c   : > { %9994 = vmatmul.msk.f32.gmra.mxu2 %vm878_vm1, %v5771_v53  ;;  %v6220_v8 = vsel %vm878_vm1, %v6160_v1, 0.0  ;;  %v5723_v33 = vadd.f32 %v5657_v45, %v5447_v49  ;;  %v5171_v1 = vadd.f32 %v14556_v26, %v4895_v62  ;;  %v18650_v26 = vld [vmem:[#allocation48_spill] sm:$0xff] }
 0x54d   : > { %6221 = vadd.xlane.f32.xlu0 %v6220_v8  ;;  %v4620_v49 = vadd.f32 %v14297_v7, %v4344_v19  ;;  %v4042_v62 = vadd.f32 %v18650_v26, %v18649_v63  ;;  %v18655_v63 = vld [vmem:[#allocation52_spill] sm:$0xff]  ;;  %v18656_v26 = vld [vmem:[#allocation54_spill] sm:$0xff] }
 0x54e   : > { %9962 = vmatmul.msk.f32.gmra.mxu1 %vm878_vm1, %v5495_v47  ;;  %v6020_v46 = vpop.xlane.xlu1 %6019  ;;  %v5448_v8 = vadd.f32 %v14576_v35, %v5171_v1  ;;  %v14823_v44 = vpop.f32.mrf.mxu3 }
 0x54f   : > { %v14802_v32 = vmul.f32 %v6020_v46, %v18646_v36  ;;  %v5933_v55 = vpop.f32.mrf.mxu2  ;;  %v4896_v46 = vadd.f32 %v14305_v31, %v4620_v49  ;;  %v18652_v31 = vld [vmem:[#allocation50_spill] sm:$0xff] }
 0x550   : > { %v14804_v24 = vadd.f32 %v5933_v55, %v5723_v33  ;;  %v6180_v47 = vpop.xlane.xlu2 %6179 }
 0x551   : > { %v6306_v53 = vmul.f32 %v14802_v32, %v14802_v32  ;;  %v6274_v39 = vmul.f32 %v6180_v47, %v18646_v36 }
 0x552   : > { %18647 = vst [vmem:[#allocation107_spill] sm:$0xff] %v14804_v24  ;;  %v6063_v15 = vsel %vm878_vm1, %v14804_v24, 0.0  ;;  %v6161_v45 = vmul.f32 %v14804_v24, %v14804_v24  ;;  %v18659_v24 = vld [vmem:[#allocation58_spill] sm:$0xff] }
 0x553   : > { %v5660_v58 = vpop.f32.mrf.mxu1  ;;  %v6338_v18 = vsub.f32 %v6274_v39, %v6306_v53  ;;  %6064 = vadd.xlane.f32.xlu1 %v6063_v15  ;;  %v4054_v13 = vadd.f32 %v18660_v9, %v18659_v24  ;;  %v18665_v24 = vld [vmem:[#allocation64_spill] sm:$0xff] }
 0x554   : > { %v6223_v54 = vsel %vm878_vm1, %v6161_v45, 0.0  ;;  %v5724_v55 = vadd.f32 %v5660_v58, %v5448_v8  ;;  %v4345_v58 = vadd.f32 %v18652_v31, %v4042_v62  ;;  %v5172_v45 = vadd.f32 %v14584_v17, %v4896_v46  ;;  %v18653_v8 = vld [vmem:[#allocation49_spill] sm:$0xff]  ;;  %v18657_v46 = vld [vmem:[#allocation55_spill] sm:$0xff] }
 0x555   : > { %v6370_v33 = vmax.f32 %v6338_v18, 0.0  ;;  %6224 = vadd.xlane.f32.xlu2 %v6223_v54  ;;  %v18654_v54 = vld [vmem:[#allocation51_spill] sm:$0xff] }
 0x556   : > { %v6023_v47 = vpop.xlane.xlu0 %6022  ;;  %v5449_v62 = vadd.f32 %v14604_v14, %v5172_v45  ;;  %v18663_v14 = vld [vmem:[#allocation53_spill] sm:$0xff]  ;;  %v18664_v45 = vld [vmem:[#allocation56_spill] sm:$0xff] }
 0x557   : > { %v14825_v53 = vadd.f32 1e-06, %v6370_v33  ;;  %v14828_v7 = vmul.f32 %v6023_v47, %v18646_v36  ;;  %v5936_v35 = vpop.f32.mrf.mxu2  ;;  %v4045_v33 = vadd.f32 %v18654_v54, %v18653_v8  ;;  %v18662_v8 = vld [vmem:[#allocation63_spill] sm:$0xff] }
 0x558   : > { %v14830_v39 = vadd.f32 %v5936_v35, %v5724_v55  ;;  %v6183_v19 = vpop.xlane.xlu1 %6182  ;;  %v4048_v55 = vadd.f32 %v18656_v26, %v18655_v63  ;;  %v4621_v35 = vadd.f32 %v14309_v16, %v4345_v58  ;;  %v4057_v54 = vadd.f32 %v18662_v8, %v18661_v42 }
 0x559   : > { %10302 = vrsqrt.f32 %v14825_v53  ;;  %v6307_v1 = vmul.f32 %v14828_v7, %v14828_v7  ;;  %v6275_v18 = vmul.f32 %v6183_v19, %v18646_v36  ;;  %v18658_v19 = vld [vmem:[#allocation57_spill] sm:$0xff]  ;;  %vm6472_vm6 = vweird.f32 %v14825_v53 }
 0x55a   : > { %18651 = vst [vmem:[#allocation98_spill] sm:$0xff] %v14830_v39  ;;  %v6066_v49 = vsel %vm878_vm1, %v14830_v39, 0.0  ;;  %v6162_v47 = vmul.f32 %v14830_v39, %v14830_v39  ;;  %v4051_v31 = vadd.f32 %v18658_v19, %v18657_v46  ;;  %v14860_v46 = vpop.f32.mrf.mxu0  ;;  %v18666_v19 = vld [vmem:[#allocation66_spill] sm:$0xff] }
 0x55b   : > { %v5663_v15 = vpop.f32.mrf.mxu1  ;;  %6067 = vadd.xlane.f32.xlu0 %v6066_v49  ;;  %v6339_v17 = vsub.f32 %v6275_v18, %v6307_v1  ;;  %v4897_v49 = vadd.f32 %v14317_v0, %v4621_v35  ;;  %v4346_v1 = vadd.f32 %v18663_v14, %v4045_v33  ;;  %v4347_v18 = vadd.f32 %v18664_v45, %v4048_v55  ;;  %v18668_v35 = vld [vmem:[#allocation59_spill] sm:$0xff]  ;;  %v18670_v55 = vld [vmem:[#allocation65_spill] sm:$0xff] }
 0x55c   : > { %v6226_v63 = vsel %vm878_vm1, %v6162_v47, 0.0  ;;  %v5725_v39 = vadd.f32 %v5663_v15, %v5449_v62  ;;  %v4060_v42 = vadd.f32 %v18666_v19, %v18665_v24  ;;  %v14871_v62 = vadd.f32 %v18668_v35, %v4051_v31  ;;  %v18671_v24 = vld [vmem:[#allocation67_spill] sm:$0xff]  ;;  %v18674_v35 = vld [vmem:[#allocation72_spill] sm:$0xff] }
 0x55d   : > { %v6371_v26 = vmax.f32 %v6339_v17, 0.0  ;;  %6227 = vadd.xlane.f32.xlu1 %v6226_v63  ;;  %v18669_v17 = vld [vmem:[#allocation62_spill] sm:$0xff]  ;;  %v14877_v8 = vadd.f32 %v18670_v55, %v4057_v54  ;;  %v14879_v63 = vpop.f32.mrf.mxu3  ;;  %v18676_v55 = vld [vmem:[#allocation75_spill] sm:$0xff] }
 0x55e   : > { %v6026_v16 = vpop.xlane.xlu2 %6025  ;;  %v14874_v33 = vadd.f32 %v18669_v17, %v4054_v13  ;;  %v18675_v17 = vld [vmem:[#allocation73_spill] sm:$0xff] }
 0x55f   : > { %v14856_v58 = vpop.eup %10302  ;;  %v5939_v9 = vpop.f32.mrf.mxu2  ;;  %v14866_v0 = vadd.f32 1e-06, %v6371_v26  ;;  %v14882_v14 = vmul.f32 %v6026_v16, %v18646_v36  ;;  %v18672_v26 = vld [vmem:[#allocation69_spill] sm:$0xff]  ;;  %v4069_v11 = vadd.f32 %v18676_v55, %v18675_v17 }
 0x560   : > { %v6467_v47 = vmul.f32 %v14856_v58, %v14825_v53  ;;  %v14868_v15 = vadd.f32 %v5939_v9, %v5725_v39  ;;  %v4063_v19 = vadd.f32 %v18672_v26, %v18671_v24  ;;  %v5173_v39 = vadd.f32 %v14612_v41, %v4897_v49  ;;  %v6186_v13 = vpop.xlane.xlu0 %6185  ;;  %v18673_v9 = vld [vmem:[#allocation70_spill] sm:$0xff]  ;;  %v18677_v24 = vld [vmem:[#allocation68_spill] sm:$0xff] }
 0x561   : > { %10304 = vrsqrt.f32 %v14866_v0  ;;  %v4066_v54 = vadd.f32 %v18674_v35, %v18673_v9  ;;  %v14898_v26 = vadd.f32 %v18677_v24, %v4060_v42  ;;  %v4622_v41 = vadd.f32 %v14321_v29, %v4346_v1  ;;  %v18679_v9 = vld [vmem:[#allocation78_spill] sm:$0xff]  ;;  %v18683_v24 = vld [vmem:[#allocation79_spill] sm:$0xff] }
 0x562   : > { %18667 = vst [vmem:[#allocation100_spill] sm:$0xff] %v14868_v15  ;;  %v6468_v31 = vmul.f32 %v14856_v58, %v6467_v47  ;;  %v6069_v16 = vsel %vm878_vm1, %v14868_v15, 0.0  ;;  %v6163_v37 = vmul.f32 %v14868_v15, %v14868_v15  ;;  %v5450_v49 = vadd.f32 %v14628_v30, %v5173_v39  ;;  %v18680_v30 = vld [vmem:[#allocation71_spill] sm:$0xff]  ;;  %v18681_v39 = vld [vmem:[#allocation74_spill] sm:$0xff] }
 0x563   : > { %v5666_v45 = vpop.f32.mrf.mxu1  ;;  %6070 = vadd.xlane.f32.xlu2 %v6069_v16  ;;  %v4072_v35 = vadd.f32 %v18679_v9, %v18678_v57  ;;  %v6308_v17 = vmul.f32 %v14882_v14, %v14882_v14  ;;  %v6276_v55 = vmul.f32 %v6186_v13, %v18646_v36  ;;  %v4898_v15 = vadd.f32 %v14329_v27, %v4622_v41  ;;  %v18682_v57 = vld [vmem:[#allocation77_spill] sm:$0xff]  ;;  %v18685_v41 = vld [vmem:[#allocation82_spill] sm:$0xff] }
 0x564   : > { %v6469_v47 = vmul.f32 0.5, %v6468_v31  ;;  %v6229_v6 = vsel %vm878_vm1, %v6163_v37, 0.0  ;;  %vm6473_vm5 = vweird.f32 %v14856_v58  ;;  %v5726_v29 = vadd.f32 %v5666_v45, %v5450_v49  ;;  %v18684_v13 = vld [vmem:[#allocation81_spill] sm:$0xff] }
 0x565   : > { %6230 = vadd.xlane.f32.xlu0 %v6229_v6  ;;  %v14911_v1 = vadd.f32 %v18680_v30, %v4063_v19  ;;  %v14914_v31 = vadd.f32 %v18681_v39, %v4066_v54  ;;  %v14917_v16 = vadd.f32 %v18682_v57, %v4069_v11  ;;  %v4075_v9 = vadd.f32 %v18684_v13, %v18683_v24  ;;  %v18688_v54 = vld [vmem:[#allocation80_spill] sm:$0xff]  ;;  %v14932_v11 = vpop.f32.mrf.mxu0  ;;  %v14939_v39 = vld [vmem:[%s18238_s8] ss:$0 sm:$0xff]  ;;  %vm6474_vm7 = vmor %vm6472_vm6, %vm6473_vm5 }
 0x566   : > { %v6470_v42 = vsub.f32 1.5, %v6469_v47  ;;  %v6029_v37 = vpop.xlane.xlu1 %6028  ;;  %v18686_v47 = vld [vmem:[#allocation84_spill] sm:$0xff]  ;;  %v14930_v49 = vadd.f32 %v18688_v54, %v4072_v35  ;;  %v6402_v30 = vsub.f32 %v14510_v28, %v14802_v32  ;;  %v6340_v53 = vsub.f32 %v6276_v55, %v6308_v17  ;;  %v18689_v35 = vld [vmem:[#allocation145_spill] sm:$0xff]  ;;  %v18690_v32 = vld [vmem:[#allocation83_spill] sm:$0xff] }
 0x567   : > { %v5942_v25 = vpop.f32.mrf.mxu2  ;;  %v14921_v27 = vpop.eup %10304  ;;  %v4078_v45 = vadd.f32 %v18686_v47, %v18685_v41  ;;  %v5174_v57 = vadd.f32 %v14630_v22, %v4898_v15  ;;  %v14949_v28 = vmul.f32 %v6029_v37, %v18646_v36  ;;  %v14952_v13 = vadd.f32 %v18690_v32, %v4075_v9  ;;  %v14959_v47 = vld [vmem:[%s18239_s9] ss:$0 sm:$0xff]  ;;  %v18692_v37 = vld [vmem:[#allocation146_spill] sm:$0xff]  ;;  %v18694_v32 = vld [vmem:[#allocation88_spill] sm:$0xff] }
 0x568   : > { %v6471_v6 = vmul.f32 %v14856_v58, %v6470_v42  ;;  %v14927_v19 = vadd.f32 %v5942_v25, %v5726_v29  ;;  %v6477_v25 = vmul.f32 %v14921_v27, %v14866_v0  ;;  %v4623_v29 = vadd.f32 %v18689_v35, %v4347_v18  ;;  %v14954_v41 = vpop.f32.mrf.mxu3  ;;  %v6189_v55 = vpop.xlane.xlu2 %6188  ;;  %v18693_v35 = vld [vmem:[#allocation86_spill] sm:$0xff] }
 0x569   : > { %v6372_v23 = vmax.f32 %v6340_v53, 0.0  ;;  %v6309_v21 = vmul.f32 %v14949_v28, %v14949_v28  ;;  %vm6483_vm8 = vweird.f32 %v14921_v27  ;;  %vm6482_vm13 = vweird.f32 %v14866_v0 }
 0x56a   : > { %18687 = vst [vmem:[#allocation103_spill] sm:$0xff] %v14927_v19  ;;  %v6475_v24 = vsel %vm6474_vm7, %v14856_v58, %v6471_v6  ;;  %v6478_v18 = vmul.f32 %v14921_v27, %v6477_v25  ;;  %v6072_v22 = vsel %vm878_vm1, %v14927_v19, 0.0  ;;  %v18691_v58 = vld [vmem:[#allocation87_spill] sm:$0xff]  ;;  %v4899_v9 = vadd.f32 %v18692_v37, %v4623_v29  ;;  %vm6484_vm9 = vmor %vm6482_vm13, %vm6483_vm8 }
 0x56b   : > { %v5669_v42 = vpop.f32.mrf.mxu1  ;;  %v6786_v17 = vmul.f32 %v6475_v24, %v6402_v30  ;;  %v14965_v15 = vadd.f32 %v18691_v58, %v4078_v45  ;;  %v5451_v6 = vadd.f32 %v14646_v61, %v5174_v57  ;;  %6073 = vadd.xlane.f32.xlu1 %v6072_v22  ;;  %v6164_v54 = vmul.f32 %v14927_v19, %v14927_v19  ;;  %v18695_v61 = vld [vmem:[#allocation147_spill] sm:$0xff] }
 0x56c   : > { %v4081_v30 = vadd.f32 %v18694_v32, %v18693_v35  ;;  %v6479_v24 = vmul.f32 0.5, %v6478_v18  ;;  %v6277_v45 = vmul.f32 %v6189_v55, %v18646_v36  ;;  %v4624_v57 = vadd.f32 %v18695_v61, %v14871_v62  ;;  %v18696_v18 = vld [vmem:[#allocation149_spill] sm:$0xff] }
 0x56d   : > { %v6821_v25 = vmul.f32 %v14939_v39, %v6786_v17  ;;  %v5727_v58 = vadd.f32 %v5669_v42, %v5451_v6  ;;  %v6232_v29 = vsel %vm878_vm1, %v6164_v54, 0.0  ;;  %v5175_v53 = vadd.f32 %v14650_v5, %v4899_v9  ;;  %v18697_v42 = vld [vmem:[#allocation151_spill] sm:$0xff]  ;;  %v18700_v9 = vld [vmem:[#allocation150_spill] sm:$0xff] }
 0x56e   : > { %v6480_v37 = vsub.f32 1.5, %v6479_v24  ;;  %6233 = vadd.xlane.f32.xlu2 %v6232_v29  ;;  %v4625_v35 = vadd.f32 %v18696_v18, %v14874_v33  ;;  %v4626_v55 = vadd.f32 %v18697_v42, %v14877_v8  ;;  %v14996_v32 = vadd.f32 1e-06, %v6372_v23  ;;  %v18699_v24 = vld [vmem:[#allocation148_spill] sm:$0xff]  ;;  %v18701_v33 = vld [vmem:[#allocation153_spill] sm:$0xff]  ;;  %v15005_v18 = vpop.f32.mrf.mxu0  ;;  %v6032_v42 = vpop.xlane.xlu0 %6031 }
 0x56f   : > { %v14981_v22 = vadd.f32 %v14959_v47, %v6821_v25  ;;  %v5945_v17 = vpop.f32.mrf.mxu2  ;;  %v4900_v5 = vadd.f32 %v18699_v24, %v4624_v57  ;;  %v4627_v61 = vadd.f32 %v18701_v33, %v14898_v26  ;;  %v6341_v8 = vsub.f32 %v6277_v45, %v6309_v21 }
 0x570   : > { %v14989_v6 = vadd.f32 %v5945_v17, %v5727_v58  ;;  %v6481_v54 = vmul.f32 %v14921_v27, %v6480_v37  ;;  %v4901_v29 = vadd.f32 %v18700_v9, %v4625_v35  ;;  %v18702_v58 = vld [vmem:[#allocation152_spill] sm:$0xff]  ;;  %v6403_v0 = vsub.f32 %v14533_v56, %v14828_v7  ;;  %v18703_v37 = vld [vmem:[#allocation154_spill] sm:$0xff]  ;;  %v15019_v9 = vpop.f32.mrf.mxu3 }
 0x571   : > { %v14992_v62 = vmul.f32 0.70710677, %v14981_v22  ;;  %v4902_v17 = vadd.f32 %v18702_v58, %v4626_v55  ;;  %v4903_v35 = vadd.f32 %v18703_v37, %v4627_v61  ;;  %v5452_v26 = vadd.f32 %v14664_v20, %v5175_v53  ;;  %v18704_v55 = vld [vmem:[#allocation91_spill] sm:$0xff] }
 0x572   : > { %18698 = vst [vmem:[#allocation93_spill] sm:$0xff] %v14989_v6  ;;  %v6485_v57 = vsel %vm6484_vm9, %v14921_v27, %v6481_v54  ;;  %v6075_v21 = vsel %vm878_vm1, %v14989_v6, 0.0  ;;  %v6165_v45 = vmul.f32 %v14989_v6, %v14989_v6  ;;  %v4358_v24 = vadd.f32 %v18704_v55, %v4081_v30  ;;  %v18705_v30 = vld [vmem:[#allocation155_spill] sm:$0xff] }
 0x573   : > { %v5672_v25 = vpop.f32.mrf.mxu1  ;;  %v6952_v23 = vmul.f32 %v14992_v62, %v14992_v62  ;;  %v6787_v56 = vmul.f32 %v6485_v57, %v6403_v0  ;;  %10306 = vrsqrt.f32 %v14996_v32  ;;  %6076 = vadd.xlane.f32.xlu0 %v6075_v21  ;;  %v5176_v7 = vadd.f32 %v14672_v38, %v4900_v5  ;;  %v18706_v38 = vld [vmem:[#allocation157_spill] sm:$0xff]  ;;  %v18707_v5 = vld [vmem:[#allocation159_spill] sm:$0xff] }
 0x574   : > { %v6373_v20 = vmax.f32 %v6341_v8, 0.0  ;;  %v5728_v27 = vadd.f32 %v5672_v25, %v5452_v26  ;;  %v6235_v53 = vsel %vm878_vm1, %v6165_v45, 0.0  ;;  %v5177_v54 = vadd.f32 %v14696_v3, %v4901_v29  ;;  %v6192_v29 = vpop.xlane.xlu1 %6191  ;;  %v18709_v8 = vld [vmem:[#allocation156_spill] sm:$0xff]  ;;  %v18713_v55 = vld [vmem:[#allocation163_spill] sm:$0xff] }
 0x575   : > { %v15021_v33 = vmin.f32 %v6952_v23, 16.0  ;;  %v15028_v61 = vadd.f32 %v14719_v4, %v4902_v17  ;;  %v4628_v58 = vadd.f32 %v18705_v30, %v14911_v1  ;;  %v15033_v23 = vmul.f32 %v6032_v42, %v18646_v36  ;;  %6236 = vadd.xlane.f32.xlu1 %v6235_v53  ;;  %v18710_v1 = vld [vmem:[#allocation161_spill] sm:$0xff]  ;;  %v18712_v45 = vld [vmem:[#allocation160_spill] sm:$0xff]  ;;  %v18714_v30 = vld [vmem:[#allocation162_spill] sm:$0xff] }
 0x576   : > { %v15036_v57 = vadd.f32 %v14743_v59, %v4903_v35  ;;  %v4629_v25 = vadd.f32 %v18706_v38, %v14914_v31  ;;  %v4630_v3 = vadd.f32 %v18707_v5, %v14917_v16  ;;  %v4631_v37 = vadd.f32 %v18710_v1, %v14930_v49  ;;  %v18711_v35 = vld [vmem:[#allocation158_spill] sm:$0xff]  ;;  %v18715_v49 = vld [vmem:[#allocation165_spill] sm:$0xff] }
 0x577   : > { %v5948_v0 = vpop.f32.mrf.mxu2  ;;  %v4904_v17 = vadd.f32 %v18709_v8, %v4628_v58  ;;  %v6965_v42 = vmul.f32 3.8918573e-05, %v15021_v33  ;;  %v6822_v59 = vmul.f32 %v14939_v39, %v6787_v56  ;;  %v4632_v16 = vadd.f32 %v18713_v55, %v14952_v13 }
 0x578   : > { %v15042_v4 = vadd.f32 %v5948_v0, %v5728_v27  ;;  %v4905_v21 = vadd.f32 %v18711_v35, %v4629_v25  ;;  %v4906_v31 = vadd.f32 %v18712_v45, %v4630_v3  ;;  %v15053_v53 = vadd.f32 1e-06, %v6373_v20  ;;  %v18716_v25 = vld [vmem:[#allocation164_spill] sm:$0xff]  ;;  %v18717_v3 = vld [vmem:[#allocation166_spill] sm:$0xff]  ;;  %v6035_v20 = vpop.xlane.xlu2 %6034  ;;  %v18718_v35 = vld [vmem:[#allocation95_spill] sm:$0xff]  ;;  %v15069_v45 = vpop.f32.mrf.mxu0 }
 0x579   : > { %v15055_v27 = vpop.eup %10306  ;;  %v4907_v58 = vadd.f32 %v18714_v30, %v4631_v37  ;;  %v4633_v0 = vadd.f32 %v18715_v49, %v14965_v15  ;;  %v6310_v38 = vmul.f32 %v15033_v23, %v15033_v23  ;;  %v6278_v56 = vmul.f32 %v6192_v29, %v18646_v36  ;;  %v5152_v30 = vpop.f32.mrf.mxu3 }
 0x57a   : > { %18708 = vst [vmem:[#allocation132_spill] sm:$0xff] %v15042_v4  ;;  %v4908_v5 = vadd.f32 %v18716_v25, %v4632_v16  ;;  %v4634_v8 = vadd.f32 %v18717_v3, %v4358_v24  ;;  %v5453_v13 = vadd.f32 %v14689_v34, %v5176_v7  ;;  %v6078_v1 = vsel %vm878_vm1, %v15042_v4, 0.0  ;;  %v18719_v16 = vld [vmem:[#allocation85_spill] sm:$0xff] }
 0x57b   : > { %v5675_v26 = vpop.f32.mrf.mxu1  ;;  %v4909_v37 = vadd.f32 %v18718_v35, %v4633_v0  ;;  %6079 = vadd.xlane.f32.xlu2 %v6078_v1  ;;  %v6166_v15 = vmul.f32 %v15042_v4, %v15042_v4  ;;  %v6966_v55 = vadd.f32 0.001143296, %v6965_v42  ;;  %v15074_v29 = vadd.f32 %v14959_v47, %v6822_v59  ;;  %v6195_v35 = vpop.xlane.xlu0 %6194 }
 0x57c   : > { %v4910_v24 = vadd.f32 %v18719_v16, %v4634_v8  ;;  %v6487_v34 = vmul.f32 %v15055_v27, %v14996_v32  ;;  %10308 = vrsqrt.f32 %v15053_v53  ;;  %v5729_v7 = vadd.f32 %v5675_v26, %v5453_v13 }
 0x57d   : > { %v6954_v49 = vmul.f32 2.1237322e-06, %v15021_v33  ;;  %v6342_v0 = vsub.f32 %v6278_v56, %v6310_v38  ;;  %v15082_v25 = vmul.f32 %v6035_v20, %v18646_v36  ;;  %v6238_v42 = vsel %vm878_vm1, %v6166_v15, 0.0 }
 0x57e   : > { %v5180_v59 = vadd.f32 %v14771_v48, %v4904_v17  ;;  %v5181_v8 = vadd.f32 %v14796_v50, %v4905_v21  ;;  %v5182_v1 = vadd.f32 %v14823_v44, %v4906_v31  ;;  %6239 = vadd.xlane.f32.xlu0 %v6238_v42  ;;  %v5183_v26 = vadd.f32 %v14879_v63, %v4907_v58  ;;  %v6038_v56 = vpop.xlane.xlu1 %6037 }
 0x57f   : > { %v5951_v3 = vpop.f32.mrf.mxu2  ;;  %v5184_v38 = vadd.f32 %v14954_v41, %v4908_v5  ;;  %v6967_v20 = vmul.f32 %v6966_v55, %v15021_v33  ;;  %v15094_v15 = vmul.f32 0.70710677, %v15074_v29  ;;  %v5185_v48 = vadd.f32 %v15019_v9, %v4909_v37 }
 0x580   : > { %v15088_v16 = vadd.f32 %v5951_v3, %v5729_v7  ;;  %v5186_v50 = vadd.f32 %v5152_v30, %v4910_v24  ;;  %v5454_v44 = vadd.f32 %v14714_v51, %v5177_v54  ;;  %v6488_v17 = vmul.f32 %v15055_v27, %v6487_v34  ;;  %v6198_v24 = vpop.xlane.xlu2 %6197 }
 0x581   : > { %v6955_v21 = vadd.f32 0.00028619796, %v6954_v49  ;;  %v6374_v31 = vmax.f32 %v6342_v0, 0.0  ;;  %v6311_v63 = vmul.f32 %v15082_v25, %v15082_v25  ;;  %v6279_v41 = vmul.f32 %v6195_v35, %v18646_v36 }
 0x582   : > { %18720 = vst [vmem:[#allocation108_spill] sm:$0xff] %v15088_v16  ;;  %v15102_v58 = vpop.eup %10308  ;;  %v5455_v5 = vadd.f32 %v14739_v10, %v15028_v61  ;;  %v15107_v55 = vmul.f32 %v6038_v56, %v18646_v36  ;;  %v6081_v51 = vsel %vm878_vm1, %v15088_v16, 0.0  ;;  %v6167_v9 = vmul.f32 %v15088_v16, %v15088_v16 }
 0x583   : > { %v5678_v13 = vpop.f32.mrf.mxu1  ;;  %v15115_v54 = vadd.f32 %v14763_v12, %v15036_v57  ;;  %v15118_v37 = vadd.f32 %v14789_v60, %v5180_v59  ;;  %6082 = vadd.xlane.f32.xlu1 %v6081_v51  ;;  %v6968_v34 = vadd.f32 0.014752088, %v6967_v20  ;;  %v6992_v10 = vmul.f32 %v15094_v15, %v15094_v15  ;;  %v5429_v60 = vpop.f32.mrf.mxu0 }
 0x584   : > { %v15123_v61 = vadd.f32 %v14818_v43, %v5181_v8  ;;  %v6489_v7 = vmul.f32 0.5, %v6488_v17  ;;  %v5730_v30 = vadd.f32 %v5678_v13, %v5454_v44  ;;  %v6241_v49 = vsel %vm878_vm1, %v6167_v9, 0.0 }
 0x585   : > { %v15127_v0 = vadd.f32 %v14860_v46, %v5182_v1  ;;  %v6956_v12 = vmul.f32 %v6955_v21, %v15021_v33  ;;  %v15130_v57 = vadd.f32 1e-06, %v6374_v31  ;;  %v6343_v42 = vsub.f32 %v6279_v41, %v6311_v63  ;;  %6242 = vadd.xlane.f32.xlu2 %v6241_v49 }
 0x586   : > { %v6497_v59 = vmul.f32 %v15102_v58, %v15053_v53  ;;  %v6312_v43 = vmul.f32 %v15107_v55, %v15107_v55  ;;  %v6280_v8 = vmul.f32 %v6198_v24, %v18646_v36  ;;  %v6041_v35 = vpop.xlane.xlu0 %6040  ;;  %v15140_v46 = vadd.f32 %v14932_v11, %v5183_v26 }
 0x587   : > { %v5954_v3 = vpop.f32.mrf.mxu2  ;;  %v15143_v1 = vadd.f32 %v15005_v18, %v5184_v38  ;;  %v6969_v20 = vmul.f32 %v6968_v34, %v15021_v33  ;;  %v15146_v44 = vmin.f32 %v6992_v10, 16.0  ;;  %v15149_v17 = vadd.f32 %v15069_v45, %v5185_v48  ;;  %v18732_v18 = vld [vmem:[#allocation97_spill] sm:$0xff] }
 0x588   : > { %v15137_v56 = vadd.f32 %v5954_v3, %v5730_v30  ;;  %v15151_v21 = vadd.f32 %v5429_v60, %v5186_v50  ;;  %v6404_v31 = vsub.f32 %v14554_v40, %v14882_v14  ;;  %v6490_v63 = vsub.f32 1.5, %v6489_v7  ;;  %v6201_v24 = vpop.xlane.xlu1 %6200 }
 0x589   : > { %v6957_v41 = vadd.f32 0.0036580483, %v6956_v12  ;;  %vm6492_vm10 = vweird.f32 %v14996_v32  ;;  %10310 = vrsqrt.f32 %v15130_v57  ;;  %v6375_v11 = vmax.f32 %v6343_v42, 0.0 }
 0x58a   : > { %18721 = vst [vmem:[#allocation113_spill] sm:$0xff] %v15137_v56  ;;  %v6498_v26 = vmul.f32 %v15102_v58, %v6497_v59  ;;  %v6344_v38 = vsub.f32 %v6280_v8, %v6312_v43  ;;  %v6084_v45 = vsel %vm878_vm1, %v15137_v56, 0.0  ;;  %v15163_v48 = vmul.f32 %v6041_v35, %v18646_v36 }
 0x58b   : > { %v5681_v13 = vpop.f32.mrf.mxu1  ;;  %6085 = vadd.xlane.f32.xlu0 %v6084_v45  ;;  %v6168_v40 = vmul.f32 %v15137_v56, %v15137_v56  ;;  %v6970_v14 = vadd.f32 0.112945676, %v6969_v20  ;;  %v7005_v50 = vmul.f32 3.8918573e-05, %v15146_v44  ;;  %v15169_v51 = vmul.f32 0.5, %v14981_v22 }
 0x58c   : > { %v6491_v9 = vmul.f32 %v15055_v27, %v6490_v63  ;;  %vm6493_vm11 = vweird.f32 %v15055_v27  ;;  %v5731_v34 = vadd.f32 %v5681_v13, %v5455_v5  ;;  %v6958_v7 = vmul.f32 %v6957_v41, %v15021_v33 }
 0x58d   : > { %v15174_v30 = vadd.f32 1e-06, %v6375_v11  ;;  %v6244_v49 = vsel %vm878_vm1, %v6168_v40, 0.0  ;;  %v6376_v42 = vmax.f32 %v6344_v38, 0.0  ;;  %v6971_v5 = vmul.f32 %v6970_v14, %v15021_v33  ;;  %vm15191_vm12 = vmor %vm6492_vm10, %vm6493_vm11 }
 0x58e   : > { %v6044_v10 = vpop.xlane.xlu2 %6043  ;;  %6245 = vadd.xlane.f32.xlu1 %v6244_v49  ;;  %v6499_v35 = vmul.f32 0.5, %v6498_v26  ;;  %v6313_v13 = vmul.f32 %v15163_v48, %v15163_v48  ;;  %v6281_v20 = vmul.f32 %v6201_v24, %v18646_v36  ;;  %v7006_v41 = vadd.f32 0.001143296, %v7005_v50 }
 0x58f   : > { %v15178_v12 = vmul.f32 %v6044_v10, %v18646_v36  ;;  %v5957_v60 = vpop.f32.mrf.mxu2  ;;  %v15185_v43 = vpop.eup %10310  ;;  %v6495_v11 = vsel %vm15191_vm12, %v15055_v27, %v6491_v9  ;;  %vm6503_vm14 = vweird.f32 %v15102_v58  ;;  %v6959_v45 = vadd.f32 0.05243302, %v6958_v7 }
 0x590   : > { %v15182_v3 = vadd.f32 %v5957_v60, %v5731_v34  ;;  %v6204_v59 = vpop.xlane.xlu0 %6203  ;;  %10312 = vrsqrt.f32 %v15174_v30  ;;  %v6994_v40 = vmul.f32 2.1237322e-06, %v15146_v44  ;;  %vm6502_vm15 = vweird.f32 %v15053_v53 }
 0x591   : > { %v6314_v32 = vmul.f32 %v15178_v12, %v15178_v12  ;;  %v6282_v38 = vmul.f32 %v6204_v59, %v18646_v36  ;;  %v6507_v27 = vmul.f32 %v15185_v43, %v15130_v57  ;;  %v15212_v14 = vadd.f32 1e-06, %v6376_v42  ;;  %vm15254_vm2 = vmor %vm6502_vm15, %vm6503_vm14 }
 0x592   : > { %18722 = vst [vmem:[#allocation104_spill] sm:$0xff] %v15182_v3  ;;  %v6087_v26 = vsel %vm878_vm1, %v15182_v3, 0.0  ;;  %v6169_v50 = vmul.f32 %v15182_v3, %v15182_v3  ;;  %v6972_v9 = vadd.f32 0.4994258, %v6971_v5  ;;  %v6788_v24 = vmul.f32 %v6495_v11, %v6404_v31 }
 0x593   : > { %v5684_v63 = vpop.f32.mrf.mxu1  ;;  %6088 = vadd.xlane.f32.xlu2 %v6087_v26  ;;  %v6500_v34 = vsub.f32 1.5, %v6499_v35  ;;  %v6345_v10 = vsub.f32 %v6281_v20, %v6313_v13  ;;  %v7007_v7 = vmul.f32 %v7006_v41, %v15146_v44  ;;  %v6346_v49 = vsub.f32 %v6282_v38, %v6314_v32  ;;  %v18725_v26 = vld [vmem:[#allocation122_spill] sm:$0xff] }
 0x594   : > { %v5732_v60 = vadd.f32 %v5684_v63, %v15115_v54  ;;  %v6247_v59 = vsel %vm878_vm1, %v6169_v50, 0.0  ;;  %v6973_v22 = vmul.f32 %v6972_v9, %v15021_v33  ;;  %v6960_v42 = vmul.f32 %v6959_v45, %v15021_v33 }
 0x595   : > { %6248 = vadd.xlane.f32.xlu0 %v6247_v59  ;;  %v6995_v35 = vadd.f32 0.00028619796, %v6994_v40  ;;  %v6508_v13 = vmul.f32 %v15185_v43, %v6507_v27  ;;  %10314 = vrsqrt.f32 %v15212_v14  ;;  %v6501_v11 = vmul.f32 %v15102_v58, %v6500_v34 }
 0x596   : > { %v6047_v8 = vpop.xlane.xlu1 %6046  ;;  %v15230_v63 = vadd.f32 1.0, %v6973_v22  ;;  %v15232_v41 = vpop.eup %10312  ;;  %v6377_v32 = vmax.f32 %v6345_v10, 0.0  ;;  %v15236_v45 = vmul.f32 0.5, %v15074_v29  ;;  %v6823_v40 = vmul.f32 %v14939_v39, %v6788_v24 }
 0x597   : > { %v15224_v31 = vmul.f32 %v6047_v8, %v18646_v36  ;;  %v5960_v5 = vpop.f32.mrf.mxu2  ;;  %v6378_v50 = vmax.f32 %v6346_v49, 0.0  ;;  %v6961_v22 = vadd.f32 0.18741608, %v6960_v42  ;;  %v6996_v10 = vmul.f32 %v6995_v35, %v15146_v44  ;;  %v18729_v8 = vld [vmem:[#allocation90_spill] sm:$0xff] }
 0x598   : > { %v15228_v54 = vadd.f32 %v5960_v5, %v5732_v60  ;;  %v6207_v20 = vpop.xlane.xlu2 %6206  ;;  %v7008_v60 = vadd.f32 0.014752088, %v7007_v7  ;;  %v6509_v29 = vmul.f32 0.5, %v6508_v13  ;;  %v6517_v24 = vmul.f32 %v15232_v41, %v15174_v30 }
 0x599   : > { %v6315_v27 = vmul.f32 %v15224_v31, %v15224_v31  ;;  %v6283_v9 = vmul.f32 %v6207_v20, %v18646_v36  ;;  %10316 = vrcp.f32 %v15230_v63  ;;  %v15260_v5 = vadd.f32 1e-06, %v6377_v32 }
 0x59a   : > { %18726 = vst [vmem:[#allocation106_spill] sm:$0xff] %v15228_v54  ;;  %v6090_v59 = vsel %vm878_vm1, %v15228_v54, 0.0  ;;  %v6170_v34 = vmul.f32 %v15228_v54, %v15228_v54  ;;  %v15264_v13 = vadd.f32 %v14959_v47, %v6823_v40  ;;  %v6505_v53 = vsel %vm15254_vm2, %v15102_v58, %v6501_v11 }
 0x59b   : > { %v5687_v38 = vpop.f32.mrf.mxu1  ;;  %v6347_v49 = vsub.f32 %v6283_v9, %v6315_v27  ;;  %6091 = vadd.xlane.f32.xlu1 %v6090_v59  ;;  %v15266_v20 = vpop.eup %10314  ;;  %v15271_v27 = vadd.f32 1e-06, %v6378_v50  ;;  %v7009_v32 = vmul.f32 %v7008_v60, %v15146_v44  ;;  %v6962_v42 = vmul.f32 %v6961_v22, %v15021_v33 }
 0x59c   : > { %v6250_v35 = vsel %vm878_vm1, %v6170_v34, 0.0  ;;  %v5733_v9 = vadd.f32 %v5687_v38, %v15118_v37  ;;  %vm6512_vm3 = vweird.f32 %v15130_v57  ;;  %vm6513_vm4 = vweird.f32 %v15185_v43 }
 0x59d   : > { %6251 = vadd.xlane.f32.xlu2 %v6250_v35  ;;  %v6997_v7 = vadd.f32 0.0036580483, %v6996_v10  ;;  %v6510_v58 = vsub.f32 1.5, %v6509_v29  ;;  %v6518_v11 = vmul.f32 %v15232_v41, %v6517_v24  ;;  %v6379_v50 = vmax.f32 %v6347_v49, 0.0  ;;  %vm15327_vm6 = vmor %vm6512_vm3, %vm6513_vm4 }
 0x59e   : > { %v6050_v59 = vpop.xlane.xlu0 %6049  ;;  %v18731_v60 = vsub.f32 %v14574_v52, %v14949_v28  ;;  %v6527_v22 = vmul.f32 %v15266_v20, %v15212_v14  ;;  %10318 = vrsqrt.f32 %v15260_v5  ;;  %v15293_v35 = vmul.f32 0.70710677, %v15264_v13 }
 0x59f   : > { %v15279_v40 = vmul.f32 %v6050_v59, %v18646_v36  ;;  %v5963_v34 = vpop.f32.mrf.mxu2  ;;  %v10317_v10 = vpop.eup %10316  ;;  %10320 = vrsqrt.f32 %v15271_v27  ;;  %v7010_v49 = vadd.f32 0.112945676, %v7009_v32  ;;  %v6963_v52 = vadd.f32 1.1283791, %v6962_v42 }
 0x5a0   : > { %v15282_v37 = vadd.f32 %v5963_v34, %v5733_v9  ;;  %v6210_v38 = vpop.xlane.xlu1 %6209  ;;  %v15287_v33 = vmul.f32 %v6505_v53, %v18731_v60  ;;  %v6976_v9 = vmul.f32 %v10317_v10, %v15230_v63  ;;  %v6998_v59 = vmul.f32 %v6997_v7, %v15146_v44 }
 0x5a1   : > { %v6316_v29 = vmul.f32 %v15279_v40, %v15279_v40  ;;  %v6284_v24 = vmul.f32 %v6210_v38, %v18646_v36  ;;  %v6511_v34 = vmul.f32 %v15185_v43, %v6510_v58  ;;  %v6519_v60 = vmul.f32 0.5, %v6518_v11 }
 0x5a2   : > { %18730 = vst [vmem:[#allocation109_spill] sm:$0xff] %v15282_v37  ;;  %v6093_v53 = vsel %vm878_vm1, %v15282_v37, 0.0  ;;  %v15306_v3 = vadd.f32 1e-06, %v6379_v50  ;;  %v6528_v32 = vmul.f32 %v15266_v20, %v6527_v22  ;;  %v6977_v42 = vsub.f32 1.0, %v6976_v9 }
 0x5a3   : > { %v5690_v28 = vpop.f32.mrf.mxu1  ;;  %6094 = vadd.xlane.f32.xlu0 %v6093_v53  ;;  %v6171_v38 = vmul.f32 %v15282_v37, %v15282_v37  ;;  %v7032_v56 = vmul.f32 %v15293_v35, %v15293_v35  ;;  %v6348_v16 = vsub.f32 %v6284_v24, %v6316_v29  ;;  %v6984_v58 = vand.u32 2147483647, %v15230_v63 }
 0x5a4   : > { %v5734_v7 = vadd.f32 %v5690_v28, %v15123_v61  ;;  %v7011_v11 = vmul.f32 %v7010_v49, %v15146_v44  ;;  %v15316_v54 = vpop.eup %10318  ;;  %vm6523_vm5 = vweird.f32 %v15232_v41  ;;  %v6978_v50 = vmul.f32 %v10317_v10, %v6977_v42 }
 0x5a5   : > { %v6986_v22 = vand.u32 2147483648, %v15230_v63  ;;  %v6253_v53 = vsel %vm878_vm1, %v6171_v38, 0.0  ;;  %v6999_v37 = vadd.f32 0.05243302, %v6998_v59  ;;  %v15321_v4 = vpop.eup %10320  ;;  %10322 = vrsqrt.f32 %v15306_v3 }
 0x5a6   : > { %vm6981_vm7 = vweird.f32 %v10317_v10  ;;  %6254 = vadd.xlane.f32.xlu1 %v6253_v53  ;;  %v7012_v24 = vadd.f32 0.4994258, %v7011_v11  ;;  %v6964_v49 = vmul.f32 %v6963_v52, %v14992_v62  ;;  %v6515_v28 = vsel %vm15327_vm6, %v15185_v43, %v6511_v34  ;;  %v6053_v6 = vpop.xlane.xlu2 %6052 }
 0x5a7   : > { %v5966_v9 = vpop.f32.mrf.mxu2  ;;  %v6520_v59 = vsub.f32 1.5, %v6519_v60  ;;  %vm6522_vm8 = vweird.f32 %v15174_v30  ;;  %v6529_v57 = vmul.f32 0.5, %v6528_v32  ;;  %v6380_v42 = vmax.f32 %v6348_v16, 0.0 }
 0x5a8   : > { %v15332_v29 = vadd.f32 %v5966_v9, %v5734_v7  ;;  %v6979_v38 = vadd.f32 %v10317_v10, %v6978_v50  ;;  %vm6980_vm13 = vweird.f32 %v15230_v63  ;;  %v15340_v19 = vmin.f32 %v7032_v56, 16.0  ;;  %vm15384_vm12 = vmor %vm6522_vm8, %vm6523_vm5 }
 0x5a9   : > { %v6537_v7 = vmul.f32 %v15316_v54, %v15260_v5  ;;  %v6547_v62 = vmul.f32 %v15321_v4, %v15271_v27  ;;  %vm6982_vm9 = vmor %vm6980_vm13, %vm6981_vm7  ;;  %vm6985_vm10 = vcmp.eq.f32.partialorder %v6984_v58, 8.507059e+37  ;;  %v6987_v43 = vor.u32 1.1754944e-38, %v6986_v22  ;;  %v6213_v22 = vpop.xlane.xlu0 %6212 }
 0x5aa   : > { %v6983_v52 = vsel %vm6982_vm9, %v10317_v10, %v6979_v38  ;;  %v6096_v16 = vsel %vm878_vm1, %v15332_v29, 0.0  ;;  %v7000_v34 = vmul.f32 %v6999_v37, %v15146_v44  ;;  %v7013_v63 = vmul.f32 %v7012_v24, %v15146_v44 }
 0x5ab   : > { %v18735_v56 = vsub.f32 %v14596_v2, %v15033_v23  ;;  %v6988_v32 = vsel %vm6985_vm10, %v6987_v43, %v6983_v52  ;;  %v15357_v11 = vmul.f32 %v6053_v6, %v18646_v36  ;;  %6097 = vadd.xlane.f32.xlu2 %v6096_v16  ;;  %v6172_v10 = vmul.f32 %v15332_v29, %v15332_v29  ;;  %v15361_v58 = vpop.eup %10322  ;;  %v5693_v43 = vpop.f32.mrf.mxu1 }
 0x5ac   : > { %vm6532_vm11 = vweird.f32 %v15212_v14  ;;  %v15364_v37 = vadd.f32 1e-06, %v6380_v42  ;;  %v6989_v50 = vmul.f32 %v6988_v32, %v6964_v49  ;;  %v15366_v53 = vadd.f32 1.0, %v7013_v63 }
 0x5ad   : > { %v15354_v60 = vmul.f32 %v6515_v28, %v18735_v56  ;;  %v7034_v2 = vmul.f32 2.1237322e-06, %v15340_v19  ;;  %v6521_v23 = vmul.f32 %v15232_v41, %v6520_v59  ;;  %v6530_v6 = vsub.f32 1.5, %v6529_v57 }
 0x5ae   : > { %v6538_v9 = vmul.f32 %v15316_v54, %v6537_v7  ;;  %v6256_v61 = vsel %vm878_vm1, %v6172_v10, 0.0  ;;  %v6056_v24 = vpop.xlane.xlu1 %6055  ;;  %v6548_v28 = vmul.f32 %v15321_v4, %v6547_v62  ;;  %v9995_v38 = vclamps-f32 %v6989_v50, 1.0 }
 0x5af   : > { %v7001_v42 = vadd.f32 0.18741608, %v7000_v34  ;;  %6257 = vadd.xlane.f32.xlu0 %v6256_v61  ;;  %v7045_v49 = vmul.f32 3.8918573e-05, %v15340_v19  ;;  %v6557_v52 = vmul.f32 %v15361_v58, %v15306_v3  ;;  %v6317_v59 = vmul.f32 %v15357_v11, %v15357_v11  ;;  %v5969_v34 = vpop.f32.mrf.mxu2 }
 0x5b0   : > { %v6285_v57 = vmul.f32 %v6213_v22, %v18646_v36  ;;  %10324 = vrcp.f32 %v15366_v53  ;;  %v8232_v62 = vadd.f32 1.0, %v9995_v38  ;;  %v15390_v16 = vmul.f32 %v6056_v24, %v18646_v36  ;;  %v6216_v32 = vpop.xlane.xlu2 %6215 }
 0x5b1   : > { %10326 = vrsqrt.f32 %v15364_v37  ;;  %v7035_v63 = vadd.f32 0.00028619796, %v7034_v2  ;;  %v6525_v56 = vsel %vm15384_vm12, %v15232_v41, %v6521_v23  ;;  %vm6533_vm14 = vweird.f32 %v15266_v20 }
 0x5b2   : > { %v5735_v30 = vadd.f32 %v5693_v43, %v15127_v0  ;;  %v6824_v10 = vmul.f32 %v14939_v39, %v15287_v33  ;;  %v15400_v50 = vmul.f32 %v15266_v20, %v6530_v6  ;;  %v15402_v22 = vmul.f32 0.5, %v6538_v9  ;;  %vm15425_vm15 = vmor %vm6532_vm11, %vm6533_vm14 }
 0x5b3   : > { %v15404_v61 = vmul.f32 0.5, %v6548_v28  ;;  %v8264_v2 = vmul.f32 %v8232_v62, %v15169_v51  ;;  %v6558_v24 = vmul.f32 %v15361_v58, %v6557_v52  ;;  %v6349_v41 = vsub.f32 %v6285_v57, %v6317_v59 }
 0x5b4   : > { %v7002_v23 = vmul.f32 %v7001_v42, %v15146_v44  ;;  %v15409_v38 = vadd.f32 %v5969_v34, %v5735_v30  ;;  %v6318_v0 = vmul.f32 %v15390_v16, %v15390_v16  ;;  %v6286_v33 = vmul.f32 %v6216_v32, %v18646_v36 }
 0x5b5   : > { %10027 = vmatmul.msk.f32.vlgmr.msra.gmra.mxu3 %vm878_vm1, %v8264_v2  ;;  %v7036_v6 = vmul.f32 %v7035_v63, %v15340_v19  ;;  %v7046_v9 = vadd.f32 0.001143296, %v7045_v49  ;;  %v18738_v51 = vsub.f32 %v18725_v26, %v15082_v25  ;;  %v15432_v52 = vmul.f32 0.5, %v15264_v13 }
 0x5b6   : > { %v10325_v28 = vpop.eup %10324  ;;  %v6099_v42 = vsel %vm878_vm1, %v15409_v38, 0.0  ;;  %v15435_v49 = vadd.f32 %v14959_v47, %v6824_v10  ;;  %v6535_v14 = vsel %vm15425_vm15, %v15266_v20, %v15400_v50  ;;  %v6540_v26 = vsub.f32 1.5, %v15402_v22 }
 0x5b7   : > { %v15419_v43 = vmul.f32 %v6525_v56, %v18738_v51  ;;  %v15437_v25 = vpop.eup %10326  ;;  %v7016_v59 = vmul.f32 %v10325_v28, %v15366_v53  ;;  %6100 = vadd.xlane.f32.xlu1 %v6099_v42  ;;  %v7037_v57 = vadd.f32 0.0036580483, %v7036_v6  ;;  %v6559_v7 = vmul.f32 0.5, %v6558_v24 }
 0x5b8   : > { %v7003_v62 = vadd.f32 1.1283791, %v7002_v23  ;;  %v7047_v13 = vmul.f32 %v7046_v9, %v15340_v19  ;;  %v15447_v34 = vmul.f32 0.70710677, %v15435_v49  ;;  %v6550_v63 = vsub.f32 1.5, %v15404_v61 }
 0x5b9   : > { %v6381_v56 = vmax.f32 %v6349_v41, 0.0  ;;  %v7017_v30 = vsub.f32 1.0, %v7016_v59  ;;  %v6350_v32 = vsub.f32 %v6286_v33, %v6318_v0  ;;  %v6567_v10 = vmul.f32 %v15437_v25, %v15364_v37  ;;  %v5696_v59 = vpop.f32.mrf.mxu1 }
 0x5ba   : > { %v7026_v22 = vand.u32 2147483648, %v15366_v53  ;;  %v7038_v2 = vmul.f32 %v7037_v57, %v15340_v19  ;;  %v7048_v6 = vadd.f32 0.014752088, %v7047_v13  ;;  %vm7021_vm2 = vweird.f32 %v10325_v28 }
 0x5bb   : > { %v7018_v24 = vmul.f32 %v10325_v28, %v7017_v30  ;;  %v7024_v23 = vand.u32 2147483647, %v15366_v53  ;;  %v7072_v9 = vmul.f32 %v15447_v34, %v15447_v34  ;;  %vm6543_vm3 = vweird.f32 %v15316_v54 }
 0x5bc   : > { %v6560_v61 = vsub.f32 1.5, %v6559_v7  ;;  %v7004_v41 = vmul.f32 %v7003_v62, %v15094_v15  ;;  %v7039_v0 = vadd.f32 0.05243302, %v7038_v2  ;;  %v7049_v33 = vmul.f32 %v7048_v6, %v15340_v19 }
 0x5bd   : > { %vm6553_vm4 = vweird.f32 %v15321_v4  ;;  %v7019_v51 = vadd.f32 %v10325_v28, %v7018_v24  ;;  %vm7020_vm5 = vweird.f32 %v15366_v53  ;;  %v6382_v42 = vmax.f32 %v6350_v32, 0.0 }
 0x5be   : > { %v15462_v57 = vmin.f32 %v7072_v9, 16.0  ;;  %vm6542_vm6 = vweird.f32 %v15260_v5  ;;  %v15465_v13 = vadd.f32 1e-06, %v6381_v56  ;;  %vm7022_vm7 = vmor %vm7020_vm5, %vm7021_vm2  ;;  %v7027_v7 = vor.u32 1.1754944e-38, %v7026_v22 }
 0x5bf   : > { %v7050_v15 = vadd.f32 0.112945676, %v7049_v33  ;;  %v6825_v62 = vmul.f32 %v14939_v39, %v15354_v60  ;;  %v6568_v30 = vmul.f32 %v15437_v25, %v6567_v10  ;;  %v7023_v2 = vsel %vm7022_vm7, %v10325_v28, %v7019_v51  ;;  %v5972_v60 = vpop.f32.mrf.mxu2  ;;  %vm15506_vm9 = vmor %vm6542_vm6, %vm6543_vm3 }
 0x5c0   : > { %vm7025_vm8 = vcmp.eq.f32.partialorder %v7024_v23, 8.507059e+37  ;;  %v6173_v53 = vmul.f32 %v15409_v38, %v15409_v38  ;;  %v5736_v6 = vadd.f32 %v5696_v59, %v15140_v46  ;;  %v7040_v56 = vmul.f32 %v7039_v0, %v15340_v19 }
 0x5c1   : > { %v7028_v32 = vsel %vm7025_vm8, %v7027_v7, %v7023_v2  ;;  %v7051_v24 = vmul.f32 %v7050_v15, %v15340_v19  ;;  %v15476_v22 = vadd.f32 1e-06, %v6382_v42  ;;  %v7074_v10 = vmul.f32 2.1237322e-06, %v15462_v57 }
 0x5c2   : > { %v7029_v9 = vmul.f32 %v7028_v32, %v7004_v41  ;;  %v6259_v33 = vsel %vm878_vm1, %v6173_v53, 0.0  ;;  %10328 = vrsqrt.f32 %v15465_v13  ;;  %v15481_v23 = vadd.f32 %v5972_v60, %v5736_v6  ;;  %v18743_v6 = vld [vmem:[#allocation101_spill] sm:$0xff]  ;;  %v18750_v60 = vld [vmem:[#allocation94_spill] sm:$0xff] }
 0x5c3   : > { %v7052_v28 = vadd.f32 0.4994258, %v7051_v24  ;;  %6260 = vadd.xlane.f32.xlu2 %v6259_v33  ;;  %v15484_v46 = vadd.f32 %v14959_v47, %v6825_v62  ;;  %v6541_v0 = vmul.f32 %v15316_v54, %v6540_v26  ;;  %v6551_v41 = vmul.f32 %v15321_v4, %v6550_v63  ;;  %v18744_v24 = vld [vmem:[#allocation92_spill] sm:$0xff] }
 0x5c4   : > { %vm6563_vm13 = vweird.f32 %v15361_v58  ;;  %v9996_v51 = vclamps-f32 %v7029_v9, 1.0  ;;  %v6561_v42 = vmul.f32 %v15361_v58, %v6560_v61  ;;  %v6569_v59 = vmul.f32 0.5, %v6568_v30 }
 0x5c5   : > { %v7041_v7 = vadd.f32 0.18741608, %v7040_v56  ;;  %v7053_v15 = vmul.f32 %v7052_v28, %v15340_v19  ;;  %10330 = vrsqrt.f32 %v15476_v22  ;;  %v7075_v53 = vadd.f32 0.00028619796, %v7074_v10 }
 0x5c6   : > { %v8233_v2 = vadd.f32 1.0, %v9996_v51  ;;  %v7085_v62 = vmul.f32 3.8918573e-05, %v15462_v57  ;;  %v6102_v26 = vsel %vm878_vm1, %v15481_v23, 0.0  ;;  %v15498_v63 = vmul.f32 0.70710677, %v15484_v46 }
 0x5c7   : > { %v15493_v32 = vadd.f32 1.0, %v7053_v15  ;;  %v6826_v61 = vmul.f32 %v14939_v39, %v15419_v43  ;;  %v6410_v56 = vsub.f32 %v18743_v6, %v15178_v12  ;;  %vm6552_vm10 = vweird.f32 %v15271_v27  ;;  %6103 = vadd.xlane.f32.xlu0 %v6102_v26  ;;  %v18752_v51 = vld [vmem:[#allocation96_spill] sm:$0xff] }
 0x5c8   : > { %v6411_v9 = vsub.f32 %v18744_v24, %v15224_v31  ;;  %v8265_v33 = vmul.f32 %v8233_v2, %v15236_v45  ;;  %v15516_v39 = vpop.eup %10328  ;;  %v18745_v5 = vsub.f32 %v18729_v8, %v15107_v55  ;;  %v6545_v12 = vsel %vm15506_vm9, %v15316_v54, %v6541_v0  ;;  %vm15533_vm11 = vmor %vm6552_vm10, %vm6553_vm4  ;;  %v6059_v55 = vpop.xlane.xlu0 %6058 }
 0x5c9   : > { %vm6562_vm12 = vweird.f32 %v15306_v3  ;;  %10332 = vrcp.f32 %v15493_v32  ;;  %v6555_v45 = vsel %vm15533_vm11, %v15321_v4, %v6551_v41  ;;  %v7042_v54 = vmul.f32 %v7041_v7, %v15340_v19  ;;  %v6219_v2 = vpop.xlane.xlu1 %6218 }
 0x5ca   : > { %v15526_v43 = vmul.f32 %v6535_v14, %v18745_v5  ;;  %vm15544_vm14 = vmor %vm6562_vm12, %vm6563_vm13  ;;  %10028 = vmatmul.msk.f32.gmra.mxu3 %vm878_vm1, %v8265_v33  ;;  %v7076_v20 = vmul.f32 %v7075_v53, %v15462_v57  ;;  %v7086_v3 = vadd.f32 0.001143296, %v7085_v62  ;;  %v6570_v50 = vsub.f32 1.5, %v6569_v59  ;;  %v5699_v33 = vpop.f32.mrf.mxu1 }
 0x5cb   : > { %v6565_v27 = vsel %vm15544_vm14, %v15361_v58, %v6561_v42  ;;  %v7112_v4 = vmul.f32 %v15498_v63, %v15498_v63  ;;  %v15557_v44 = vadd.f32 %v14959_v47, %v6826_v61  ;;  %v15559_v14 = vpop.eup %10330  ;;  %v6412_v10 = vsub.f32 %v18750_v60, %v15279_v40 }
 0x5cc   : > { %v6577_v19 = vmul.f32 %v15516_v39, %v15465_v13  ;;  %v15566_v28 = vmul.f32 %v6059_v55, %v18646_v36  ;;  %v7087_v58 = vmul.f32 %v7086_v3, %v15462_v57  ;;  %v18751_v0 = vsub.f32 %v18732_v18, %v15163_v48 }
 0x5cd   : > { %v15574_v47 = vmul.f32 %v6555_v45, %v6410_v56  ;;  %v6413_v42 = vsub.f32 %v18752_v51, %v15357_v11  ;;  %v15578_v59 = vmin.f32 %v7112_v4, 16.0  ;;  %v15580_v7 = vmul.f32 %v6565_v27, %v6411_v9 }
 0x5ce   : > { %v15572_v41 = vmul.f32 %v6545_v12, %v18751_v0  ;;  %v7043_v15 = vadd.f32 1.1283791, %v7042_v54  ;;  %v7077_v53 = vadd.f32 0.0036580483, %v7076_v20  ;;  %v15583_v62 = vmul.f32 0.70710677, %v15557_v44 }
 0x5cf   : > { %v10333_v26 = vpop.eup %10332  ;;  %v15586_v18 = vmul.f32 %v15437_v25, %v6570_v50  ;;  %v7088_v48 = vadd.f32 0.014752088, %v7087_v58  ;;  %v7114_v61 = vmul.f32 2.1237322e-06, %v15578_v59  ;;  %v7125_v30 = vmul.f32 3.8918573e-05, %v15578_v59 }
 0x5d0   : > { %v6578_v6 = vmul.f32 %v15516_v39, %v6577_v19  ;;  %v6587_v56 = vmul.f32 %v15559_v14, %v15476_v22  ;;  %v7056_v24 = vmul.f32 %v10333_v26, %v15493_v32  ;;  %v6319_v9 = vmul.f32 %v15566_v28, %v15566_v28 }
 0x5d1   : > { %v6287_v5 = vmul.f32 %v6219_v2, %v18646_v36  ;;  %v7089_v12 = vmul.f32 %v7088_v48, %v15462_v57  ;;  %v7115_v31 = vadd.f32 0.00028619796, %v7114_v61  ;;  %v7126_v55 = vadd.f32 0.001143296, %v7125_v30  ;;  %v6062_v30 = vpop.xlane.xlu2 %6061 }
 0x5d2   : > { %vm6573_vm15 = vweird.f32 %v15437_v25  ;;  %v7057_v45 = vsub.f32 1.0, %v7056_v24  ;;  %v7064_v8 = vand.u32 2147483647, %v15493_v32  ;;  %v7066_v54 = vand.u32 2147483648, %v15493_v32  ;;  %v5975_v24 = vpop.f32.mrf.mxu2 }
 0x5d3   : > { %v7078_v20 = vmul.f32 %v7077_v53, %v15462_v57  ;;  %v7044_v3 = vmul.f32 %v7043_v15, %v15293_v35  ;;  %v5737_v27 = vadd.f32 %v5699_v33, %v15143_v1  ;;  %v7090_v50 = vadd.f32 0.112945676, %v7089_v12 }
 0x5d4   : > { %v7152_v4 = vmul.f32 %v15583_v62, %v15583_v62  ;;  %vm6572_vm2 = vweird.f32 %v15364_v37  ;;  %v7058_v19 = vmul.f32 %v10333_v26, %v7057_v45  ;;  %vm7061_vm3 = vweird.f32 %v10333_v26 }
 0x5d5   : > { %v7116_v58 = vmul.f32 %v7115_v31, %v15578_v59  ;;  %v7127_v0 = vmul.f32 %v7126_v55, %v15578_v59  ;;  %vm7060_vm4 = vweird.f32 %v15493_v32  ;;  %v6351_v2 = vsub.f32 %v6287_v5, %v6319_v9  ;;  %v6222_v55 = vpop.xlane.xlu0 %6221  ;;  %vm15651_vm7 = vmor %vm6572_vm2, %vm6573_vm15 }
 0x5d6   : > { %v7091_v53 = vmul.f32 %v7090_v50, %v15462_v57  ;;  %v6174_v1 = vmul.f32 %v15481_v23, %v15481_v23  ;;  %v7059_v35 = vadd.f32 %v10333_v26, %v7058_v19  ;;  %vm15613_vm5 = vcmp.eq.f32.partialorder %v7064_v8, 8.507059e+37  ;;  %vm7062_vm6 = vmor %vm7060_vm4, %vm7061_vm3 }
 0x5d7   : > { %v7067_v48 = vor.u32 1.1754944e-38, %v7066_v54  ;;  %v7079_v61 = vadd.f32 0.05243302, %v7078_v20  ;;  %v15619_v32 = vmul.f32 %v6062_v30, %v18646_v36  ;;  %v15621_v9 = vmin.f32 %v7152_v4, 16.0  ;;  %v15672_v30 = vld [vmem:[%s18239_s9] ss:$0 sm:$0xff] }
 0x5d8   : > { %v7092_v33 = vadd.f32 0.4994258, %v7091_v53  ;;  %v6262_v12 = vsel %vm878_vm1, %v6174_v1, 0.0  ;;  %v7063_v5 = vsel %vm7062_vm6, %v10333_v26, %v7059_v35  ;;  %v15623_v31 = vadd.f32 %v5975_v24, %v5737_v27 }
 0x5d9   : > { %6263 = vadd.xlane.f32.xlu1 %v6262_v12  ;;  %v7117_v45 = vadd.f32 0.0036580483, %v7116_v58  ;;  %v7128_v8 = vadd.f32 0.014752088, %v7127_v0  ;;  %v6579_v54 = vmul.f32 0.5, %v6578_v6  ;;  %v7068_v20 = vsel %vm15613_vm5, %v7067_v48, %v7063_v5 }
 0x5da   : > { %v6383_v50 = vmax.f32 %v6351_v2, 0.0  ;;  %v7093_v19 = vmul.f32 %v7092_v33, %v15462_v57  ;;  %v6588_v53 = vmul.f32 %v15559_v14, %v6587_v56  ;;  %v7069_v1 = vmul.f32 %v7068_v20, %v7044_v3  ;;  %v15643_v3 = vld [vmem:[%s18238_s8] ss:$0 sm:$0xff] }
 0x5db   : > { %v7080_v4 = vmul.f32 %v7079_v61, %v15462_v57  ;;  %v6105_v26 = vsel %vm878_vm1, %v15623_v31, 0.0  ;;  %v6320_v58 = vmul.f32 %v15619_v32, %v15619_v32  ;;  %v6288_v6 = vmul.f32 %v6222_v55, %v18646_v36  ;;  %v18757_v61 = vld [vmem:[#allocation89_spill] sm:$0xff] }
 0x5dc   : > { %v15632_v27 = vadd.f32 1.0, %v7093_v19  ;;  %6106 = vadd.xlane.f32.xlu2 %v6105_v26  ;;  %v7165_v0 = vmul.f32 3.8918573e-05, %v15621_v9  ;;  %v9997_v2 = vclamps-f32 %v7069_v1, 1.0  ;;  %v7118_v35 = vmul.f32 %v7117_v45, %v15578_v59 }
 0x5dd   : > { %v7129_v56 = vmul.f32 %v7128_v8, %v15578_v59  ;;  %v6827_v15 = vmul.f32 %v15643_v3, %v15526_v43  ;;  %v15657_v24 = vadd.f32 1e-06, %v6383_v50  ;;  %v7154_v33 = vmul.f32 2.1237322e-06, %v15621_v9  ;;  %v5702_v8 = vpop.f32.mrf.mxu1 }
 0x5de   : > { %10334 = vrcp.f32 %v15632_v27  ;;  %v6575_v43 = vsel %vm15651_vm7, %v15437_v25, %v15586_v18  ;;  %v8234_v12 = vadd.f32 1.0, %v9997_v2  ;;  %v15666_v37 = vmul.f32 0.5, %v15435_v49 }
 0x5df   : > { %v7081_v5 = vadd.f32 0.18741608, %v7080_v4  ;;  %v6580_v55 = vsub.f32 1.5, %v6579_v54  ;;  %v6352_v45 = vsub.f32 %v6288_v6, %v6320_v58  ;;  %v7130_v20 = vadd.f32 0.112945676, %v7129_v56  ;;  %v5978_v58 = vpop.f32.mrf.mxu2 }
 0x5e0   : > { %v7166_v50 = vadd.f32 0.001143296, %v7165_v0  ;;  %v6589_v19 = vmul.f32 0.5, %v6588_v53  ;;  %v8266_v1 = vmul.f32 %v8234_v12, %v15432_v52  ;;  %v7119_v26 = vadd.f32 0.05243302, %v7118_v35 }
 0x5e1   : > { %v15675_v25 = vadd.f32 %v15672_v30, %v6827_v15  ;;  %10336 = vrsqrt.f32 %v15657_v24  ;;  %v7131_v49 = vmul.f32 %v7130_v20, %v15578_v59  ;;  %v6175_v18 = vmul.f32 %v15623_v31, %v15623_v31 }
 0x5e2   : > { %v7155_v54 = vadd.f32 0.00028619796, %v7154_v33  ;;  %v15684_v52 = vmul.f32 %v6575_v43, %v6412_v10  ;;  %vm6583_vm8 = vweird.f32 %v15516_v39  ;;  %10029 = vmatmul.msk.f32.gmra.mxu3 %vm878_vm1, %v8266_v1  ;;  %v7082_v53 = vmul.f32 %v7081_v5, %v15462_v57 }
 0x5e3   : > { %v5738_v4 = vadd.f32 %v5702_v8, %v15149_v17  ;;  %v6384_v0 = vmax.f32 %v6352_v45, 0.0  ;;  %v7132_v2 = vadd.f32 0.4994258, %v7131_v49  ;;  %v6265_v35 = vsel %vm878_vm1, %v6175_v18, 0.0  ;;  %v6065_v45 = vpop.xlane.xlu1 %6064 }
 0x5e4   : > { %v10335_v6 = vpop.eup %10334  ;;  %v7167_v56 = vmul.f32 %v7166_v50, %v15621_v9  ;;  %vm6582_vm13 = vweird.f32 %v15465_v13  ;;  %v7120_v60 = vmul.f32 %v7119_v26, %v15578_v59  ;;  %6266 = vadd.xlane.f32.xlu0 %v6265_v35  ;;  %v15698_v57 = vmul.f32 0.70710677, %v15675_v25 }
 0x5e5   : > { %v7096_v40 = vmul.f32 %v10335_v6, %v15632_v27  ;;  %v15695_v10 = vadd.f32 %v5978_v58, %v5738_v4  ;;  %v15701_v17 = vmul.f32 %v15516_v39, %v6580_v55  ;;  %v6590_v15 = vsub.f32 1.5, %v6589_v19  ;;  %vm15739_vm2 = vmor %vm6582_vm13, %vm6583_vm8 }
 0x5e6   : > { %vm6592_vm9 = vweird.f32 %v15476_v22  ;;  %v7133_v48 = vmul.f32 %v7132_v2, %v15578_v59  ;;  %v7156_v33 = vmul.f32 %v7155_v54, %v15621_v9  ;;  %v7083_v43 = vadd.f32 1.1283791, %v7082_v53  ;;  %v6225_v2 = vpop.xlane.xlu2 %6224 }
 0x5e7   : > { %v7097_v12 = vsub.f32 1.0, %v7096_v40  ;;  %v7104_v5 = vand.u32 2147483647, %v15632_v27  ;;  %v6108_v8 = vsel %vm878_vm1, %v15695_v10, 0.0  ;;  %v15709_v20 = vpop.eup %10336  ;;  %v7106_v55 = vand.u32 2147483648, %v15632_v27 }
 0x5e8   : > { %v15712_v50 = vadd.f32 1e-06, %v6384_v0  ;;  %v15714_v19 = vadd.f32 1.0, %v7133_v48  ;;  %6109 = vadd.xlane.f32.xlu1 %v6108_v8  ;;  %v7168_v1 = vadd.f32 0.014752088, %v7167_v56  ;;  %vm7101_vm10 = vweird.f32 %v10335_v6  ;;  %v5705_v48 = vpop.f32.mrf.mxu1 }
 0x5e9   : > { %v7098_v26 = vmul.f32 %v10335_v6, %v7097_v12  ;;  %v7121_v49 = vadd.f32 0.18741608, %v7120_v60  ;;  %v7192_v18 = vmul.f32 %v15698_v57, %v15698_v57  ;;  %vm6593_vm11 = vweird.f32 %v15559_v14 }
 0x5ea   : > { %10338 = vrcp.f32 %v15714_v19  ;;  %v15721_v54 = vmul.f32 %v6065_v45, %v18646_v36  ;;  %v7157_v53 = vadd.f32 0.0036580483, %v7156_v33  ;;  %v15724_v4 = vmul.f32 %v15559_v14, %v6590_v15  ;;  %vm15755_vm3 = vmor %vm6592_vm9, %vm6593_vm11 }
 0x5eb   : > { %v6597_v58 = vmul.f32 %v15709_v20, %v15657_v24  ;;  %v7099_v0 = vadd.f32 %v10335_v6, %v7098_v26  ;;  %vm7100_vm12 = vweird.f32 %v15632_v27  ;;  %v7084_v35 = vmul.f32 %v7083_v43, %v15447_v34 }
 0x5ec   : > { %vm7102_vm14 = vmor %vm7100_vm12, %vm7101_vm10  ;;  %vm7105_vm15 = vcmp.eq.f32.partialorder %v7104_v5, 8.507059e+37  ;;  %v7107_v56 = vor.u32 1.1754944e-38, %v7106_v55  ;;  %v7169_v40 = vmul.f32 %v7168_v1, %v15621_v9  ;;  %10340 = vrsqrt.f32 %v15712_v50 }
 0x5ed   : > { %v7103_v60 = vsel %vm7102_vm14, %v10335_v6, %v7099_v0  ;;  %v7122_v15 = vmul.f32 %v7121_v49, %v15578_v59  ;;  %v15733_v33 = vmin.f32 %v7192_v18, 16.0  ;;  %v6321_v43 = vmul.f32 %v15721_v54, %v15721_v54 }
 0x5ee   : > { %v7108_v34 = vsel %vm7105_vm15, %v7107_v56, %v7103_v60  ;;  %v6289_v6 = vmul.f32 %v6225_v2, %v18646_v36  ;;  %v7158_v12 = vmul.f32 %v7157_v53, %v15621_v9  ;;  %v6585_v59 = vsel %vm15739_vm2, %v15516_v39, %v15701_v17 }
 0x5ef   : > { %v7109_v5 = vmul.f32 %v7108_v34, %v7084_v35  ;;  %v15760_v45 = vmul.f32 0.5, %v15484_v46  ;;  %v7170_v8 = vadd.f32 0.112945676, %v7169_v40  ;;  %v6595_v1 = vsel %vm15755_vm3, %v15559_v14, %v15724_v4  ;;  %v5981_v14 = vpop.f32.mrf.mxu2 }
 0x5f0   : > { %v10339_v55 = vpop.eup %10338  ;;  %v6598_v39 = vmul.f32 %v15709_v20, %v6597_v58  ;;  %v5739_v17 = vadd.f32 %v5705_v48, %v15151_v21  ;;  %v7194_v22 = vmul.f32 2.1237322e-06, %v15733_v33  ;;  %v7123_v49 = vadd.f32 1.1283791, %v7122_v15 }
 0x5f1   : > { %v9998_v26 = vclamps-f32 %v7109_v5, 1.0  ;;  %v7136_v18 = vmul.f32 %v10339_v55, %v15714_v19  ;;  %v7171_v46 = vmul.f32 %v7170_v8, %v15621_v9  ;;  %v7144_v53 = vand.u32 2147483647, %v15714_v19 }
 0x5f2   : > { %v6353_v0 = vsub.f32 %v6289_v6, %v6321_v43  ;;  %v7159_v2 = vadd.f32 0.05243302, %v7158_v12  ;;  %v6176_v35 = vmul.f32 %v15695_v10, %v15695_v10  ;;  %v15774_v4 = vpop.eup %10340  ;;  %v7146_v56 = vand.u32 2147483648, %v15714_v19 }
 0x5f3   : > { %v8235_v58 = vadd.f32 1.0, %v9998_v26  ;;  %v7137_v21 = vsub.f32 1.0, %v7136_v18  ;;  %v7172_v40 = vadd.f32 0.4994258, %v7171_v46  ;;  %v15778_v15 = vadd.f32 %v5981_v14, %v5739_v17 }
 0x5f4   : > { %v6268_v60 = vsel %vm878_vm1, %v6176_v35, 0.0  ;;  %v7195_v48 = vadd.f32 0.00028619796, %v7194_v22  ;;  %v7205_v27 = vmul.f32 3.8918573e-05, %v15733_v33  ;;  %vm7141_vm4 = vweird.f32 %v10339_v55  ;;  %v6068_v35 = vpop.xlane.xlu0 %6067 }
 0x5f5   : > { %v8267_v34 = vmul.f32 %v8235_v58, %v15666_v37  ;;  %v7138_v43 = vmul.f32 %v10339_v55, %v7137_v21  ;;  %v7173_v6 = vmul.f32 %v7172_v40, %v15621_v9  ;;  %6269 = vadd.xlane.f32.xlu2 %v6268_v60  ;;  %v6599_v12 = vmul.f32 0.5, %v6598_v39 }
 0x5f6   : > { %v7160_v13 = vmul.f32 %v7159_v2, %v15621_v9  ;;  %v6111_v5 = vsel %vm878_vm1, %v15778_v15, 0.0  ;;  %v6828_v8 = vmul.f32 %v15643_v3, %v15572_v41  ;;  %v6607_v17 = vmul.f32 %v15774_v4, %v15712_v50 }
 0x5f7   : > { %10030 = vmatmul.msk.f32.gmra.mxu3 %vm878_vm1, %v8267_v34  ;;  %v7139_v37 = vadd.f32 %v10339_v55, %v7138_v43  ;;  %vm7140_vm5 = vweird.f32 %v15714_v19  ;;  %v15792_v22 = vadd.f32 1.0, %v7173_v6  ;;  %6112 = vadd.xlane.f32.xlu0 %v6111_v5  ;;  %v7147_v39 = vor.u32 1.1754944e-38, %v7146_v56 }
 0x5f8   : > { %vm7142_vm6 = vmor %vm7140_vm5, %vm7141_vm4  ;;  %v6385_v26 = vmax.f32 %v6353_v0, 0.0  ;;  %v7196_v18 = vmul.f32 %v7195_v48, %v15733_v33  ;;  %v7206_v46 = vadd.f32 0.001143296, %v7205_v27  ;;  %v7124_v2 = vmul.f32 %v7123_v49, %v15498_v63 }
 0x5f9   : > { %v7143_v41 = vsel %vm7142_vm6, %v10339_v55, %v7139_v37  ;;  %vm7145_vm7 = vcmp.eq.f32.partialorder %v7144_v53, 8.507059e+37  ;;  %10342 = vrcp.f32 %v15792_v22  ;;  %v6600_v14 = vsub.f32 1.5, %v6599_v12  ;;  %v18762_v55 = vld [vmem:[#allocation128_spill] sm:$0xff] }
 0x5fa   : > { %v7148_v58 = vsel %vm7145_vm7, %v7147_v39, %v7143_v41  ;;  %v7161_v21 = vadd.f32 0.18741608, %v7160_v13  ;;  %v15798_v19 = vadd.f32 %v15672_v30, %v6828_v8  ;;  %v6608_v40 = vmul.f32 %v15774_v4, %v6607_v17 }
 0x5fb   : > { %v7149_v56 = vmul.f32 %v7148_v58, %v7124_v2  ;;  %v7197_v0 = vadd.f32 0.0036580483, %v7196_v18  ;;  %v7207_v60 = vmul.f32 %v7206_v46, %v15733_v33  ;;  %v15805_v63 = vmul.f32 %v6585_v59, %v6413_v42  ;;  %v6228_v42 = vpop.xlane.xlu1 %6227 }
 0x5fc   : > { %v6415_v49 = vsub.f32 %v18762_v55, %v15566_v28  ;;  %v15809_v53 = vadd.f32 1e-06, %v6385_v26  ;;  %v15812_v48 = vmul.f32 %v6068_v35, %v18646_v36  ;;  %v18763_v27 = vsub.f32 %v18757_v61, %v15390_v16 }
 0x5fd   : > { %v9999_v43 = vclamps-f32 %v7149_v56, 1.0  ;;  %v15820_v6 = vmul.f32 0.5, %v15557_v44  ;;  %v7208_v11 = vadd.f32 0.014752088, %v7207_v60  ;;  %v7162_v51 = vmul.f32 %v7161_v21, %v15621_v9 }
 0x5fe   : > { %v15817_v34 = vmul.f32 %v6595_v1, %v18763_v27  ;;  %v15824_v59 = vmul.f32 0.5, %v15675_v25  ;;  %v7198_v12 = vmul.f32 %v7197_v0, %v15733_v33  ;;  %v15828_v13 = vmul.f32 0.70710677, %v15798_v19  ;;  %v6071_v27 = vpop.xlane.xlu2 %6070 }
 0x5ff   : > { %v10343_v5 = vpop.eup %10342  ;;  %v15831_v16 = vmul.f32 %v15709_v20, %v6600_v14  ;;  %v6609_v61 = vmul.f32 0.5, %v6608_v40  ;;  %v8236_v1 = vadd.f32 1.0, %v9999_v43  ;;  %v7209_v44 = vmul.f32 %v7208_v11, %v15733_v33 }
 0x600   : > { %10344 = vrsqrt.f32 %v15809_v53  ;;  %v7176_v9 = vmul.f32 %v10343_v5, %v15792_v22  ;;  %v6322_v25 = vmul.f32 %v15812_v48, %v15812_v48  ;;  %v7232_v8 = vmul.f32 %v15828_v13, %v15828_v13 }
 0x601   : > { %v8268_v17 = vmul.f32 %v8236_v1, %v15760_v45  ;;  %v6290_v37 = vmul.f32 %v6228_v42, %v18646_v36  ;;  %v7210_v39 = vadd.f32 0.112945676, %v7209_v44  ;;  %v6829_v26 = vmul.f32 %v15643_v3, %v15574_v47 }
 0x602   : > { %v7163_v18 = vadd.f32 1.1283791, %v7162_v51  ;;  %v7177_v46 = vsub.f32 1.0, %v7176_v9  ;;  %v7199_v2 = vadd.f32 0.05243302, %v7198_v12  ;;  %v15844_v41 = vmin.f32 %v7232_v8, 16.0 }
 0x603   : > { %vm6603_vm8 = vweird.f32 %v15709_v20  ;;  %10031 = vmatmul.msk.f32.gmra.mxu3 %vm878_vm1, %v8268_v17  ;;  %v7184_v35 = vand.u32 2147483647, %v15792_v22  ;;  %v7186_v14 = vand.u32 2147483648, %v15792_v22  ;;  %v7211_v45 = vmul.f32 %v7210_v39, %v15733_v33 }
 0x604   : > { %v6177_v58 = vmul.f32 %v15778_v15, %v15778_v15  ;;  %vm6613_vm13 = vweird.f32 %v15774_v4  ;;  %v7178_v47 = vmul.f32 %v10343_v5, %v7177_v46  ;;  %vm7181_vm9 = vweird.f32 %v10343_v5 }
 0x605   : > { %v7234_v21 = vmul.f32 2.1237322e-06, %v15844_v41  ;;  %v7245_v40 = vmul.f32 3.8918573e-05, %v15844_v41  ;;  %vm6602_vm10 = vweird.f32 %v15657_v24  ;;  %v6610_v56 = vsub.f32 1.5, %v6609_v61 }
 0x606   : > { %v6354_v0 = vsub.f32 %v6290_v37, %v6322_v25  ;;  %v7212_v60 = vadd.f32 0.4994258, %v7211_v45  ;;  %v15858_v43 = vadd.f32 %v15672_v30, %v6829_v26  ;;  %v15860_v11 = vpop.eup %10344  ;;  %v7179_v51 = vadd.f32 %v10343_v5, %v7178_v47  ;;  %v6231_v26 = vpop.xlane.xlu0 %6230  ;;  %vm15899_vm15 = vmor %vm6602_vm10, %vm6603_vm8 }
 0x607   : > { %vm7180_vm11 = vweird.f32 %v15792_v22  ;;  %v7200_v42 = vmul.f32 %v7199_v2, %v15733_v33  ;;  %v6271_v12 = vsel %vm878_vm1, %v6177_v58, 0.0  ;;  %v7164_v1 = vmul.f32 %v7163_v18, %v15583_v62 }
 0x608   : > { %vm7182_vm12 = vmor %vm7180_vm11, %vm7181_vm9  ;;  %v7187_v61 = vor.u32 1.1754944e-38, %v7186_v14  ;;  %v7213_v44 = vmul.f32 %v7212_v60, %v15733_v33  ;;  %6272 = vadd.xlane.f32.xlu1 %v6271_v12  ;;  %v7235_v9 = vadd.f32 0.00028619796, %v7234_v21  ;;  %vm7185_vm14 = vcmp.eq.f32.partialorder %v7184_v35, 8.507059e+37 }
 0x609   : > { %v7183_v25 = vsel %vm7182_vm12, %v10343_v5, %v7179_v51  ;;  %v15869_v8 = vmul.f32 %v6071_v27, %v18646_v36  ;;  %v7246_v17 = vadd.f32 0.001143296, %v7245_v40  ;;  %v6386_v37 = vmax.f32 %v6354_v0, 0.0  ;;  %v18764_v0 = vld [vmem:[#allocation102_spill] sm:$0xff] }
 0x60a   : > { %v7188_v22 = vsel %vm7185_vm14, %v7187_v61, %v7183_v25  ;;  %v15871_v39 = vadd.f32 1.0, %v7213_v44  ;;  %v15874_v62 = vmul.f32 0.70710677, %v15858_v43  ;;  %v7201_v46 = vadd.f32 0.18741608, %v7200_v42 }
 0x60b   : > { %v7189_v18 = vmul.f32 %v7188_v22, %v7164_v1  ;;  %v7236_v2 = vmul.f32 %v7235_v9, %v15844_v41  ;;  %v7247_v14 = vmul.f32 %v7246_v17, %v15844_v41  ;;  %v15879_v5 = vmul.f32 %v15774_v4, %v6610_v56 }
 0x60c   : > { %v6617_v35 = vmul.f32 %v15860_v11, %v15809_v53  ;;  %10346 = vrcp.f32 %v15871_v39  ;;  %v6830_v45 = vmul.f32 %v15643_v3, %v15580_v7  ;;  %v6323_v47 = vmul.f32 %v15869_v8, %v15869_v8 }
 0x60d   : > { %v10000_v58 = vclamps-f32 %v7189_v18, 1.0  ;;  %v6291_v21 = vmul.f32 %v6231_v26, %v18646_v36  ;;  %v7237_v40 = vadd.f32 0.0036580483, %v7236_v2  ;;  %v6416_v60 = vsub.f32 %v18764_v0, %v15619_v32 }
 0x60e   : > { %v15891_v56 = vadd.f32 1e-06, %v6386_v37  ;;  %v7248_v27 = vadd.f32 0.014752088, %v7247_v14  ;;  %v7272_v51 = vmul.f32 %v15874_v62, %v15874_v62  ;;  %vm6612_vm2 = vweird.f32 %v15712_v50 }
 0x60f   : > { %v8237_v42 = vadd.f32 1.0, %v10000_v58  ;;  %v7202_v12 = vmul.f32 %v7201_v46, %v15733_v33  ;;  %v7238_v1 = vmul.f32 %v7237_v40, %v15844_v41  ;;  %v6605_v61 = vsel %vm15899_vm15, %v15709_v20, %v15831_v16  ;;  %vm15912_vm3 = vmor %vm6612_vm2, %vm6613_vm13 }
 0x610   : > { %v7249_v44 = vmul.f32 %v7248_v27, %v15844_v41  ;;  %v15917_v9 = vmin.f32 %v7272_v51, 16.0  ;;  %v15920_v50 = vadd.f32 %v15672_v30, %v6830_v45  ;;  %v6615_v33 = vsel %vm15912_vm3, %v15774_v4, %v15879_v5 }
 0x611   : > { %v6618_v20 = vmul.f32 %v15860_v11, %v6617_v35  ;;  %v8269_v16 = vmul.f32 %v8237_v42, %v15820_v6  ;;  %v6355_v25 = vsub.f32 %v6291_v21, %v6323_v47  ;;  %10348 = vrsqrt.f32 %v15891_v56  ;;  %v6074_v47 = vpop.xlane.xlu1 %6073  ;;  %v6234_v21 = vpop.xlane.xlu2 %6233 }
 0x612   : > { %v10347_v17 = vpop.eup %10346  ;;  %v7239_v22 = vadd.f32 0.05243302, %v7238_v1  ;;  %v7250_v37 = vadd.f32 0.112945676, %v7249_v44  ;;  %v7274_v26 = vmul.f32 2.1237322e-06, %v15917_v9  ;;  %v15941_v7 = vmul.f32 %v6074_v47, %v18646_v36 }
 0x613   : > { %10032 = vmatmul.msk.f32.gmra.mxu3 %vm878_vm1, %v8269_v16  ;;  %v7203_v18 = vadd.f32 1.1283791, %v7202_v12  ;;  %v7216_v46 = vmul.f32 %v10347_v17, %v15871_v39  ;;  %v7224_v2 = vand.u32 2147483647, %v15871_v39  ;;  %v7285_v4 = vmul.f32 3.8918573e-05, %v15917_v9 }
 0x614   : > { %v7226_v14 = vand.u32 2147483648, %v15871_v39  ;;  %v7251_v6 = vmul.f32 %v7250_v37, %v15844_v41  ;;  %v7275_v5 = vadd.f32 0.00028619796, %v7274_v26  ;;  %v15937_v35 = vmul.f32 0.70710677, %v15920_v50 }
 0x615   : > { %v7217_v45 = vsub.f32 1.0, %v7216_v46  ;;  %vm7221_vm4 = vweird.f32 %v10347_v17  ;;  %v6387_v58 = vmax.f32 %v6355_v25, 0.0  ;;  %v7286_v40 = vadd.f32 0.001143296, %v7285_v4 }
 0x616   : > { %v7240_v27 = vmul.f32 %v7239_v22, %v15844_v41  ;;  %v7252_v51 = vadd.f32 0.4994258, %v7251_v6  ;;  %v6292_v42 = vmul.f32 %v6234_v21, %v18646_v36  ;;  %v7276_v1 = vmul.f32 %v7275_v5, %v15917_v9 }
 0x617   : > { %v7218_v12 = vmul.f32 %v10347_v17, %v7217_v45  ;;  %v7287_v24 = vmul.f32 %v7286_v40, %v15917_v9  ;;  %v7312_v44 = vmul.f32 %v15937_v35, %v15937_v35  ;;  %v15948_v16 = vpop.eup %10348  ;;  %v6619_v25 = vmul.f32 0.5, %v6618_v20 }
 0x618   : > { %v7204_v37 = vmul.f32 %v7203_v18, %v15698_v57  ;;  %vm7220_vm5 = vweird.f32 %v15871_v39  ;;  %v7253_v22 = vmul.f32 %v7252_v51, %v15844_v41  ;;  %vm7225_vm6 = vcmp.eq.f32.partialorder %v7224_v2, 8.507059e+37 }
 0x619   : > { %v7219_v26 = vadd.f32 %v10347_v17, %v7218_v12  ;;  %v6324_v46 = vmul.f32 %v15941_v7, %v15941_v7  ;;  %v7277_v4 = vadd.f32 0.0036580483, %v7276_v1  ;;  %vm7222_vm7 = vmor %vm7220_vm5, %vm7221_vm4  ;;  %v7227_v6 = vor.u32 1.1754944e-38, %v7226_v14 }
 0x61a   : > { %v15956_v5 = vadd.f32 1e-06, %v6387_v58  ;;  %v15958_v45 = vadd.f32 1.0, %v7253_v22  ;;  %v7288_v20 = vadd.f32 0.014752088, %v7287_v24  ;;  %v15960_v39 = vmin.f32 %v7312_v44, 16.0 }
 0x61b   : > { %v7223_v47 = vsel %vm7222_vm7, %v10347_v17, %v7219_v26  ;;  %v7241_v57 = vadd.f32 0.18741608, %v7240_v27  ;;  %v6356_v18 = vsub.f32 %v6292_v42, %v6324_v46  ;;  %v15965_v2 = vmul.f32 %v6605_v61, %v6415_v49  ;;  %v18769_v17 = vld [vmem:[#allocation107_spill] sm:$0xff] }
 0x61c   : > { %v7228_v21 = vsel %vm7225_vm6, %v7227_v6, %v7223_v47  ;;  %10350 = vrcp.f32 %v15958_v45  ;;  %v7278_v14 = vmul.f32 %v7277_v4, %v15917_v9  ;;  %v15972_v58 = vmul.f32 %v6615_v33, %v6416_v60  ;;  %v18770_v60 = vld [vmem:[#allocation98_spill] sm:$0xff] }
 0x61d   : > { %v6417_v40 = vsub.f32 %v18769_v17, %v15721_v54  ;;  %v7229_v27 = vmul.f32 %v7228_v21, %v7204_v37  ;;  %v6831_v51 = vmul.f32 %v15643_v3, %v15684_v52  ;;  %v6620_v28 = vsub.f32 1.5, %v6619_v25 }
 0x61e   : > { %v6627_v55 = vmul.f32 %v15948_v16, %v15891_v56  ;;  %v6388_v49 = vmax.f32 %v6356_v18, 0.0  ;;  %v7289_v61 = vmul.f32 %v7288_v20, %v15917_v9  ;;  %10352 = vrsqrt.f32 %v15956_v5 }
 0x61f   : > { %v10001_v42 = vclamps-f32 %v7229_v27, 1.0  ;;  %v7242_v32 = vmul.f32 %v7241_v57, %v15844_v41  ;;  %v7314_v0 = vmul.f32 2.1237322e-06, %v15960_v39  ;;  %v6418_v33 = vsub.f32 %v18770_v60, %v15812_v48 }
 0x620   : > { %v15986_v12 = vadd.f32 1e-06, %v6388_v49  ;;  %v7279_v52 = vadd.f32 0.05243302, %v7278_v14  ;;  %v7290_v1 = vadd.f32 0.112945676, %v7289_v61  ;;  %v15990_v37 = vadd.f32 %v15672_v30, %v6831_v51  ;;  %v6077_v51 = vpop.xlane.xlu0 %6076 }
 0x621   : > { %v8238_v24 = vadd.f32 1.0, %v10001_v42  ;;  %v7315_v44 = vadd.f32 0.00028619796, %v7314_v0  ;;  %v7325_v25 = vmul.f32 3.8918573e-05, %v15960_v39  ;;  %v6621_v26 = vmul.f32 %v15860_v11, %v6620_v28  ;;  %v6237_v28 = vpop.xlane.xlu1 %6236 }
 0x622   : > { %v10351_v22 = vpop.eup %10350  ;;  %vm6622_vm8 = vweird.f32 %v15809_v53  ;;  %vm6623_vm13 = vweird.f32 %v15860_v11  ;;  %v6628_v41 = vmul.f32 %v15948_v16, %v6627_v55  ;;  %v15997_v46 = vmul.f32 0.5, %v15798_v19 }
 0x623   : > { %v8270_v4 = vmul.f32 %v8238_v24, %v15824_v59  ;;  %v7243_v6 = vadd.f32 1.1283791, %v7242_v32  ;;  %v7256_v20 = vmul.f32 %v10351_v22, %v15958_v45  ;;  %v7264_v47 = vand.u32 2147483647, %v15958_v45  ;;  %vm16037_vm12 = vmor %vm6622_vm8, %vm6623_vm13 }
 0x624   : > { %v7266_v57 = vand.u32 2147483648, %v15958_v45  ;;  %v7291_v18 = vmul.f32 %v7290_v1, %v15917_v9  ;;  %v7316_v21 = vmul.f32 %v7315_v44, %v15960_v39  ;;  %v7326_v14 = vadd.f32 0.001143296, %v7325_v25  ;;  %v16005_v27 = vpop.eup %10352 }
 0x625   : > { %10033 = vmatmul.msk.f32.gmra.mxu3 %vm878_vm1, %v8270_v4  ;;  %v7257_v19 = vsub.f32 1.0, %v7256_v20  ;;  %10354 = vrsqrt.f32 %v15986_v12  ;;  %v7280_v59 = vmul.f32 %v7279_v52, %v15917_v9  ;;  %v16011_v55 = vmul.f32 0.70710677, %v15990_v37 }
 0x626   : > { %vm7261_vm9 = vweird.f32 %v10351_v22  ;;  %v7292_v49 = vadd.f32 0.4994258, %v7291_v18  ;;  %v16014_v61 = vmul.f32 %v6077_v51, %v18646_v36  ;;  %v6293_v42 = vmul.f32 %v6237_v28, %v18646_v36 }
 0x627   : > { %v7258_v32 = vmul.f32 %v10351_v22, %v7257_v19  ;;  %v7317_v0 = vadd.f32 0.0036580483, %v7316_v21  ;;  %v7327_v1 = vmul.f32 %v7326_v14, %v15960_v39  ;;  %v7352_v24 = vmul.f32 %v16011_v55, %v16011_v55 }
 0x628   : > { %v6629_v52 = vmul.f32 0.5, %v6628_v41  ;;  %v6637_v44 = vmul.f32 %v16005_v27, %v15956_v5  ;;  %v7293_v25 = vmul.f32 %v7292_v49, %v15917_v9  ;;  %v6325_v4 = vmul.f32 %v16014_v61, %v16014_v61 }
 0x629   : > { %v7259_v20 = vadd.f32 %v10351_v22, %v7258_v32  ;;  %vm7260_vm10 = vweird.f32 %v15958_v45  ;;  %v7267_v18 = vor.u32 1.1754944e-38, %v7266_v57  ;;  %v7281_v19 = vadd.f32 0.18741608, %v7280_v59 }
 0x62a   : > { %vm7262_vm11 = vmor %vm7260_vm10, %vm7261_vm9  ;;  %v16027_v21 = vadd.f32 1.0, %v7293_v25  ;;  %v6357_v14 = vsub.f32 %v6293_v42, %v6325_v4  ;;  %v7328_v51 = vadd.f32 0.014752088, %v7327_v1  ;;  %v16029_v41 = vmin.f32 %v7352_v24, 16.0 }
 0x62b   : > { %v16031_v28 = vpop.eup %10354  ;;  %v7244_v45 = vmul.f32 %v7243_v6, %v15828_v13  ;;  %v7263_v57 = vsel %vm7262_vm11, %v10351_v22, %v7259_v20  ;;  %vm7265_vm14 = vcmp.eq.f32.partialorder %v7264_v47, 8.507059e+37  ;;  %v7318_v59 = vmul.f32 %v7317_v0, %v15960_v39 }
 0x62c   : > { %v6625_v42 = vsel %vm16037_vm12, %v15860_v11, %v6621_v26  ;;  %v6630_v32 = vsub.f32 1.5, %v6629_v52  ;;  %v7268_v1 = vsel %vm7265_vm14, %v7267_v18, %v7263_v57  ;;  %10356 = vrcp.f32 %v16027_v21 }
 0x62d   : > { %v6638_v53 = vmul.f32 %v16005_v27, %v6637_v44  ;;  %v7269_v24 = vmul.f32 %v7268_v1, %v7244_v45  ;;  %v6389_v25 = vmax.f32 %v6357_v14, 0.0  ;;  %v6832_v4 = vmul.f32 %v15643_v3, %v15805_v63 }
 0x62e   : > { %vm6632_vm15 = vweird.f32 %v15891_v56  ;;  %v7282_v13 = vmul.f32 %v7281_v19, %v15917_v9  ;;  %v7329_v22 = vmul.f32 %v7328_v51, %v15960_v39  ;;  %v7354_v6 = vmul.f32 2.1237322e-06, %v16029_v41 }
 0x62f   : > { %v16057_v11 = vmul.f32 %v6625_v42, %v6417_v40  ;;  %v10002_v26 = vclamps-f32 %v7269_v24, 1.0  ;;  %v6647_v47 = vmul.f32 %v16031_v28, %v15986_v12  ;;  %v7319_v0 = vadd.f32 0.05243302, %v7318_v59  ;;  %v6080_v42 = vpop.xlane.xlu2 %6079 }
 0x630   : > { %vm6633_vm2 = vweird.f32 %v15948_v16  ;;  %v16062_v63 = vadd.f32 1e-06, %v6389_v25  ;;  %v7330_v52 = vadd.f32 0.112945676, %v7329_v22  ;;  %v7355_v9 = vadd.f32 0.00028619796, %v7354_v6 }
 0x631   : > { %v6631_v44 = vmul.f32 %v15948_v16, %v6630_v32  ;;  %v16065_v20 = vmul.f32 0.5, %v6638_v53  ;;  %v8239_v18 = vadd.f32 1.0, %v10002_v26  ;;  %v16068_v54 = vadd.f32 %v15672_v30, %v6832_v4  ;;  %v6240_v32 = vpop.xlane.xlu0 %6239  ;;  %vm16092_vm4 = vmor %vm6632_vm15, %vm6633_vm2 }
 0x632   : > { %v10357_v17 = vpop.eup %10356  ;;  %v7283_v40 = vadd.f32 1.1283791, %v7282_v13  ;;  %v7331_v19 = vmul.f32 %v7330_v52, %v15960_v39  ;;  %v7356_v14 = vmul.f32 %v7355_v9, %v16029_v41  ;;  %v7365_v51 = vmul.f32 3.8918573e-05, %v16029_v41 }
 0x633   : > { %v8271_v49 = vmul.f32 %v8239_v18, %v15997_v46  ;;  %v6648_v45 = vmul.f32 %v16031_v28, %v6647_v47  ;;  %v7296_v57 = vmul.f32 %v10357_v17, %v16027_v21  ;;  %v7304_v59 = vand.u32 2147483647, %v16027_v21 }
 0x634   : > { %10358 = vrsqrt.f32 %v16062_v63  ;;  %v7320_v1 = vmul.f32 %v7319_v0, %v15960_v39  ;;  %v7332_v53 = vadd.f32 0.4994258, %v7331_v19  ;;  %v16080_v24 = vmul.f32 %v6080_v42, %v18646_v36 }
 0x635   : > { %10034 = vmatmul.msk.f32.gmra.mxu3 %vm878_vm1, %v8271_v49  ;;  %v7297_v25 = vsub.f32 1.0, %v7296_v57  ;;  %v7306_v46 = vand.u32 2147483648, %v16027_v21  ;;  %v7357_v4 = vadd.f32 0.0036580483, %v7356_v14  ;;  %v7366_v13 = vadd.f32 0.001143296, %v7365_v51 }
 0x636   : > { %vm7301_vm3 = vweird.f32 %v10357_v17  ;;  %v7333_v22 = vmul.f32 %v7332_v53, %v15960_v39  ;;  %v6326_v6 = vmul.f32 %v16080_v24, %v16080_v24  ;;  %v6294_v26 = vmul.f32 %v6240_v32, %v18646_v36 }
 0x637   : > { %v7298_v0 = vmul.f32 %v10357_v17, %v7297_v25  ;;  %v7358_v52 = vmul.f32 %v7357_v4, %v16029_v41  ;;  %v7367_v9 = vmul.f32 %v7366_v13, %v16029_v41  ;;  %v16099_v18 = vmul.f32 0.70710677, %v16068_v54 }
 0x638   : > { %v6635_v19 = vsel %vm16092_vm4, %v15948_v16, %v6631_v44  ;;  %v6640_v14 = vsub.f32 1.5, %v16065_v20  ;;  %v7321_v51 = vadd.f32 0.18741608, %v7320_v1  ;;  %v16105_v56 = vadd.f32 1.0, %v7333_v22 }
 0x639   : > { %v7284_v49 = vmul.f32 %v7283_v40, %v15874_v62  ;;  %v7299_v57 = vadd.f32 %v10357_v17, %v7298_v0  ;;  %vm7300_vm5 = vweird.f32 %v16027_v21  ;;  %v7368_v42 = vadd.f32 0.014752088, %v7367_v9 }
 0x63a   : > { %v16109_v32 = vpop.eup %10358  ;;  %vm7302_vm6 = vmor %vm7300_vm5, %vm7301_vm3  ;;  %v7307_v53 = vor.u32 1.1754944e-38, %v7306_v46  ;;  %10360 = vrcp.f32 %v16105_v56  ;;  %v6358_v25 = vsub.f32 %v6294_v26, %v6326_v6  ;;  %v7392_v16 = vmul.f32 %v16099_v18, %v16099_v18  ;;  %v18775_v46 = vld [vmem:[#allocation100_spill] sm:$0xff] }
 0x63b   : > { %v16115_v44 = vmul.f32 0.5, %v6648_v45  ;;  %v7303_v20 = vsel %vm7302_vm6, %v10357_v17, %v7299_v57  ;;  %vm7305_vm7 = vcmp.eq.f32.partialorder %v7304_v59, 8.507059e+37  ;;  %v7359_v62 = vadd.f32 0.05243302, %v7358_v52 }
 0x63c   : > { %v7308_v40 = vsel %vm7305_vm7, %v7307_v53, %v7303_v20  ;;  %v7322_v21 = vmul.f32 %v7321_v51, %v15960_v39  ;;  %v7369_v1 = vmul.f32 %v7368_v42, %v16029_v41  ;;  %v6833_v4 = vmul.f32 %v15643_v3, %v15817_v34  ;;  %v6083_v51 = vpop.xlane.xlu1 %6082 }
 0x63d   : > { %v6419_v13 = vsub.f32 %v18775_v46, %v15869_v8  ;;  %v6896_v22 = vmul.f32 0.5, %v15858_v43  ;;  %v7309_v6 = vmul.f32 %v7308_v40, %v7284_v49  ;;  %v6657_v45 = vmul.f32 %v16109_v32, %v16062_v63  ;;  %v6243_v49 = vpop.xlane.xlu2 %6242 }
 0x63e   : > { %v16129_v17 = vmul.f32 %v6635_v19, %v6418_v33  ;;  %v6390_v39 = vmax.f32 %v6358_v25, 0.0  ;;  %v7370_v59 = vadd.f32 0.112945676, %v7369_v1  ;;  %v16131_v26 = vmin.f32 %v7392_v16, 16.0 }
 0x63f   : > { %v16134_v3 = vmul.f32 %v16005_v27, %v6640_v14  ;;  %v6650_v34 = vsub.f32 1.5, %v16115_v44  ;;  %v10003_v47 = vclamps-f32 %v7309_v6, 1.0  ;;  %v7360_v43 = vmul.f32 %v7359_v62, %v16029_v41 }
 0x640   : > { %v10361_v0 = vpop.eup %10360  ;;  %vm6643_vm8 = vweird.f32 %v16005_v27  ;;  %v7323_v52 = vadd.f32 1.1283791, %v7322_v21  ;;  %v7371_v48 = vmul.f32 %v7370_v59, %v16029_v41  ;;  %v7394_v60 = vmul.f32 2.1237322e-06, %v16131_v26 }
 0x641   : > { %v16142_v33 = vadd.f32 %v15672_v30, %v6833_v4  ;;  %v8240_v9 = vadd.f32 1.0, %v10003_v47  ;;  %v6658_v19 = vmul.f32 %v16109_v32, %v6657_v45  ;;  %v7336_v14 = vmul.f32 %v10361_v0, %v16105_v56 }
 0x642   : > { %v7405_v57 = vmul.f32 3.8918573e-05, %v16131_v26  ;;  %v7344_v42 = vand.u32 2147483647, %v16105_v56  ;;  %v16148_v53 = vadd.f32 1e-06, %v6390_v39  ;;  %v16151_v16 = vmul.f32 %v6083_v51, %v18646_v36 }
 0x643   : > { %v7372_v25 = vadd.f32 0.4994258, %v7371_v48  ;;  %v8272_v44 = vmul.f32 %v8240_v9, %v6896_v22  ;;  %v7337_v30 = vsub.f32 1.0, %v7336_v14  ;;  %v7346_v20 = vand.u32 2147483648, %v16105_v56 }
 0x644   : > { %v7361_v62 = vadd.f32 0.18741608, %v7360_v43  ;;  %vm7341_vm13 = vweird.f32 %v10361_v0  ;;  %v6295_v21 = vmul.f32 %v6243_v49, %v18646_v36  ;;  %v7395_v1 = vadd.f32 0.00028619796, %v7394_v60 }
 0x645   : > { %v7373_v40 = vmul.f32 %v7372_v25, %v16029_v41  ;;  %10035 = vmatmul.msk.f32.gmra.mxu3 %vm878_vm1, %v8272_v44  ;;  %v7338_v4 = vmul.f32 %v10361_v0, %v7337_v30  ;;  %v6327_v6 = vmul.f32 %v16151_v16, %v16151_v16  ;;  %v7406_v45 = vadd.f32 0.001143296, %v7405_v57  ;;  %v18778_v25 = vld [vmem:[#allocation103_spill] sm:$0xff] }
 0x646   : > { %v16160_v39 = vmul.f32 0.70710677, %v16142_v33  ;;  %v7324_v22 = vmul.f32 %v7323_v52, %v15937_v35  ;;  %vm7340_vm9 = vweird.f32 %v16105_v56  ;;  %10362 = vrsqrt.f32 %v16148_v53 }
 0x647   : > { %v16165_v59 = vadd.f32 1.0, %v7373_v40  ;;  %v16167_v47 = vmul.f32 0.5, %v6658_v19  ;;  %v7339_v43 = vadd.f32 %v10361_v0, %v7338_v4  ;;  %v7396_v48 = vmul.f32 %v7395_v1, %v16131_v26  ;;  %vm7342_vm10 = vmor %vm7340_vm9, %vm7341_vm13 }
 0x648   : > { %v7407_v60 = vmul.f32 %v7406_v45, %v16131_v26  ;;  %vm7345_vm11 = vcmp.eq.f32.partialorder %v7344_v42, 8.507059e+37  ;;  %v7347_v9 = vor.u32 1.1754944e-38, %v7346_v20  ;;  %v7432_v35 = vmul.f32 %v16160_v39, %v16160_v39  ;;  %v6246_v42 = vpop.xlane.xlu1 %6245 }
 0x649   : > { %10364 = vrcp.f32 %v16165_v59  ;;  %v7343_v56 = vsel %vm7342_vm10, %v10361_v0, %v7339_v43  ;;  %v7362_v52 = vmul.f32 %v7361_v62, %v16029_v41  ;;  %v6359_v14 = vsub.f32 %v6295_v21, %v6327_v6 }
 0x64a   : > { %v7397_v19 = vadd.f32 0.0036580483, %v7396_v48  ;;  %vm6642_vm12 = vweird.f32 %v15956_v5  ;;  %v6897_v51 = vmul.f32 0.5, %v15920_v50  ;;  %v7348_v49 = vsel %vm7345_vm11, %v7347_v9, %v7343_v56 }
 0x64b   : > { %v7408_v57 = vadd.f32 0.014752088, %v7407_v60  ;;  %vm16180_vm14 = vmor %vm6642_vm12, %vm6643_vm8  ;;  %v6420_v44 = vsub.f32 %v18778_v25, %v15941_v7  ;;  %v7349_v0 = vmul.f32 %v7348_v49, %v7324_v22  ;;  %v16187_v41 = vmul.f32 0.5, %v15990_v37 }
 0x64c   : > { %v7398_v30 = vmul.f32 %v7397_v19, %v16131_v26  ;;  %v16190_v5 = vpop.eup %10362  ;;  %v6645_v50 = vsel %vm16180_vm14, %v16005_v27, %v16134_v3  ;;  %v16197_v20 = vmul.f32 %v16031_v28, %v6650_v34  ;;  %v16200_v40 = vmin.f32 %v7432_v35, 16.0  ;;  %v16209_v3 = vld [vmem:[%s18238_s8] ss:$0 sm:$0xff] }
 0x64d   : > { %v7409_v62 = vmul.f32 %v7408_v57, %v16131_v26  ;;  %v6660_v21 = vsub.f32 1.5, %v16167_v47  ;;  %v10004_v37 = vclamps-f32 %v7349_v0, 1.0  ;;  %v7363_v1 = vadd.f32 1.1283791, %v7362_v52  ;;  %v6086_v57 = vpop.xlane.xlu0 %6085 }
 0x64e   : > { %v6391_v4 = vmax.f32 %v6359_v14, 0.0  ;;  %vm6653_vm15 = vweird.f32 %v16031_v28  ;;  %v7434_v22 = vmul.f32 2.1237322e-06, %v16200_v40  ;;  %v7445_v27 = vmul.f32 3.8918573e-05, %v16200_v40 }
 0x64f   : > { %v10365_v6 = vpop.eup %10364  ;;  %v7410_v45 = vadd.f32 0.112945676, %v7409_v62  ;;  %v6834_v34 = vmul.f32 %v16209_v3, %v15965_v2  ;;  %v8241_v47 = vadd.f32 1.0, %v10004_v37  ;;  %v6667_v43 = vmul.f32 %v16190_v5, %v16148_v53  ;;  %v16229_v37 = vld [vmem:[%s18239_s9] ss:$0 sm:$0xff] }
 0x650   : > { %v7376_v48 = vmul.f32 %v10365_v6, %v16165_v59  ;;  %v7399_v60 = vadd.f32 0.05243302, %v7398_v30  ;;  %vm6652_vm2 = vweird.f32 %v15986_v12  ;;  %v7384_v9 = vand.u32 2147483647, %v16165_v59 }
 0x651   : > { %v7411_v35 = vmul.f32 %v7410_v45, %v16131_v26  ;;  %v7435_v56 = vadd.f32 0.00028619796, %v7434_v22  ;;  %v7446_v52 = vadd.f32 0.001143296, %v7445_v27  ;;  %v8273_v14 = vmul.f32 %v8241_v47, %v6897_v51  ;;  %vm16261_vm7 = vmor %vm6652_vm2, %vm6653_vm15 }
 0x652   : > { %v7377_v19 = vsub.f32 1.0, %v7376_v48  ;;  %v7386_v49 = vand.u32 2147483648, %v16165_v59  ;;  %v16220_v2 = vadd.f32 1e-06, %v6391_v4  ;;  %v16223_v62 = vmul.f32 %v6086_v57, %v18646_v36 }
 0x653   : > { %v7412_v0 = vadd.f32 0.4994258, %v7411_v35  ;;  %v7436_v30 = vmul.f32 %v7435_v56, %v16200_v40  ;;  %v16232_v51 = vadd.f32 %v16229_v37, %v6834_v34  ;;  %10036 = vmatmul.msk.f32.gmra.mxu3 %vm878_vm1, %v8273_v14  ;;  %vm7381_vm3 = vweird.f32 %v10365_v6 }
 0x654   : > { %v7378_v4 = vmul.f32 %v10365_v6, %v7377_v19  ;;  %v7400_v45 = vmul.f32 %v7399_v60, %v16131_v26  ;;  %v7447_v22 = vmul.f32 %v7446_v52, %v16200_v40  ;;  %v7364_v27 = vmul.f32 %v7363_v1, %v16011_v55 }
 0x655   : > { %v7413_v47 = vmul.f32 %v7412_v0, %v16131_v26  ;;  %v6328_v48 = vmul.f32 %v16223_v62, %v16223_v62  ;;  %v6296_v35 = vmul.f32 %v6246_v42, %v18646_v36  ;;  %vm7380_vm4 = vweird.f32 %v16165_v59 }
 0x656   : > { %v7379_v56 = vadd.f32 %v10365_v6, %v7378_v4  ;;  %10366 = vrsqrt.f32 %v16220_v2  ;;  %v7437_v34 = vadd.f32 0.0036580483, %v7436_v30  ;;  %v6668_v14 = vmul.f32 %v16190_v5, %v6667_v43  ;;  %vm7382_vm5 = vmor %vm7380_vm4, %vm7381_vm3 }
 0x657   : > { %v7387_v60 = vor.u32 1.1754944e-38, %v7386_v49  ;;  %v16245_v52 = vadd.f32 1.0, %v7413_v47  ;;  %v7448_v55 = vadd.f32 0.014752088, %v7447_v22  ;;  %vm7385_vm6 = vcmp.eq.f32.partialorder %v7384_v9, 8.507059e+37 }
 0x658   : > { %v7383_v1 = vsel %vm7382_vm5, %v10365_v6, %v7379_v56  ;;  %v7401_v19 = vadd.f32 0.18741608, %v7400_v45  ;;  %v16248_v57 = vmul.f32 0.70710677, %v16232_v51  ;;  %v6360_v59 = vsub.f32 %v6296_v35, %v6328_v48 }
 0x659   : > { %v7388_v42 = vsel %vm7385_vm6, %v7387_v60, %v7383_v1  ;;  %10368 = vrcp.f32 %v16245_v52  ;;  %v7438_v0 = vmul.f32 %v7437_v34, %v16200_v40  ;;  %v16255_v43 = vmul.f32 %v6645_v50, %v6419_v13 }
 0x65a   : > { %v16266_v9 = vmul.f32 %v16109_v32, %v6660_v21  ;;  %vm6663_vm8 = vweird.f32 %v16109_v32  ;;  %v7389_v49 = vmul.f32 %v7388_v42, %v7364_v27  ;;  %v6655_v8 = vsel %vm16261_vm7, %v16031_v28, %v16197_v20  ;;  %v18781_v21 = vld [vmem:[#allocation93_spill] sm:$0xff] }
 0x65b   : > { %v16273_v46 = vmul.f32 0.5, %v6668_v14  ;;  %v7449_v13 = vmul.f32 %v7448_v55, %v16200_v40  ;;  %v7472_v12 = vmul.f32 %v16248_v57, %v16248_v57  ;;  %v6421_v30 = vsub.f32 %v18781_v21, %v16014_v61  ;;  %v6089_v55 = vpop.xlane.xlu2 %6088 }
 0x65c   : > { %v16278_v50 = vpop.eup %10366  ;;  %vm6662_vm13 = vweird.f32 %v16062_v63  ;;  %v10005_v4 = vclamps-f32 %v7389_v49, 1.0  ;;  %v7402_v45 = vmul.f32 %v7401_v19, %v16131_v26  ;;  %v6392_v28 = vmax.f32 %v6360_v59, 0.0 }
 0x65d   : > { %vm16284_vm9 = vmor %vm6662_vm13, %vm6663_vm8  ;;  %v7439_v20 = vadd.f32 0.05243302, %v7438_v0  ;;  %v7450_v27 = vadd.f32 0.112945676, %v7449_v13  ;;  %v16288_v47 = vmin.f32 %v7472_v12, 16.0  ;;  %v16293_v48 = vmul.f32 %v6655_v8, %v6420_v44 }
 0x65e   : > { %v6665_v61 = vsel %vm16284_vm9, %v16109_v32, %v16266_v9  ;;  %v8242_v63 = vadd.f32 1.0, %v10005_v4  ;;  %v16300_v26 = vmul.f32 0.5, %v16068_v54  ;;  %v6670_v56 = vsub.f32 1.5, %v16273_v46  ;;  %v6249_v54 = vpop.xlane.xlu0 %6248 }
 0x65f   : > { %v10369_v35 = vpop.eup %10368  ;;  %v6677_v34 = vmul.f32 %v16278_v50, %v16220_v2  ;;  %v7451_v14 = vmul.f32 %v7450_v27, %v16200_v40  ;;  %v7474_v7 = vmul.f32 2.1237322e-06, %v16288_v47  ;;  %v7403_v44 = vadd.f32 1.1283791, %v7402_v45 }
 0x660   : > { %v8274_v25 = vmul.f32 %v8242_v63, %v16187_v41  ;;  %v7416_v60 = vmul.f32 %v10369_v35, %v16245_v52  ;;  %v7424_v32 = vand.u32 2147483647, %v16245_v52  ;;  %v16310_v1 = vadd.f32 1e-06, %v6392_v28 }
 0x661   : > { %v7440_v19 = vmul.f32 %v7439_v20, %v16200_v40  ;;  %v7452_v42 = vadd.f32 0.4994258, %v7451_v14  ;;  %v16314_v59 = vmul.f32 %v6089_v55, %v18646_v36  ;;  %v7426_v41 = vand.u32 2147483648, %v16245_v52 }
 0x662   : > { %10037 = vmatmul.msk.f32.gmra.mxu3 %vm878_vm1, %v8274_v25  ;;  %v7417_v0 = vsub.f32 1.0, %v7416_v60  ;;  %v7475_v6 = vadd.f32 0.00028619796, %v7474_v7  ;;  %v7485_v9 = vmul.f32 3.8918573e-05, %v16288_v47  ;;  %vm7421_vm10 = vweird.f32 %v10369_v35 }
 0x663   : > { %v7453_v49 = vmul.f32 %v7452_v42, %v16200_v40  ;;  %v6297_v8 = vmul.f32 %v6249_v54, %v18646_v36  ;;  %v6835_v46 = vmul.f32 %v16209_v3, %v15972_v58  ;;  %v6329_v12 = vmul.f32 %v16314_v59, %v16314_v59 }
 0x664   : > { %v7418_v13 = vmul.f32 %v10369_v35, %v7417_v0  ;;  %v7476_v21 = vmul.f32 %v7475_v6, %v16288_v47  ;;  %v7486_v4 = vadd.f32 0.001143296, %v7485_v9  ;;  %v6678_v45 = vmul.f32 %v16278_v50, %v6677_v34 }
 0x665   : > { %10370 = vrsqrt.f32 %v16310_v1  ;;  %v7441_v22 = vadd.f32 0.18741608, %v7440_v19  ;;  %v16328_v28 = vadd.f32 1.0, %v7453_v49  ;;  %vm7420_vm11 = vweird.f32 %v16245_v52 }
 0x666   : > { %v7419_v20 = vadd.f32 %v10369_v35, %v7418_v13  ;;  %v7477_v27 = vadd.f32 0.0036580483, %v7476_v21  ;;  %v7487_v58 = vmul.f32 %v7486_v4, %v16288_v47  ;;  %v7404_v63 = vmul.f32 %v7403_v44, %v16099_v18  ;;  %vm7422_vm12 = vmor %vm7420_vm11, %vm7421_vm10  ;;  %v18784_v44 = vld [vmem:[#allocation132_spill] sm:$0xff] }
 0x667   : > { %v7427_v14 = vor.u32 1.1754944e-38, %v7426_v41  ;;  %10372 = vrcp.f32 %v16328_v28  ;;  %v16336_v34 = vadd.f32 %v16229_v37, %v6835_v46  ;;  %vm7425_vm14 = vcmp.eq.f32.partialorder %v7424_v32, 8.507059e+37 }
 0x668   : > { %v7423_v7 = vsel %vm7422_vm12, %v10369_v35, %v7419_v20  ;;  %v6361_v25 = vsub.f32 %v6297_v8, %v6329_v12  ;;  %v7478_v60 = vmul.f32 %v7477_v27, %v16288_v47  ;;  %v16339_v55 = vmul.f32 0.5, %v6678_v45 }
 0x669   : > { %v7428_v52 = vsel %vm7425_vm14, %v7427_v14, %v7423_v7  ;;  %v7442_v54 = vmul.f32 %v7441_v22, %v16200_v40  ;;  %v7488_v19 = vadd.f32 0.014752088, %v7487_v58  ;;  %v16342_v18 = vmul.f32 %v6665_v61, %v6421_v30 }
 0x66a   : > { %v6422_v42 = vsub.f32 %v18784_v44, %v16080_v24  ;;  %v7429_v0 = vmul.f32 %v7428_v52, %v7404_v63  ;;  %v16347_v41 = vmul.f32 0.5, %v16142_v33  ;;  %vm6673_vm15 = vweird.f32 %v16190_v5 }
 0x66b   : > { %v16349_v35 = vpop.eup %10370  ;;  %v7489_v32 = vmul.f32 %v7488_v19, %v16288_v47  ;;  %v16354_v6 = vmul.f32 0.70710677, %v16336_v34  ;;  %v6836_v40 = vmul.f32 %v16209_v3, %v16057_v11  ;;  %v16359_v30 = vmul.f32 %v16190_v5, %v6670_v56 }
 0x66c   : > { %v10006_v61 = vclamps-f32 %v7429_v0, 1.0  ;;  %v6393_v9 = vmax.f32 %v6361_v25, 0.0  ;;  %v7479_v49 = vadd.f32 0.05243302, %v7478_v60  ;;  %vm6672_vm2 = vweird.f32 %v16148_v53  ;;  %v6092_v25 = vpop.xlane.xlu1 %6091  ;;  %v6252_v60 = vpop.xlane.xlu2 %6251 }
 0x66d   : > { %v10373_v33 = vpop.eup %10372  ;;  %v6680_v8 = vsub.f32 1.5, %v16339_v55  ;;  %v7443_v46 = vadd.f32 1.1283791, %v7442_v54  ;;  %v7490_v13 = vadd.f32 0.112945676, %v7489_v32  ;;  %v7512_v12 = vmul.f32 %v16354_v6, %v16354_v6  ;;  %vm16402_vm7 = vmor %vm6672_vm2, %vm6673_vm15 }
 0x66e   : > { %v8243_v21 = vadd.f32 1.0, %v10006_v61  ;;  %v6687_v11 = vmul.f32 %v16349_v35, %v16310_v1  ;;  %v7456_v56 = vmul.f32 %v10373_v33, %v16328_v28  ;;  %v16369_v4 = vadd.f32 %v16229_v37, %v6836_v40 }
 0x66f   : > { %v7464_v45 = vand.u32 2147483647, %v16328_v28  ;;  %v7466_v22 = vand.u32 2147483648, %v16328_v28  ;;  %v7491_v20 = vmul.f32 %v7490_v13, %v16288_v47  ;;  %v16374_v27 = vmin.f32 %v7512_v12, 16.0 }
 0x670   : > { %v8275_v58 = vmul.f32 %v8243_v21, %v16300_v26  ;;  %v7457_v63 = vsub.f32 1.0, %v7456_v56  ;;  %v16377_v14 = vadd.f32 1e-06, %v6393_v9  ;;  %v7480_v7 = vmul.f32 %v7479_v49, %v16288_v47 }
 0x671   : > { %v7492_v55 = vadd.f32 0.4994258, %v7491_v20  ;;  %v16381_v52 = vmul.f32 %v6092_v25, %v18646_v36  ;;  %v6298_v54 = vmul.f32 %v6252_v60, %v18646_v36  ;;  %v7514_v19 = vmul.f32 2.1237322e-06, %v16374_v27 }
 0x672   : > { %10038 = vmatmul.msk.f32.gmra.mxu3 %vm878_vm1, %v8275_v58  ;;  %v7458_v0 = vmul.f32 %v10373_v33, %v7457_v63  ;;  %vm7461_vm3 = vweird.f32 %v10373_v33  ;;  %v7525_v26 = vmul.f32 3.8918573e-05, %v16374_v27  ;;  %v16388_v32 = vmul.f32 0.70710677, %v16369_v4  ;;  %v18787_v63 = vld [vmem:[#allocation108_spill] sm:$0xff] }
 0x673   : > { %v7444_v40 = vmul.f32 %v7443_v46, %v16160_v39  ;;  %vm7460_vm4 = vweird.f32 %v16328_v28  ;;  %v7493_v61 = vmul.f32 %v7492_v55, %v16288_v47  ;;  %v6330_v9 = vmul.f32 %v16381_v52, %v16381_v52 }
 0x674   : > { %v7459_v49 = vadd.f32 %v10373_v33, %v7458_v0  ;;  %vm7465_vm5 = vcmp.eq.f32.partialorder %v7464_v45, 8.507059e+37  ;;  %v7467_v13 = vor.u32 1.1754944e-38, %v7466_v22  ;;  %v7515_v12 = vadd.f32 0.00028619796, %v7514_v19  ;;  %vm7462_vm6 = vmor %vm7460_vm4, %vm7461_vm3 }
 0x675   : > { %10374 = vrsqrt.f32 %v16377_v14  ;;  %v16396_v21 = vadd.f32 1.0, %v7493_v61  ;;  %v6362_v56 = vsub.f32 %v6298_v54, %v6330_v9  ;;  %v7526_v20 = vadd.f32 0.001143296, %v7525_v26 }
 0x676   : > { %v7463_v28 = vsel %vm7462_vm6, %v10373_v33, %v7459_v49  ;;  %v7481_v46 = vadd.f32 0.18741608, %v7480_v7  ;;  %v7516_v45 = vmul.f32 %v7515_v12, %v16374_v27  ;;  %v7552_v22 = vmul.f32 %v16388_v32, %v16388_v32 }
 0x677   : > { %v6675_v58 = vsel %vm16402_vm7, %v16190_v5, %v16359_v30  ;;  %v6423_v25 = vsub.f32 %v18787_v63, %v16151_v16  ;;  %v7468_v53 = vsel %vm7465_vm5, %v7467_v13, %v7463_v28  ;;  %10376 = vrcp.f32 %v16396_v21 }
 0x678   : > { %v16417_v60 = vmul.f32 %v16278_v50, %v6680_v8  ;;  %vm6683_vm8 = vweird.f32 %v16278_v50  ;;  %v6688_v33 = vmul.f32 %v16349_v35, %v6687_v11  ;;  %v7469_v7 = vmul.f32 %v7468_v53, %v7444_v40 }
 0x679   : > { %v6394_v55 = vmax.f32 %v6362_v56, 0.0  ;;  %v7517_v54 = vadd.f32 0.0036580483, %v7516_v45  ;;  %v7527_v19 = vmul.f32 %v7526_v20, %v16374_v27  ;;  %v16422_v0 = vmin.f32 %v7552_v22, 16.0 }
 0x67a   : > { %v16427_v5 = vmul.f32 %v6675_v58, %v6422_v42  ;;  %vm6682_vm13 = vweird.f32 %v16220_v2  ;;  %v10007_v30 = vclamps-f32 %v7469_v7, 1.0  ;;  %v7482_v8 = vmul.f32 %v7481_v46, %v16288_v47  ;;  %v18790_v2 = vld [vmem:[#allocation113_spill] sm:$0xff] }
 0x67b   : > { %v16431_v26 = vpop.eup %10374  ;;  %v16434_v11 = vmul.f32 0.5, %v16232_v51  ;;  %v7518_v40 = vmul.f32 %v7517_v54, %v16374_v27  ;;  %v7528_v61 = vadd.f32 0.014752088, %v7527_v19  ;;  %v7554_v9 = vmul.f32 2.1237322e-06, %v16422_v0  ;;  %vm16440_vm9 = vmor %vm6682_vm13, %vm6683_vm8 }
 0x67c   : > { %v6424_v44 = vsub.f32 %v18790_v2, %v16223_v62  ;;  %v6689_v47 = vmul.f32 0.5, %v6688_v33  ;;  %v8244_v42 = vadd.f32 1.0, %v10007_v30  ;;  %v7565_v49 = vmul.f32 3.8918573e-05, %v16422_v0 }
 0x67d   : > { %v10377_v51 = vpop.eup %10376  ;;  %v6685_v13 = vsel %vm16440_vm9, %v16278_v50, %v16417_v60  ;;  %v16451_v12 = vadd.f32 1e-06, %v6394_v55  ;;  %v7529_v56 = vmul.f32 %v7528_v61, %v16374_v27  ;;  %v7555_v20 = vadd.f32 0.00028619796, %v7554_v9  ;;  %v6255_v61 = vpop.xlane.xlu1 %6254 }
 0x67e   : > { %v8276_v39 = vmul.f32 %v8244_v42, %v16347_v41  ;;  %v7483_v28 = vadd.f32 1.1283791, %v7482_v8  ;;  %v7496_v46 = vmul.f32 %v10377_v51, %v16396_v21  ;;  %v6837_v45 = vmul.f32 %v16209_v3, %v16129_v17 }
 0x67f   : > { %v7519_v22 = vadd.f32 0.05243302, %v7518_v40  ;;  %v7530_v58 = vadd.f32 0.112945676, %v7529_v56  ;;  %v7556_v53 = vmul.f32 %v7555_v20, %v16422_v0  ;;  %v7566_v33 = vadd.f32 0.001143296, %v7565_v49  ;;  %v6095_v40 = vpop.xlane.xlu0 %6094 }
 0x680   : > { %v6690_v7 = vsub.f32 1.5, %v6689_v47  ;;  %vm6693_vm10 = vweird.f32 %v16349_v35  ;;  %10039 = vmatmul.msk.f32.gmra.mxu3 %vm878_vm1, %v8276_v39  ;;  %v6697_v50 = vmul.f32 %v16431_v26, %v16377_v14  ;;  %v7497_v41 = vsub.f32 1.0, %v7496_v46 }
 0x681   : > { %v7506_v60 = vand.u32 2147483648, %v16396_v21  ;;  %10378 = vrsqrt.f32 %v16451_v12  ;;  %v7531_v17 = vmul.f32 %v7530_v58, %v16374_v27  ;;  %v7557_v55 = vadd.f32 0.0036580483, %v7556_v53 }
 0x682   : > { %v7567_v54 = vmul.f32 %v7566_v33, %v16422_v0  ;;  %v7484_v19 = vmul.f32 %v7483_v28, %v16248_v57  ;;  %v7498_v30 = vmul.f32 %v10377_v51, %v7497_v41  ;;  %vm7501_vm11 = vweird.f32 %v10377_v51 }
 0x683   : > { %v7504_v8 = vand.u32 2147483647, %v16396_v21  ;;  %vm7500_vm12 = vweird.f32 %v16396_v21  ;;  %v7520_v9 = vmul.f32 %v7519_v22, %v16374_v27  ;;  %v7532_v24 = vadd.f32 0.4994258, %v7531_v17 }
 0x684   : > { %v16472_v47 = vadd.f32 %v16229_v37, %v6837_v45  ;;  %v7499_v42 = vadd.f32 %v10377_v51, %v7498_v30  ;;  %v16475_v49 = vmul.f32 %v6095_v40, %v18646_v36  ;;  %v6299_v57 = vmul.f32 %v6255_v61, %v18646_v36  ;;  %vm7502_vm14 = vmor %vm7500_vm12, %vm7501_vm11 }
 0x685   : > { %v7558_v56 = vmul.f32 %v7557_v55, %v16422_v0  ;;  %v6698_v20 = vmul.f32 %v16431_v26, %v6697_v50  ;;  %v7507_v39 = vor.u32 1.1754944e-38, %v7506_v60  ;;  %v7533_v21 = vmul.f32 %v7532_v24, %v16374_v27 }
 0x686   : > { %v7568_v28 = vadd.f32 0.014752088, %v7567_v54  ;;  %v7503_v46 = vsel %vm7502_vm14, %v10377_v51, %v7499_v42  ;;  %vm7505_vm15 = vcmp.eq.f32.partialorder %v7504_v8, 8.507059e+37  ;;  %v6331_v45 = vmul.f32 %v16475_v49, %v16475_v49 }
 0x687   : > { %v7559_v22 = vadd.f32 0.05243302, %v7558_v56  ;;  %v16483_v58 = vpop.eup %10378  ;;  %v16486_v53 = vmul.f32 %v16349_v35, %v6690_v7  ;;  %v7508_v33 = vsel %vm7505_vm15, %v7507_v39, %v7503_v46  ;;  %v16488_v41 = vadd.f32 1.0, %v7533_v21 }
 0x688   : > { %v16491_v50 = vmul.f32 0.70710677, %v16472_v47  ;;  %v7509_v60 = vmul.f32 %v7508_v33, %v7484_v19  ;;  %v7521_v17 = vadd.f32 0.18741608, %v7520_v9  ;;  %v6363_v55 = vsub.f32 %v6299_v57, %v6331_v45  ;;  %v6258_v45 = vpop.xlane.xlu0 %6257 }
 0x689   : > { %v7569_v51 = vmul.f32 %v7568_v28, %v16422_v0  ;;  %v16497_v54 = vmul.f32 %v6685_v13, %v6423_v25  ;;  %vm6692_vm2 = vweird.f32 %v16310_v1  ;;  %v6699_v7 = vmul.f32 0.5, %v6698_v20  ;;  %v18793_v1 = vld [vmem:[#allocation104_spill] sm:$0xff] }
 0x68a   : > { %10380 = vrcp.f32 %v16488_v41  ;;  %v10008_v30 = vclamps-f32 %v7509_v60, 1.0  ;;  %v6707_v8 = vmul.f32 %v16483_v58, %v16451_v12  ;;  %v7560_v19 = vmul.f32 %v7559_v22, %v16422_v0  ;;  %vm16508_vm3 = vmor %vm6692_vm2, %vm6693_vm10 }
 0x68b   : > { %v6838_v40 = vmul.f32 %v16209_v3, %v16255_v43  ;;  %v6425_v63 = vsub.f32 %v18793_v1, %v16314_v59  ;;  %v6395_v25 = vmax.f32 %v6363_v55, 0.0  ;;  %v7570_v13 = vadd.f32 0.112945676, %v7569_v51 }
 0x68c   : > { %v7592_v61 = vmul.f32 %v16491_v50, %v16491_v50  ;;  %v6695_v9 = vsel %vm16508_vm3, %v16349_v35, %v16486_v53  ;;  %v8245_v43 = vadd.f32 1.0, %v10008_v30  ;;  %v16521_v24 = vmul.f32 0.5, %v16336_v34  ;;  %v6098_v35 = vpop.xlane.xlu2 %6097 }
 0x68d   : > { %v7522_v42 = vmul.f32 %v7521_v17, %v16374_v27  ;;  %v6700_v57 = vsub.f32 1.5, %v6699_v7  ;;  %v16525_v56 = vmul.f32 0.5, %v16369_v4  ;;  %v7571_v20 = vmul.f32 %v7570_v13, %v16422_v0 }
 0x68e   : > { %v16528_v39 = vmin.f32 %v7592_v61, 16.0  ;;  %v8277_v21 = vmul.f32 %v8245_v43, %v16434_v11  ;;  %v6708_v28 = vmul.f32 %v16483_v58, %v6707_v8  ;;  %v7561_v46 = vadd.f32 0.18741608, %v7560_v19 }
 0x68f   : > { %v16533_v34 = vadd.f32 %v16229_v37, %v6838_v40  ;;  %v16535_v27 = vadd.f32 1e-06, %v6395_v25  ;;  %v7572_v53 = vadd.f32 0.4994258, %v7571_v20  ;;  %v16538_v4 = vmul.f32 %v6098_v35, %v18646_v36 }
 0x690   : > { %v10381_v22 = vpop.eup %10380  ;;  %v6300_v33 = vmul.f32 %v6258_v45, %v18646_v36  ;;  %vm6702_vm4 = vweird.f32 %v16377_v14  ;;  %10040 = vmatmul.msk.f32.gmra.mxu3 %vm878_vm1, %v8277_v21  ;;  %v7523_v11 = vadd.f32 1.1283791, %v7522_v42  ;;  %v7594_v17 = vmul.f32 2.1237322e-06, %v16528_v39 }
 0x691   : > { %v7536_v60 = vmul.f32 %v10381_v22, %v16488_v41  ;;  %v7605_v55 = vmul.f32 3.8918573e-05, %v16528_v39  ;;  %v7544_v51 = vand.u32 2147483647, %v16488_v41  ;;  %v7546_v7 = vand.u32 2147483648, %v16488_v41 }
 0x692   : > { %v7573_v30 = vmul.f32 %v7572_v53, %v16422_v0  ;;  %v6332_v8 = vmul.f32 %v16538_v4, %v16538_v4  ;;  %v7562_v40 = vmul.f32 %v7561_v46, %v16422_v0  ;;  %v7595_v16 = vadd.f32 0.00028619796, %v7594_v17 }
 0x693   : > { %v7537_v19 = vsub.f32 1.0, %v7536_v60  ;;  %v7606_v25 = vadd.f32 0.001143296, %v7605_v55  ;;  %10382 = vrsqrt.f32 %v16535_v27  ;;  %v16556_v43 = vmul.f32 0.70710677, %v16533_v34 }
 0x694   : > { %v16553_v13 = vadd.f32 1.0, %v7573_v30  ;;  %v6364_v61 = vsub.f32 %v6300_v33, %v6332_v8  ;;  %vm7541_vm5 = vweird.f32 %v10381_v22  ;;  %v7596_v20 = vmul.f32 %v7595_v16, %v16528_v39 }
 0x695   : > { %v7538_v42 = vmul.f32 %v10381_v22, %v7537_v19  ;;  %v7607_v21 = vmul.f32 %v7606_v25, %v16528_v39  ;;  %v16561_v35 = vmul.f32 %v16431_v26, %v6700_v57  ;;  %vm6703_vm6 = vweird.f32 %v16431_v26 }
 0x696   : > { %v16564_v0 = vmul.f32 0.5, %v6708_v28  ;;  %10384 = vrcp.f32 %v16553_v13  ;;  %vm7540_vm7 = vweird.f32 %v16488_v41  ;;  %v7547_v45 = vor.u32 1.1754944e-38, %v7546_v7  ;;  %vm16582_vm9 = vmor %vm6702_vm4, %vm6703_vm6 }
 0x697   : > { %v7539_v46 = vadd.f32 %v10381_v22, %v7538_v42  ;;  %v6396_v53 = vmax.f32 %v6364_v61, 0.0  ;;  %vm7542_vm8 = vmor %vm7540_vm7, %vm7541_vm5  ;;  %v7563_v33 = vadd.f32 1.1283791, %v7562_v40  ;;  %v7597_v60 = vadd.f32 0.0036580483, %v7596_v20 }
 0x698   : > { %v7608_v17 = vadd.f32 0.014752088, %v7607_v21  ;;  %v7632_v55 = vmul.f32 %v16556_v43, %v16556_v43  ;;  %v16573_v57 = vmul.f32 %v6695_v9, %v6424_v44  ;;  %v7524_v28 = vmul.f32 %v7523_v11, %v16354_v6  ;;  %v18796_v44 = vld [vmem:[#allocation106_spill] sm:$0xff] }
 0x699   : > { %v7543_v30 = vsel %vm7542_vm8, %v10381_v22, %v7539_v46  ;;  %vm7545_vm13 = vcmp.eq.f32.partialorder %v7544_v51, 8.507059e+37  ;;  %v16576_v8 = vpop.eup %10382  ;;  %v16586_v19 = vadd.f32 1e-06, %v6396_v53  ;;  %v7598_v62 = vmul.f32 %v7597_v60, %v16528_v39  ;;  %v6101_v60 = vpop.xlane.xlu1 %6100 }
 0x69a   : > { %v7548_v7 = vsel %vm7545_vm13, %v7547_v45, %v7543_v30  ;;  %v7609_v2 = vmul.f32 %v7608_v17, %v16528_v39  ;;  %v6705_v6 = vsel %vm16582_vm9, %v16431_v26, %v16561_v35  ;;  %v16596_v22 = vmin.f32 %v7632_v55, 16.0  ;;  %v6261_v30 = vpop.xlane.xlu2 %6260 }
 0x69b   : > { %v7549_v14 = vmul.f32 %v7548_v7, %v7524_v28  ;;  %v6710_v51 = vsub.f32 1.5, %v16564_v0  ;;  %v7564_v40 = vmul.f32 %v7563_v33, %v16388_v32  ;;  %v7599_v16 = vadd.f32 0.05243302, %v7598_v62  ;;  %v16615_v28 = vpop.f32.mrf.mxu3 }
 0x69c   : > { %v10385_v11 = vpop.eup %10384  ;;  %v7610_v25 = vadd.f32 0.112945676, %v7609_v2  ;;  %v7634_v20 = vmul.f32 2.1237322e-06, %v16596_v22  ;;  %v6839_v21 = vmul.f32 %v16209_v3, %v16293_v48  ;;  %vm6713_vm10 = vweird.f32 %v16483_v58 }
 0x69d   : > { %v10009_v61 = vclamps-f32 %v7549_v14, 1.0  ;;  %v7576_v42 = vmul.f32 %v10385_v11, %v16553_v13  ;;  %v6717_v46 = vmul.f32 %v16576_v8, %v16535_v27  ;;  %v7584_v45 = vand.u32 2147483647, %v16553_v13 }
 0x69e   : > { %10386 = vrsqrt.f32 %v16586_v19  ;;  %v7611_v32 = vmul.f32 %v7610_v25, %v16528_v39  ;;  %vm7581_vm11 = vweird.f32 %v10385_v11  ;;  %v7586_v33 = vand.u32 2147483648, %v16553_v13 }
 0x69f   : > { %v8246_v0 = vadd.f32 1.0, %v10009_v61  ;;  %v7577_v53 = vsub.f32 1.0, %v7576_v42  ;;  %v7600_v17 = vmul.f32 %v7599_v16, %v16528_v39  ;;  %v16613_v55 = vmul.f32 %v6101_v60, %v18646_v36 }
 0x6a0   : > { %v7612_v48 = vadd.f32 0.4994258, %v7611_v32  ;;  %v7645_v7 = vmul.f32 3.8918573e-05, %v16596_v22  ;;  %v6301_v14 = vmul.f32 %v6261_v30, %v18646_v36  ;;  %v7635_v25 = vadd.f32 0.00028619796, %v7634_v20 }
 0x6a1   : > { %v8278_v62 = vmul.f32 %v8246_v0, %v16521_v24  ;;  %v7578_v2 = vmul.f32 %v10385_v11, %v7577_v53  ;;  %v6718_v61 = vmul.f32 %v16576_v8, %v6717_v46  ;;  %vm7580_vm12 = vweird.f32 %v16553_v13 }
 0x6a2   : > { %v7613_v16 = vmul.f32 %v7612_v48, %v16528_v39  ;;  %v16624_v42 = vadd.f32 %v16229_v37, %v6839_v21  ;;  %vm7585_vm14 = vcmp.eq.f32.partialorder %v7584_v45, 8.507059e+37  ;;  %v6333_v24 = vmul.f32 %v16613_v55, %v16613_v55  ;;  %vm7582_vm15 = vmor %vm7580_vm12, %vm7581_vm11 }
 0x6a3   : > { %10041 = vmatmul.msk.f32.gmra.mxu3 %vm878_vm1, %v8278_v62  ;;  %v7579_v32 = vadd.f32 %v10385_v11, %v7578_v2  ;;  %v8509_v0 = vsel %vm666_vm0, %v16615_v28, 0.0  ;;  %v7587_v13 = vor.u32 1.1754944e-38, %v7586_v33  ;;  %v7601_v46 = vadd.f32 0.18741608, %v7600_v17 }
 0x6a4   : > { %v16631_v20 = vpop.eup %10386  ;;  %v16634_v53 = vadd.f32 1.0, %v7613_v16  ;;  %8510 = vadd.xlane.f32.xlu2 %v8509_v0  ;;  %v8644_v21 = vmul.f32 %v16615_v28, %v16615_v28  ;;  %v6365_v45 = vsub.f32 %v6301_v14, %v6333_v24  ;;  %v7636_v48 = vmul.f32 %v7635_v25, %v16596_v22  ;;  %v18799_v24 = vld [vmem:[#allocation109_spill] sm:$0xff] }
 0x6a5   : > { %v7583_v60 = vsel %vm7582_vm15, %v10385_v11, %v7579_v32  ;;  %v7646_v30 = vadd.f32 0.001143296, %v7645_v7  ;;  %v6711_v62 = vmul.f32 %v16483_v58, %v6710_v51  ;;  %v16642_v9 = vmul.f32 0.70710677, %v16624_v42 }
 0x6a6   : > { %v7588_v2 = vsel %vm7585_vm14, %v7587_v13, %v7583_v60  ;;  %10388 = vrcp.f32 %v16634_v53  ;;  %vm6712_vm2 = vweird.f32 %v16451_v12  ;;  %v6719_v33 = vmul.f32 0.5, %v6718_v61 }
 0x6a7   : > { %v7589_v17 = vmul.f32 %v7588_v2, %v7564_v40  ;;  %v6727_v16 = vmul.f32 %v16631_v20, %v16586_v19  ;;  %v7602_v11 = vmul.f32 %v7601_v46, %v16528_v39  ;;  %v6397_v14 = vmax.f32 %v6365_v45, 0.0  ;;  %vm16661_vm3 = vmor %vm6712_vm2, %vm6713_vm10 }
 0x6a8   : > { %v8676_v7 = vsel %vm666_vm0, %v8644_v21, 0.0  ;;  %v7637_v25 = vadd.f32 0.0036580483, %v7636_v48  ;;  %v16657_v12 = vmul.f32 %v6705_v6, %v6425_v63  ;;  %v16666_v40 = vmul.f32 0.5, %v16472_v47 }
 0x6a9   : > { %v10010_v39 = vclamps-f32 %v7589_v17, 1.0  ;;  %8677 = vadd.xlane.f32.xlu1 %v8676_v7  ;;  %v7647_v59 = vmul.f32 %v7646_v30, %v16596_v22  ;;  %v6715_v1 = vsel %vm16661_vm3, %v16483_v58, %v6711_v62  ;;  %v16673_v26 = vmul.f32 0.5, %v16533_v34 }
 0x6aa   : > { %v7638_v63 = vmul.f32 %v7637_v25, %v16596_v22  ;;  %v7672_v35 = vmul.f32 %v16642_v9, %v16642_v9  ;;  %v6720_v41 = vsub.f32 1.5, %v6719_v33  ;;  %v6728_v47 = vmul.f32 %v16631_v20, %v6727_v16 }
 0x6ab   : > { %v8247_v6 = vadd.f32 1.0, %v10010_v39  ;;  %v7648_v61 = vadd.f32 0.014752088, %v7647_v59  ;;  %v6427_v0 = vsub.f32 %v18799_v24, %v16475_v49  ;;  %v7603_v13 = vadd.f32 1.1283791, %v7602_v11 }
 0x6ac   : > { %v10389_v32 = vpop.eup %10388  ;;  %v16681_v46 = vadd.f32 1e-06, %v6397_v14  ;;  %v7639_v58 = vadd.f32 0.05243302, %v7638_v63  ;;  %v18800_v34 = vsub.f32 %v18796_v44, %v16381_v52  ;;  %v6840_v48 = vmul.f32 %v16209_v3, %v16342_v18  ;;  %v6104_v63 = vpop.xlane.xlu0 %6103 }
 0x6ad   : > { %v8279_v60 = vmul.f32 %v8247_v6, %v16525_v56  ;;  %v7616_v45 = vmul.f32 %v10389_v32, %v16634_v53  ;;  %vm6723_vm4 = vweird.f32 %v16576_v8  ;;  %v7624_v30 = vand.u32 2147483647, %v16634_v53 }
 0x6ae   : > { %v16686_v21 = vmul.f32 %v6715_v1, %v18800_v34  ;;  %v7626_v62 = vand.u32 2147483648, %v16634_v53  ;;  %v7649_v2 = vmul.f32 %v7648_v61, %v16596_v22  ;;  %v16696_v33 = vmin.f32 %v7672_v35, 16.0  ;;  %v16717_v35 = vpop.f32.mrf.mxu3  ;;  %v6264_v61 = vpop.xlane.xlu1 %6263 }
 0x6af   : > { %v16699_v52 = vmul.f32 %v16576_v8, %v6720_v41  ;;  %10042 = vmatmul.msk.f32.gmra.mxu3 %vm878_vm1, %v8279_v60  ;;  %v6729_v56 = vmul.f32 0.5, %v6728_v47  ;;  %v7617_v44 = vsub.f32 1.0, %v7616_v45  ;;  %v7640_v17 = vmul.f32 %v7639_v58, %v16596_v22 }
 0x6b0   : > { %vm6722_vm5 = vweird.f32 %v16535_v27  ;;  %v7604_v18 = vmul.f32 %v7603_v13, %v16491_v50  ;;  %10390 = vrsqrt.f32 %v16681_v46  ;;  %v7650_v16 = vadd.f32 0.112945676, %v7649_v2 }
 0x6b1   : > { %v7674_v11 = vmul.f32 2.1237322e-06, %v16696_v33  ;;  %v7618_v14 = vmul.f32 %v10389_v32, %v7617_v44  ;;  %vm7621_vm6 = vweird.f32 %v10389_v32  ;;  %v7685_v7 = vmul.f32 3.8918573e-05, %v16696_v33  ;;  %vm16752_vm9 = vmor %vm6722_vm5, %vm6723_vm4 }
 0x6b2   : > { %v16709_v25 = vadd.f32 %v16229_v37, %v6840_v48  ;;  %vm7620_vm7 = vweird.f32 %v16634_v53  ;;  %vm16712_vm8 = vcmp.eq.f32.partialorder %v7624_v30, 8.507059e+37  ;;  %v7627_v39 = vor.u32 1.1754944e-38, %v7626_v62 }
 0x6b3   : > { %v7651_v50 = vmul.f32 %v7650_v16, %v16596_v22  ;;  %v7619_v59 = vadd.f32 %v10389_v32, %v7618_v14  ;;  %v7641_v1 = vadd.f32 0.18741608, %v7640_v17  ;;  %v7675_v41 = vadd.f32 0.00028619796, %v7674_v11  ;;  %vm7622_vm13 = vmor %vm7620_vm7, %vm7621_vm6 }
 0x6b4   : > { %v6841_v6 = vmul.f32 %v16209_v3, %v16427_v5  ;;  %v16722_v53 = vmul.f32 %v6104_v63, %v18646_v36  ;;  %v8512_v13 = vsel %vm666_vm0, %v16717_v35, 0.0  ;;  %v7686_v58 = vadd.f32 0.001143296, %v7685_v7 }
 0x6b5   : > { %v7652_v47 = vadd.f32 0.4994258, %v7651_v50  ;;  %v7623_v34 = vsel %vm7622_vm13, %v10389_v32, %v7619_v59  ;;  %v6302_v60 = vmul.f32 %v6264_v61, %v18646_v36  ;;  %8513 = vadd.xlane.f32.xlu0 %v8512_v13  ;;  %v8645_v45 = vmul.f32 %v16717_v35, %v16717_v35 }
 0x6b6   : > { %v16730_v48 = vmul.f32 0.70710677, %v16709_v25  ;;  %v16732_v3 = vpop.eup %10390  ;;  %v6730_v5 = vsub.f32 1.5, %v6729_v56  ;;  %v7628_v30 = vsel %vm16712_vm8, %v7627_v39, %v7623_v34  ;;  %v6334_v32 = vmul.f32 %v16722_v53, %v16722_v53 }
 0x6b7   : > { %v7653_v62 = vmul.f32 %v7652_v47, %v16596_v22  ;;  %v7629_v2 = vmul.f32 %v7628_v30, %v7604_v18  ;;  %v7642_v44 = vmul.f32 %v7641_v1, %v16596_v22  ;;  %v8679_v17 = vsel %vm666_vm0, %v8645_v45, 0.0 }
 0x6b8   : > { %v16742_v16 = vadd.f32 %v16229_v37, %v6841_v6  ;;  %v6366_v14 = vsub.f32 %v6302_v60, %v6334_v32  ;;  %8680 = vadd.xlane.f32.xlu2 %v8679_v17  ;;  %v7676_v56 = vmul.f32 %v7675_v41, %v16696_v33  ;;  %v7687_v7 = vmul.f32 %v7686_v58, %v16696_v33 }
 0x6b9   : > { %v16744_v11 = vadd.f32 1.0, %v7653_v62  ;;  %v6428_v37 = vsub.f32 %v15332_v29, %v16538_v4  ;;  %v10011_v22 = vclamps-f32 %v7629_v2, 1.0  ;;  %v6737_v51 = vmul.f32 %v16732_v3, %v16681_v46 }
 0x6ba   : > { %v7712_v39 = vmul.f32 %v16730_v48, %v16730_v48  ;;  %v6725_v50 = vsel %vm16752_vm9, %v16576_v8, %v16699_v52  ;;  %vm6732_vm10 = vweird.f32 %v16586_v19  ;;  %vm6733_vm11 = vweird.f32 %v16631_v20 }
 0x6bb   : > { %10392 = vrcp.f32 %v16744_v11  ;;  %v8248_v27 = vadd.f32 1.0, %v10011_v22  ;;  %v6398_v59 = vmax.f32 %v6366_v14, 0.0  ;;  %v7677_v1 = vadd.f32 0.0036580483, %v7676_v56  ;;  %vm16797_vm12 = vmor %vm6732_vm10, %vm6733_vm11 }
 0x6bc   : > { %v16770_v63 = vmul.f32 0.70710677, %v16742_v16  ;;  %v16773_v41 = vmul.f32 %v16631_v20, %v6730_v5  ;;  %v7643_v6 = vadd.f32 1.1283791, %v7642_v44  ;;  %v7688_v47 = vadd.f32 0.014752088, %v7687_v7 }
 0x6bd   : > { %v16775_v61 = vmin.f32 %v7712_v39, 16.0  ;;  %v8280_v8 = vmul.f32 %v8248_v27, %v16666_v40  ;;  %v6738_v52 = vmul.f32 %v16732_v3, %v6737_v51  ;;  %v16779_v13 = vadd.f32 1e-06, %v6398_v59  ;;  %v6107_v39 = vpop.xlane.xlu2 %6106 }
 0x6be   : > { %v7678_v58 = vmul.f32 %v7677_v1, %v16696_v33  ;;  %v16783_v34 = vmul.f32 0.5, %v16624_v42  ;;  %v7689_v60 = vmul.f32 %v7688_v47, %v16696_v33  ;;  %v16791_v30 = vmul.f32 %v6725_v50, %v6427_v0  ;;  %v16818_v50 = vpop.f32.mrf.mxu3  ;;  %v6267_v1 = vpop.xlane.xlu0 %6266 }
 0x6bf   : > { %v7714_v45 = vmul.f32 2.1237322e-06, %v16775_v61  ;;  %v7725_v5 = vmul.f32 3.8918573e-05, %v16775_v61  ;;  %10043 = vmatmul.msk.f32.gmra.mxu3 %vm878_vm1, %v8280_v8  ;;  %10394 = vrsqrt.f32 %v16779_v13  ;;  %v7752_v62 = vmul.f32 %v16770_v63, %v16770_v63 }
 0x6c0   : > { %v7679_v42 = vadd.f32 0.05243302, %v7678_v58  ;;  %v6735_v49 = vsel %vm16797_vm12, %v16631_v20, %v16773_v41  ;;  %v7690_v24 = vadd.f32 0.112945676, %v7689_v60  ;;  %v6739_v2 = vmul.f32 0.5, %v6738_v52 }
 0x6c1   : > { %v10393_v32 = vpop.eup %10392  ;;  %v7715_v19 = vadd.f32 0.00028619796, %v7714_v45  ;;  %v7726_v0 = vadd.f32 0.001143296, %v7725_v5  ;;  %v7644_v44 = vmul.f32 %v7643_v6, %v16556_v43  ;;  %v16811_v14 = vmin.f32 %v7752_v62, 16.0 }
 0x6c2   : > { %v7656_v17 = vmul.f32 %v10393_v32, %v16744_v11  ;;  %v7664_v56 = vand.u32 2147483647, %v16744_v11  ;;  %v7666_v7 = vand.u32 2147483648, %v16744_v11  ;;  %v7691_v18 = vmul.f32 %v7690_v24, %v16696_v33 }
 0x6c3   : > { %v7716_v22 = vmul.f32 %v7715_v19, %v16775_v61  ;;  %vm7661_vm14 = vweird.f32 %v10393_v32  ;;  %v7680_v20 = vmul.f32 %v7679_v42, %v16696_v33  ;;  %v7727_v43 = vmul.f32 %v7726_v0, %v16775_v61 }
 0x6c4   : > { %v7657_v51 = vsub.f32 1.0, %v7656_v17  ;;  %vm6742_vm15 = vweird.f32 %v16681_v46  ;;  %v7692_v27 = vadd.f32 0.4994258, %v7691_v18  ;;  %v16823_v59 = vmul.f32 %v6107_v39, %v18646_v36 }
 0x6c5   : > { %v8515_v41 = vsel %vm666_vm0, %v16818_v50, 0.0  ;;  %v8646_v6 = vmul.f32 %v16818_v50, %v16818_v50  ;;  %v16829_v47 = vpop.eup %10394  ;;  %v6303_v52 = vmul.f32 %v6267_v1, %v18646_v36  ;;  %v7717_v58 = vadd.f32 0.0036580483, %v7716_v22 }
 0x6c6   : > { %v7658_v8 = vmul.f32 %v10393_v32, %v7657_v51  ;;  %8516 = vadd.xlane.f32.xlu1 %v8515_v41  ;;  %v7754_v60 = vmul.f32 2.1237322e-06, %v16811_v14  ;;  %v6740_v45 = vsub.f32 1.5, %v6739_v2  ;;  %vm7660_vm2 = vweird.f32 %v16744_v11  ;;  %v16853_v41 = vld [vmem:[%s18238_s8] ss:$0 sm:$0xff] }
 0x6c7   : > { %v7693_v5 = vmul.f32 %v7692_v27, %v16696_v33  ;;  %v6335_v40 = vmul.f32 %v16823_v59, %v16823_v59  ;;  %v7667_v62 = vor.u32 1.1754944e-38, %v7666_v7  ;;  %v7681_v24 = vadd.f32 0.18741608, %v7680_v20  ;;  %vm7662_vm3 = vmor %vm7660_vm2, %vm7661_vm14 }
 0x6c8   : > { %v7659_v42 = vadd.f32 %v10393_v32, %v7658_v8  ;;  %v8682_v19 = vsel %vm666_vm0, %v8646_v6, 0.0  ;;  %v6747_v0 = vmul.f32 %v16829_v47, %v16779_v13  ;;  %v7718_v11 = vmul.f32 %v7717_v58, %v16775_v61 }
 0x6c9   : > { %v16841_v17 = vadd.f32 1.0, %v7693_v5  ;;  %v6367_v2 = vsub.f32 %v6303_v52, %v6335_v40  ;;  %8683 = vadd.xlane.f32.xlu0 %v8682_v19  ;;  %vm7665_vm4 = vcmp.eq.f32.partialorder %v7664_v56, 8.507059e+37  ;;  %v7728_v22 = vadd.f32 0.014752088, %v7727_v43 }
 0x6ca   : > { %v7663_v18 = vsel %vm7662_vm3, %v10393_v32, %v7659_v42  ;;  %v7755_v51 = vadd.f32 0.00028619796, %v7754_v60  ;;  %v16845_v7 = vmul.f32 %v16732_v3, %v6740_v45  ;;  %vm6743_vm5 = vweird.f32 %v16732_v3  ;;  %v16887_v45 = vld [vmem:[%s18239_s9] ss:$0 sm:$0xff] }
 0x6cb   : > { %v7668_v20 = vsel %vm7665_vm4, %v7667_v62, %v7663_v18  ;;  %10396 = vrcp.f32 %v16841_v17  ;;  %v7682_v27 = vmul.f32 %v7681_v24, %v16696_v33  ;;  %v6399_v1 = vmax.f32 %v6367_v2, 0.0  ;;  %vm16869_vm6 = vmor %vm6742_vm15, %vm6743_vm5  ;;  %v16896_v18 = vpop.f32.mrf.mxu3 }
 0x6cc   : > { %v7669_v39 = vmul.f32 %v7668_v20, %v7644_v44  ;;  %v6842_v32 = vmul.f32 %v16853_v41, %v16497_v54  ;;  %v6748_v56 = vmul.f32 %v16829_v47, %v6747_v0  ;;  %v7719_v43 = vadd.f32 0.05243302, %v7718_v11  ;;  %v6110_v11 = vpop.xlane.xlu1 %6109 }
 0x6cd   : > { %v7729_v6 = vmul.f32 %v7728_v22, %v16775_v61  ;;  %v7756_v8 = vmul.f32 %v7755_v51, %v16811_v14  ;;  %v16863_v33 = vmul.f32 %v6735_v49, %v6428_v37  ;;  %v6429_v44 = vsub.f32 %v15409_v38, %v16613_v55 }
 0x6ce   : > { %v10012_v54 = vclamps-f32 %v7669_v39, 1.0  ;;  %v16873_v58 = vadd.f32 1e-06, %v6399_v1  ;;  %v6745_v60 = vsel %vm16869_vm6, %v16732_v3, %v16845_v7  ;;  %v16880_v29 = vmul.f32 0.5, %v16709_v25 }
 0x6cf   : > { %v7720_v4 = vmul.f32 %v7719_v43, %v16775_v61  ;;  %v7730_v37 = vadd.f32 0.112945676, %v7729_v6  ;;  %v7757_v46 = vadd.f32 0.0036580483, %v7756_v8  ;;  %v16890_v5 = vadd.f32 %v16887_v45, %v6842_v32 }
 0x6d0   : > { %v8249_v49 = vadd.f32 1.0, %v10012_v54  ;;  %10398 = vrsqrt.f32 %v16873_v58  ;;  %v6749_v42 = vmul.f32 0.5, %v6748_v56  ;;  %v7683_v62 = vadd.f32 1.1283791, %v7682_v27  ;;  %v6270_v27 = vpop.xlane.xlu2 %6269 }
 0x6d1   : > { %v10397_v40 = vpop.eup %10396  ;;  %v7704_v25 = vand.u32 2147483647, %v16841_v17  ;;  %v7731_v24 = vmul.f32 %v7730_v37, %v16775_v61  ;;  %v7721_v2 = vadd.f32 0.18741608, %v7720_v4  ;;  %v7765_v22 = vmul.f32 3.8918573e-05, %v16811_v14 }
 0x6d2   : > { %v8281_v19 = vmul.f32 %v8249_v49, %v16673_v26  ;;  %v7696_v0 = vmul.f32 %v10397_v40, %v16841_v17  ;;  %v7706_v51 = vand.u32 2147483648, %v16841_v17  ;;  %v16901_v39 = vmul.f32 %v6110_v11, %v18646_v36 }
 0x6d3   : > { %v7732_v20 = vadd.f32 0.4994258, %v7731_v24  ;;  %v8518_v1 = vsel %vm666_vm0, %v16896_v18, 0.0  ;;  %v6304_v32 = vmul.f32 %v6270_v27, %v18646_v36  ;;  %v8647_v56 = vmul.f32 %v16896_v18, %v16896_v18 }
 0x6d4   : > { %10044 = vmatmul.msk.f32.gmra.mxu3 %vm878_vm1, %v8281_v19  ;;  %v7697_v26 = vsub.f32 1.0, %v7696_v0  ;;  %8519 = vadd.xlane.f32.xlu2 %v8518_v1  ;;  %v7758_v43 = vmul.f32 %v7757_v46, %v16811_v14  ;;  %v6750_v6 = vsub.f32 1.5, %v6749_v42  ;;  %vm7701_vm7 = vweird.f32 %v10397_v40 }
 0x6d5   : > { %v7733_v8 = vmul.f32 %v7732_v20, %v16775_v61  ;;  %v6336_v54 = vmul.f32 %v16901_v39, %v16901_v39  ;;  %v7722_v49 = vmul.f32 %v7721_v2, %v16775_v61  ;;  %v8685_v24 = vsel %vm666_vm0, %v8647_v56, 0.0 }
 0x6d6   : > { %v16913_v4 = vpop.eup %10398  ;;  %v7698_v37 = vmul.f32 %v10397_v40, %v7697_v26  ;;  %v7766_v19 = vadd.f32 0.001143296, %v7765_v22  ;;  %vm6753_vm8 = vweird.f32 %v16829_v47  ;;  %v7684_v0 = vmul.f32 %v7683_v62, %v16642_v9  ;;  %8686 = vadd.xlane.f32.xlu1 %v8685_v24 }
 0x6d7   : > { %vm7700_vm13 = vweird.f32 %v16841_v17  ;;  %v16920_v46 = vadd.f32 1.0, %v7733_v8  ;;  %v6368_v11 = vsub.f32 %v6304_v32, %v6336_v54  ;;  %v7759_v20 = vadd.f32 0.05243302, %v7758_v43 }
 0x6d8   : > { %v7699_v42 = vadd.f32 %v10397_v40, %v7698_v37  ;;  %v7767_v27 = vmul.f32 %v7766_v19, %v16811_v14  ;;  %vm7702_vm9 = vmor %vm7700_vm13, %vm7701_vm7  ;;  %vm7705_vm10 = vcmp.eq.f32.partialorder %v7704_v25, 8.507059e+37  ;;  %v7707_v61 = vor.u32 1.1754944e-38, %v7706_v51 }
 0x6d9   : > { %v6757_v2 = vmul.f32 %v16913_v4, %v16873_v58  ;;  %10400 = vrcp.f32 %v16920_v46  ;;  %v16928_v9 = vmul.f32 %v16829_v47, %v6750_v6  ;;  %v7723_v62 = vadd.f32 1.1283791, %v7722_v49 }
 0x6da   : > { %v7703_v17 = vsel %vm7702_vm9, %v10397_v40, %v7699_v42  ;;  %v6400_v22 = vmax.f32 %v6368_v11, 0.0  ;;  %v6430_v1 = vsub.f32 %v15481_v23, %v16722_v53  ;;  %v16933_v32 = vmul.f32 0.5, %v16742_v16 }
 0x6db   : > { %v7708_v26 = vsel %vm7705_vm10, %v7707_v61, %v7703_v17  ;;  %v7768_v25 = vadd.f32 0.014752088, %v7767_v27  ;;  %vm6752_vm11 = vweird.f32 %v16779_v13  ;;  %v7760_v43 = vmul.f32 %v7759_v20, %v16811_v14  ;;  %v6113_v27 = vpop.xlane.xlu0 %6112  ;;  %v16979_v61 = vpop.f32.mrf.mxu3 }
 0x6dc   : > { %v7709_v51 = vmul.f32 %v7708_v26, %v7684_v0  ;;  %v16936_v56 = vadd.f32 1e-06, %v6400_v22  ;;  %v16947_v40 = vmul.f32 %v6745_v60, %v6429_v44  ;;  %vm16951_vm12 = vmor %vm6752_vm11, %vm6753_vm8  ;;  %v6758_v13 = vmul.f32 %v16913_v4, %v6757_v2  ;;  %v6273_v17 = vpop.xlane.xlu1 %6272 }
 0x6dd   : > { %v7769_v6 = vmul.f32 %v7768_v25, %v16811_v14  ;;  %v16958_v8 = vmul.f32 0.70710677, %v16890_v5  ;;  %v6755_v38 = vsel %vm16951_vm12, %v16829_v47, %v16928_v9  ;;  %v6431_v3 = vsub.f32 %v15623_v31, %v16823_v59 }
 0x6de   : > { %v10013_v55 = vclamps-f32 %v7709_v51, 1.0  ;;  %v7724_v7 = vmul.f32 %v7723_v62, %v16730_v48  ;;  %10402 = vrsqrt.f32 %v16936_v56  ;;  %v6843_v54 = vmul.f32 %v16853_v41, %v16573_v57 }
 0x6df   : > { %v10401_v44 = vpop.eup %10400  ;;  %v7770_v52 = vadd.f32 0.112945676, %v7769_v6  ;;  %v7792_v60 = vmul.f32 %v16958_v8, %v16958_v8  ;;  %v7744_v47 = vand.u32 2147483647, %v16920_v46  ;;  %v7761_v24 = vadd.f32 0.18741608, %v7760_v43 }
 0x6e0   : > { %v8250_v37 = vadd.f32 1.0, %v10013_v55  ;;  %v7736_v49 = vmul.f32 %v10401_v44, %v16920_v46  ;;  %v6759_v19 = vmul.f32 0.5, %v6758_v13  ;;  %v7746_v0 = vand.u32 2147483648, %v16920_v46 }
 0x6e1   : > { %v7771_v48 = vmul.f32 %v7770_v52, %v16811_v14  ;;  %v16976_v42 = vmin.f32 %v7792_v60, 16.0  ;;  %vm7741_vm14 = vweird.f32 %v10401_v44  ;;  %v16982_v57 = vadd.f32 %v16887_v45, %v6843_v54 }
 0x6e2   : > { %v8282_v11 = vmul.f32 %v8250_v37, %v16783_v34  ;;  %v7737_v20 = vsub.f32 1.0, %v7736_v49  ;;  %v16985_v9 = vmul.f32 %v6113_v27, %v18646_v36  ;;  %v8521_v62 = vsel %vm666_vm0, %v16979_v61, 0.0 }
 0x6e3   : > { %v7772_v2 = vadd.f32 0.4994258, %v7771_v48  ;;  %v8648_v22 = vmul.f32 %v16979_v61, %v16979_v61  ;;  %v6305_v26 = vmul.f32 %v6273_v17, %v18646_v36  ;;  %8522 = vadd.xlane.f32.xlu0 %v8521_v62  ;;  %v7794_v25 = vmul.f32 2.1237322e-06, %v16976_v42  ;;  %v17081_v59 = vpop.f32.mrf.mxu3 }
 0x6e4   : > { %10045 = vmatmul.msk.f32.gmra.mxu3 %vm878_vm1, %v8282_v11  ;;  %v7738_v34 = vmul.f32 %v10401_v44, %v7737_v20  ;;  %v7805_v51 = vmul.f32 3.8918573e-05, %v16976_v42  ;;  %v16995_v43 = vpop.eup %10402  ;;  %vm6762_vm15 = vweird.f32 %v16873_v58  ;;  %vm7740_vm2 = vweird.f32 %v16920_v46 }
 0x6e5   : > { %vm16999_vm3 = vcmp.eq.f32.partialorder %v7744_v47, 8.507059e+37  ;;  %v7773_v13 = vmul.f32 %v7772_v2, %v16811_v14  ;;  %v6337_v36 = vmul.f32 %v16985_v9, %v16985_v9  ;;  %v7747_v55 = vor.u32 1.1754944e-38, %v7746_v0  ;;  %vm7742_vm4 = vmor %vm7740_vm2, %vm7741_vm14 }
 0x6e6   : > { %v7739_v6 = vadd.f32 %v10401_v44, %v7738_v34  ;;  %v8688_v52 = vsel %vm666_vm0, %v8648_v22, 0.0  ;;  %v7795_v60 = vadd.f32 0.00028619796, %v7794_v25  ;;  %v6760_v54 = vsub.f32 1.5, %v6759_v19 }
 0x6e7   : > { %v17008_v37 = vadd.f32 1.0, %v7773_v13  ;;  %v6369_v46 = vsub.f32 %v6305_v26, %v6337_v36  ;;  %8689 = vadd.xlane.f32.xlu2 %v8688_v52  ;;  %v7806_v49 = vadd.f32 0.001143296, %v7805_v51  ;;  %v6767_v48 = vmul.f32 %v16995_v43, %v16936_v56 }
 0x6e8   : > { %v7743_v47 = vsel %vm7742_vm4, %v10401_v44, %v7739_v6  ;;  %v7796_v11 = vmul.f32 %v7795_v60, %v16976_v42  ;;  %v17014_v20 = vmul.f32 0.70710677, %v16982_v57  ;;  %v17019_v19 = vmul.f32 %v6755_v38, %v6430_v1 }
 0x6e9   : > { %v7748_v0 = vsel %vm16999_vm3, %v7747_v55, %v7743_v47  ;;  %v7762_v27 = vmul.f32 %v7761_v24, %v16811_v14  ;;  %10404 = vrcp.f32 %v17008_v37  ;;  %vm6763_vm5 = vweird.f32 %v16913_v4 }
 0x6ea   : > { %v7749_v44 = vmul.f32 %v7748_v0, %v7724_v7  ;;  %v6401_v2 = vmax.f32 %v6369_v46, 0.0  ;;  %v6844_v17 = vmul.f32 %v16853_v41, %v16657_v12  ;;  %v6761_v62 = vmul.f32 %v16913_v4, %v6760_v54  ;;  %vm17044_vm6 = vmor %vm6762_vm15, %vm6763_vm5 }
 0x6eb   : > { %v7797_v22 = vadd.f32 0.0036580483, %v7796_v11  ;;  %v7807_v23 = vmul.f32 %v7806_v49, %v16976_v42  ;;  %v7832_v53 = vmul.f32 %v17014_v20, %v17014_v20  ;;  %v6432_v14 = vsub.f32 %v15695_v10, %v16901_v39 }
 0x6ec   : > { %v10014_v1 = vclamps-f32 %v7749_v44, 1.0  ;;  %v6768_v38 = vmul.f32 %v16995_v43, %v6767_v48  ;;  %v17035_v24 = vadd.f32 1e-06, %v6401_v2  ;;  %v7763_v7 = vadd.f32 1.1283791, %v7762_v27 }
 0x6ed   : > { %v7798_v34 = vmul.f32 %v7797_v22, %v16976_v42  ;;  %v7808_v12 = vadd.f32 0.014752088, %v7807_v23  ;;  %v17038_v26 = vmin.f32 %v7832_v53, 16.0  ;;  %v17050_v16 = vmul.f32 0.5, %v16890_v5 }
 0x6ee   : > { %v8251_v51 = vadd.f32 1.0, %v10014_v1  ;;  %10406 = vrsqrt.f32 %v17035_v24  ;;  %v17053_v13 = vadd.f32 %v16887_v45, %v6844_v17  ;;  %v6765_v6 = vsel %vm17044_vm6, %v16913_v4, %v6761_v62 }
 0x6ef   : > { %v10405_v36 = vpop.eup %10404  ;;  %v7799_v55 = vadd.f32 0.05243302, %v7798_v34  ;;  %v7809_v58 = vmul.f32 %v7808_v12, %v16976_v42  ;;  %v7834_v52 = vmul.f32 2.1237322e-06, %v17038_v26  ;;  %v6769_v54 = vmul.f32 0.5, %v6768_v38 }
 0x6f0   : > { %v8283_v60 = vmul.f32 %v8251_v51, %v16880_v29  ;;  %v7776_v46 = vmul.f32 %v10405_v36, %v17008_v37  ;;  %v7784_v5 = vand.u32 2147483647, %v17008_v37  ;;  %v7845_v11 = vmul.f32 3.8918573e-05, %v17038_v26 }
 0x6f1   : > { %v7800_v49 = vmul.f32 %v7799_v55, %v16976_v42  ;;  %v7810_v47 = vadd.f32 0.112945676, %v7809_v58  ;;  %v7835_v48 = vadd.f32 0.00028619796, %v7834_v52  ;;  %v17068_v4 = vmul.f32 %v6765_v6, %v6431_v3 }
 0x6f2   : > { %10046 = vmatmul.msk.f32.gmra.mxu3 %vm878_vm1, %v8283_v60  ;;  %v7764_v29 = vmul.f32 %v7763_v7, %v16770_v63  ;;  %v7777_v0 = vsub.f32 1.0, %v7776_v46  ;;  %v17073_v27 = vmul.f32 0.70710677, %v17053_v13  ;;  %v7786_v44 = vand.u32 2147483648, %v17008_v37 }
 0x6f3   : > { %v7811_v2 = vmul.f32 %v7810_v47, %v16976_v42  ;;  %v7836_v17 = vmul.f32 %v7835_v48, %v17038_v26  ;;  %v7846_v62 = vadd.f32 0.001143296, %v7845_v11  ;;  %vm7780_vm7 = vweird.f32 %v17008_v37 }
 0x6f4   : > { %v17078_v22 = vpop.eup %10406  ;;  %v7778_v31 = vmul.f32 %v10405_v36, %v7777_v0  ;;  %vm7781_vm8 = vweird.f32 %v10405_v36  ;;  %v7872_v63 = vmul.f32 %v17073_v27, %v17073_v27  ;;  %v6770_v3 = vsub.f32 1.5, %v6769_v54 }
 0x6f5   : > { %vm6772_vm13 = vweird.f32 %v16936_v56  ;;  %vm17086_vm9 = vcmp.eq.f32.partialorder %v7784_v5, 8.507059e+37  ;;  %v7801_v53 = vadd.f32 0.18741608, %v7800_v49  ;;  %v7812_v1 = vadd.f32 0.4994258, %v7811_v2  ;;  %vm7782_vm10 = vmor %vm7780_vm7, %vm7781_vm8 }
 0x6f6   : > { %v7779_v38 = vadd.f32 %v10405_v36, %v7778_v31  ;;  %v8524_v7 = vsel %vm666_vm0, %v17081_v59, 0.0  ;;  %v8649_v37 = vmul.f32 %v17081_v59, %v17081_v59  ;;  %v7837_v34 = vadd.f32 0.0036580483, %v7836_v17 }
 0x6f7   : > { %v7787_v12 = vor.u32 1.1754944e-38, %v7786_v44  ;;  %v6777_v25 = vmul.f32 %v17078_v22, %v17035_v24  ;;  %v7813_v51 = vmul.f32 %v7812_v1, %v16976_v42  ;;  %8525 = vadd.xlane.f32.xlu1 %v8524_v7  ;;  %v7847_v6 = vmul.f32 %v7846_v62, %v17038_v26 }
 0x6f8   : > { %v7783_v55 = vsel %vm7782_vm10, %v10405_v36, %v7779_v38  ;;  %v8691_v58 = vsel %vm666_vm0, %v8649_v37, 0.0  ;;  %v7838_v52 = vmul.f32 %v7837_v34, %v17038_v26  ;;  %v17100_v60 = vmin.f32 %v7872_v63, 16.0 }
 0x6f9   : > { %v7788_v54 = vsel %vm17086_vm9, %v7787_v12, %v7783_v55  ;;  %v7802_v46 = vmul.f32 %v7801_v53, %v16976_v42  ;;  %v17105_v5 = vadd.f32 1.0, %v7813_v51  ;;  %8692 = vadd.xlane.f32.xlu0 %v8691_v58  ;;  %v6845_v49 = vmul.f32 %v16853_v41, %v16686_v21  ;;  %v17149_v55 = vpop.f32.mrf.mxu3 }
 0x6fa   : > { %v7789_v47 = vmul.f32 %v7788_v54, %v7764_v29  ;;  %v7839_v48 = vadd.f32 0.05243302, %v7838_v52  ;;  %v7848_v36 = vadd.f32 0.014752088, %v7847_v6  ;;  %v7874_v11 = vmul.f32 2.1237322e-06, %v17100_v60 }
 0x6fb   : > { %v17111_v0 = vmul.f32 %v16995_v43, %v6770_v3  ;;  %vm6773_vm11 = vweird.f32 %v16995_v43  ;;  %10408 = vrcp.f32 %v17105_v5  ;;  %v6846_v42 = vmul.f32 %v16853_v41, %v16791_v30 }
 0x6fc   : > { %v10015_v44 = vclamps-f32 %v7789_v47, 1.0  ;;  %v6778_v2 = vmul.f32 %v17078_v22, %v6777_v25  ;;  %v7840_v21 = vmul.f32 %v7839_v48, %v17038_v26  ;;  %v7849_v29 = vmul.f32 %v7848_v36, %v17038_v26  ;;  %vm17126_vm12 = vmor %vm6772_vm13, %vm6773_vm11 }
 0x6fd   : > { %v7803_v17 = vadd.f32 1.1283791, %v7802_v46  ;;  %v7875_v62 = vadd.f32 0.00028619796, %v7874_v11  ;;  %v7885_v31 = vmul.f32 3.8918573e-05, %v17100_v60  ;;  %v17122_v63 = vadd.f32 %v16887_v45, %v6845_v49 }
 0x6fe   : > { %v8252_v30 = vadd.f32 1.0, %v10015_v44  ;;  %v17131_v23 = vmul.f32 0.5, %v16982_v57  ;;  %v7841_v53 = vadd.f32 0.18741608, %v7840_v21  ;;  %v7850_v1 = vadd.f32 0.112945676, %v7849_v29 }
 0x6ff   : > { %v6775_v38 = vsel %vm17126_vm12, %v16995_v43, %v17111_v0  ;;  %v17138_v7 = vmul.f32 0.5, %v17053_v13  ;;  %v7876_v56 = vmul.f32 %v7875_v62, %v17100_v60  ;;  %v7886_v37 = vadd.f32 0.001143296, %v7885_v31 }
 0x700   : > { %v8284_v34 = vmul.f32 %v8252_v30, %v16933_v32  ;;  %v17142_v12 = vmul.f32 0.5, %v6778_v2  ;;  %v7851_v57 = vmul.f32 %v7850_v1, %v17038_v26  ;;  %v17146_v25 = vadd.f32 %v16887_v45, %v6846_v42 }
 0x701   : > { %v10409_v51 = vpop.eup %10408  ;;  %v7804_v6 = vmul.f32 %v7803_v17, %v16958_v8  ;;  %v7877_v58 = vadd.f32 0.0036580483, %v7876_v56  ;;  %v7887_v13 = vmul.f32 %v7886_v37, %v17100_v60  ;;  %v17153_v52 = vmul.f32 0.70710677, %v17122_v63 }
 0x702   : > { %10047 = vmatmul.msk.f32.gmra.mxu3 %vm878_vm1, %v8284_v34  ;;  %v7816_v32 = vmul.f32 %v10409_v51, %v17105_v5  ;;  %v7824_v54 = vand.u32 2147483647, %v17105_v5  ;;  %v7842_v46 = vmul.f32 %v7841_v53, %v17038_v26  ;;  %v7852_v49 = vadd.f32 0.4994258, %v7851_v57 }
 0x703   : > { %v8527_v8 = vsel %vm666_vm0, %v17149_v55, 0.0  ;;  %v8650_v47 = vmul.f32 %v17149_v55, %v17149_v55  ;;  %v7878_v48 = vmul.f32 %v7877_v58, %v17100_v60  ;;  %v7888_v36 = vadd.f32 0.014752088, %v7887_v13 }
 0x704   : > { %v7817_v11 = vsub.f32 1.0, %v7816_v32  ;;  %v7826_v42 = vand.u32 2147483648, %v17105_v5  ;;  %v7853_v44 = vmul.f32 %v7852_v49, %v17038_v26  ;;  %8528 = vadd.xlane.f32.xlu2 %v8527_v8  ;;  %v7912_v2 = vmul.f32 %v17153_v52, %v17153_v52  ;;  %v17185_v8 = vpop.f32.mrf.mxu3 }
 0x705   : > { %v8694_v21 = vsel %vm666_vm0, %v8650_v47, 0.0  ;;  %v7879_v29 = vadd.f32 0.05243302, %v7878_v48  ;;  %v7889_v17 = vmul.f32 %v7888_v36, %v17100_v60  ;;  %v17171_v62 = vmul.f32 0.70710677, %v17146_v25 }
 0x706   : > { %v7818_v31 = vmul.f32 %v10409_v51, %v7817_v11  ;;  %vm7821_vm14 = vweird.f32 %v10409_v51  ;;  %v17173_v30 = vadd.f32 1.0, %v7853_v44  ;;  %8695 = vadd.xlane.f32.xlu1 %v8694_v21  ;;  %v17175_v53 = vmin.f32 %v7912_v2, 16.0 }
 0x707   : > { %v7843_v26 = vadd.f32 1.1283791, %v7842_v46  ;;  %v7880_v1 = vmul.f32 %v7879_v29, %v17100_v60  ;;  %v7890_v56 = vadd.f32 0.112945676, %v7889_v17  ;;  %v7952_v37 = vmul.f32 %v17171_v62, %v17171_v62 }
 0x708   : > { %v6780_v34 = vsub.f32 1.5, %v17142_v12  ;;  %v7819_v57 = vadd.f32 %v10409_v51, %v7818_v31  ;;  %vm7820_vm15 = vweird.f32 %v17105_v5  ;;  %10410 = vrcp.f32 %v17173_v30 }
 0x709   : > { %vm7822_vm2 = vmor %vm7820_vm15, %vm7821_vm14  ;;  %vm7825_vm3 = vcmp.eq.f32.partialorder %v7824_v54, 8.507059e+37  ;;  %v7827_v58 = vor.u32 1.1754944e-38, %v7826_v42  ;;  %v7891_v13 = vmul.f32 %v7890_v56, %v17100_v60  ;;  %v7914_v32 = vmul.f32 2.1237322e-06, %v17175_v53 }
 0x70a   : > { %v7823_v46 = vsel %vm7822_vm2, %v10409_v51, %v7819_v57  ;;  %v7881_v49 = vadd.f32 0.18741608, %v7880_v1  ;;  %v7925_v47 = vmul.f32 3.8918573e-05, %v17175_v53  ;;  %v17188_v48 = vmin.f32 %v7952_v37, 16.0 }
 0x70b   : > { %v7828_v36 = vsel %vm7825_vm3, %v7827_v58, %v7823_v46  ;;  %v7844_v5 = vmul.f32 %v7843_v26, %v17014_v20  ;;  %v7892_v11 = vadd.f32 0.4994258, %v7891_v13  ;;  %v6847_v54 = vmul.f32 %v16853_v41, %v16863_v33 }
 0x70c   : > { %v7829_v42 = vmul.f32 %v7828_v36, %v7804_v6  ;;  %v8530_v44 = vsel %vm666_vm0, %v17185_v8, 0.0  ;;  %v8651_v51 = vmul.f32 %v17185_v8, %v17185_v8  ;;  %v7915_v2 = vadd.f32 0.00028619796, %v7914_v32 }
 0x70d   : > { %v7893_v21 = vmul.f32 %v7892_v11, %v17100_v60  ;;  %8531 = vadd.xlane.f32.xlu0 %v8530_v44  ;;  %v7926_v29 = vadd.f32 0.001143296, %v7925_v47  ;;  %v7954_v17 = vmul.f32 2.1237322e-06, %v17188_v48  ;;  %v6848_v20 = vmul.f32 %v16853_v41, %v16947_v40 }
 0x70e   : > { %v10411_v31 = vpop.eup %10410  ;;  %v10016_v26 = vclamps-f32 %v7829_v42, 1.0  ;;  %v7882_v33 = vmul.f32 %v7881_v49, %v17100_v60  ;;  %v8697_v6 = vsel %vm666_vm0, %v8651_v51, 0.0  ;;  %v7916_v1 = vmul.f32 %v7915_v2, %v17175_v53 }
 0x70f   : > { %v7856_v56 = vmul.f32 %v10411_v31, %v17173_v30  ;;  %v7864_v37 = vand.u32 2147483647, %v17173_v30  ;;  %v17206_v57 = vadd.f32 1.0, %v7893_v21  ;;  %8698 = vadd.xlane.f32.xlu2 %v8697_v6  ;;  %v7965_v58 = vmul.f32 3.8918573e-05, %v17188_v48 }
 0x710   : > { %v8253_v13 = vadd.f32 1.0, %v10016_v26  ;;  %v7917_v32 = vadd.f32 0.0036580483, %v7916_v1  ;;  %v7927_v40 = vmul.f32 %v7926_v29, %v17175_v53  ;;  %v7955_v46 = vadd.f32 0.00028619796, %v7954_v17 }
 0x711   : > { %v7857_v47 = vsub.f32 1.0, %v7856_v56  ;;  %vm7860_vm4 = vweird.f32 %v17173_v30  ;;  %v7866_v60 = vand.u32 2147483648, %v17173_v30  ;;  %10412 = vrcp.f32 %v17206_v57 }
 0x712   : > { %v8285_v49 = vmul.f32 %v8253_v13, %v17050_v16  ;;  %v7883_v36 = vadd.f32 1.1283791, %v7882_v33  ;;  %v7918_v11 = vmul.f32 %v7917_v32, %v17175_v53  ;;  %v7928_v42 = vadd.f32 0.014752088, %v7927_v40 }
 0x713   : > { %v7858_v44 = vmul.f32 %v10411_v31, %v7857_v47  ;;  %vm7861_vm5 = vweird.f32 %v10411_v31  ;;  %v7956_v51 = vmul.f32 %v7955_v46, %v17188_v48  ;;  %v7966_v2 = vadd.f32 0.001143296, %v7965_v58 }
 0x714   : > { %10048 = vmatmul.msk.f32.gmra.mxu3 %vm878_vm1, %v8285_v49  ;;  %vm17217_vm6 = vcmp.eq.f32.partialorder %v7864_v37, 8.507059e+37  ;;  %v7919_v29 = vadd.f32 0.05243302, %v7918_v11  ;;  %v7929_v17 = vmul.f32 %v7928_v42, %v17175_v53  ;;  %v17223_v16 = vadd.f32 %v16887_v45, %v6847_v54  ;;  %vm7862_vm7 = vmor %vm7860_vm4, %vm7861_vm5 }
 0x715   : > { %v7859_v26 = vadd.f32 %v10411_v31, %v7858_v44  ;;  %v7867_v33 = vor.u32 1.1754944e-38, %v7866_v60  ;;  %v7957_v6 = vadd.f32 0.0036580483, %v7956_v51  ;;  %v7967_v1 = vmul.f32 %v7966_v2, %v17188_v48  ;;  %v17244_v2 = vpop.f32.mrf.mxu3 }
 0x716   : > { %v7884_v56 = vmul.f32 %v7883_v36, %v17073_v27  ;;  %v7920_v37 = vmul.f32 %v7919_v29, %v17175_v53  ;;  %v7930_v58 = vadd.f32 0.112945676, %v7929_v17  ;;  %v17231_v13 = vmul.f32 0.70710677, %v17223_v16 }
 0x717   : > { %v10413_v32 = vpop.eup %10412  ;;  %v7863_v40 = vsel %vm7862_vm7, %v10411_v31, %v7859_v26  ;;  %v7904_v54 = vand.u32 2147483647, %v17206_v57  ;;  %v7958_v46 = vmul.f32 %v7957_v6, %v17188_v48  ;;  %v7968_v47 = vadd.f32 0.014752088, %v7967_v1 }
 0x718   : > { %v7868_v60 = vsel %vm17217_vm6, %v7867_v33, %v7863_v40  ;;  %v7896_v30 = vmul.f32 %v10413_v32, %v17206_v57  ;;  %v7906_v27 = vand.u32 2147483648, %v17206_v57  ;;  %v17240_v49 = vadd.f32 %v16887_v45, %v6848_v20 }
 0x719   : > { %v7869_v36 = vmul.f32 %v7868_v60, %v7844_v5  ;;  %v7931_v11 = vmul.f32 %v7930_v58, %v17175_v53  ;;  %v7959_v42 = vadd.f32 0.05243302, %v7958_v46  ;;  %v7969_v31 = vmul.f32 %v7968_v47, %v17188_v48 }
 0x71a   : > { %v7897_v44 = vsub.f32 1.0, %v7896_v30  ;;  %vm7901_vm8 = vweird.f32 %v10413_v32  ;;  %v7921_v51 = vadd.f32 0.18741608, %v7920_v37  ;;  %v7992_v21 = vmul.f32 %v17231_v13, %v17231_v13 }
 0x71b   : > { %v10017_v29 = vclamps-f32 %v7869_v36, 1.0  ;;  %v7932_v17 = vadd.f32 0.4994258, %v7931_v11  ;;  %v8533_v20 = vsel %vm666_vm0, %v17244_v2, 0.0  ;;  %v8652_v5 = vmul.f32 %v17244_v2, %v17244_v2 }
 0x71c   : > { %v7898_v26 = vmul.f32 %v10413_v32, %v7897_v44  ;;  %8534 = vadd.xlane.f32.xlu1 %v8533_v20  ;;  %v7960_v33 = vmul.f32 %v7959_v42, %v17188_v48  ;;  %v7970_v6 = vadd.f32 0.112945676, %v7969_v31  ;;  %v17254_v1 = vmul.f32 0.70710677, %v17240_v49 }
 0x71d   : > { %v8254_v37 = vadd.f32 1.0, %v10017_v29  ;;  %v7933_v58 = vmul.f32 %v7932_v17, %v17175_v53  ;;  %v8700_v40 = vsel %vm666_vm0, %v8652_v5, 0.0  ;;  %v17258_v46 = vmin.f32 %v7992_v21, 16.0  ;;  %v17289_v17 = vpop.f32.mrf.mxu3 }
 0x71e   : > { %v7899_v47 = vadd.f32 %v10413_v32, %v7898_v26  ;;  %vm7900_vm13 = vweird.f32 %v17206_v57  ;;  %v7907_v60 = vor.u32 1.1754944e-38, %v7906_v27  ;;  %8701 = vadd.xlane.f32.xlu0 %v8700_v40  ;;  %v7971_v30 = vmul.f32 %v7970_v6, %v17188_v48 }
 0x71f   : > { %v8286_v36 = vmul.f32 %v8254_v37, %v17131_v23  ;;  %vm7902_vm9 = vmor %vm7900_vm13, %vm7901_vm8  ;;  %v7922_v11 = vmul.f32 %v7921_v51, %v17175_v53  ;;  %v17265_v42 = vadd.f32 1.0, %v7933_v58  ;;  %v7994_v31 = vmul.f32 2.1237322e-06, %v17258_v46 }
 0x720   : > { %v7903_v44 = vsel %vm7902_vm9, %v10413_v32, %v7899_v47  ;;  %vm7905_vm10 = vcmp.eq.f32.partialorder %v7904_v54, 8.507059e+37  ;;  %v7961_v21 = vadd.f32 0.18741608, %v7960_v33  ;;  %v7972_v29 = vadd.f32 0.4994258, %v7971_v30 }
 0x721   : > { %10049 = vmatmul.msk.f32.gmra.mxu3 %vm878_vm1, %v8286_v36  ;;  %v7908_v57 = vsel %vm7905_vm10, %v7907_v60, %v7903_v44  ;;  %10414 = vrcp.f32 %v17265_v42  ;;  %v8005_v27 = vmul.f32 3.8918573e-05, %v17258_v46  ;;  %v8032_v23 = vmul.f32 %v17254_v1, %v17254_v1 }
 0x722   : > { %v17281_v53 = vmul.f32 %v6775_v38, %v6432_v14  ;;  %v17286_v32 = vmul.f32 %v17078_v22, %v6780_v34  ;;  %v7909_v54 = vmul.f32 %v7908_v57, %v7884_v56  ;;  %v7973_v51 = vmul.f32 %v7972_v29, %v17188_v48 }
 0x723   : > { %v7923_v20 = vadd.f32 1.1283791, %v7922_v11  ;;  %v8653_v10 = vmul.f32 %v17289_v17, %v17289_v17  ;;  %v8536_v39 = vsel %vm666_vm0, %v17289_v17, 0.0  ;;  %v7995_v43 = vadd.f32 0.00028619796, %v7994_v31 }
 0x724   : > { %v10018_v14 = vclamps-f32 %v7909_v54, 1.0  ;;  %v7944_v0 = vand.u32 2147483647, %v17265_v42  ;;  %v7962_v3 = vmul.f32 %v7961_v21, %v17188_v48  ;;  %v17297_v38 = vadd.f32 1.0, %v7973_v51  ;;  %8537 = vadd.xlane.f32.xlu2 %v8536_v39 }
 0x725   : > { %v8703_v12 = vsel %vm666_vm0, %v8653_v10, 0.0  ;;  %v7996_v34 = vmul.f32 %v7995_v43, %v17258_v46  ;;  %v8006_v56 = vadd.f32 0.001143296, %v8005_v27  ;;  %v17301_v5 = vmin.f32 %v8032_v23, 16.0 }
 0x726   : > { %v8255_v26 = vadd.f32 1.0, %v10018_v14  ;;  %v17304_v33 = vmul.f32 0.5, %v17122_v63  ;;  %v7946_v6 = vand.u32 2147483648, %v17265_v42  ;;  %10416 = vrcp.f32 %v17297_v38  ;;  %8704 = vadd.xlane.f32.xlu1 %v8703_v12 }
 0x727   : > { %v10415_v48 = vpop.eup %10414  ;;  %v7924_v37 = vmul.f32 %v7923_v20, %v17153_v52  ;;  %v7997_v58 = vadd.f32 0.0036580483, %v7996_v34  ;;  %v8007_v40 = vmul.f32 %v8006_v56, %v17258_v46  ;;  %v8034_v47 = vmul.f32 2.1237322e-06, %v17301_v5 }
 0x728   : > { %v8287_v60 = vmul.f32 %v8255_v26, %v17138_v7  ;;  %v7936_v30 = vmul.f32 %v10415_v48, %v17265_v42  ;;  %vm7940_vm11 = vweird.f32 %v17265_v42  ;;  %v7963_v63 = vadd.f32 1.1283791, %v7962_v3 }
 0x729   : > { %vm17314_vm12 = vcmp.eq.f32.partialorder %v7944_v0, 8.507059e+37  ;;  %v7998_v11 = vmul.f32 %v7997_v58, %v17258_v46  ;;  %v8008_v31 = vadd.f32 0.014752088, %v8007_v40  ;;  %v8035_v52 = vadd.f32 0.00028619796, %v8034_v47  ;;  %v17340_v40 = vpop.f32.mrf.mxu3 }
 0x72a   : > { %10050 = vmatmul.msk.f32.gmra.mxu3 %vm878_vm1, %v8287_v60  ;;  %v7937_v44 = vsub.f32 1.0, %v7936_v30  ;;  %v7947_v21 = vor.u32 1.1754944e-38, %v7946_v6  ;;  %v8045_v29 = vmul.f32 3.8918573e-05, %v17301_v5  ;;  %v6849_v7 = vmul.f32 %v16853_v41, %v17019_v19 }
 0x72b   : > { %vm6783_vm14 = vweird.f32 %v17078_v22  ;;  %v7986_v57 = vand.u32 2147483648, %v17297_v38  ;;  %v7999_v27 = vadd.f32 0.05243302, %v7998_v11  ;;  %v8009_v23 = vmul.f32 %v8008_v31, %v17258_v46 }
 0x72c   : > { %v8036_v54 = vmul.f32 %v8035_v52, %v17301_v5  ;;  %v10417_v51 = vpop.eup %10416  ;;  %v7938_v20 = vmul.f32 %v10415_v48, %v7937_v44  ;;  %vm7941_vm15 = vweird.f32 %v10415_v48  ;;  %v8046_v10 = vadd.f32 0.001143296, %v8045_v29 }
 0x72d   : > { %v17328_v39 = vadd.f32 %v16887_v45, %v6849_v7  ;;  %vm6782_vm2 = vweird.f32 %v17035_v24  ;;  %v7964_v19 = vmul.f32 %v7963_v63, %v17171_v62  ;;  %v7976_v43 = vmul.f32 %v10417_v51, %v17297_v38  ;;  %vm7942_vm4 = vmor %vm7940_vm11, %vm7941_vm15 }
 0x72e   : > { %vm7980_vm3 = vweird.f32 %v17297_v38  ;;  %v8010_v14 = vadd.f32 0.112945676, %v8009_v23  ;;  %v7939_v0 = vadd.f32 %v10415_v48, %v7938_v20  ;;  %v7984_v3 = vand.u32 2147483647, %v17297_v38  ;;  %vm17367_vm8 = vmor %vm6782_vm2, %vm6783_vm14 }
 0x72f   : > { %v8037_v12 = vadd.f32 0.0036580483, %v8036_v54  ;;  %v8047_v34 = vmul.f32 %v8046_v10, %v17301_v5  ;;  %v7977_v56 = vsub.f32 1.0, %v7976_v43  ;;  %v7987_v26 = vor.u32 1.1754944e-38, %v7986_v57 }
 0x730   : > { %v8000_v6 = vmul.f32 %v7999_v27, %v17258_v46  ;;  %v8011_v62 = vmul.f32 %v8010_v14, %v17258_v46  ;;  %v7943_v58 = vsel %vm7942_vm4, %v10415_v48, %v7939_v0  ;;  %v17344_v30 = vmul.f32 0.70710677, %v17328_v39 }
 0x731   : > { %v8038_v47 = vmul.f32 %v8037_v12, %v17301_v5  ;;  %v8048_v60 = vadd.f32 0.014752088, %v8047_v34  ;;  %v7948_v63 = vsel %vm17314_vm12, %v7947_v21, %v7943_v58  ;;  %v7978_v42 = vmul.f32 %v10417_v51, %v7977_v56 }
 0x732   : > { %vm7981_vm5 = vweird.f32 %v10417_v51  ;;  %v8012_v11 = vadd.f32 0.4994258, %v8011_v62  ;;  %v7949_v31 = vmul.f32 %v7948_v63, %v7924_v37  ;;  %v8654_v52 = vmul.f32 %v17340_v40, %v17340_v40 }
 0x733   : > { %v8539_v48 = vsel %vm666_vm0, %v17340_v40, 0.0  ;;  %v8039_v44 = vadd.f32 0.05243302, %v8038_v47  ;;  %v7979_v29 = vadd.f32 %v10417_v51, %v7978_v42  ;;  %v8049_v57 = vmul.f32 %v8048_v60, %v17301_v5  ;;  %vm7982_vm6 = vmor %vm7980_vm3, %vm7981_vm5 }
 0x734   : > { %v8013_v7 = vmul.f32 %v8012_v11, %v17258_v46  ;;  %8540 = vadd.xlane.f32.xlu0 %v8539_v48  ;;  %v6850_v36 = vmul.f32 %v16853_v41, %v17068_v4  ;;  %v10019_v21 = vclamps-f32 %v7949_v31, 1.0  ;;  %v8001_v37 = vadd.f32 0.18741608, %v8000_v6 }
 0x735   : > { %v8706_v27 = vsel %vm666_vm0, %v8654_v52, 0.0  ;;  %v8072_v23 = vmul.f32 %v17344_v30, %v17344_v30  ;;  %v7983_v54 = vsel %vm7982_vm6, %v10417_v51, %v7979_v29  ;;  %vm7985_vm7 = vcmp.eq.f32.partialorder %v7984_v3, 8.507059e+37 }
 0x736   : > { %v17361_v20 = vadd.f32 1.0, %v8013_v7  ;;  %8707 = vadd.xlane.f32.xlu2 %v8706_v27  ;;  %v8050_v10 = vadd.f32 0.112945676, %v8049_v57  ;;  %v8256_v38 = vadd.f32 1.0, %v10019_v21  ;;  %v7988_v43 = vsel %vm7985_vm7, %v7987_v26, %v7983_v54 }
 0x737   : > { %v8040_v14 = vmul.f32 %v8039_v44, %v17301_v5  ;;  %v17372_v0 = vmin.f32 %v8072_v23, 16.0  ;;  %v6433_v51 = vsub.f32 %v15778_v15, %v16985_v9  ;;  %v6785_v3 = vsel %vm17367_vm8, %v17078_v22, %v17286_v32  ;;  %v17388_v9 = vpop.f32.mrf.mxu3 }
 0x738   : > { %v7989_v12 = vmul.f32 %v7988_v43, %v7964_v19  ;;  %10418 = vrcp.f32 %v17361_v20  ;;  %v8288_v24 = vmul.f32 %v8256_v38, %v17304_v33  ;;  %v8002_v34 = vmul.f32 %v8001_v37, %v17258_v46 }
 0x739   : > { %v8051_v56 = vmul.f32 %v8050_v10, %v17301_v5  ;;  %v17385_v26 = vadd.f32 %v16887_v45, %v6850_v36  ;;  %v6913_v6 = vmul.f32 0.5, %v17146_v25  ;;  %v8074_v62 = vmul.f32 2.1237322e-06, %v17372_v0 }
 0x73a   : > { %v10020_v15 = vclamps-f32 %v7989_v12, 1.0  ;;  %v8085_v22 = vmul.f32 3.8918573e-05, %v17372_v0  ;;  %10051 = vmatmul.msk.f32.gmra.mxu3 %vm878_vm1, %v8288_v24  ;;  %v8041_v32 = vadd.f32 0.18741608, %v8040_v14  ;;  %v8655_v46 = vmul.f32 %v17388_v9, %v17388_v9 }
 0x73b   : > { %v8052_v33 = vadd.f32 0.4994258, %v8051_v56  ;;  %v6851_v19 = vmul.f32 %v16853_v41, %v17281_v53  ;;  %v8542_v25 = vsel %vm666_vm0, %v17388_v9, 0.0  ;;  %v8075_v47 = vadd.f32 0.00028619796, %v8074_v62 }
 0x73c   : > { %v8257_v58 = vadd.f32 1.0, %v10020_v15  ;;  %v8086_v60 = vadd.f32 0.001143296, %v8085_v22  ;;  %v8003_v63 = vadd.f32 1.1283791, %v8002_v34  ;;  %8543 = vadd.xlane.f32.xlu1 %v8542_v25  ;;  %v8709_v11 = vsel %vm666_vm0, %v8655_v46, 0.0 }
 0x73d   : > { %v8053_v42 = vmul.f32 %v8052_v33, %v17301_v5  ;;  %v17402_v31 = vmul.f32 0.70710677, %v17385_v26  ;;  %v8024_v44 = vand.u32 2147483647, %v17361_v20  ;;  %8710 = vadd.xlane.f32.xlu0 %v8709_v11  ;;  %v8076_v41 = vmul.f32 %v8075_v47, %v17372_v0  ;;  %v10526_v62 = vld [vmem:[%s18238_s8] ss:$0 sm:$0xff] }
 0x73e   : > { %v10419_v52 = vpop.eup %10418  ;;  %v8289_v48 = vmul.f32 %v8257_v58, %v6913_v6  ;;  %v8087_v53 = vmul.f32 %v8086_v60, %v17372_v0  ;;  %v17413_v36 = vadd.f32 %v16887_v45, %v6851_v19  ;;  %v8026_v21 = vand.u32 2147483648, %v17361_v20 }
 0x73f   : > { %v8016_v29 = vmul.f32 %v10419_v52, %v17361_v20  ;;  %v17408_v7 = vadd.f32 1.0, %v8053_v42  ;;  %v8112_v57 = vmul.f32 %v17402_v31, %v17402_v31  ;;  %v8042_v37 = vmul.f32 %v8041_v32, %v17301_v5  ;;  %v17451_v42 = vpop.f32.mrf.mxu3 }
 0x740   : > { %v8077_v27 = vadd.f32 0.0036580483, %v8076_v41  ;;  %v8088_v23 = vadd.f32 0.014752088, %v8087_v53  ;;  %v6817_v54 = vmul.f32 %v6785_v3, %v6433_v51  ;;  %v17418_v10 = vmul.f32 0.5, %v17223_v16 }
 0x741   : > { %v8017_v4 = vsub.f32 1.0, %v8016_v29  ;;  %10420 = vrcp.f32 %v17408_v7  ;;  %v8004_v38 = vmul.f32 %v8003_v63, %v17231_v13  ;;  %v17424_v14 = vmin.f32 %v8112_v57, 16.0 }
 0x742   : > { %v8078_v43 = vmul.f32 %v8077_v27, %v17372_v0  ;;  %v8089_v45 = vmul.f32 %v8088_v23, %v17372_v0  ;;  %10052 = vmatmul.msk.f32.gmra.mxu3 %vm878_vm1, %v8289_v48  ;;  %vm8020_vm13 = vweird.f32 %v17361_v20  ;;  %vm8021_vm9 = vweird.f32 %v10419_v52 }
 0x743   : > { %v8018_v5 = vmul.f32 %v10419_v52, %v8017_v4  ;;  %v17429_v16 = vmul.f32 0.70710677, %v17413_v36  ;;  %vm17431_vm10 = vcmp.eq.f32.partialorder %v8024_v44, 8.507059e+37  ;;  %v8027_v13 = vor.u32 1.1754944e-38, %v8026_v21  ;;  %vm8022_vm11 = vmor %vm8020_vm13, %vm8021_vm9 }
 0x744   : > { %v8043_v3 = vadd.f32 1.1283791, %v8042_v37  ;;  %v8090_v12 = vadd.f32 0.112945676, %v8089_v45  ;;  %v8114_v34 = vmul.f32 2.1237322e-06, %v17424_v14  ;;  %vm8060_vm12 = vweird.f32 %v17408_v7 }
 0x745   : > { %v8019_v24 = vadd.f32 %v10419_v52, %v8018_v5  ;;  %v8125_v56 = vmul.f32 3.8918573e-05, %v17424_v14  ;;  %v8152_v6 = vmul.f32 %v17429_v16, %v17429_v16  ;;  %v8079_v20 = vadd.f32 0.05243302, %v8078_v43 }
 0x746   : > { %v8091_v15 = vmul.f32 %v8090_v12, %v17372_v0  ;;  %v6852_v22 = vmul.f32 %v10526_v62, %v6817_v54  ;;  %v8115_v46 = vadd.f32 0.00028619796, %v8114_v34  ;;  %v8064_v60 = vand.u32 2147483647, %v17408_v7  ;;  %v10527_v34 = vld [vmem:[%s18239_s9] ss:$0 sm:$0xff] }
 0x747   : > { %v10421_v32 = vpop.eup %10420  ;;  %v8023_v33 = vsel %vm8022_vm11, %v10419_v52, %v8019_v24  ;;  %v8126_v19 = vadd.f32 0.001143296, %v8125_v56  ;;  %v17444_v58 = vmin.f32 %v8152_v6, 16.0  ;;  %v8066_v63 = vand.u32 2147483648, %v17408_v7 }
 0x748   : > { %v8028_v25 = vsel %vm17431_vm10, %v8027_v13, %v8023_v33  ;;  %v8056_v47 = vmul.f32 %v10421_v32, %v17408_v7  ;;  %v8092_v48 = vadd.f32 0.4994258, %v8091_v15  ;;  %v8656_v52 = vmul.f32 %v17451_v42, %v17451_v42 }
 0x749   : > { %v8029_v11 = vmul.f32 %v8028_v25, %v8004_v38  ;;  %v8545_v44 = vsel %vm666_vm0, %v17451_v42, 0.0  ;;  %v8080_v53 = vmul.f32 %v8079_v20, %v17372_v0  ;;  %v8116_v29 = vmul.f32 %v8115_v46, %v17424_v14 }
 0x74a   : > { %v8057_v41 = vsub.f32 1.0, %v8056_v47  ;;  %8546 = vadd.xlane.f32.xlu2 %v8545_v44  ;;  %v8127_v57 = vmul.f32 %v8126_v19, %v17424_v14  ;;  %v8093_v37 = vmul.f32 %v8092_v48, %v17372_v0  ;;  %v8712_v27 = vsel %vm666_vm0, %v8656_v52, 0.0  ;;  %v17488_v48 = vpop.f32.mrf.mxu3 }
 0x74b   : > { %v10021_v21 = vclamps-f32 %v8029_v11, 1.0  ;;  %v8154_v23 = vmul.f32 2.1237322e-06, %v17444_v58  ;;  %vm8061_vm14 = vweird.f32 %v10421_v32  ;;  %8713 = vadd.xlane.f32.xlu1 %v8712_v27  ;;  %v8117_v4 = vadd.f32 0.0036580483, %v8116_v29 }
 0x74c   : > { %v8058_v54 = vmul.f32 %v10421_v32, %v8057_v41  ;;  %v8128_v38 = vadd.f32 0.014752088, %v8127_v57  ;;  %v17463_v45 = vadd.f32 1.0, %v8093_v37  ;;  %v8165_v51 = vmul.f32 3.8918573e-05, %v17444_v58  ;;  %vm8062_vm15 = vmor %vm8060_vm12, %vm8061_vm14 }
 0x74d   : > { %v8258_v43 = vadd.f32 1.0, %v10021_v21  ;;  %v8155_v5 = vadd.f32 0.00028619796, %v8154_v23  ;;  %v8081_v12 = vadd.f32 0.18741608, %v8080_v53  ;;  %v17470_v56 = vadd.f32 %v10527_v34, %v6852_v22 }
 0x74e   : > { %v8059_v13 = vadd.f32 %v10421_v32, %v8058_v54  ;;  %v8129_v24 = vmul.f32 %v8128_v38, %v17424_v14  ;;  %v8044_v20 = vmul.f32 %v8043_v3, %v17254_v1  ;;  %v8067_v15 = vor.u32 1.1754944e-38, %v8066_v63 }
 0x74f   : > { %v8290_v6 = vmul.f32 %v8258_v43, %v17418_v10  ;;  %10422 = vrcp.f32 %v17463_v45  ;;  %vm8065_vm2 = vcmp.eq.f32.partialorder %v8064_v60, 8.507059e+37  ;;  %v8118_v33 = vmul.f32 %v8117_v4, %v17424_v14 }
 0x750   : > { %v8063_v62 = vsel %vm8062_vm15, %v10421_v32, %v8059_v13  ;;  %v8130_v46 = vadd.f32 0.112945676, %v8129_v24  ;;  %v8156_v19 = vmul.f32 %v8155_v5, %v17444_v58  ;;  %v8166_v10 = vadd.f32 0.001143296, %v8165_v51 }
 0x751   : > { %10053 = vmatmul.msk.f32.gmra.mxu3 %vm878_vm1, %v8290_v6  ;;  %v8068_v22 = vsel %vm8065_vm2, %v8067_v15, %v8063_v62  ;;  %v8082_v1 = vmul.f32 %v8081_v12, %v17372_v0  ;;  %v17484_v3 = vmul.f32 0.70710677, %v17470_v56  ;;  %v6915_v47 = vmul.f32 0.5, %v17240_v49 }
 0x752   : > { %v8069_v25 = vmul.f32 %v8068_v22, %v8044_v20  ;;  %v8131_v7 = vmul.f32 %v8130_v46, %v17424_v14  ;;  %v8167_v32 = vmul.f32 %v8166_v10, %v17444_v58  ;;  %v8119_v63 = vadd.f32 0.05243302, %v8118_v33 }
 0x753   : > { %v8657_v44 = vmul.f32 %v17488_v48, %v17488_v48  ;;  %v8548_v0 = vsel %vm666_vm0, %v17488_v48, 0.0  ;;  %v8157_v41 = vadd.f32 0.0036580483, %v8156_v19  ;;  %v8083_v57 = vadd.f32 1.1283791, %v8082_v1 }
 0x754   : > { %v10022_v60 = vclamps-f32 %v8069_v25, 1.0  ;;  %v8132_v11 = vadd.f32 0.4994258, %v8131_v7  ;;  %v8168_v53 = vadd.f32 0.014752088, %v8167_v32  ;;  %8549 = vadd.xlane.f32.xlu0 %v8548_v0  ;;  %v8192_v49 = vmul.f32 %v17484_v3, %v17484_v3  ;;  %v17515_v7 = vpop.f32.mrf.mxu3 }
 0x755   : > { %v10423_v52 = vpop.eup %10422  ;;  %v8106_v37 = vand.u32 2147483648, %v17463_v45  ;;  %v8715_v23 = vsel %vm666_vm0, %v8657_v44, 0.0  ;;  %v8120_v43 = vmul.f32 %v8119_v63, %v17424_v14  ;;  %v8158_v51 = vmul.f32 %v8157_v41, %v17444_v58 }
 0x756   : > { %v8259_v29 = vadd.f32 1.0, %v10022_v60  ;;  %v8096_v21 = vmul.f32 %v10423_v52, %v17463_v45  ;;  %v8133_v27 = vmul.f32 %v8132_v11, %v17424_v14  ;;  %v8169_v54 = vmul.f32 %v8168_v53, %v17444_v58  ;;  %8716 = vadd.xlane.f32.xlu2 %v8715_v23 }
 0x757   : > { %v10779_v12 = vmov 32.0   ;;  %vm8101_vm3 = vweird.f32 %v10423_v52  ;;  %v8104_v34 = vand.u32 2147483647, %v17463_v45  ;;  %v17507_v6 = vmin.f32 %v8192_v49, 16.0 }
 0x758   : > { %v8291_v4 = vmul.f32 %v8259_v29, %v6915_v47  ;;  %v8097_v38 = vsub.f32 1.0, %v8096_v21  ;;  %v17502_v5 = vadd.f32 1.0, %v8133_v27  ;;  %v8170_v13 = vadd.f32 0.112945676, %v8169_v54 }
 0x759   : > { %10424 = vrcp.f32 %v10779_v12  ;;  %vm8100_vm4 = vweird.f32 %v17463_v45  ;;  %v8121_v15 = vadd.f32 0.18741608, %v8120_v43  ;;  %v8194_v33 = vmul.f32 2.1237322e-06, %v17507_v6 }
 0x75a   : > { %10054 = vmatmul.msk.f32.gmra.mxu3 %vm878_vm1, %v8291_v4  ;;  %v8098_v24 = vmul.f32 %v10423_v52, %v8097_v38  ;;  %10426 = vrcp.f32 %v17502_v5  ;;  %v8171_v62 = vmul.f32 %v8170_v13, %v17444_v58  ;;  %v8084_v46 = vmul.f32 %v8083_v57, %v17344_v30  ;;  %vm8102_vm5 = vmor %vm8100_vm4, %vm8101_vm3 }
 0x75b   : > { %v8107_v22 = vor.u32 1.1754944e-38, %v8106_v37  ;;  %v8159_v19 = vadd.f32 0.05243302, %v8158_v51  ;;  %v8205_v10 = vmul.f32 3.8918573e-05, %v17507_v6  ;;  %vm8105_vm6 = vcmp.eq.f32.partialorder %v8104_v34, 8.507059e+37 }
 0x75c   : > { %v8099_v20 = vadd.f32 %v10423_v52, %v8098_v24  ;;  %v8172_v1 = vadd.f32 0.4994258, %v8171_v62  ;;  %v8195_v45 = vadd.f32 0.00028619796, %v8194_v33  ;;  %v8658_v60 = vmul.f32 %v17515_v7, %v17515_v7 }
 0x75d   : > { %v8551_v63 = vsel %vm666_vm0, %v17515_v7, 0.0  ;;  %v8206_v30 = vadd.f32 0.001143296, %v8205_v10  ;;  %v8122_v44 = vmul.f32 %v8121_v15, %v17424_v14  ;;  %v8160_v53 = vmul.f32 %v8159_v19, %v17444_v58 }
 0x75e   : > { %v8103_v25 = vsel %vm8102_vm5, %v10423_v52, %v8099_v20  ;;  %v8173_v0 = vmul.f32 %v8172_v1, %v17444_v58  ;;  %8552 = vadd.xlane.f32.xlu1 %v8551_v63  ;;  %v8718_v29 = vsel %vm666_vm0, %v8658_v60, 0.0  ;;  %v8196_v57 = vmul.f32 %v8195_v45, %v17507_v6 }
 0x75f   : > { %v10425_v32 = vpop.eup %10424  ;;  %v8108_v47 = vsel %vm8105_vm6, %v8107_v22, %v8103_v25  ;;  %v8207_v21 = vmul.f32 %v8206_v30, %v17507_v6  ;;  %8719 = vadd.xlane.f32.xlu0 %v8718_v29  ;;  %v6916_v4 = vmul.f32 0.5, %v17328_v39  ;;  %v8123_v43 = vadd.f32 1.1283791, %v8122_v44  ;;  %v8511_v22 = vpop.xlane.xlu2 %8510 }
 0x760   : > { %v8109_v11 = vmul.f32 %v8108_v47, %v8084_v46  ;;  %v8606_v52 = vmul.f32 32.0, %v10425_v32  ;;  %v10427_v41 = vpop.eup %10426  ;;  %v17528_v27 = vadd.f32 1.0, %v8173_v0  ;;  %v8197_v23 = vadd.f32 0.0036580483, %v8196_v57  ;;  %v8678_v0 = vpop.xlane.xlu1 %8677 }
 0x761   : > { %v8136_v37 = vmul.f32 %v10427_v41, %v17502_v5  ;;  %v8208_v54 = vadd.f32 0.014752088, %v8207_v21  ;;  %v8144_v13 = vand.u32 2147483647, %v17502_v5  ;;  %v8146_v12 = vand.u32 2147483648, %v17502_v5 }
 0x762   : > { %v10023_v49 = vclamps-f32 %v8109_v11, 1.0  ;;  %v8607_v14 = vsub.f32 1.0, %v8606_v52  ;;  %v8161_v24 = vadd.f32 0.18741608, %v8160_v53  ;;  %10428 = vrcp.f32 %v17528_v27 }
 0x763   : > { %v8137_v51 = vsub.f32 1.0, %v8136_v37  ;;  %vm8141_vm7 = vweird.f32 %v10427_v41  ;;  %vm8610_vm8 = vweird.f32 %v10425_v32  ;;  %v8198_v62 = vmul.f32 %v8197_v23, %v17507_v6 }
 0x764   : > { %v8260_v38 = vadd.f32 1.0, %v10023_v49  ;;  %v8608_v15 = vmul.f32 %v10425_v32, %v8607_v14  ;;  %v8209_v33 = vmul.f32 %v8208_v54, %v17507_v6  ;;  %vm8140_vm13 = vweird.f32 %v17502_v5  ;;  %v17555_v54 = vpop.f32.mrf.mxu3 }
 0x765   : > { %v8138_v20 = vmul.f32 %v10427_v41, %v8137_v51  ;;  %v8124_v19 = vmul.f32 %v8123_v43, %v17402_v31  ;;  %vm8142_vm9 = vmor %vm8140_vm13, %vm8141_vm7  ;;  %v8147_v10 = vor.u32 1.1754944e-38, %v8146_v12  ;;  %vm8145_vm10 = vcmp.eq.f32.partialorder %v8144_v13, 8.507059e+37  ;;  %v8514_v43 = vpop.xlane.xlu0 %8513 }
 0x766   : > { %v8292_v34 = vmul.f32 %v8260_v38, %v6916_v4  ;;  %v8609_v46 = vadd.f32 %v10425_v32, %v8608_v15  ;;  %v8210_v25 = vadd.f32 0.112945676, %v8209_v33  ;;  %v8162_v45 = vmul.f32 %v8161_v24, %v17444_v58 }
 0x767   : > { %v8139_v39 = vadd.f32 %v10427_v41, %v8138_v20  ;;  %v8199_v11 = vadd.f32 0.05243302, %v8198_v62  ;;  %v6917_v52 = vmul.f32 0.5, %v17385_v26  ;;  %v8184_v21 = vand.u32 2147483647, %v17528_v27  ;;  %v8681_v62 = vpop.xlane.xlu2 %8680 }
 0x768   : > { %10055 = vmatmul.msk.f32.gmra.mxu3 %vm878_vm1, %v8292_v34  ;;  %v17540_v47 = vsel %vm8610_vm8, %v10425_v32, %v8609_v46  ;;  %v10429_v60 = vpop.eup %10428  ;;  %v8211_v5 = vmul.f32 %v8210_v25, %v17507_v6  ;;  %v8163_v29 = vadd.f32 1.1283791, %v8162_v45  ;;  %v8186_v49 = vand.u32 2147483648, %v17528_v27 }
 0x769   : > { %v8143_v1 = vsel %vm8142_vm9, %v10427_v41, %v8139_v39  ;;  %v17543_v30 = vmul.f32 %v17540_v47, %v8511_v22  ;;  %v8176_v31 = vmul.f32 %v10429_v60, %v17528_v27  ;;  %v8772_v32 = vmul.f32 %v8678_v0, %v17540_v47 }
 0x76a   : > { %v8148_v63 = vsel %vm8145_vm10, %v8147_v10, %v8143_v1  ;;  %v8212_v58 = vadd.f32 0.4994258, %v8211_v5  ;;  %v8200_v37 = vmul.f32 %v8199_v11, %v17507_v6  ;;  %vm8181_vm11 = vweird.f32 %v10429_v60  ;;  %v8517_v11 = vpop.xlane.xlu1 %8516 }
 0x76b   : > { %v8149_v44 = vmul.f32 %v8148_v63, %v8124_v19  ;;  %v8804_v41 = vmul.f32 %v17543_v30, %v17543_v30  ;;  %v8177_v57 = vsub.f32 1.0, %v8176_v31  ;;  %v8659_v38 = vmul.f32 %v17555_v54, %v17555_v54 }
 0x76c   : > { %v8213_v14 = vmul.f32 %v8212_v58, %v17507_v6  ;;  %v8554_v12 = vsel %vm666_vm0, %v17555_v54, 0.0  ;;  %v17564_v24 = vmul.f32 %v17540_v47, %v8514_v43  ;;  %vm8180_vm12 = vweird.f32 %v17528_v27  ;;  %v17578_v63 = vpop.f32.mrf.mxu3 }
 0x76d   : > { %v10024_v53 = vclamps-f32 %v8149_v44, 1.0  ;;  %v8836_v23 = vsub.f32 %v8772_v32, %v8804_v41  ;;  %v8178_v4 = vmul.f32 %v10429_v60, %v8177_v57  ;;  %8555 = vadd.xlane.f32.xlu2 %v8554_v12  ;;  %v8721_v15 = vsel %vm666_vm0, %v8659_v38, 0.0  ;;  %vm8182_vm14 = vmor %vm8180_vm12, %vm8181_vm11  ;;  %v8684_v0 = vpop.xlane.xlu0 %8683 }
 0x76e   : > { %v17559_v51 = vadd.f32 1.0, %v8213_v14  ;;  %v8164_v33 = vmul.f32 %v8163_v29, %v17429_v16  ;;  %v8187_v39 = vor.u32 1.1754944e-38, %v8186_v49  ;;  %v8201_v46 = vadd.f32 0.18741608, %v8200_v37  ;;  %8722 = vadd.xlane.f32.xlu1 %v8721_v15 }
 0x76f   : > { %v8261_v26 = vadd.f32 1.0, %v10024_v53  ;;  %v8868_v13 = vmax.f32 %v8836_v23, 0.0  ;;  %v8179_v20 = vadd.f32 %v10429_v60, %v8178_v4  ;;  %vm8185_vm15 = vcmp.eq.f32.partialorder %v8184_v21, 8.507059e+37 }
 0x770   : > { %10430 = vrcp.f32 %v17559_v51  ;;  %v8805_v27 = vmul.f32 %v17564_v24, %v17564_v24  ;;  %v8773_v25 = vmul.f32 %v8681_v62, %v17540_v47  ;;  %v8202_v16 = vmul.f32 %v8201_v46, %v17507_v6 }
 0x771   : > { %v8293_v34 = vmul.f32 %v8261_v26, %v6917_v52  ;;  %v8183_v22 = vsel %vm8182_vm14, %v10429_v60, %v8179_v20  ;;  %v17571_v19 = vadd.f32 1e-06, %v8868_v13  ;;  %v8660_v60 = vmul.f32 %v17578_v63, %v17578_v63  ;;  %v8520_v13 = vpop.xlane.xlu2 %8519 }
 0x772   : > { %v8188_v10 = vsel %vm8185_vm15, %v8187_v39, %v8183_v22  ;;  %v8837_v45 = vsub.f32 %v8773_v25, %v8805_v27  ;;  %v8557_v44 = vsel %vm666_vm0, %v17578_v63, 0.0  ;;  %v17585_v31 = vmul.f32 %v17540_v47, %v8517_v11  ;;  %v8687_v62 = vpop.xlane.xlu1 %8686 }
 0x773   : > { %10056 = vmatmul.msk.f32.gmra.mxu3 %vm878_vm1, %v8293_v34  ;;  %v8189_v1 = vmul.f32 %v8188_v10, %v8164_v33  ;;  %10432 = vrsqrt.f32 %v17571_v19  ;;  %v6918_v41 = vmul.f32 0.5, %v17413_v36  ;;  %8558 = vadd.xlane.f32.xlu0 %v8557_v44  ;;  %v8724_v53 = vsel %vm666_vm0, %v8660_v60, 0.0 }
 0x774   : > { %v8869_v58 = vmax.f32 %v8837_v45, 0.0  ;;  %v8774_v29 = vmul.f32 %v8684_v0, %v17540_v47  ;;  %v8203_v57 = vadd.f32 1.1283791, %v8202_v16  ;;  %v8806_v49 = vmul.f32 %v17585_v31, %v17585_v31  ;;  %v17602_v20 = vpop.f32.mrf.mxu3 }
 0x775   : > { %v10025_v5 = vclamps-f32 %v8189_v1, 1.0  ;;  %8725 = vadd.xlane.f32.xlu2 %v8724_v53  ;;  %v8226_v36 = vand.u32 2147483648, %v17559_v51  ;;  %v8224_v38 = vand.u32 2147483647, %v17559_v51  ;;  %vm8220_vm3 = vweird.f32 %v17559_v51  ;;  %v8523_v44 = vpop.xlane.xlu0 %8522 }
 0x776   : > { %v10431_v52 = vpop.eup %10430  ;;  %v17591_v21 = vadd.f32 1e-06, %v8869_v58  ;;  %v8838_v43 = vsub.f32 %v8774_v29, %v8806_v49  ;;  %v8204_v12 = vmul.f32 %v8203_v57, %v17484_v3  ;;  %v17605_v15 = vmul.f32 %v17540_v47, %v8520_v13  ;;  %v17628_v29 = vld [vmem:[%s18240_s10] ss:$0 sm:$0xff] }
 0x777   : > { %v8262_v6 = vadd.f32 1.0, %v10025_v5  ;;  %v8216_v32 = vmul.f32 %v10431_v52, %v17559_v51  ;;  %vm8221_vm2 = vweird.f32 %v10431_v52  ;;  %v8661_v46 = vmul.f32 %v17602_v20, %v17602_v20 }
 0x778   : > { %10434 = vrsqrt.f32 %v17591_v21  ;;  %v8870_v39 = vmax.f32 %v8838_v43, 0.0  ;;  %v8560_v22 = vsel %vm666_vm0, %v17602_v20, 0.0  ;;  %vm8222_vm4 = vmor %vm8220_vm3, %vm8221_vm2  ;;  %v8227_v27 = vor.u32 1.1754944e-38, %v8226_v36 }
 0x779   : > { %v10433_v37 = vpop.eup %10432  ;;  %v8294_v14 = vmul.f32 %v8262_v6, %v6918_v41  ;;  %v8217_v23 = vsub.f32 1.0, %v8216_v32  ;;  %8561 = vadd.xlane.f32.xlu1 %v8560_v22  ;;  %v8807_v51 = vmul.f32 %v17605_v15, %v17605_v15  ;;  %v8775_v10 = vmul.f32 %v8687_v62, %v17540_v47  ;;  %v8690_v49 = vpop.xlane.xlu2 %8689 }
 0x77a   : > { %v8965_v26 = vmul.f32 %v10433_v37, %v17571_v19  ;;  %vm8225_vm5 = vcmp.eq.f32.partialorder %v8224_v38, 8.507059e+37  ;;  %v17614_v1 = vadd.f32 1e-06, %v8870_v39  ;;  %v8727_v16 = vsel %vm666_vm0, %v8661_v46, 0.0  ;;  %v8526_v22 = vpop.xlane.xlu1 %8525 }
 0x77b   : > { %10057 = vmatmul.msk.f32.gmra.mxu3 %vm878_vm1, %v8294_v14  ;;  %v8218_v4 = vmul.f32 %v10431_v52, %v8217_v23  ;;  %vm8971_vm6 = vweird.f32 %v10433_v37  ;;  %8728 = vadd.xlane.f32.xlu0 %v8727_v16  ;;  %v8839_v60 = vsub.f32 %v8775_v10, %v8807_v51  ;;  %vm8970_vm7 = vweird.f32 %v17571_v19 }
 0x77c   : > { %v8966_v34 = vmul.f32 %v10433_v37, %v8965_v26  ;;  %10436 = vrsqrt.f32 %v17614_v1  ;;  %v17621_v6 = vmul.f32 %v17540_v47, %v8523_v44  ;;  %v8900_v32 = vsub.f32 %v16615_v28, %v17543_v30  ;;  %vm8972_vm8 = vmor %vm8970_vm7, %vm8971_vm6  ;;  %v17633_v36 = vpop.f32.mrf.mxu3  ;;  %v17640_v30 = vld [vmem:[%s18827_s30] ss:$0 sm:$0xff] }
 0x77d   : > { %v8219_v33 = vadd.f32 %v10431_v52, %v8218_v4  ;;  %v6919_v14 = vmul.f32 0.5, %v17470_v56  ;;  %v8662_v43 = vmul.f32 %v17633_v36, %v17633_v36  ;;  %v8563_v56 = vsel %vm666_vm0, %v17633_v36, 0.0 }
 0x77e   : > { %v8967_v3 = vmul.f32 0.5, %v8966_v34  ;;  %v10435_v45 = vpop.eup %10434  ;;  %v8808_v26 = vmul.f32 %v17621_v6, %v17621_v6  ;;  %8564 = vadd.xlane.f32.xlu2 %v8563_v56  ;;  %vm8980_vm9 = vweird.f32 %v17591_v21  ;;  %v17655_v10 = vmul.f32 %v17540_v47, %v8526_v22 }
 0x77f   : > { %v8223_v25 = vsel %vm8222_vm4, %v10431_v52, %v8219_v33  ;;  %v8975_v41 = vmul.f32 %v10435_v45, %v17591_v21  ;;  %v8871_v52 = vmax.f32 %v8839_v60, 0.0  ;;  %vm8981_vm13 = vweird.f32 %v10435_v45 }
 0x780   : > { %v8228_v11 = vsel %vm8225_vm5, %v8227_v27, %v8223_v25  ;;  %v8968_v5 = vsub.f32 1.5, %v8967_v3  ;;  %v8730_v33 = vsel %vm666_vm0, %v8662_v43, 0.0  ;;  %v8693_v27 = vpop.xlane.xlu0 %8692  ;;  %v8901_v25 = vsub.f32 %v16717_v35, %v17564_v24  ;;  %vm8982_vm10 = vmor %vm8980_vm9, %vm8981_vm13 }
 0x781   : > { %v8229_v0 = vmul.f32 %v8228_v11, %v8204_v12  ;;  %v8976_v57 = vmul.f32 %v10435_v45, %v8975_v41  ;;  %v17631_v19 = vadd.f32 1e-06, %v8871_v52  ;;  %8731 = vadd.xlane.f32.xlu1 %v8730_v33  ;;  %v8777_v41 = vmul.f32 %v8693_v27, %v17540_v47 }
 0x782   : > { %v8969_v58 = vmul.f32 %v10433_v37, %v8968_v5  ;;  %v10437_v13 = vpop.eup %10436  ;;  %v10528_v5 = vld [vmem:[%s10994_s21] sm:$0xff]  ;;  %vm8990_vm11 = vweird.f32 %v17614_v1  ;;  %v8696_v43 = vpop.xlane.xlu1 %8695  ;;  %v8902_v56 = vsub.f32 %v16818_v50, %v17585_v31 }
 0x783   : > { %v10026_v53 = vclamps-f32 %v8229_v0, 1.0  ;;  %v8977_v38 = vmul.f32 0.5, %v8976_v57  ;;  %10438 = vrsqrt.f32 %v17631_v19  ;;  %v8985_v39 = vmul.f32 %v10437_v13, %v17614_v1 }
 0x784   : > { %v8973_v23 = vsel %vm8972_vm8, %v10433_v37, %v8969_v58  ;;  %v8776_v37 = vmul.f32 %v8690_v49, %v17540_v47  ;;  %v8809_v0 = vmul.f32 %v17655_v10, %v17655_v10  ;;  %vm9000_vm15 = vweird.f32 %v17631_v19 }
 0x785   : > { %v8263_v28 = vadd.f32 1.0, %v10026_v53  ;;  %v9284_v4 = vmul.f32 %v8973_v23, %v8900_v32  ;;  %v8978_v62 = vsub.f32 1.5, %v8977_v38  ;;  %v8986_v16 = vmul.f32 %v10437_v13, %v8985_v39  ;;  %v17666_v53 = vpop.f32.mrf.mxu3  ;;  %v8529_v38 = vpop.xlane.xlu2 %8528 }
 0x786   : > { %v8840_v46 = vsub.f32 %v8776_v37, %v8808_v26  ;;  %v8663_v24 = vmul.f32 %v17666_v53, %v17666_v53  ;;  %v8841_v26 = vsub.f32 %v8777_v41, %v8809_v0 }
 0x787   : > { %v8295_v12 = vmul.f32 %v8263_v28, %v6919_v14  ;;  %v9319_v34 = vmul.f32 %v17628_v29, %v9284_v4  ;;  %v8979_v51 = vmul.f32 %v10435_v45, %v8978_v62  ;;  %v8987_v52 = vmul.f32 0.5, %v8986_v16  ;;  %v10529_v62 = vld [vmem:[%s10994_s21 + $0x8] sm:$0xff] }
 0x788   : > { %v8872_v11 = vmax.f32 %v8840_v46, 0.0  ;;  %v8733_v23 = vsel %vm666_vm0, %v8663_v24, 0.0  ;;  %v8778_v46 = vmul.f32 %v8696_v43, %v17540_v47  ;;  %v8903_v16 = vsub.f32 %v16896_v18, %v17605_v15  ;;  %v8532_v41 = vpop.xlane.xlu0 %8531 }
 0x789   : > { %10058 = vmatmul.msk.f32.gmra.mxu3 %vm878_vm1, %v8295_v12  ;;  %v9354_v3 = vadd.f32 %v17640_v30, %v9319_v34  ;;  %v8983_v44 = vsel %vm8982_vm10, %v10435_v45, %v8979_v51  ;;  %v10439_v21 = vpop.eup %10438  ;;  %v8566_v45 = vsel %vm666_vm0, %v17666_v53, 0.0  ;;  %v8988_v49 = vsub.f32 1.5, %v8987_v52  ;;  %8734 = vadd.xlane.f32.xlu2 %v8733_v23 }
 0x78a   : > { %v9285_v58 = vmul.f32 %v8983_v44, %v8901_v25  ;;  %v17664_v32 = vadd.f32 1e-06, %v8872_v11  ;;  %v8995_v35 = vmul.f32 %v10439_v21, %v17631_v19  ;;  %vm8991_vm1 = vweird.f32 %v10437_v13  ;;  %8567 = vadd.xlane.f32.xlu0 %v8566_v45 }
 0x78b   : > { %v9386_v60 = vadd.f32 %v10528_v5, %v9354_v3  ;;  %v8989_v4 = vmul.f32 %v10437_v13, %v8988_v49  ;;  %vm8992_vm12 = vmor %vm8990_vm11, %vm8991_vm1  ;;  %v8873_v12 = vmax.f32 %v8841_v26, 0.0  ;;  %v17687_v34 = vmul.f32 %v17540_v47, %v8529_v38 }
 0x78c   : > { %v9320_v57 = vmul.f32 %v17628_v29, %v9285_v58  ;;  %10440 = vrsqrt.f32 %v17664_v32  ;;  %v8996_v14 = vmul.f32 %v10439_v21, %v8995_v35  ;;  %vm9001_vm14 = vweird.f32 %v10439_v21  ;;  %v10530_v35 = vld [vmem:[%s10994_s21 + $0x10] sm:$0xff] }
 0x78d   : > { %9418 = vst.msk [vmem:[%s17670_s13] sm:$0xff] %vm666_vm0, %v9386_v60  ;;  %v8993_v39 = vsel %vm8992_vm12, %v10437_v13, %v8989_v4  ;;  %v17691_v27 = vadd.f32 1e-06, %v8873_v12  ;;  %v8810_v3 = vmul.f32 %v17687_v34, %v17687_v34  ;;  %v17697_v31 = vpop.f32.mrf.mxu3  ;;  %vm9002_vm2 = vmor %vm9000_vm15, %vm9001_vm14  ;;  %v17712_v15 = vmul.f32 %v17540_v47, %v8532_v41  ;;  %v8699_v52 = vpop.xlane.xlu2 %8698 }
 0x78e   : > { %v9355_v28 = vadd.f32 %v17640_v30, %v9320_v57  ;;  %v8997_v37 = vmul.f32 0.5, %v8996_v14  ;;  %v9286_v1 = vmul.f32 %v8993_v39, %v8902_v56  ;;  %v8664_v11 = vmul.f32 %v17697_v31, %v17697_v31 }
 0x78f   : > { %10442 = vrsqrt.f32 %v17691_v27  ;;  %v8569_v5 = vsel %vm666_vm0, %v17697_v31, 0.0  ;;  %v8842_v19 = vsub.f32 %v8778_v46, %v8810_v3  ;;  %v8779_v49 = vmul.f32 %v8699_v52, %v17540_v47  ;;  %v8535_v12 = vpop.xlane.xlu1 %8534 }
 0x790   : > { %v9387_v33 = vadd.f32 %v10529_v62, %v9355_v28  ;;  %v8998_v22 = vsub.f32 1.5, %v8997_v37  ;;  %v9321_v51 = vmul.f32 %v17628_v29, %v9286_v1  ;;  %8570 = vadd.xlane.f32.xlu1 %v8569_v5  ;;  %v8736_v18 = vsel %vm666_vm0, %v8664_v11, 0.0  ;;  %v10531_v62 = vld [vmem:[%s10994_s21 + $0x18] sm:$0xff] }
 0x791   : > { %v8874_v57 = vmax.f32 %v8842_v19, 0.0  ;;  %v8811_v14 = vmul.f32 %v17712_v15, %v17712_v15  ;;  %vm9010_vm4 = vweird.f32 %v17664_v32  ;;  %v8904_v39 = vsub.f32 %v16979_v61, %v17621_v6 }
 0x792   : > { %v10441_v50 = vpop.eup %10440  ;;  %9419 = vst.msk [vmem:[%s17670_s13 + $0x8] sm:$0xff] %vm666_vm0, %v9387_v33  ;;  %v8999_v25 = vmul.f32 %v10439_v21, %v8998_v22  ;;  %v9356_v60 = vadd.f32 %v17640_v30, %v9321_v51  ;;  %8737 = vadd.xlane.f32.xlu0 %v8736_v18  ;;  %v17737_v51 = vmul.f32 %v17540_v47, %v8535_v12  ;;  %vm9020_vm7 = vweird.f32 %v17691_v27 }
 0x793   : > { %v9005_v13 = vmul.f32 %v10441_v50, %v17664_v32  ;;  %vm9011_vm3 = vweird.f32 %v10441_v50  ;;  %v17721_v26 = vadd.f32 1e-06, %v8874_v57  ;;  %v8843_v43 = vsub.f32 %v8779_v49, %v8811_v14 }
 0x794   : > { %v9003_v44 = vsel %vm9002_vm2, %v10439_v21, %v8999_v25  ;;  %v9388_v24 = vadd.f32 %v10530_v35, %v9356_v60  ;;  %vm9012_vm5 = vmor %vm9010_vm4, %vm9011_vm3  ;;  %v8702_v25 = vpop.xlane.xlu0 %8701 }
 0x795   : > { %v9006_v0 = vmul.f32 %v10441_v50, %v9005_v13  ;;  %v9287_v58 = vmul.f32 %v9003_v44, %v8903_v16  ;;  %v10443_v28 = vpop.eup %10442  ;;  %10444 = vrsqrt.f32 %v17721_v26  ;;  %v8875_v3 = vmax.f32 %v8843_v43, 0.0 }
 0x796   : > { %9420 = vst.msk [vmem:[%s17670_s13 + $0x10] sm:$0xff] %vm666_vm0, %v9388_v24  ;;  %v9015_v37 = vmul.f32 %v10443_v28, %v17691_v27  ;;  %v8780_v6 = vmul.f32 %v8702_v25, %v17540_v47  ;;  %vm9021_vm6 = vweird.f32 %v10443_v28  ;;  %v8905_v27 = vsub.f32 %v17081_v59, %v17655_v10 }
 0x797   : > { %v9007_v45 = vmul.f32 0.5, %v9006_v0  ;;  %v9322_v21 = vmul.f32 %v17628_v29, %v9287_v58  ;;  %v17724_v38 = vpop.f32.mrf.mxu3  ;;  %v17743_v11 = vadd.f32 1e-06, %v8875_v3  ;;  %v8538_v19 = vpop.xlane.xlu2 %8537  ;;  %vm9022_vm8 = vmor %vm9020_vm7, %vm9021_vm6  ;;  %vm9030_vm9 = vweird.f32 %v17721_v26 }
 0x798   : > { %v8665_v46 = vmul.f32 %v17724_v38, %v17724_v38  ;;  %v8572_v1 = vsel %vm666_vm0, %v17724_v38, 0.0  ;;  %v9016_v32 = vmul.f32 %v10443_v28, %v9015_v37  ;;  %v17755_v52 = vmul.f32 %v17540_v47, %v8538_v19 }
 0x799   : > { %v9008_v23 = vsub.f32 1.5, %v9007_v45  ;;  %v9357_v4 = vadd.f32 %v17640_v30, %v9322_v21  ;;  %8573 = vadd.xlane.f32.xlu2 %v8572_v1  ;;  %10446 = vrsqrt.f32 %v17743_v11  ;;  %v8705_v49 = vpop.xlane.xlu1 %8704  ;;  %v10532_v21 = vld [vmem:[%s10994_s21 + $0x20] sm:$0xff]  ;;  %vm9040_vm11 = vweird.f32 %v17743_v11 }
 0x79a   : > { %v8739_v61 = vsel %vm666_vm0, %v8665_v46, 0.0  ;;  %v9017_v16 = vmul.f32 0.5, %v9016_v32  ;;  %v8781_v12 = vmul.f32 %v8705_v49, %v17540_v47 }
 0x79b   : > { %v9009_v56 = vmul.f32 %v10441_v50, %v9008_v23  ;;  %v9389_v33 = vadd.f32 %v10531_v62, %v9357_v4  ;;  %8740 = vadd.xlane.f32.xlu1 %v8739_v61  ;;  %v10445_v60 = vpop.eup %10444  ;;  %v8813_v4 = vmul.f32 %v17755_v52, %v17755_v52 }
 0x79c   : > { %v9018_v44 = vsub.f32 1.5, %v9017_v16  ;;  %v9025_v58 = vmul.f32 %v10445_v60, %v17721_v26  ;;  %vm9031_vm13 = vweird.f32 %v10445_v60 }
 0x79d   : > { %v9013_v22 = vsel %vm9012_vm5, %v10441_v50, %v9009_v56  ;;  %9421 = vst.msk [vmem:[%s17670_s13 + $0x18] sm:$0xff] %vm666_vm0, %v9389_v33  ;;  %v8812_v50 = vmul.f32 %v17737_v51, %v17737_v51  ;;  %v8845_v10 = vsub.f32 %v8781_v12, %v8813_v4  ;;  %vm9032_vm10 = vmor %vm9030_vm9, %vm9031_vm13 }
 0x79e   : > { %v9288_v13 = vmul.f32 %v9013_v22, %v8904_v39  ;;  %v9019_v35 = vmul.f32 %v10443_v28, %v9018_v44  ;;  %v9026_v23 = vmul.f32 %v10445_v60, %v9025_v58  ;;  %v8906_v22 = vsub.f32 %v17149_v55, %v17687_v34  ;;  %v10533_v44 = vld [vmem:[%s10994_s21 + $0x28] sm:$0xff] }
 0x79f   : > { %v8844_v0 = vsub.f32 %v8780_v6, %v8812_v50  ;;  %v10447_v59 = vpop.eup %10446  ;;  %v8877_v32 = vmax.f32 %v8845_v10, 0.0 }
 0x7a0   : > { %v9323_v5 = vmul.f32 %v17628_v29, %v9288_v13  ;;  %v9023_v43 = vsel %vm9022_vm8, %v10443_v28, %v9019_v35  ;;  %v9027_v33 = vmul.f32 0.5, %v9026_v23  ;;  %v9035_v28 = vmul.f32 %v10447_v59, %v17743_v11 }
 0x7a1   : > { %v8876_v57 = vmax.f32 %v8844_v0, 0.0  ;;  %v9289_v62 = vmul.f32 %v9023_v43, %v8905_v27  ;;  %v17790_v26 = vadd.f32 1e-06, %v8877_v32  ;;  %vm9041_vm1 = vweird.f32 %v10447_v59 }
 0x7a2   : > { %v9358_v41 = vadd.f32 %v17640_v30, %v9323_v5  ;;  %v9028_v1 = vsub.f32 1.5, %v9027_v33  ;;  %v9036_v6 = vmul.f32 %v10447_v59, %v9035_v28  ;;  %vm9042_vm12 = vmor %vm9040_vm11, %vm9041_vm1 }
 0x7a3   : > { %v17768_v37 = vadd.f32 1e-06, %v8876_v57  ;;  %v9324_v46 = vmul.f32 %v17628_v29, %v9289_v62  ;;  %v8907_v62 = vsub.f32 %v17185_v8, %v17712_v15  ;;  %vm9060_vm4 = vweird.f32 %v17790_v26 }
 0x7a4   : > { %v17752_v18 = vpop.f32.mrf.mxu3  ;;  %v9390_v14 = vadd.f32 %v10532_v21, %v9358_v41  ;;  %v9029_v61 = vmul.f32 %v10445_v60, %v9028_v1  ;;  %v9037_v41 = vmul.f32 0.5, %v9036_v6  ;;  %v10534_v1 = vld [vmem:[%s10994_s21 + $0x30] sm:$0xff] }
 0x7a5   : > { %v8666_v24 = vmul.f32 %v17752_v18, %v17752_v18  ;;  %v8575_v45 = vsel %vm666_vm0, %v17752_v18, 0.0  ;;  %10448 = vrsqrt.f32 %v17768_v37  ;;  %v9359_v13 = vadd.f32 %v17640_v30, %v9324_v46 }
 0x7a6   : > { %8576 = vadd.xlane.f32.xlu0 %v8575_v45  ;;  %9422 = vst.msk [vmem:[%s17670_s13 + $0x20] sm:$0xff] %vm666_vm0, %v9390_v14  ;;  %v9033_v19 = vsel %vm9032_vm10, %v10445_v60, %v9029_v61  ;;  %10450 = vrsqrt.f32 %v17790_v26  ;;  %v9038_v45 = vsub.f32 1.5, %v9037_v41  ;;  %vm9050_vm15 = vweird.f32 %v17768_v37 }
 0x7a7   : > { %v8742_v56 = vsel %vm666_vm0, %v8666_v24, 0.0  ;;  %v8541_v39 = vpop.xlane.xlu0 %8540  ;;  %v9391_v0 = vadd.f32 %v10533_v44, %v9359_v13  ;;  %v9290_v35 = vmul.f32 %v9033_v19, %v8906_v22 }
 0x7a8   : > { %8743 = vadd.xlane.f32.xlu2 %v8742_v56  ;;  %v17780_v3 = vmul.f32 %v17540_v47, %v8541_v39  ;;  %v9039_v23 = vmul.f32 %v10447_v59, %v9038_v45 }
 0x7a9   : > { %v8708_v25 = vpop.xlane.xlu2 %8707  ;;  %9423 = vst.msk [vmem:[%s17670_s13 + $0x28] sm:$0xff] %vm666_vm0, %v9391_v0  ;;  %v9325_v14 = vmul.f32 %v17628_v29, %v9290_v35  ;;  %v10535_v0 = vld [vmem:[%s10994_s21 + $0x38] sm:$0xff] }
 0x7aa   : > { %v8782_v50 = vmul.f32 %v8708_v25, %v17540_v47  ;;  %v8814_v5 = vmul.f32 %v17780_v3, %v17780_v3  ;;  %v9043_v33 = vsel %vm9042_vm12, %v10447_v59, %v9039_v23 }
 0x7ab   : > { %v10449_v58 = vpop.eup %10448  ;;  %v9360_v12 = vadd.f32 %v17640_v30, %v9325_v14  ;;  %v9291_v22 = vmul.f32 %v9043_v33, %v8907_v62  ;;  %v10536_v33 = vld [vmem:[%s10994_s21 + $0x40] sm:$0xff] }
 0x7ac   : > { %v9045_v57 = vmul.f32 %v10449_v58, %v17768_v37  ;;  %v8846_v49 = vsub.f32 %v8782_v50, %v8814_v5  ;;  %v10451_v46 = vpop.eup %10450  ;;  %vm9051_vm14 = vweird.f32 %v10449_v58  ;;  %v8908_v50 = vsub.f32 %v17244_v2, %v17737_v51 }
 0x7ad   : > { %v17783_v16 = vpop.f32.mrf.mxu3  ;;  %v9392_v28 = vadd.f32 %v10534_v1, %v9360_v12  ;;  %v9055_v13 = vmul.f32 %v10451_v46, %v17790_v26  ;;  %v9326_v8 = vmul.f32 %v17628_v29, %v9291_v22  ;;  %vm9052_vm2 = vmor %vm9050_vm15, %vm9051_vm14  ;;  %vm9061_vm3 = vweird.f32 %v10451_v46 }
 0x7ae   : > { %v8667_v55 = vmul.f32 %v17783_v16, %v17783_v16  ;;  %v8578_v34 = vsel %vm666_vm0, %v17783_v16, 0.0  ;;  %v9046_v4 = vmul.f32 %v10449_v58, %v9045_v57  ;;  %v8878_v43 = vmax.f32 %v8846_v49, 0.0  ;;  %vm9062_vm5 = vmor %vm9060_vm4, %vm9061_vm3 }
 0x7af   : > { %8579 = vadd.xlane.f32.xlu1 %v8578_v34  ;;  %v8544_v21 = vpop.xlane.xlu1 %8543  ;;  %9424 = vst.msk [vmem:[%s17670_s13 + $0x30] sm:$0xff] %vm666_vm0, %v9392_v28  ;;  %v9056_v61 = vmul.f32 %v10451_v46, %v9055_v13  ;;  %v9361_v6 = vadd.f32 %v17640_v30, %v9326_v8 }
 0x7b0   : > { %v8745_v24 = vsel %vm666_vm0, %v8667_v55, 0.0  ;;  %v17803_v60 = vmul.f32 %v17540_v47, %v8544_v21  ;;  %v8711_v27 = vpop.xlane.xlu0 %8710  ;;  %v9047_v10 = vmul.f32 0.5, %v9046_v4  ;;  %v17812_v39 = vadd.f32 1e-06, %v8878_v43 }
 0x7b1   : > { %8746 = vadd.xlane.f32.xlu0 %v8745_v24  ;;  %v8783_v56 = vmul.f32 %v8711_v27, %v17540_v47  ;;  %v9057_v5 = vmul.f32 0.5, %v9056_v61  ;;  %v9393_v19 = vadd.f32 %v10535_v0, %v9361_v6  ;;  %v8909_v43 = vsub.f32 %v17289_v17, %v17755_v52 }
 0x7b2   : > { %v8815_v11 = vmul.f32 %v17803_v60, %v17803_v60  ;;  %v9048_v25 = vsub.f32 1.5, %v9047_v10  ;;  %10452 = vrsqrt.f32 %v17812_v39  ;;  %vm9070_vm7 = vweird.f32 %v17812_v39 }
 0x7b3   : > { %v9058_v24 = vsub.f32 1.5, %v9057_v5  ;;  %9425 = vst.msk [vmem:[%s17670_s13 + $0x38] sm:$0xff] %vm666_vm0, %v9393_v19  ;;  %v8910_v61 = vsub.f32 %v17340_v40, %v17780_v3  ;;  %v10537_v5 = vld [vmem:[%s10994_s21 + $0x48] sm:$0xff] }
 0x7b4   : > { %v8847_v32 = vsub.f32 %v8783_v56, %v8815_v11  ;;  %v9049_v59 = vmul.f32 %v10449_v58, %v9048_v25 }
 0x7b5   : > { %v9059_v14 = vmul.f32 %v10451_v46, %v9058_v24 }
 0x7b6   : > { %v8879_v15 = vmax.f32 %v8847_v32, 0.0  ;;  %v9053_v34 = vsel %vm9052_vm2, %v10449_v58, %v9049_v59 }
 0x7b7   : > { %v9292_v41 = vmul.f32 %v9053_v34, %v8908_v50  ;;  %v9063_v12 = vsel %vm9062_vm5, %v10451_v46, %v9059_v14 }
 0x7b8   : > { %v17824_v55 = vadd.f32 1e-06, %v8879_v15  ;;  %v10453_v37 = vpop.eup %10452  ;;  %v9293_v10 = vmul.f32 %v9063_v12, %v8909_v43 }
 0x7b9   : > { %v9327_v57 = vmul.f32 %v17628_v29, %v9292_v41  ;;  %v9065_v49 = vmul.f32 %v10453_v37, %v17812_v39  ;;  %vm9071_vm6 = vweird.f32 %v10453_v37 }
 0x7ba   : > { %10454 = vrsqrt.f32 %v17824_v55  ;;  %v9328_v32 = vmul.f32 %v17628_v29, %v9293_v10  ;;  %vm9072_vm8 = vmor %vm9070_vm7, %vm9071_vm6  ;;  %vm9080_vm9 = vweird.f32 %v17824_v55 }
 0x7bb   : > { %v9362_v4 = vadd.f32 %v17640_v30, %v9327_v57  ;;  %v9066_v56 = vmul.f32 %v10453_v37, %v9065_v49 }
 0x7bc   : > { %v9363_v15 = vadd.f32 %v17640_v30, %v9328_v32 }
 0x7bd   : > { %v8547_v44 = vpop.xlane.xlu2 %8546  ;;  %v17827_v35 = vpop.f32.mrf.mxu3  ;;  %v9394_v26 = vadd.f32 %v10536_v33, %v9362_v4  ;;  %v9067_v1 = vmul.f32 0.5, %v9066_v56  ;;  %v10538_v4 = vld [vmem:[%s10994_s21 + $0x50] sm:$0xff] }
 0x7be   : > { %v8668_v2 = vmul.f32 %v17827_v35, %v17827_v35  ;;  %v8581_v51 = vsel %vm666_vm0, %v17827_v35, 0.0  ;;  %v17835_v58 = vmul.f32 %v17540_v47, %v8547_v44  ;;  %v8714_v45 = vpop.xlane.xlu1 %8713  ;;  %v9395_v44 = vadd.f32 %v10537_v5, %v9363_v15 }
 0x7bf   : > { %8582 = vadd.xlane.f32.xlu2 %v8581_v51  ;;  %v8784_v21 = vmul.f32 %v8714_v45, %v17540_v47  ;;  %9426 = vst.msk [vmem:[%s17670_s13 + $0x40] sm:$0xff] %vm666_vm0, %v9394_v26  ;;  %v9068_v25 = vsub.f32 1.5, %v9067_v1 }
 0x7c0   : > { %v8748_v27 = vsel %vm666_vm0, %v8668_v2, 0.0  ;;  %v8816_v23 = vmul.f32 %v17835_v58, %v17835_v58  ;;  %v10455_v11 = vpop.eup %10454  ;;  %9427 = vst.msk [vmem:[%s17670_s13 + $0x48] sm:$0xff] %vm666_vm0, %v9395_v44  ;;  %v8912_v15 = vsub.f32 %v17451_v42, %v17835_v58 }
 0x7c1   : > { %8749 = vadd.xlane.f32.xlu1 %v8748_v27  ;;  %v9075_v28 = vmul.f32 %v10455_v11, %v17824_v55  ;;  %v9069_v59 = vmul.f32 %v10453_v37, %v9068_v25  ;;  %vm9081_vm13 = vweird.f32 %v10455_v11 }
 0x7c2   : > { %v8848_v62 = vsub.f32 %v8784_v21, %v8816_v23  ;;  %vm9082_vm10 = vmor %vm9080_vm9, %vm9081_vm13 }
 0x7c3   : > { %v9076_v13 = vmul.f32 %v10455_v11, %v9075_v28  ;;  %v9073_v0 = vsel %vm9072_vm8, %v10453_v37, %v9069_v59  ;;  %v8911_v37 = vsub.f32 %v17388_v9, %v17803_v60  ;;  %v10539_v28 = vld [vmem:[%s10994_s21 + $0x58] sm:$0xff] }
 0x7c4   : > { %v8880_v22 = vmax.f32 %v8848_v62, 0.0  ;;  %v9294_v39 = vmul.f32 %v9073_v0, %v8910_v61 }
 0x7c5   : > { %v17855_v17 = vpop.f32.mrf.mxu3  ;;  %v9077_v50 = vmul.f32 0.5, %v9076_v13 }
 0x7c6   : > { %v8669_v52 = vmul.f32 %v17855_v17, %v17855_v17  ;;  %v8584_v46 = vsel %vm666_vm0, %v17855_v17, 0.0  ;;  %v17861_v8 = vadd.f32 1e-06, %v8880_v22  ;;  %v9329_v2 = vmul.f32 %v17628_v29, %v9294_v39 }
 0x7c7   : > { %8585 = vadd.xlane.f32.xlu0 %v8584_v46  ;;  %v8550_v34 = vpop.xlane.xlu0 %8549  ;;  %v9078_v41 = vsub.f32 1.5, %v9077_v50 }
 0x7c8   : > { %v8751_v6 = vsel %vm666_vm0, %v8669_v52, 0.0  ;;  %10456 = vrsqrt.f32 %v17861_v8  ;;  %v17871_v19 = vmul.f32 %v17540_v47, %v8550_v34  ;;  %v9364_v49 = vadd.f32 %v17640_v30, %v9329_v2 }
 0x7c9   : > { %8752 = vadd.xlane.f32.xlu2 %v8751_v6  ;;  %v8717_v24 = vpop.xlane.xlu2 %8716  ;;  %v9079_v51 = vmul.f32 %v10455_v11, %v9078_v41  ;;  %vm9090_vm11 = vweird.f32 %v17861_v8 }
 0x7ca   : > { %v8817_v40 = vmul.f32 %v17871_v19, %v17871_v19  ;;  %v8785_v3 = vmul.f32 %v8717_v24, %v17540_v47  ;;  %v9396_v43 = vadd.f32 %v10538_v4, %v9364_v49 }
 0x7cb   : > { %v9083_v21 = vsel %vm9082_vm10, %v10455_v11, %v9079_v51 }
 0x7cc   : > { %v8849_v45 = vsub.f32 %v8785_v3, %v8817_v40  ;;  %v9295_v14 = vmul.f32 %v9083_v21, %v8911_v37  ;;  %9428 = vst.msk [vmem:[%s17670_s13 + $0x50] sm:$0xff] %vm666_vm0, %v9396_v43  ;;  %v10540_v3 = vld [vmem:[%s10994_s21 + $0x60] sm:$0xff] }
 0x7ce   : > { %v10457_v57 = vpop.eup %10456  ;;  %v8881_v23 = vmax.f32 %v8849_v45, 0.0  ;;  %v9330_v56 = vmul.f32 %v17628_v29, %v9295_v14  ;;  %v8913_v45 = vsub.f32 %v17488_v48, %v17871_v19 }
 0x7cf   : > { %v9085_v27 = vmul.f32 %v10457_v57, %v17861_v8  ;;  %vm9091_vm1 = vweird.f32 %v10457_v57 }
 0x7d0   : > { %v8945_v55 = vadd.f32 1e-06, %v8881_v23  ;;  %v9365_v60 = vadd.f32 %v17640_v30, %v9330_v56  ;;  %vm9092_vm12 = vmor %vm9090_vm11, %vm9091_vm1 }
 0x7d1   : > { %v9086_v12 = vmul.f32 %v10457_v57, %v9085_v27  ;;  %v8553_v9 = vpop.xlane.xlu1 %8552 }
 0x7d2   : > { %10458 = vrsqrt.f32 %v8945_v55  ;;  %v17896_v10 = vmul.f32 %v17540_v47, %v8553_v9  ;;  %v8720_v1 = vpop.xlane.xlu0 %8719  ;;  %v9397_v22 = vadd.f32 %v10539_v28, %v9365_v60  ;;  %vm9100_vm15 = vweird.f32 %v8945_v55 }
 0x7d3   : > { %v9087_v11 = vmul.f32 0.5, %v9086_v12  ;;  %v8786_v25 = vmul.f32 %v8720_v1, %v17540_v47 }
 0x7d4   : > { %v17889_v62 = vpop.f32.mrf.mxu3  ;;  %v8818_v46 = vmul.f32 %v17896_v10, %v17896_v10  ;;  %9429 = vst.msk [vmem:[%s17670_s13 + $0x58] sm:$0xff] %vm666_vm0, %v9397_v22 }
 0x7d5   : > { %v8670_v33 = vmul.f32 %v17889_v62, %v17889_v62  ;;  %v8587_v26 = vsel %vm666_vm0, %v17889_v62, 0.0  ;;  %v9088_v32 = vsub.f32 1.5, %v9087_v11  ;;  %v10541_v11 = vld [vmem:[%s10994_s21 + $0x68] sm:$0xff] }
 0x7d6   : > { %8588 = vadd.xlane.f32.xlu1 %v8587_v26  ;;  %v8850_v59 = vsub.f32 %v8786_v25, %v8818_v46 }
 0x7d7   : > { %v8754_v52 = vsel %vm666_vm0, %v8670_v33, 0.0  ;;  %v9089_v13 = vmul.f32 %v10457_v57, %v9088_v32 }
 0x7d8   : > { %8755 = vadd.xlane.f32.xlu0 %v8754_v52  ;;  %v10459_v61 = vpop.eup %10458  ;;  %v8882_v5 = vmax.f32 %v8850_v59, 0.0 }
 0x7d9   : > { %v9093_v6 = vsel %vm9092_vm12, %v10457_v57, %v9089_v13  ;;  %v9095_v34 = vmul.f32 %v10459_v61, %v8945_v55  ;;  %vm9101_vm14 = vweird.f32 %v10459_v61 }
 0x7da   : > { %v9296_v50 = vmul.f32 %v9093_v6, %v8912_v15  ;;  %v8946_v41 = vadd.f32 1e-06, %v8882_v5  ;;  %vm9102_vm2 = vmor %vm9100_vm15, %vm9101_vm14  ;;  %v8914_v15 = vsub.f32 %v17515_v7, %v17896_v10 }
 0x7db   : > { %v9096_v39 = vmul.f32 %v10459_v61, %v9095_v34 }
 0x7dc   : > { %v9331_v44 = vmul.f32 %v17628_v29, %v9296_v50  ;;  %10460 = vrsqrt.f32 %v8946_v41  ;;  %vm9110_vm4 = vweird.f32 %v8946_v41 }
 0x7dd   : > { %v17909_v0 = vpop.f32.mrf.mxu3  ;;  %v9097_v24 = vmul.f32 0.5, %v9096_v39 }
 0x7de   : > { %v8671_v8 = vmul.f32 %v17909_v0, %v17909_v0  ;;  %v8590_v42 = vsel %vm666_vm0, %v17909_v0, 0.0  ;;  %v9366_v58 = vadd.f32 %v17640_v30, %v9331_v44 }
 0x7df   : > { %8591 = vadd.xlane.f32.xlu2 %v8590_v42  ;;  %v9098_v51 = vsub.f32 1.5, %v9097_v24  ;;  %v10542_v24 = vld [vmem:[%s10994_s21 + $0x70] sm:$0xff] }
 0x7e0   : > { %v8757_v40 = vsel %vm666_vm0, %v8671_v8, 0.0  ;;  %v9398_v2 = vadd.f32 %v10540_v3, %v9366_v58  ;;  %v8556_v21 = vpop.xlane.xlu2 %8555 }
 0x7e1   : > { %8758 = vadd.xlane.f32.xlu1 %v8757_v40  ;;  %v9099_v37 = vmul.f32 %v10459_v61, %v9098_v51  ;;  %v17923_v23 = vmul.f32 %v17540_v47, %v8556_v21  ;;  %v8723_v4 = vpop.xlane.xlu1 %8722 }
 0x7e2   : > { %9430 = vst.msk [vmem:[%s17670_s13 + $0x60] sm:$0xff] %vm666_vm0, %v9398_v2  ;;  %v10461_v57 = vpop.eup %10460  ;;  %v8787_v43 = vmul.f32 %v8723_v4, %v17540_v47 }
 0x7e3   : > { %v9103_v49 = vsel %vm9102_vm2, %v10459_v61, %v9099_v37  ;;  %v9105_v27 = vmul.f32 %v10461_v57, %v8946_v41  ;;  %v8819_v48 = vmul.f32 %v17923_v23, %v17923_v23  ;;  %vm9111_vm3 = vweird.f32 %v10461_v57 }
 0x7e4   : > { %v9297_v14 = vmul.f32 %v9103_v49, %v8913_v45  ;;  %vm9112_vm5 = vmor %vm9110_vm4, %vm9111_vm3 }
 0x7e5   : > { %v9106_v12 = vmul.f32 %v10461_v57, %v9105_v27  ;;  %v8851_v9 = vsub.f32 %v8787_v43, %v8819_v48 }
 0x7e6   : > { %v9332_v56 = vmul.f32 %v17628_v29, %v9297_v14  ;;  %v8559_v22 = vpop.xlane.xlu0 %8558 }
 0x7e7   : > { %v9107_v55 = vmul.f32 0.5, %v9106_v12  ;;  %v8883_v32 = vmax.f32 %v8851_v9, 0.0  ;;  %v17938_v25 = vmul.f32 %v17540_v47, %v8559_v22 }
 0x7e8   : > { %v9367_v19 = vadd.f32 %v17640_v30, %v9332_v56  ;;  %v8726_v13 = vpop.xlane.xlu2 %8725 }
 0x7e9   : > { %v9108_v28 = vsub.f32 1.5, %v9107_v55  ;;  %v8947_v59 = vadd.f32 1e-06, %v8883_v32  ;;  %v8820_v61 = vmul.f32 %v17938_v25, %v17938_v25  ;;  %v8788_v6 = vmul.f32 %v8726_v13, %v17540_v47 }
 0x7ea   : > { %v9399_v33 = vadd.f32 %v10541_v11, %v9367_v19 }
 0x7eb   : > { %v17930_v60 = vpop.f32.mrf.mxu3  ;;  %v9109_v46 = vmul.f32 %v10461_v57, %v9108_v28  ;;  %10462 = vrsqrt.f32 %v8947_v59  ;;  %v8852_v5 = vsub.f32 %v8788_v6, %v8820_v61  ;;  %vm9120_vm7 = vweird.f32 %v8947_v59 }
 0x7ec   : > { %v8672_v26 = vmul.f32 %v17930_v60, %v17930_v60  ;;  %v8593_v1 = vsel %vm666_vm0, %v17930_v60, 0.0  ;;  %9431 = vst.msk [vmem:[%s17670_s13 + $0x68] sm:$0xff] %vm666_vm0, %v9399_v33  ;;  %v8562_v41 = vpop.xlane.xlu1 %8561 }
 0x7ed   : > { %8594 = vadd.xlane.f32.xlu0 %v8593_v1  ;;  %v9113_v50 = vsel %vm9112_vm5, %v10461_v57, %v9109_v46  ;;  %v8884_v39 = vmax.f32 %v8852_v5, 0.0  ;;  %v17952_v8 = vmul.f32 %v17540_v47, %v8562_v41 }
 0x7ee   : > { %v8760_v52 = vsel %vm666_vm0, %v8672_v26, 0.0  ;;  %v9298_v34 = vmul.f32 %v9113_v50, %v8914_v15  ;;  %v8729_v42 = vpop.xlane.xlu0 %8728  ;;  %v8915_v26 = vsub.f32 %v17555_v54, %v17923_v23 }
 0x7ef   : > { %8761 = vadd.xlane.f32.xlu2 %v8760_v52  ;;  %v8948_v10 = vadd.f32 1e-06, %v8884_v39  ;;  %v8821_v2 = vmul.f32 %v17952_v8, %v17952_v8  ;;  %v8789_v45 = vmul.f32 %v8729_v42, %v17540_v47  ;;  %v8916_v39 = vsub.f32 %v17578_v63, %v17938_v25 }
 0x7f0   : > { %v9333_v44 = vmul.f32 %v17628_v29, %v9298_v34 }
 0x7f1   : > { %v10463_v58 = vpop.eup %10462  ;;  %10464 = vrsqrt.f32 %v8948_v10  ;;  %v8853_v49 = vsub.f32 %v8789_v45, %v8821_v2  ;;  %v8565_v4 = vpop.xlane.xlu2 %8564  ;;  %vm9130_vm9 = vweird.f32 %v8948_v10 }
 0x7f2   : > { %v9368_v7 = vadd.f32 %v17640_v30, %v9333_v44  ;;  %v9115_v37 = vmul.f32 %v10463_v58, %v8947_v59  ;;  %vm9121_vm6 = vweird.f32 %v10463_v58  ;;  %v17965_v12 = vmul.f32 %v17540_v47, %v8565_v4 }
 0x7f3   : > { %v8885_v27 = vmax.f32 %v8853_v49, 0.0  ;;  %vm9122_vm8 = vmor %vm9120_vm7, %vm9121_vm6 }
 0x7f4   : > { %v9400_v40 = vadd.f32 %v10542_v24, %v9368_v7  ;;  %v9116_v57 = vmul.f32 %v10463_v58, %v9115_v37  ;;  %v8732_v48 = vpop.xlane.xlu1 %8731  ;;  %v8822_v33 = vmul.f32 %v17965_v12, %v17965_v12 }
 0x7f5   : > { %v17967_v19 = vadd.f32 1e-06, %v8885_v27  ;;  %v8790_v55 = vmul.f32 %v8732_v48, %v17540_v47 }
 0x7f6   : > { %v17955_v3 = vpop.f32.mrf.mxu3  ;;  %9432 = vst.msk [vmem:[%s17670_s13 + $0x70] sm:$0xff] %vm666_vm0, %v9400_v40  ;;  %v9117_v21 = vmul.f32 0.5, %v9116_v57 }
 0x7f7   : > { %v8596_v51 = vsel %vm666_vm0, %v17955_v3, 0.0  ;;  %v10465_v14 = vpop.eup %10464  ;;  %10466 = vrsqrt.f32 %v17967_v19  ;;  %v8854_v13 = vsub.f32 %v8790_v55, %v8822_v33  ;;  %vm9140_vm11 = vweird.f32 %v17967_v19 }
 0x7f8   : > { %8597 = vadd.xlane.f32.xlu1 %v8596_v51  ;;  %v9118_v43 = vsub.f32 1.5, %v9117_v21  ;;  %v9125_v56 = vmul.f32 %v10465_v14, %v8948_v10  ;;  %vm9131_vm13 = vweird.f32 %v10465_v14  ;;  %v10543_v10 = vld [vmem:[%s10994_s21 + $0x78] sm:$0xff]  ;;  %v8917_v33 = vsub.f32 %v17602_v20, %v17952_v8  ;;  %v18030_v20 = vld [vmem:[%s18240_s10] ss:$0 sm:$0xff] }
 0x7f9   : > { %v8886_v61 = vmax.f32 %v8854_v13, 0.0  ;;  %vm9132_vm10 = vmor %vm9130_vm9, %vm9131_vm13 }
 0x7fa   : > { %v9119_v9 = vmul.f32 %v10463_v58, %v9118_v43  ;;  %v9126_v11 = vmul.f32 %v10465_v14, %v9125_v56  ;;  %v10544_v43 = vld [vmem:[%s10994_s21 + $0x80] sm:$0xff] }
 0x7fb   : > { %v17989_v41 = vadd.f32 1e-06, %v8886_v61 }
 0x7fc   : > { %v9123_v28 = vsel %vm9122_vm8, %v10463_v58, %v9119_v9  ;;  %v9127_v52 = vmul.f32 0.5, %v9126_v11  ;;  %v8735_v34 = vpop.xlane.xlu2 %8734 }
 0x7fd   : > { %v9299_v46 = vmul.f32 %v9123_v28, %v8915_v26  ;;  %v8568_v54 = vpop.xlane.xlu0 %8567  ;;  %v10467_v5 = vpop.eup %10466  ;;  %v8791_v24 = vmul.f32 %v8735_v34, %v17540_v47  ;;  %10468 = vrsqrt.f32 %v17989_v41  ;;  %vm9150_vm15 = vweird.f32 %v17989_v41 }
 0x7fe   : > { %v17974_v1 = vpop.f32.mrf.mxu3  ;;  %v9128_v59 = vsub.f32 1.5, %v9127_v52  ;;  %v17984_v6 = vmul.f32 %v17540_v47, %v8568_v54  ;;  %v9135_v58 = vmul.f32 %v10467_v5, %v17967_v19  ;;  %vm9141_vm1 = vweird.f32 %v10467_v5 }
 0x7ff   : > { %v8674_v22 = vmul.f32 %v17974_v1, %v17974_v1  ;;  %v8599_v32 = vsel %vm666_vm0, %v17974_v1, 0.0  ;;  %v9334_v23 = vmul.f32 %v17628_v29, %v9299_v46  ;;  %vm9142_vm12 = vmor %vm9140_vm11, %vm9141_vm1 }
 0x800   : > { %8600 = vadd.xlane.f32.xlu2 %v8599_v32  ;;  %v9129_v50 = vmul.f32 %v10465_v14, %v9128_v59  ;;  %v8823_v7 = vmul.f32 %v17984_v6, %v17984_v6  ;;  %v9136_v51 = vmul.f32 %v10467_v5, %v9135_v58  ;;  %v8673_v32 = vmul.f32 %v17955_v3, %v17955_v3 }
 0x801   : > { %v8766_v15 = vsel %vm666_vm0, %v8674_v22, 0.0  ;;  %v9369_v44 = vadd.f32 %v17640_v30, %v9334_v23 }
 0x802   : > { %8767 = vadd.xlane.f32.xlu1 %v8766_v15  ;;  %v9133_v42 = vsel %vm9132_vm10, %v10465_v14, %v9129_v50  ;;  %v8855_v37 = vsub.f32 %v8791_v24, %v8823_v7  ;;  %v9137_v25 = vmul.f32 0.5, %v9136_v51  ;;  %v18039_v50 = vld [vmem:[%s18827_s30] ss:$0 sm:$0xff]  ;;  %v10547_v24 = vld [vmem:[%s10994_s21 + $0x88] sm:$0xff] }
 0x803   : > { %v9401_v40 = vadd.f32 %v10543_v10, %v9369_v44  ;;  %v9300_v2 = vmul.f32 %v9133_v42, %v8916_v39  ;;  %v8571_v49 = vpop.xlane.xlu1 %8570  ;;  %v10469_v4 = vpop.eup %10468 }
 0x804   : > { %v8887_v45 = vmax.f32 %v8855_v37, 0.0  ;;  %v9138_v21 = vsub.f32 1.5, %v9137_v25  ;;  %v18004_v27 = vmul.f32 %v17540_v47, %v8571_v49  ;;  %v9145_v9 = vmul.f32 %v10469_v4, %v17989_v41 }
 0x805   : > { %9433 = vst.msk [vmem:[%s17670_s13 + $0x78] sm:$0xff] %vm666_vm0, %v9401_v40  ;;  %v9335_v63 = vmul.f32 %v17628_v29, %v9300_v2  ;;  %v8738_v11 = vpop.xlane.xlu0 %8737  ;;  %vm9151_vm14 = vweird.f32 %v10469_v4  ;;  %v8918_v40 = vsub.f32 %v17633_v36, %v17965_v12 }
 0x806   : > { %v18001_v14 = vadd.f32 1e-06, %v8887_v45  ;;  %v9139_v55 = vmul.f32 %v10467_v5, %v9138_v21  ;;  %v8824_v19 = vmul.f32 %v18004_v27, %v18004_v27  ;;  %v9146_v22 = vmul.f32 %v10469_v4, %v9145_v9  ;;  %vm9152_vm2 = vmor %vm9150_vm15, %vm9151_vm14 }
 0x807   : > { %v9370_v57 = vadd.f32 %v17640_v30, %v9335_v63  ;;  %v8792_v46 = vmul.f32 %v8738_v11, %v17540_v47  ;;  %v10548_v11 = vld [vmem:[%s10994_s21 + $0x90] sm:$0xff] }
 0x808   : > { %10470 = vrsqrt.f32 %v18001_v14  ;;  %v9143_v28 = vsel %vm9142_vm12, %v10467_v5, %v9139_v55  ;;  %v9147_v13 = vmul.f32 0.5, %v9146_v22  ;;  %v8763_v5 = vsel %vm666_vm0, %v8673_v32, 0.0 }
 0x809   : > { %v9402_v56 = vadd.f32 %v10544_v43, %v9370_v57  ;;  %v9301_v52 = vmul.f32 %v9143_v28, %v8917_v33  ;;  %v8856_v15 = vsub.f32 %v8792_v46, %v8824_v19  ;;  %vm9160_vm4 = vweird.f32 %v18001_v14 }
 0x80a   : > { %v9148_v54 = vsub.f32 1.5, %v9147_v13  ;;  %v8919_v19 = vsub.f32 %v17666_v53, %v17984_v6 }
 0x80b   : > { %9434 = vst.msk [vmem:[%s17670_s13 + $0x80] sm:$0xff] %vm666_vm0, %v9402_v56  ;;  %v9336_v8 = vmul.f32 %v18030_v20, %v9301_v52  ;;  %v8888_v44 = vmax.f32 %v8856_v15, 0.0 }
 0x80c   : > { %v18007_v48 = vpop.f32.mrf.mxu3  ;;  %v8574_v59 = vpop.xlane.xlu2 %8573  ;;  %v9149_v7 = vmul.f32 %v10469_v4, %v9148_v54 }
 0x80d   : > { %v8675_v29 = vmul.f32 %v18007_v48, %v18007_v48  ;;  %v8602_v30 = vsel %vm666_vm0, %v18007_v48, 0.0  ;;  %v18034_v23 = vmul.f32 %v17540_v47, %v8574_v59  ;;  %v9371_v34 = vadd.f32 %v18039_v50, %v9336_v8 }
 0x80e   : > { %8603 = vadd.xlane.f32.xlu0 %v8602_v30  ;;  %v10471_v61 = vpop.eup %10470  ;;  %v8741_v39 = vpop.xlane.xlu1 %8740  ;;  %v8952_v2 = vadd.f32 1e-06, %v8888_v44  ;;  %v9153_v37 = vsel %vm9152_vm2, %v10469_v4, %v9149_v7 }
 0x80f   : > { %v8769_v26 = vsel %vm666_vm0, %v8675_v29, 0.0  ;;  %v9155_v42 = vmul.f32 %v10471_v61, %v18001_v14  ;;  %v8825_v58 = vmul.f32 %v18034_v23, %v18034_v23  ;;  %v9403_v10 = vadd.f32 %v10547_v24, %v9371_v34 }
 0x810   : > { %8770 = vadd.xlane.f32.xlu2 %v8769_v26  ;;  %v8793_v51 = vmul.f32 %v8741_v39, %v17540_v47  ;;  %v9302_v41 = vmul.f32 %v9153_v37, %v8918_v40  ;;  %10472 = vrsqrt.f32 %v8952_v2  ;;  %vm9161_vm3 = vweird.f32 %v10471_v61  ;;  %v10549_v39 = vld [vmem:[%s10994_s21 + $0x98] sm:$0xff] }
 0x811   : > { %v9156_v63 = vmul.f32 %v10471_v61, %v9155_v42  ;;  %9435 = vst.msk [vmem:[%s17670_s13 + $0x88] sm:$0xff] %vm666_vm0, %v9403_v10  ;;  %vm9162_vm5 = vmor %vm9160_vm4, %vm9161_vm3  ;;  %vm9170_vm7 = vweird.f32 %v8952_v2  ;;  %v8920_v10 = vsub.f32 %v17697_v31, %v18004_v27  ;;  %v8921_v31 = vsub.f32 %v17724_v38, %v18034_v23 }
 0x812   : > { %v8857_v25 = vsub.f32 %v8793_v51, %v8825_v58  ;;  %v9337_v49 = vmul.f32 %v18030_v20, %v9302_v41 }
 0x813   : > { %v9157_v45 = vmul.f32 0.5, %v9156_v63 }
 0x814   : > { %v8889_v21 = vmax.f32 %v8857_v25, 0.0  ;;  %v9372_v4 = vadd.f32 %v18039_v50, %v9337_v49 }
 0x815   : > { %v9158_v12 = vsub.f32 1.5, %v9157_v45 }
 0x816   : > { %8764 = vadd.xlane.f32.xlu0 %v8763_v5  ;;  %v8953_v56 = vadd.f32 1e-06, %v8889_v21  ;;  %v10473_v9 = vpop.eup %10472  ;;  %v9404_v33 = vadd.f32 %v10548_v11, %v9372_v4 }
 0x817   : > { %v9159_v30 = vmul.f32 %v10471_v61, %v9158_v12  ;;  %v9165_v28 = vmul.f32 %v10473_v9, %v8952_v2  ;;  %vm9171_vm6 = vweird.f32 %v10473_v9 }
 0x818   : > { %10474 = vrsqrt.f32 %v8953_v56  ;;  %9436 = vst.msk [vmem:[%s17670_s13 + $0x90] sm:$0xff] %vm666_vm0, %v9404_v33  ;;  %vm9172_vm8 = vmor %vm9170_vm7, %vm9171_vm6  ;;  %vm9180_vm9 = vweird.f32 %v8953_v56 }
 0x819   : > { %v8577_v57 = vpop.xlane.xlu0 %8576  ;;  %v9163_v26 = vsel %vm9162_vm5, %v10471_v61, %v9159_v30  ;;  %v9166_v52 = vmul.f32 %v10473_v9, %v9165_v28 }
 0x81a   : > { %v18056_v36 = vmul.f32 %v17540_v47, %v8577_v57  ;;  %v9303_v32 = vmul.f32 %v9163_v26, %v8919_v19 }
 0x81b   : > { %v8744_v43 = vpop.xlane.xlu2 %8743  ;;  %v9167_v15 = vmul.f32 0.5, %v9166_v52 }
 0x81c   : > { %v8826_v29 = vmul.f32 %v18056_v36, %v18056_v36  ;;  %v8794_v55 = vmul.f32 %v8744_v43, %v17540_v47  ;;  %v9338_v13 = vmul.f32 %v18030_v20, %v9303_v32  ;;  %v10550_v43 = vld [vmem:[%s10994_s21 + $0xa0] sm:$0xff]  ;;  %v8922_v32 = vsub.f32 %v17752_v18, %v18056_v36 }
 0x81d   : > { %v9168_v5 = vsub.f32 1.5, %v9167_v15 }
 0x81e   : > { %v8858_v22 = vsub.f32 %v8794_v55, %v8826_v29  ;;  %v10475_v6 = vpop.eup %10474  ;;  %v9373_v54 = vadd.f32 %v18039_v50, %v9338_v13 }
 0x81f   : > { %v9175_v44 = vmul.f32 %v10475_v6, %v8953_v56  ;;  %v9169_v58 = vmul.f32 %v10473_v9, %v9168_v5  ;;  %vm9181_vm13 = vweird.f32 %v10475_v6 }
 0x820   : > { %v8890_v46 = vmax.f32 %v8858_v22, 0.0  ;;  %v9405_v7 = vadd.f32 %v10549_v39, %v9373_v54  ;;  %vm9182_vm10 = vmor %vm9180_vm9, %vm9181_vm13 }
 0x821   : > { %v9176_v24 = vmul.f32 %v10475_v6, %v9175_v44  ;;  %v9173_v51 = vsel %vm9172_vm8, %v10473_v9, %v9169_v58 }
 0x822   : > { %v8580_v14 = vpop.xlane.xlu1 %8579  ;;  %v8954_v59 = vadd.f32 1e-06, %v8890_v46  ;;  %9437 = vst.msk [vmem:[%s17670_s13 + $0x98] sm:$0xff] %vm666_vm0, %v9405_v7  ;;  %v9304_v63 = vmul.f32 %v9173_v51, %v8920_v10  ;;  %v10551_v46 = vld [vmem:[%s10994_s21 + $0xa8] sm:$0xff] }
 0x823   : > { %v18070_v8 = vmul.f32 %v17540_v47, %v8580_v14  ;;  %v9177_v37 = vmul.f32 0.5, %v9176_v24  ;;  %v10552_v24 = vld [vmem:[%s10994_s21 + $0xb0] sm:$0xff] }
 0x824   : > { %v8747_v53 = vpop.xlane.xlu0 %8746  ;;  %10476 = vrsqrt.f32 %v8954_v59  ;;  %v9339_v57 = vmul.f32 %v18030_v20, %v9304_v63  ;;  %vm9190_vm11 = vweird.f32 %v8954_v59 }
 0x825   : > { %v8827_v61 = vmul.f32 %v18070_v8, %v18070_v8  ;;  %v8795_v34 = vmul.f32 %v8747_v53, %v17540_v47  ;;  %v9178_v45 = vsub.f32 1.5, %v9177_v37 }
 0x826   : > { %v9374_v21 = vadd.f32 %v18039_v50, %v9339_v57  ;;  %v10553_v57 = vld [vmem:[%s10994_s21 + $0xb8] sm:$0xff] }
 0x827   : > { %v8859_v42 = vsub.f32 %v8795_v34, %v8827_v61  ;;  %v9179_v2 = vmul.f32 %v10475_v6, %v9178_v45 }
 0x828   : > { %v9406_v4 = vadd.f32 %v10550_v43, %v9374_v21 }
 0x829   : > { %v8891_v40 = vmax.f32 %v8859_v42, 0.0  ;;  %v9183_v12 = vsel %vm9182_vm10, %v10475_v6, %v9179_v2  ;;  %v8923_v42 = vsub.f32 %v17783_v16, %v18070_v8 }
 0x82a   : > { %v10477_v25 = vpop.eup %10476  ;;  %v9305_v29 = vmul.f32 %v9183_v12, %v8921_v31  ;;  %9438 = vst.msk [vmem:[%s17670_s13 + $0xa0] sm:$0xff] %vm666_vm0, %v9406_v4 }
 0x82b   : > { %v8955_v41 = vadd.f32 1e-06, %v8891_v40  ;;  %v9185_v49 = vmul.f32 %v10477_v25, %v8954_v59  ;;  %vm9191_vm1 = vweird.f32 %v10477_v25 }
 0x82c   : > { %v9340_v56 = vmul.f32 %v18030_v20, %v9305_v29  ;;  %vm9192_vm12 = vmor %vm9190_vm11, %vm9191_vm1 }
 0x82d   : > { %10478 = vrsqrt.f32 %v8955_v41  ;;  %v9186_v27 = vmul.f32 %v10477_v25, %v9185_v49  ;;  %vm9200_vm15 = vweird.f32 %v8955_v41 }
 0x82e   : > { %v9375_v26 = vadd.f32 %v18039_v50, %v9340_v56 }
 0x82f   : > { %v9187_v30 = vmul.f32 0.5, %v9186_v27 }
 0x830   : > { %v9407_v14 = vadd.f32 %v10551_v46, %v9375_v26 }
 0x831   : > { %v9188_v33 = vsub.f32 1.5, %v9187_v30 }
 0x832   : > { %v8583_v55 = vpop.xlane.xlu2 %8582  ;;  %9439 = vst.msk [vmem:[%s17670_s13 + $0xa8] sm:$0xff] %vm666_vm0, %v9407_v14 }
 0x833   : > { %v18087_v9 = vmul.f32 %v17540_v47, %v8583_v55  ;;  %v10479_v11 = vpop.eup %10478  ;;  %v9189_v28 = vmul.f32 %v10477_v25, %v9188_v33 }
 0x834   : > { %v8750_v38 = vpop.xlane.xlu1 %8749  ;;  %v9195_v23 = vmul.f32 %v10479_v11, %v8955_v41  ;;  %vm9201_vm14 = vweird.f32 %v10479_v11 }
 0x835   : > { %v8828_v19 = vmul.f32 %v18087_v9, %v18087_v9  ;;  %v8796_v22 = vmul.f32 %v8750_v38, %v17540_v47  ;;  %v9193_v13 = vsel %vm9192_vm12, %v10477_v25, %v9189_v28  ;;  %vm9202_vm2 = vmor %vm9200_vm15, %vm9201_vm14  ;;  %v8924_v33 = vsub.f32 %v17827_v35, %v18087_v9 }
 0x836   : > { %v9196_v52 = vmul.f32 %v10479_v11, %v9195_v23  ;;  %v9306_v53 = vmul.f32 %v9193_v13, %v8922_v32 }
 0x837   : > { %v8860_v15 = vsub.f32 %v8796_v22, %v8828_v19 }
 0x838   : > { %v9197_v6 = vmul.f32 0.5, %v9196_v52  ;;  %v9341_v59 = vmul.f32 %v18030_v20, %v9306_v53 }
 0x839   : > { %v8892_v54 = vmax.f32 %v8860_v15, 0.0 }
 0x83a   : > { %v8586_v61 = vpop.xlane.xlu0 %8585  ;;  %v9198_v34 = vsub.f32 1.5, %v9197_v6  ;;  %v9376_v44 = vadd.f32 %v18039_v50, %v9341_v59  ;;  %v10554_v6 = vld [vmem:[%s10994_s21 + $0xc0] sm:$0xff] }
 0x83b   : > { %v18103_v5 = vmul.f32 %v17540_v47, %v8586_v61  ;;  %v8956_v18 = vadd.f32 1e-06, %v8892_v54 }
 0x83c   : > { %v8753_v36 = vpop.xlane.xlu2 %8752  ;;  %v9199_v39 = vmul.f32 %v10479_v11, %v9198_v34  ;;  %v9408_v10 = vadd.f32 %v10552_v24, %v9376_v44 }
 0x83d   : > { %v8829_v7 = vmul.f32 %v18103_v5, %v18103_v5  ;;  %10480 = vrsqrt.f32 %v8956_v18  ;;  %v8797_v58 = vmul.f32 %v8753_v36, %v17540_v47  ;;  %vm9210_vm4 = vweird.f32 %v8956_v18 }
 0x83e   : > { %v9203_v40 = vsel %vm9202_vm2, %v10479_v11, %v9199_v39  ;;  %9440 = vst.msk [vmem:[%s17670_s13 + $0xb0] sm:$0xff] %vm666_vm0, %v9408_v10  ;;  %v8925_v61 = vsub.f32 %v17855_v17, %v18103_v5  ;;  %v10555_v10 = vld [vmem:[%s10994_s21 + $0xc8] sm:$0xff] }
 0x83f   : > { %v9307_v51 = vmul.f32 %v9203_v40, %v8923_v42  ;;  %v8861_v37 = vsub.f32 %v8797_v58, %v8829_v7 }
 0x841   : > { %v9342_v63 = vmul.f32 %v18030_v20, %v9307_v51  ;;  %v8893_v41 = vmax.f32 %v8861_v37, 0.0 }
 0x843   : > { %v10481_v25 = vpop.eup %10480  ;;  %v9377_v45 = vadd.f32 %v18039_v50, %v9342_v63  ;;  %v8957_v16 = vadd.f32 1e-06, %v8893_v41 }
 0x844   : > { %v9205_v8 = vmul.f32 %v10481_v25, %v8956_v18  ;;  %vm9211_vm3 = vweird.f32 %v10481_v25 }
 0x845   : > { %v9409_v49 = vadd.f32 %v10553_v57, %v9377_v45  ;;  %10482 = vrsqrt.f32 %v8957_v16  ;;  %vm9212_vm5 = vmor %vm9210_vm4, %vm9211_vm3  ;;  %vm9220_vm7 = vweird.f32 %v8957_v16 }
 0x846   : > { %v9206_v2 = vmul.f32 %v10481_v25, %v9205_v8 }
 0x847   : > { %9441 = vst.msk [vmem:[%s17670_s13 + $0xb8] sm:$0xff] %vm666_vm0, %v9409_v49 }
 0x848   : > { %v9207_v31 = vmul.f32 0.5, %v9206_v2 }
 0x849   : > { %v8589_v21 = vpop.xlane.xlu1 %8588 }
 0x84a   : > { %v18120_v27 = vmul.f32 %v17540_v47, %v8589_v21  ;;  %v9208_v43 = vsub.f32 1.5, %v9207_v31 }
 0x84b   : > { %v8756_v12 = vpop.xlane.xlu0 %8755  ;;  %v10483_v30 = vpop.eup %10482 }
 0x84c   : > { %v8830_v4 = vmul.f32 %v18120_v27, %v18120_v27  ;;  %v8798_v29 = vmul.f32 %v8756_v12, %v17540_v47  ;;  %v9209_v55 = vmul.f32 %v10481_v25, %v9208_v43  ;;  %v9215_v11 = vmul.f32 %v10483_v30, %v8957_v16 }
 0x84d   : > { %vm9221_vm6 = vweird.f32 %v10483_v30  ;;  %v8926_v8 = vsub.f32 %v17889_v62, %v18120_v27 }
 0x84e   : > { %v8862_v56 = vsub.f32 %v8798_v29, %v8830_v4  ;;  %v9213_v38 = vsel %vm9212_vm5, %v10481_v25, %v9209_v55  ;;  %v9216_v23 = vmul.f32 %v10483_v30, %v9215_v11  ;;  %vm9222_vm8 = vmor %vm9220_vm7, %vm9221_vm6  ;;  %v10556_v11 = vld [vmem:[%s10994_s21 + $0xd0] sm:$0xff] }
 0x84f   : > { %v9308_v26 = vmul.f32 %v9213_v38, %v8924_v33 }
 0x850   : > { %v8894_v19 = vmax.f32 %v8862_v56, 0.0  ;;  %v9217_v28 = vmul.f32 0.5, %v9216_v23 }
 0x851   : > { %v9343_v52 = vmul.f32 %v18030_v20, %v9308_v26 }
 0x852   : > { %v8958_v22 = vadd.f32 1e-06, %v8894_v19  ;;  %v8592_v32 = vpop.xlane.xlu2 %8591  ;;  %v9218_v14 = vsub.f32 1.5, %v9217_v28 }
 0x853   : > { %v18129_v46 = vmul.f32 %v17540_v47, %v8592_v32  ;;  %v9378_v35 = vadd.f32 %v18039_v50, %v9343_v52  ;;  %v10557_v52 = vld [vmem:[%s10994_s21 + $0xd8] sm:$0xff] }
 0x854   : > { %10484 = vrsqrt.f32 %v8958_v22  ;;  %v8759_v13 = vpop.xlane.xlu1 %8758  ;;  %v9219_v53 = vmul.f32 %v10483_v30, %v9218_v14  ;;  %vm9230_vm9 = vweird.f32 %v8958_v22 }
 0x855   : > { %v8831_v9 = vmul.f32 %v18129_v46, %v18129_v46  ;;  %v8799_v15 = vmul.f32 %v8759_v13, %v17540_v47  ;;  %v9410_v54 = vadd.f32 %v10554_v6, %v9378_v35  ;;  %v8927_v56 = vsub.f32 %v17909_v0, %v18129_v46 }
 0x856   : > { %v9223_v34 = vsel %vm9222_vm8, %v10483_v30, %v9219_v53 }
 0x857   : > { %v8863_v59 = vsub.f32 %v8799_v15, %v8831_v9  ;;  %9442 = vst.msk [vmem:[%s17670_s13 + $0xc0] sm:$0xff] %vm666_vm0, %v9410_v54  ;;  %v9309_v18 = vmul.f32 %v9223_v34, %v8925_v61 }
 0x859   : > { %v8895_v36 = vmax.f32 %v8863_v59, 0.0  ;;  %v9344_v39 = vmul.f32 %v18030_v20, %v9309_v18 }
 0x85a   : > { %v10485_v44 = vpop.eup %10484 }
 0x85b   : > { %v9225_v7 = vmul.f32 %v10485_v44, %v8958_v22  ;;  %v8959_v42 = vadd.f32 1e-06, %v8895_v36  ;;  %v9379_v58 = vadd.f32 %v18039_v50, %v9344_v39  ;;  %vm9231_vm13 = vweird.f32 %v10485_v44 }
 0x85c   : > { %vm9232_vm10 = vmor %vm9230_vm9, %vm9231_vm13 }
 0x85d   : > { %v9226_v24 = vmul.f32 %v10485_v44, %v9225_v7  ;;  %10486 = vrsqrt.f32 %v8959_v42  ;;  %v9411_v40 = vadd.f32 %v10555_v10, %v9379_v58  ;;  %vm9240_vm11 = vweird.f32 %v8959_v42  ;;  %v10558_v7 = vld [vmem:[%s10994_s21 + $0xe0] sm:$0xff] }
 0x85f   : > { %v9227_v17 = vmul.f32 0.5, %v9226_v24  ;;  %9443 = vst.msk [vmem:[%s17670_s13 + $0xc8] sm:$0xff] %vm666_vm0, %v9411_v40 }
 0x860   : > { %v8595_v5 = vpop.xlane.xlu0 %8594 }
 0x861   : > { %v9228_v51 = vsub.f32 1.5, %v9227_v17  ;;  %v8640_v37 = vmul.f32 %v17540_v47, %v8595_v5 }
 0x862   : > { %v8762_v63 = vpop.xlane.xlu2 %8761 }
 0x863   : > { %v10487_v41 = vpop.eup %10486  ;;  %v9229_v25 = vmul.f32 %v10485_v44, %v9228_v51  ;;  %v8832_v45 = vmul.f32 %v8640_v37, %v8640_v37  ;;  %v8800_v16 = vmul.f32 %v8762_v63, %v17540_v47  ;;  %v8928_v54 = vsub.f32 %v17930_v60, %v8640_v37 }
 0x864   : > { %v9235_v57 = vmul.f32 %v10487_v41, %v8959_v42  ;;  %vm9241_vm1 = vweird.f32 %v10487_v41 }
 0x865   : > { %v9233_v49 = vsel %vm9232_vm10, %v10485_v44, %v9229_v25  ;;  %v8864_v2 = vsub.f32 %v8800_v16, %v8832_v45  ;;  %vm9242_vm12 = vmor %vm9240_vm11, %vm9241_vm1 }
 0x866   : > { %v9310_v21 = vmul.f32 %v9233_v49, %v8926_v8  ;;  %v9236_v31 = vmul.f32 %v10487_v41, %v9235_v57 }
 0x867   : > { %v8896_v12 = vmax.f32 %v8864_v2, 0.0 }
 0x868   : > { %v9345_v43 = vmul.f32 %v18030_v20, %v9310_v21  ;;  %v9237_v4 = vmul.f32 0.5, %v9236_v31 }
 0x869   : > { %v8960_v29 = vadd.f32 1e-06, %v8896_v12 }
 0x86a   : > { %v9380_v30 = vadd.f32 %v18039_v50, %v9345_v43  ;;  %v9238_v55 = vsub.f32 1.5, %v9237_v4 }
 0x86b   : > { %10488 = vrsqrt.f32 %v8960_v29  ;;  %v8598_v23 = vpop.xlane.xlu1 %8597  ;;  %vm9250_vm15 = vweird.f32 %v8960_v29 }
 0x86c   : > { %v9412_v62 = vadd.f32 %v10556_v11, %v9380_v30  ;;  %v9239_v27 = vmul.f32 %v10487_v41, %v9238_v55  ;;  %v8641_v51 = vmul.f32 %v17540_v47, %v8598_v23 }
 0x86e   : > { %9444 = vst.msk [vmem:[%s17670_s13 + $0xd0] sm:$0xff] %vm666_vm0, %v9412_v62  ;;  %v9243_v33 = vsel %vm9242_vm12, %v10487_v41, %v9239_v27  ;;  %v8833_v16 = vmul.f32 %v8641_v51, %v8641_v51  ;;  %v10559_v27 = vld [vmem:[%s10994_s21 + $0xf0] sm:$0xff] }
 0x86f   : > { %v9311_v38 = vmul.f32 %v9243_v33, %v8927_v56 }
 0x871   : > { %v10489_v19 = vpop.eup %10488  ;;  %v9346_v26 = vmul.f32 %v18030_v20, %v9311_v38 }
 0x872   : > { %v9245_v28 = vmul.f32 %v10489_v19, %v8960_v29  ;;  %vm9251_vm14 = vweird.f32 %v10489_v19 }
 0x873   : > { %v9381_v22 = vadd.f32 %v18039_v50, %v9346_v26  ;;  %v8601_v35 = vpop.xlane.xlu2 %8600  ;;  %vm9252_vm2 = vmor %vm9250_vm15, %vm9251_vm14 }
 0x874   : > { %v9246_v32 = vmul.f32 %v10489_v19, %v9245_v28  ;;  %v8642_v0 = vmul.f32 %v17540_v47, %v8601_v35 }
 0x875   : > { %v9413_v14 = vadd.f32 %v10557_v52, %v9381_v22  ;;  %v8768_v9 = vpop.xlane.xlu1 %8767 }
 0x876   : > { %v9247_v13 = vmul.f32 0.5, %v9246_v32  ;;  %v8834_v15 = vmul.f32 %v8642_v0, %v8642_v0  ;;  %v8802_v53 = vmul.f32 %v8768_v9, %v17540_v47  ;;  %v8930_v31 = vsub.f32 %v17974_v1, %v8642_v0  ;;  %v10560_v9 = vld [vmem:[%s10994_s21 + $0xf8] sm:$0xff] }
 0x877   : > { %9445 = vst.msk [vmem:[%s17670_s13 + $0xd8] sm:$0xff] %vm666_vm0, %v9413_v14  ;;  %v8929_v0 = vsub.f32 %v17955_v3, %v8641_v51 }
 0x878   : > { %v9248_v46 = vsub.f32 1.5, %v9247_v13  ;;  %v8866_v61 = vsub.f32 %v8802_v53, %v8834_v15 }
 0x87a   : > { %v9249_v6 = vmul.f32 %v10489_v19, %v9248_v46  ;;  %v8898_v18 = vmax.f32 %v8866_v61, 0.0 }
 0x87c   : > { %v9253_v59 = vsel %vm9252_vm2, %v10489_v19, %v9249_v6  ;;  %v8962_v44 = vadd.f32 1e-06, %v8898_v18 }
 0x87d   : > { %v9312_v34 = vmul.f32 %v9253_v59, %v8928_v54  ;;  %v10561_v54 = vld [vmem:[%s10994_s21 + $0xe8] sm:$0xff] }
 0x87e   : > { %10490 = vrsqrt.f32 %v8962_v44  ;;  %vm9270_vm4 = vweird.f32 %v8962_v44 }
 0x87f   : > { %v9347_v36 = vmul.f32 %v18030_v20, %v9312_v34 }
 0x881   : > { %v9382_v39 = vadd.f32 %v18039_v50, %v9347_v36  ;;  %v8604_v58 = vpop.xlane.xlu0 %8603 }
 0x882   : > { %v8643_v24 = vmul.f32 %v17540_v47, %v8604_v58 }
 0x883   : > { %v9414_v42 = vadd.f32 %v10558_v7, %v9382_v39  ;;  %v8771_v10 = vpop.xlane.xlu2 %8770 }
 0x884   : > { %v10491_v60 = vpop.eup %10490  ;;  %v8835_v40 = vmul.f32 %v8643_v24, %v8643_v24  ;;  %v8803_v17 = vmul.f32 %v8771_v10, %v17540_v47  ;;  %v8931_v28 = vsub.f32 %v18007_v48, %v8643_v24 }
 0x885   : > { %9446 = vst.msk [vmem:[%s17670_s13 + $0xe0] sm:$0xff] %vm666_vm0, %v9414_v42  ;;  %v9265_v5 = vmul.f32 %v10491_v60, %v8962_v44  ;;  %vm9271_vm3 = vweird.f32 %v10491_v60 }
 0x886   : > { %v8867_v37 = vsub.f32 %v8803_v17, %v8835_v40  ;;  %vm9272_vm5 = vmor %vm9270_vm4, %vm9271_vm3 }
 0x887   : > { %v9266_v63 = vmul.f32 %v10491_v60, %v9265_v5 }
 0x888   : > { %v8899_v41 = vmax.f32 %v8867_v37, 0.0 }
 0x889   : > { %v9267_v25 = vmul.f32 0.5, %v9266_v63  ;;  %v8765_v45 = vpop.xlane.xlu0 %8764 }
 0x88a   : > { %v8963_v8 = vadd.f32 1e-06, %v8899_v41  ;;  %v8801_v57 = vmul.f32 %v8765_v45, %v17540_v47 }
 0x88b   : > { %v9268_v49 = vsub.f32 1.5, %v9267_v25 }
 0x88c   : > { %10492 = vrsqrt.f32 %v8963_v8  ;;  %v8865_v2 = vsub.f32 %v8801_v57, %v8833_v16  ;;  %vm9280_vm7 = vweird.f32 %v8963_v8 }
 0x88d   : > { %v9269_v21 = vmul.f32 %v10491_v60, %v9268_v49 }
 0x88e   : > { %v8897_v12 = vmax.f32 %v8865_v2, 0.0 }
 0x88f   : > { %v9273_v43 = vsel %vm9272_vm5, %v10491_v60, %v9269_v21 }
 0x890   : > { %v9314_v4 = vmul.f32 %v9273_v43, %v8930_v31  ;;  %v8961_v29 = vadd.f32 1e-06, %v8897_v12 }
 0x892   : > { %v10493_v30 = vpop.eup %10492  ;;  %v9349_v55 = vmul.f32 %v18030_v20, %v9314_v4  ;;  %10494 = vrsqrt.f32 %v8961_v29  ;;  %vm9260_vm9 = vweird.f32 %v8961_v29 }
 0x893   : > { %v9275_v47 = vmul.f32 %v10493_v30, %v8963_v8  ;;  %vm9281_vm6 = vweird.f32 %v10493_v30 }
 0x894   : > { %v9384_v11 = vadd.f32 %v18039_v50, %v9349_v55  ;;  %vm9282_vm8 = vmor %vm9280_vm7, %vm9281_vm6 }
 0x895   : > { %v9276_v62 = vmul.f32 %v10493_v30, %v9275_v47 }
 0x896   : > { %v9416_v56 = vadd.f32 %v10559_v27, %v9384_v11 }
 0x897   : > { %v9277_v33 = vmul.f32 0.5, %v9276_v62 }
 0x898   : > { %v10495_v38 = vpop.eup %10494  ;;  %9448 = vst.msk [vmem:[%s17670_s13 + $0xf0] sm:$0xff] %vm666_vm0, %v9416_v56 }
 0x899   : > { %v9278_v1 = vsub.f32 1.5, %v9277_v33  ;;  %v9255_v23 = vmul.f32 %v10495_v38, %v8961_v29  ;;  %vm9261_vm13 = vweird.f32 %v10495_v38 }
 0x89a   : > { %vm9262_vm10 = vmor %vm9260_vm9, %vm9261_vm13 }
 0x89b   : > { %v9279_v19 = vmul.f32 %v10493_v30, %v9278_v1  ;;  %v9256_v26 = vmul.f32 %v10495_v38, %v9255_v23 }
 0x89d   : > { %v9283_v22 = vsel %vm9282_vm8, %v10493_v30, %v9279_v19  ;;  %v9257_v32 = vmul.f32 0.5, %v9256_v26 }
 0x89e   : > { %v9315_v52 = vmul.f32 %v9283_v22, %v8931_v28 }
 0x89f   : > { %v9258_v14 = vsub.f32 1.5, %v9257_v32 }
 0x8a0   : > { %v9350_v13 = vmul.f32 %v18030_v20, %v9315_v52 }
 0x8a1   : > { %v9259_v35 = vmul.f32 %v10495_v38, %v9258_v14 }
 0x8a2   : > { %v9385_v46 = vadd.f32 %v18039_v50, %v9350_v13 }
 0x8a3   : > { %v9263_v48 = vsel %vm9262_vm10, %v10495_v38, %v9259_v35 }
 0x8a4   : > { %v9417_v15 = vadd.f32 %v10560_v9, %v9385_v46  ;;  %v9313_v53 = vmul.f32 %v9263_v48, %v8929_v0 }
 0x8a6   : > { %9449 = vst.msk [vmem:[%s17670_s13 + $0xf8] sm:$0xff] %vm666_vm0, %v9417_v15  ;;  %v9348_v6 = vmul.f32 %v18030_v20, %v9313_v53 }
 0x8a8   : > { %v9383_v3 = vadd.f32 %v18039_v50, %v9348_v6 }
 0x8aa   : > { %v9415_v61 = vadd.f32 %v10561_v54, %v9383_v3 }
 0x8ac   : > { %9447 = vst.msk [vmem:[%s17670_s13 + $0xe8] sm:$0xff] %vm666_vm0, %v9415_v61 }
 0x8ad   : > { %10709 = shalt.err (!%p10706_p13)
}
 0x8ae   : > { %s10780_s1 = smov 128   ;;  %s10781_s21 = smov 8  }
 0x8af   : > { %10086 = dma.vmem_to_hbm [thread:$0]  (%p10939_p0), %s9467_s12, 4096, %s9469_s26, %s9451_s17, %s10780_s1, %s10780_s1, %s10781_s21  }
 0x8b0 PF: > { %s18831_s13 = sld [smem:[#allocation16_spill]]  ;;  %p10103_p3 = pnand %p9619_p4, %p10943_p2 }
 0x8b1   : > { %s18833_s18 = sld [smem:[#allocation20_spill]] }
 0x8b2   : > { %p10104_p5 = pneg %p10103_p3 }
 0x8b6   : > { %s9483_s25 = sand.u32 1, %s18831_s13  }
 0x8b7   : > { %s9484_s20 = scalar_lea.sflag [#allocation5], %s9483_s25 }
 0x8b8   : > { %10747 = dma.done.wait (%p10104_p5), %s9484_s20, 4096  }
 0x8b9   : > { %10749 = vsyncadd (%p10104_p5), %s9484_s20, 4294963200  ;;  %s32_s26 = sadd.s32 1, %s18833_s18   ;;  %s18834_s27 = sld [smem:[#allocation17_spill]] }
 0x8ba   : > { %p29_p1 = scmp.ge.s32.totalorder %s32_s26, 4   ;;  %s18835_s23 = sld [smem:[#allocation22_spill]] }
 0x8bb   : > { %s18836_s24 = sld [smem:[#allocation19_spill]]  ;;  %s18838_s21 = smov %s10756_s22 }
 0x8bc   : > { %s18837_s25 = sld [smem:[#allocation21_spill]]  ;;  %31 = sbr.rel (!%p29_p1) target bundleno = 15 (0xf), region = 169 }
 0x8bf   : > { %s18839_s22 = smov %s18834_s27 }
 0x8c1   :  { %9490 = vsyncpa [#allocation4], 1 }
 0x8c2   :  { %9492 = vsyncpa [#allocation4 + $0x1], 1 }
 0x8c3   :  { %9493 = vsyncpa [#allocation7], 1 }
 0x8c4   :  { %9495 = vsyncpa [#allocation7 + $0x1], 1 }
 0x8c5   :  { %9496 = vsyncpa [#allocation10], 1 }
 0x8c6   :  { %9497 = vsyncpa [#allocation5], 1 }
 0x8c7   :  { %9499 = vsyncpa [#allocation5 + $0x1], 1 }

</bundles_post_ra>
